<compile_context>
chip_gen: v7x
topology: tpu7x:2x2x1
jax: 0.10.0
libtpu: 0.0.40
codegen_flags: <defaults>
</compile_context>

<pallas_src>
import numpy as np
import jax
import jax.numpy as jnp
from jax.experimental import pallas as pl
from jax.experimental.pallas import tpu as pltpu

BOARD = 8
NSQ = BOARD * BOARD      # 64
CIN_PAD = 32             # conv1 input channels padded 17 -> 32
CMID = 128               # conv tower width
NHEAD = 8                # 1x1 head channels padded 5 -> 8: [ps0 ps1 pe0 pe1 v 0 0 0]
FLAT = NSQ * NHEAD       # 512 = flattened head activations per board


# ----------------------------------------------------------------------------
# Kernel A: fused conv tower + 1x1 head convs for one tile of TB boards.
# ----------------------------------------------------------------------------
def _fused_conv_heads_kernel(x_ref, w1_ref, b1_ref, w2_ref, b2_ref,
                             w3_ref, b3_ref, wh_ref, bh_ref,
                             o_ref, pad_a, pad_b, acc_ref):
    # x_ref : (TB, 10, 10, 32)  bf16 zero-padded input tile
    # wN_ref: (9, Cin, 128)     bf16, tap index = kh*3 + kw
    # bN_ref: (1, 128)          f32
    # wh_ref: (128, 8) bf16, bh_ref: (1, 8) f32     fused 1x1 heads
    # o_ref : (TB*64, 8) f32    row index = b_local*64 + h*8 + w
    # pad_a/pad_b: (TB, 10, 10, 128) bf16 scratch; acc_ref: (TB*64, 128) f32
    TB = x_ref.shape[0]
    M = TB * NSQ

    def conv3x3_relu(load_tap, w_ref, b_ref):
        cin = w_ref.shape[1]
        for kh in range(3):
            for kw in range(3):
                lhs = load_tap(kh, kw).reshape(M, cin)
                contrib = jnp.dot(lhs, w_ref[kh * 3 + kw],
                                  preferred_element_type=jnp.float32)
                if kh == 0 and kw == 0:
                    acc_ref[...] = contrib
                else:
                    acc_ref[...] += contrib
        return jnp.maximum(acc_ref[...] + b_ref[...], 0.0)       # (M, 128) f32

    def store_padded(dst_ref, h):
        # zero the whole padded buffer, then write the 8x8 interior in bf16
        dst_ref[...] = jnp.zeros(dst_ref.shape, dst_ref.dtype)
        dst_ref[:, 1:1 + BOARD, 1:1 + BOARD, :] = (
            h.reshape(TB, BOARD, BOARD, CMID).astype(dst_ref.dtype))

    # conv1 (reads the pre-padded bf16 input tile)
    h = conv3x3_relu(
        lambda kh, kw: x_ref[:, kh:kh + BOARD, kw:kw + BOARD, :], w1_ref, b1_ref)
    store_padded(pad_a, h)
    # conv2
    h = conv3x3_relu(
        lambda kh, kw: pad_a[:, kh:kh + BOARD, kw:kw + BOARD, :], w2_ref, b2_ref)
    store_padded(pad_b, h)
    # conv3
    h = conv3x3_relu(
        lambda kh, kw: pad_b[:, kh:kh + BOARD, kw:kw + BOARD, :], w3_ref, b3_ref)
    # fused 1x1 head convs + ReLU: (TB*64, 128) @ (128, 8)
    heads = jnp.dot(h.astype(jnp.bfloat16), wh_ref[...],
                    preferred_element_type=jnp.float32) + bh_ref[...]
    o_ref[...] = jnp.maximum(heads, 0.0)


def fused_conv_heads(x_pad, kp, TB):
    """x_pad: (Bp, 10, 10, 32) bf16.  Returns (Bp*64, 8) f32 head activations."""
    Bp = x_pad.shape[0]
    return pl.pallas_call(
        _fused_conv_heads_kernel,
        out_shape=jax.ShapeDtypeStruct((Bp * NSQ, NHEAD), jnp.float32),
        grid=(Bp // TB,),
        in_specs=[
            pl.BlockSpec((TB, 10, 10, CIN_PAD), lambda i: (i, 0, 0, 0)),
            pl.BlockSpec((9, CIN_PAD, CMID), lambda i: (0, 0, 0)),
            pl.BlockSpec((1, CMID), lambda i: (0, 0)),
            pl.BlockSpec((9, CMID, CMID), lambda i: (0, 0, 0)),
            pl.BlockSpec((1, CMID), lambda i: (0, 0)),
            pl.BlockSpec((9, CMID, CMID), lambda i: (0, 0, 0)),
            pl.BlockSpec((1, CMID), lambda i: (0, 0)),
            pl.BlockSpec((CMID, NHEAD), lambda i: (0, 0)),
            pl.BlockSpec((1, NHEAD), lambda i: (0, 0)),
        ],
        out_specs=pl.BlockSpec((TB * NSQ, NHEAD), lambda i: (i, 0)),
        scratch_shapes=[
            pltpu.VMEM((TB, 10, 10, CMID), jnp.bfloat16),
            pltpu.VMEM((TB, 10, 10, CMID), jnp.bfloat16),
            pltpu.VMEM((TB * NSQ, CMID), jnp.float32),
        ],
        compiler_params=pltpu.CompilerParams(
            dimension_semantics=("parallel",)),
    )(x_pad, kp['conv1_wr'], kp['conv1_b'], kp['conv2_wr'], kp['conv2_b'],
      kp['conv3_wr'], kp['conv3_b'], kp['whead'], kp['bhead'])


# ----------------------------------------------------------------------------
# Kernel B: head FC layers, reading the (Bp, 512) flat head activations.
# The channel-selection / NCHW-flatten permutation lives in the (512, 64)
# zero-row-padded weights, so the kernel is just 4 small GEMMs.
# ----------------------------------------------------------------------------
def _heads_fc_kernel(hf_ref, wps_ref, bps_ref, wpe_ref, bpe_ref,
                     wv1_ref, bv1_ref, wv2_ref, bv2_ref,
                     ops_ref, ope_ref, oval_ref):
    hf = hf_ref[...]                                           # (TB, 512) f32
    ops_ref[...] = (jnp.dot(hf, wps_ref[...],
                            preferred_element_type=jnp.float32) + bps_ref[...])
    ope_ref[...] = (jnp.dot(hf, wpe_ref[...],
                            preferred_element_type=jnp.float32) + bpe_ref[...])
    v1 = jnp.maximum(
        jnp.dot(hf, wv1_ref[...],
                preferred_element_type=jnp.float32) + bv1_ref[...], 0.0)
    oval_ref[...] = jnp.tanh(
        jnp.dot(v1, wv2_ref[...],
                preferred_element_type=jnp.float32) + bv2_ref[...])


def heads_fc(heads_flat, kp, TB):
    Bp = heads_flat.shape[0]
    row = lambda i: (i, 0)
    full2 = lambda i: (0, 0)
    return pl.pallas_call(
        _heads_fc_kernel,
        out_shape=(jax.ShapeDtypeStruct((Bp, NSQ), jnp.float32),
                   jax.ShapeDtypeStruct((Bp, NSQ), jnp.float32),
                   jax.ShapeDtypeStruct((Bp, 1), jnp.float32)),
        grid=(Bp // TB,),
        in_specs=[
            pl.BlockSpec((TB, FLAT), row),
            pl.BlockSpec((FLAT, NSQ), full2),
            pl.BlockSpec((1, NSQ), full2),
            pl.BlockSpec((FLAT, NSQ), full2),
            pl.BlockSpec((1, NSQ), full2),
            pl.BlockSpec((FLAT, NSQ), full2),
            pl.BlockSpec((1, NSQ), full2),
            pl.BlockSpec((NSQ, 1), full2),
            pl.BlockSpec((1, 1), full2),
        ],
        out_specs=(pl.BlockSpec((TB, NSQ), row),
                   pl.BlockSpec((TB, NSQ), row),
                   pl.BlockSpec((TB, 1), row)),
        compiler_params=pltpu.CompilerParams(
            dimension_semantics=("parallel",)),
    )(heads_flat, kp['ps_fc_w'], kp['ps_fc_b'], kp['pe_fc_w'], kp['pe_fc_b'],
      kp['v_fc1_w'], kp['v_fc1_b'], kp['v_fc2_w'], kp['v_fc2_b'])


# ----------------------------------------------------------------------------
# Parameters (PyTorch shapes, deterministic init) + kernel-layout conversion.
# ----------------------------------------------------------------------------
def init_params(key):
    keys = jax.random.split(key, 20)

    def u(k, shape, fan_in):
        lim = 1.0 / np.sqrt(fan_in)
        return jax.random.uniform(k, shape, jnp.float32, -lim, lim)

    p = {}
    p['conv1_w'] = u(keys[0], (128, 17, 3, 3), 17 * 9)
    p['conv1_b'] = u(keys[1], (128,), 17 * 9)
    p['conv2_w'] = u(keys[2], (128, 128, 3, 3), 128 * 9)
    p['conv2_b'] = u(keys[3], (128,), 128 * 9)
    p['conv3_w'] = u(keys[4], (128, 128, 3, 3), 128 * 9)
    p['conv3_b'] = u(keys[5], (128,), 128 * 9)
    p['ps_conv_w'] = u(keys[6], (2, 128, 1, 1), 128)
    p['ps_conv_b'] = u(keys[7], (2,), 128)
    p['pe_conv_w'] = u(keys[8], (2, 128, 1, 1), 128)
    p['pe_conv_b'] = u(keys[9], (2,), 128)
    p['v_conv_w'] = u(keys[10], (1, 128, 1, 1), 128)
    p['v_conv_b'] = u(keys[11], (1,), 128)
    p['ps_fc_w'] = u(keys[12], (64, 128), 128)
    p['ps_fc_b'] = u(keys[13], (64,), 128)
    p['pe_fc_w'] = u(keys[14], (64, 128), 128)
    p['pe_fc_b'] = u(keys[15], (64,), 128)
    p['v_fc1_w'] = u(keys[16], (64, 64), 64)
    p['v_fc1_b'] = u(keys[17], (64,), 64)
    p['v_fc2_w'] = u(keys[18], (1, 64), 64)
    p['v_fc2_b'] = u(keys[19], (1,), 64)
    return p


def to_kernel_params(p):
    kp = {}

    def conv_w(w, pad_cin=None):               # torch (Cout, Cin, 3, 3)
        cout, cin = w.shape[0], w.shape[1]
        wr = jnp.transpose(w, (2, 3, 1, 0)).reshape(9, cin, cout)  # tap=kh*3+kw
        if pad_cin is not None and pad_cin > cin:
            wr = jnp.pad(wr, ((0, 0), (0, pad_cin - cin), (0, 0)))
        return wr.astype(jnp.bfloat16)

    kp['conv1_wr'] = conv_w(p['conv1_w'], pad_cin=CIN_PAD)
    kp['conv1_b'] = p['conv1_b'].reshape(1, CMID)
    kp['conv2_wr'] = conv_w(p['conv2_w'])
    kp['conv2_b'] = p['conv2_b'].reshape(1, CMID)
    kp['conv3_wr'] = conv_w(p['conv3_w'])
    kp['conv3_b'] = p['conv3_b'].reshape(1, CMID)

    # fused 1x1 head convs: columns [ps0, ps1, pe0, pe1, v, 0, 0, 0]
    whead = jnp.concatenate([p['ps_conv_w'][:, :, 0, 0],
                             p['pe_conv_w'][:, :, 0, 0],
                             p['v_conv_w'][:, :, 0, 0]], axis=0).T    # (128, 5)
    kp['whead'] = jnp.pad(whead, ((0, 0), (0, NHEAD - 5))).astype(jnp.bfloat16)
    bhead = jnp.concatenate([p['ps_conv_b'], p['pe_conv_b'], p['v_conv_b']])
    kp['bhead'] = jnp.pad(bhead, (0, NHEAD - 5)).reshape(1, NHEAD)

    # Kernel B consumes the kernel-A output reinterpreted (free, row-major)
    # as (B, 512) with column index hw*8 + head_channel.  Fold both the
    # PyTorch NCHW flatten order (c*64 + hw) and the per-head channel
    # selection into zero-padded (512, 64) weight rows.
    def fold_policy_fc(w):                      # torch (64_out, 128_in)
        wk = jnp.zeros((NSQ, NHEAD, NSQ), jnp.float32)
        wk = wk.at[:, 0, :].set(w[:, :NSQ].T)   # c=0 rows -> hw*8 + 0
        wk = wk.at[:, 1, :].set(w[:, NSQ:].T)   # c=1 rows -> hw*8 + 1
        return wk.reshape(FLAT, NSQ)

    def fold_policy_end_fc(w):
        wk = jnp.zeros((NSQ, NHEAD, NSQ), jnp.float32)
        wk = wk.at[:, 2, :].set(w[:, :NSQ].T)   # pe channel 0 lives at col 2
        wk = wk.at[:, 3, :].set(w[:, NSQ:].T)   # pe channel 1 lives at col 3
        return wk.reshape(FLAT, NSQ)

    def fold_value_fc1(w):                      # torch (64_out, 64_in)
        wk = jnp.zeros((NSQ, NHEAD, NSQ), jnp.float32)
        wk = wk.at[:, 4, :].set(w.T)            # value channel lives at col 4
        return wk.reshape(FLAT, NSQ)

    kp['ps_fc_w'] = fold_policy_fc(p['ps_fc_w'])
    kp['ps_fc_b'] = p['ps_fc_b'].reshape(1, NSQ)
    kp['pe_fc_w'] = fold_policy_end_fc(p['pe_fc_w'])
    kp['pe_fc_b'] = p['pe_fc_b'].reshape(1, NSQ)
    kp['v_fc1_w'] = fold_value_fc1(p['v_fc1_w'])
    kp['v_fc1_b'] = p['v_fc1_b'].reshape(1, NSQ)
    kp['v_fc2_w'] = p['v_fc2_w'].T
    kp['v_fc2_b'] = p['v_fc2_b'].reshape(1, 1)
    return kp


# ----------------------------------------------------------------------------
# Forward pass (glue = tiny pads + one free reshape; all compute in kernels).
# ----------------------------------------------------------------------------
def chessbot_forward(x_nchw, kp):
    B = x_nchw.shape[0]
    TB = min(8, B)                          # boards per grid step (use 2-4 on v5e)
    Bp = ((B + TB - 1) // TB) * TB
    x = jnp.transpose(x_nchw, (0, 2, 3, 1)).astype(jnp.float32)   # NHWC (B,8,8,17)
    # pad: batch -> Bp, spatial 8 -> 10 (SAME conv), channels 17 -> 32; cast bf16
    x = jnp.pad(x, ((0, Bp - B), (1, 1), (1, 1), (0, CIN_PAD - 17)))
    x = x.astype(jnp.bfloat16)

    heads = fused_conv_heads(x, kp, TB)                  # (Bp*64, 8) f32
    heads_flat = heads.reshape(Bp, FLAT)                 # free row-major bitcast

    ps, pe, val = heads_fc(heads_flat, kp, TB)
    return ps[:B], pe[:B], val[:B]


# ----------------------------------------------------------------------------
# Pure-JAX reference (mirrors the PyTorch module exactly, NCHW, f32).
# ----------------------------------------------------------------------------
def reference_forward(x, p):
    def conv(h, w, b, pad):
        out = jax.lax.conv_general_dilated(
            h, w, window_strides=(1, 1), padding=[(pad, pad), (pad, pad)],
            dimension_numbers=('NCHW', 'OIHW', 'NCHW'))
        return out + b[None, :, None, None]

    B = x.shape[0]
    h = jax.nn.relu(conv(x, p['conv1_w'], p['conv1_b'], 1))
    h = jax.nn.relu(conv(h, p['conv2_w'], p['conv2_b'], 1))
    h = jax.nn.relu(conv(h, p['conv3_w'], p['conv3_b'], 1))
    ps = jax.nn.relu(conv(h, p['ps_conv_w'], p['ps_conv_b'], 0)).reshape(B, -1)
    ps = ps @ p['ps_fc_w'].T + p['ps_fc_b']
    pe = jax.nn.relu(conv(h, p['pe_conv_w'], p['pe_conv_b'], 0)).reshape(B, -1)
    pe = pe @ p['pe_fc_w'].T + p['pe_fc_b']
    v = jax.nn.relu(conv(h, p['v_conv_w'], p['v_conv_b'], 0)).reshape(B, -1)
    v = jax.nn.relu(v @ p['v_fc1_w'].T + p['v_fc1_b'])
    v = jnp.tanh(v @ p['v_fc2_w'].T + p['v_fc2_b'])
    return ps, pe, v


if __name__ == "__main__":
    key = jax.random.PRNGKey(0)
    pkey, xkey = jax.random.split(key)
    torch_params = init_params(pkey)
    kernel_params = to_kernel_params(torch_params)

    # batch=2, 17 input planes, 8x8 board (fixed by the module's FC shapes)
    x = jax.random.normal(xkey, (2, 17, 8, 8), jnp.float32)

    ps, pe, val = jax.jit(chessbot_forward)(x, kernel_params)
    jax.block_until_ready((ps, pe, val))

    rps, rpe, rval = reference_forward(x, torch_params)
    for got, want, name in [(ps, rps, "policy_start"),
                            (pe, rpe, "policy_end"),
                            (val, rval, "value")]:
        assert got.shape == want.shape, (name, got.shape, want.shape)
        err = float(jnp.max(jnp.abs(got - want)))
        assert err < 2e-2, f"{name} mismatch: max abs err = {err}"

    print("KERNEL_OK")
</pallas_src>

<mosaic_0001>
module attributes {stable_mosaic.version = 11 : i64} {
  func.func @_heads_fc_kernel(%arg0: i32, %arg1: memref<2x512xf32, #tpu.memory_space<vmem>>, %arg2: memref<512x64xf32, #tpu.memory_space<vmem>>, %arg3: memref<1x64xf32, #tpu.memory_space<vmem>>, %arg4: memref<512x64xf32, #tpu.memory_space<vmem>>, %arg5: memref<1x64xf32, #tpu.memory_space<vmem>>, %arg6: memref<512x64xf32, #tpu.memory_space<vmem>>, %arg7: memref<1x64xf32, #tpu.memory_space<vmem>>, %arg8: memref<64x1xf32, #tpu.memory_space<vmem>>, %arg9: memref<1x1xf32, #tpu.memory_space<vmem>>, %arg10: memref<2x64xf32, #tpu.memory_space<vmem>>, %arg11: memref<2x64xf32, #tpu.memory_space<vmem>>, %arg12: memref<2x1xf32, #tpu.memory_space<vmem>>) attributes {dimension_semantics = [#tpu.dimension_semantics<parallel>], iteration_bounds = array<i64: 1>, scalar_prefetch = 0 : i64, scratch_operands = 0 : i64, tpu.core_type = #tpu.core_type<tc>, window_params = [{transform_indices = @transform_0, window_bounds = array<i64: 2, 512>}, {pipeline_mode = #tpu.pipeline_mode<synchronous>, transform_indices = @transform_1, window_bounds = array<i64: 512, 64>}, {pipeline_mode = #tpu.pipeline_mode<synchronous>, transform_indices = @transform_2, window_bounds = array<i64: 1, 64>}, {pipeline_mode = #tpu.pipeline_mode<synchronous>, transform_indices = @transform_3, window_bounds = array<i64: 512, 64>}, {pipeline_mode = #tpu.pipeline_mode<synchronous>, transform_indices = @transform_4, window_bounds = array<i64: 1, 64>}, {pipeline_mode = #tpu.pipeline_mode<synchronous>, transform_indices = @transform_5, window_bounds = array<i64: 512, 64>}, {pipeline_mode = #tpu.pipeline_mode<synchronous>, transform_indices = @transform_6, window_bounds = array<i64: 1, 64>}, {pipeline_mode = #tpu.pipeline_mode<synchronous>, transform_indices = @transform_7, window_bounds = array<i64: 64, 1>}, {pipeline_mode = #tpu.pipeline_mode<synchronous>, transform_indices = @transform_8, window_bounds = array<i64: 1, 1>}, {transform_indices = @transform_9, window_bounds = array<i64: 2, 64>}, {transform_indices = @transform_10, window_bounds = array<i64: 2, 64>}, {transform_indices = @transform_11, window_bounds = array<i64: 2, 1>}]} {
    %c0 = arith.constant 0 : index
    %c0_0 = arith.constant 0 : index
    %0 = vector.load %arg1[%c0, %c0_0] : memref<2x512xf32, #tpu.memory_space<vmem>>, vector<2x512xf32>
    %c0_1 = arith.constant 0 : index
    %c0_2 = arith.constant 0 : index
    %1 = vector.load %arg2[%c0_1, %c0_2] : memref<512x64xf32, #tpu.memory_space<vmem>>, vector<512x64xf32>
    %cst = arith.constant dense<0.000000e+00> : vector<2x64xf32>
    %2 = tpu.matmul %0, %1, %cst {dimension_numbers = #tpu.dot_dimension_numbers<[1], [0], [0], [1], [0, 0, 1, 1], [], []>} : vector<2x512xf32>, vector<512x64xf32>, vector<2x64xf32> -> vector<2x64xf32>
    %c0_3 = arith.constant 0 : index
    %c0_4 = arith.constant 0 : index
    %3 = vector.load %arg3[%c0_3, %c0_4] : memref<1x64xf32, #tpu.memory_space<vmem>>, vector<1x64xf32>
    %4 = vector.broadcast %3 : vector<1x64xf32> to vector<2x64xf32>
    %5 = arith.addf %2, %4 : vector<2x64xf32>
    %c0_5 = arith.constant 0 : index
    %c0_6 = arith.constant 0 : index
    %6 = vector.load %arg10[%c0_5, %c0_6] : memref<2x64xf32, #tpu.memory_space<vmem>>, vector<2x64xf32>
    tpu.vector_store %arg10[%c0_5, %c0_6], %5 {strides = array<i32>} : memref<2x64xf32, #tpu.memory_space<vmem>>, vector<2x64xf32>,
    %c0_7 = arith.constant 0 : index
    %c0_8 = arith.constant 0 : index
    %7 = vector.load %arg4[%c0_7, %c0_8] : memref<512x64xf32, #tpu.memory_space<vmem>>, vector<512x64xf32>
    %cst_9 = arith.constant dense<0.000000e+00> : vector<2x64xf32>
    %8 = tpu.matmul %0, %7, %cst_9 {dimension_numbers = #tpu.dot_dimension_numbers<[1], [0], [0], [1], [0, 0, 1, 1], [], []>} : vector<2x512xf32>, vector<512x64xf32>, vector<2x64xf32> -> vector<2x64xf32>
    %c0_10 = arith.constant 0 : index
    %c0_11 = arith.constant 0 : index
    %9 = vector.load %arg5[%c0_10, %c0_11] : memref<1x64xf32, #tpu.memory_space<vmem>>, vector<1x64xf32>
    %10 = vector.broadcast %9 : vector<1x64xf32> to vector<2x64xf32>
    %11 = arith.addf %8, %10 : vector<2x64xf32>
    %c0_12 = arith.constant 0 : index
    %c0_13 = arith.constant 0 : index
    %12 = vector.load %arg11[%c0_12, %c0_13] : memref<2x64xf32, #tpu.memory_space<vmem>>, vector<2x64xf32>
    tpu.vector_store %arg11[%c0_12, %c0_13], %11 {strides = array<i32>} : memref<2x64xf32, #tpu.memory_space<vmem>>, vector<2x64xf32>,
    %c0_14 = arith.constant 0 : index
    %c0_15 = arith.constant 0 : index
    %13 = vector.load %arg6[%c0_14, %c0_15] : memref<512x64xf32, #tpu.memory_space<vmem>>, vector<512x64xf32>
    %cst_16 = arith.constant dense<0.000000e+00> : vector<2x64xf32>
    %14 = tpu.matmul %0, %13, %cst_16 {dimension_numbers = #tpu.dot_dimension_numbers<[1], [0], [0], [1], [0, 0, 1, 1], [], []>} : vector<2x512xf32>, vector<512x64xf32>, vector<2x64xf32> -> vector<2x64xf32>
    %c0_17 = arith.constant 0 : index
    %c0_18 = arith.constant 0 : index
    %15 = vector.load %arg7[%c0_17, %c0_18] : memref<1x64xf32, #tpu.memory_space<vmem>>, vector<1x64xf32>
    %16 = vector.broadcast %15 : vector<1x64xf32> to vector<2x64xf32>
    %17 = arith.addf %14, %16 : vector<2x64xf32>
    %cst_19 = arith.constant 0.000000e+00 : f32
    %18 = vector.broadcast %cst_19 : f32 to vector<2x64xf32>
    %19 = arith.maximumf %17, %18 : vector<2x64xf32>
    %c0_20 = arith.constant 0 : index
    %c0_21 = arith.constant 0 : index
    %20 = vector.load %arg8[%c0_20, %c0_21] : memref<64x1xf32, #tpu.memory_space<vmem>>, vector<64x1xf32>
    %cst_22 = arith.constant dense<0.000000e+00> : vector<2x1xf32>
    %21 = tpu.matmul %19, %20, %cst_22 {dimension_numbers = #tpu.dot_dimension_numbers<[1], [0], [0], [1], [0, 0, 1, 1], [], []>} : vector<2x64xf32>, vector<64x1xf32>, vector<2x1xf32> -> vector<2x1xf32>
    %c0_23 = arith.constant 0 : index
    %c0_24 = arith.constant 0 : index
    %22 = vector.load %arg9[%c0_23, %c0_24] : memref<1x1xf32, #tpu.memory_space<vmem>>, vector<1x1xf32>
    %23 = vector.broadcast %22 : vector<1x1xf32> to vector<2x1xf32>
    %24 = arith.addf %21, %23 : vector<2x1xf32>
    %25 = math.tanh %24 : vector<2x1xf32>
    %c0_25 = arith.constant 0 : index
    %c0_26 = arith.constant 0 : index
    %26 = vector.load %arg12[%c0_25, %c0_26] : memref<2x1xf32, #tpu.memory_space<vmem>>, vector<2x1xf32>
    tpu.vector_store %arg12[%c0_25, %c0_26], %25 {strides = array<i32>} : memref<2x1xf32, #tpu.memory_space<vmem>>, vector<2x1xf32>,
    return
  }
  func.func @transform_0(%arg0: i32) -> (i32, i32) {
    %c0_i32 = arith.constant 0 : i32
    %c0_i32_0 = arith.constant 0 : i32
    return %arg0, %c0_i32 : i32, i32
  }
  func.func @transform_1(%arg0: i32) -> (i32, i32) {
    %c0_i32 = arith.constant 0 : i32
    %c0_i32_0 = arith.constant 0 : i32
    %c0_i32_1 = arith.constant 0 : i32
    return %c0_i32, %c0_i32_0 : i32, i32
  }
  func.func @transform_2(%arg0: i32) -> (i32, i32) {
    %c0_i32 = arith.constant 0 : i32
    %c0_i32_0 = arith.constant 0 : i32
    %c0_i32_1 = arith.constant 0 : i32
    return %c0_i32, %c0_i32_0 : i32, i32
  }
  func.func @transform_3(%arg0: i32) -> (i32, i32) {
    %c0_i32 = arith.constant 0 : i32
    %c0_i32_0 = arith.constant 0 : i32
    %c0_i32_1 = arith.constant 0 : i32
    return %c0_i32, %c0_i32_0 : i32, i32
  }
  func.func @transform_4(%arg0: i32) -> (i32, i32) {
    %c0_i32 = arith.constant 0 : i32
    %c0_i32_0 = arith.constant 0 : i32
    %c0_i32_1 = arith.constant 0 : i32
    return %c0_i32, %c0_i32_0 : i32, i32
  }
  func.func @transform_5(%arg0: i32) -> (i32, i32) {
    %c0_i32 = arith.constant 0 : i32
    %c0_i32_0 = arith.constant 0 : i32
    %c0_i32_1 = arith.constant 0 : i32
    return %c0_i32, %c0_i32_0 : i32, i32
  }
  func.func @transform_6(%arg0: i32) -> (i32, i32) {
    %c0_i32 = arith.constant 0 : i32
    %c0_i32_0 = arith.constant 0 : i32
    %c0_i32_1 = arith.constant 0 : i32
    return %c0_i32, %c0_i32_0 : i32, i32
  }
  func.func @transform_7(%arg0: i32) -> (i32, i32) {
    %c0_i32 = arith.constant 0 : i32
    %c0_i32_0 = arith.constant 0 : i32
    %c0_i32_1 = arith.constant 0 : i32
    return %c0_i32, %c0_i32_0 : i32, i32
  }
  func.func @transform_8(%arg0: i32) -> (i32, i32) {
    %c0_i32 = arith.constant 0 : i32
    %c0_i32_0 = arith.constant 0 : i32
    %c0_i32_1 = arith.constant 0 : i32
    return %c0_i32, %c0_i32_0 : i32, i32
  }
  func.func @transform_9(%arg0: i32) -> (i32, i32) {
    %c0_i32 = arith.constant 0 : i32
    %c0_i32_0 = arith.constant 0 : i32
    return %arg0, %c0_i32 : i32, i32
  }
  func.func @transform_10(%arg0: i32) -> (i32, i32) {
    %c0_i32 = arith.constant 0 : i32
    %c0_i32_0 = arith.constant 0 : i32
    return %arg0, %c0_i32 : i32, i32
  }
  func.func @transform_11(%arg0: i32) -> (i32, i32) {
    %c0_i32 = arith.constant 0 : i32
    %c0_i32_0 = arith.constant 0 : i32
    return %arg0, %c0_i32 : i32, i32
  }
}

module attributes {stable_mosaic.version = 11 : i64} {
  func.func @_fused_conv_heads_kernel(%arg0: i32, %arg1: memref<2x10x10x32xbf16, #tpu.memory_space<vmem>>, %arg2: memref<9x32x128xbf16, #tpu.memory_space<vmem>>, %arg3: memref<1x128xf32, #tpu.memory_space<vmem>>, %arg4: memref<9x128x128xbf16, #tpu.memory_space<vmem>>, %arg5: memref<1x128xf32, #tpu.memory_space<vmem>>, %arg6: memref<9x128x128xbf16, #tpu.memory_space<vmem>>, %arg7: memref<1x128xf32, #tpu.memory_space<vmem>>, %arg8: memref<128x8xbf16, #tpu.memory_space<vmem>>, %arg9: memref<1x8xf32, #tpu.memory_space<vmem>>, %arg10: memref<128x8xf32, #tpu.memory_space<vmem>>, %arg11: memref<2x10x10x128xbf16, #tpu.memory_space<vmem>>, %arg12: memref<2x10x10x128xbf16, #tpu.memory_space<vmem>>, %arg13: memref<128x128xf32, #tpu.memory_space<vmem>>) attributes {dimension_semantics = [#tpu.dimension_semantics<parallel>], iteration_bounds = array<i64: 1>, scalar_prefetch = 0 : i64, scratch_operands = 3 : i64, tpu.core_type = #tpu.core_type<tc>, window_params = [{transform_indices = @transform_0, window_bounds = array<i64: 2, 10, 10, 32>}, {pipeline_mode = #tpu.pipeline_mode<synchronous>, transform_indices = @transform_1, window_bounds = array<i64: 9, 32, 128>}, {pipeline_mode = #tpu.pipeline_mode<synchronous>, transform_indices = @transform_2, window_bounds = array<i64: 1, 128>}, {pipeline_mode = #tpu.pipeline_mode<synchronous>, transform_indices = @transform_3, window_bounds = array<i64: 9, 128, 128>}, {pipeline_mode = #tpu.pipeline_mode<synchronous>, transform_indices = @transform_4, window_bounds = array<i64: 1, 128>}, {pipeline_mode = #tpu.pipeline_mode<synchronous>, transform_indices = @transform_5, window_bounds = array<i64: 9, 128, 128>}, {pipeline_mode = #tpu.pipeline_mode<synchronous>, transform_indices = @transform_6, window_bounds = array<i64: 1, 128>}, {pipeline_mode = #tpu.pipeline_mode<synchronous>, transform_indices = @transform_7, window_bounds = array<i64: 128, 8>}, {pipeline_mode = #tpu.pipeline_mode<synchronous>, transform_indices = @transform_8, window_bounds = array<i64: 1, 8>}, {transform_indices = @transform_9, window_bounds = array<i64: 128, 8>}]} {
    %c0 = arith.constant 0 : index
    %c0_0 = arith.constant 0 : index
    %c0_1 = arith.constant 0 : index
    %c0_2 = arith.constant 0 : index
    %0 = vector.load %arg1[%c0, %c0_0, %c0_1, %c0_2] : memref<2x10x10x32xbf16, #tpu.memory_space<vmem>>, vector<2x8x8x32xbf16>
    %1 = vector.shape_cast %0 : vector<2x8x8x32xbf16> to vector<128x32xbf16>
    %c0_3 = arith.constant 0 : index
    %c0_4 = arith.constant 0 : index
    %c0_5 = arith.constant 0 : index
    %2 = vector.load %arg2[%c0_3, %c0_4, %c0_5] : memref<9x32x128xbf16, #tpu.memory_space<vmem>>, vector<1x32x128xbf16>
    %3 = vector.shape_cast %2 : vector<1x32x128xbf16> to vector<32x128xbf16>
    %cst = arith.constant dense<0.000000e+00> : vector<128x128xf32>
    %4 = tpu.matmul %1, %3, %cst {dimension_numbers = #tpu.dot_dimension_numbers<[1], [0], [0], [1], [0, 0, 1, 1], [], []>} : vector<128x32xbf16>, vector<32x128xbf16>, vector<128x128xf32> -> vector<128x128xf32>
    %c0_6 = arith.constant 0 : index
    %c0_7 = arith.constant 0 : index
    %5 = vector.load %arg13[%c0_6, %c0_7] : memref<128x128xf32, #tpu.memory_space<vmem>>, vector<128x128xf32>
    tpu.vector_store %arg13[%c0_6, %c0_7], %4 {strides = array<i32>} : memref<128x128xf32, #tpu.memory_space<vmem>>, vector<128x128xf32>,
    %c0_8 = arith.constant 0 : index
    %c0_9 = arith.constant 0 : index
    %c1 = arith.constant 1 : index
    %c0_10 = arith.constant 0 : index
    %6 = vector.load %arg1[%c0_8, %c0_9, %c1, %c0_10] : memref<2x10x10x32xbf16, #tpu.memory_space<vmem>>, vector<2x8x8x32xbf16>
    %7 = vector.shape_cast %6 : vector<2x8x8x32xbf16> to vector<128x32xbf16>
    %c1_11 = arith.constant 1 : index
    %c0_12 = arith.constant 0 : index
    %c0_13 = arith.constant 0 : index
    %8 = vector.load %arg2[%c1_11, %c0_12, %c0_13] : memref<9x32x128xbf16, #tpu.memory_space<vmem>>, vector<1x32x128xbf16>
    %9 = vector.shape_cast %8 : vector<1x32x128xbf16> to vector<32x128xbf16>
    %cst_14 = arith.constant dense<0.000000e+00> : vector<128x128xf32>
    %10 = tpu.matmul %7, %9, %cst_14 {dimension_numbers = #tpu.dot_dimension_numbers<[1], [0], [0], [1], [0, 0, 1, 1], [], []>} : vector<128x32xbf16>, vector<32x128xbf16>, vector<128x128xf32> -> vector<128x128xf32>
    %c0_15 = arith.constant 0 : index
    %c0_16 = arith.constant 0 : index
    %11 = vector.load %arg13[%c0_15, %c0_16] : memref<128x128xf32, #tpu.memory_space<vmem>>, vector<128x128xf32>
    %12 = arith.addf %11, %10 : vector<128x128xf32>
    %c0_17 = arith.constant 0 : index
    %c0_18 = arith.constant 0 : index
    %13 = vector.load %arg13[%c0_17, %c0_18] : memref<128x128xf32, #tpu.memory_space<vmem>>, vector<128x128xf32>
    tpu.vector_store %arg13[%c0_17, %c0_18], %12 {strides = array<i32>} : memref<128x128xf32, #tpu.memory_space<vmem>>, vector<128x128xf32>,
    %c0_19 = arith.constant 0 : index
    %c0_20 = arith.constant 0 : index
    %c2 = arith.constant 2 : index
    %c0_21 = arith.constant 0 : index
    %14 = vector.load %arg1[%c0_19, %c0_20, %c2, %c0_21] : memref<2x10x10x32xbf16, #tpu.memory_space<vmem>>, vector<2x8x8x32xbf16>
    %15 = vector.shape_cast %14 : vector<2x8x8x32xbf16> to vector<128x32xbf16>
    %c2_22 = arith.constant 2 : index
    %c0_23 = arith.constant 0 : index
    %c0_24 = arith.constant 0 : index
    %16 = vector.load %arg2[%c2_22, %c0_23, %c0_24] : memref<9x32x128xbf16, #tpu.memory_space<vmem>>, vector<1x32x128xbf16>
    %17 = vector.shape_cast %16 : vector<1x32x128xbf16> to vector<32x128xbf16>
    %cst_25 = arith.constant dense<0.000000e+00> : vector<128x128xf32>
    %18 = tpu.matmul %15, %17, %cst_25 {dimension_numbers = #tpu.dot_dimension_numbers<[1], [0], [0], [1], [0, 0, 1, 1], [], []>} : vector<128x32xbf16>, vector<32x128xbf16>, vector<128x128xf32> -> vector<128x128xf32>
    %c0_26 = arith.constant 0 : index
    %c0_27 = arith.constant 0 : index
    %19 = vector.load %arg13[%c0_26, %c0_27] : memref<128x128xf32, #tpu.memory_space<vmem>>, vector<128x128xf32>
    %20 = arith.addf %19, %18 : vector<128x128xf32>
    %c0_28 = arith.constant 0 : index
    %c0_29 = arith.constant 0 : index
    %21 = vector.load %arg13[%c0_28, %c0_29] : memref<128x128xf32, #tpu.memory_space<vmem>>, vector<128x128xf32>
    tpu.vector_store %arg13[%c0_28, %c0_29], %20 {strides = array<i32>} : memref<128x128xf32, #tpu.memory_space<vmem>>, vector<128x128xf32>,
    %c0_30 = arith.constant 0 : index
    %c1_31 = arith.constant 1 : index
    %c0_32 = arith.constant 0 : index
    %c0_33 = arith.constant 0 : index
    %22 = vector.load %arg1[%c0_30, %c1_31, %c0_32, %c0_33] : memref<2x10x10x32xbf16, #tpu.memory_space<vmem>>, vector<2x8x8x32xbf16>
    %23 = vector.shape_cast %22 : vector<2x8x8x32xbf16> to vector<128x32xbf16>
    %c3 = arith.constant 3 : index
    %c0_34 = arith.constant 0 : index
    %c0_35 = arith.constant 0 : index
    %24 = vector.load %arg2[%c3, %c0_34, %c0_35] : memref<9x32x128xbf16, #tpu.memory_space<vmem>>, vector<1x32x128xbf16>
    %25 = vector.shape_cast %24 : vector<1x32x128xbf16> to vector<32x128xbf16>
    %cst_36 = arith.constant dense<0.000000e+00> : vector<128x128xf32>
    %26 = tpu.matmul %23, %25, %cst_36 {dimension_numbers = #tpu.dot_dimension_numbers<[1], [0], [0], [1], [0, 0, 1, 1], [], []>} : vector<128x32xbf16>, vector<32x128xbf16>, vector<128x128xf32> -> vector<128x128xf32>
    %c0_37 = arith.constant 0 : index
    %c0_38 = arith.constant 0 : index
    %27 = vector.load %arg13[%c0_37, %c0_38] : memref<128x128xf32, #tpu.memory_space<vmem>>, vector<128x128xf32>
    %28 = arith.addf %27, %26 : vector<128x128xf32>
    %c0_39 = arith.constant 0 : index
    %c0_40 = arith.constant 0 : index
    %29 = vector.load %arg13[%c0_39, %c0_40] : memref<128x128xf32, #tpu.memory_space<vmem>>, vector<128x128xf32>
    tpu.vector_store %arg13[%c0_39, %c0_40], %28 {strides = array<i32>} : memref<128x128xf32, #tpu.memory_space<vmem>>, vector<128x128xf32>,
    %c0_41 = arith.constant 0 : index
    %c1_42 = arith.constant 1 : index
    %c1_43 = arith.constant 1 : index
    %c0_44 = arith.constant 0 : index
    %30 = vector.load %arg1[%c0_41, %c1_42, %c1_43, %c0_44] : memref<2x10x10x32xbf16, #tpu.memory_space<vmem>>, vector<2x8x8x32xbf16>
    %31 = vector.shape_cast %30 : vector<2x8x8x32xbf16> to vector<128x32xbf16>
    %c4 = arith.constant 4 : index
    %c0_45 = arith.constant 0 : index
    %c0_46 = arith.constant 0 : index
    %32 = vector.load %arg2[%c4, %c0_45, %c0_46] : memref<9x32x128xbf16, #tpu.memory_space<vmem>>, vector<1x32x128xbf16>
    %33 = vector.shape_cast %32 : vector<1x32x128xbf16> to vector<32x128xbf16>
    %cst_47 = arith.constant dense<0.000000e+00> : vector<128x128xf32>
    %34 = tpu.matmul %31, %33, %cst_47 {dimension_numbers = #tpu.dot_dimension_numbers<[1], [0], [0], [1], [0, 0, 1, 1], [], []>} : vector<128x32xbf16>, vector<32x128xbf16>, vector<128x128xf32> -> vector<128x128xf32>
    %c0_48 = arith.constant 0 : index
    %c0_49 = arith.constant 0 : index
    %35 = vector.load %arg13[%c0_48, %c0_49] : memref<128x128xf32, #tpu.memory_space<vmem>>, vector<128x128xf32>
    %36 = arith.addf %35, %34 : vector<128x128xf32>
    %c0_50 = arith.constant 0 : index
    %c0_51 = arith.constant 0 : index
    %37 = vector.load %arg13[%c0_50, %c0_51] : memref<128x128xf32, #tpu.memory_space<vmem>>, vector<128x128xf32>
    tpu.vector_store %arg13[%c0_50, %c0_51], %36 {strides = array<i32>} : memref<128x128xf32, #tpu.memory_space<vmem>>, vector<128x128xf32>,
    %c0_52 = arith.constant 0 : index
    %c1_53 = arith.constant 1 : index
    %c2_54 = arith.constant 2 : index
    %c0_55 = arith.constant 0 : index
    %38 = vector.load %arg1[%c0_52, %c1_53, %c2_54, %c0_55] : memref<2x10x10x32xbf16, #tpu.memory_space<vmem>>, vector<2x8x8x32xbf16>
    %39 = vector.shape_cast %38 : vector<2x8x8x32xbf16> to vector<128x32xbf16>
    %c5 = arith.constant 5 : index
    %c0_56 = arith.constant 0 : index
    %c0_57 = arith.constant 0 : index
    %40 = vector.load %arg2[%c5, %c0_56, %c0_57] : memref<9x32x128xbf16, #tpu.memory_space<vmem>>, vector<1x32x128xbf16>
    %41 = vector.shape_cast %40 : vector<1x32x128xbf16> to vector<32x128xbf16>
    %cst_58 = arith.constant dense<0.000000e+00> : vector<128x128xf32>
    %42 = tpu.matmul %39, %41, %cst_58 {dimension_numbers = #tpu.dot_dimension_numbers<[1], [0], [0], [1], [0, 0, 1, 1], [], []>} : vector<128x32xbf16>, vector<32x128xbf16>, vector<128x128xf32> -> vector<128x128xf32>
    %c0_59 = arith.constant 0 : index
    %c0_60 = arith.constant 0 : index
    %43 = vector.load %arg13[%c0_59, %c0_60] : memref<128x128xf32, #tpu.memory_space<vmem>>, vector<128x128xf32>
    %44 = arith.addf %43, %42 : vector<128x128xf32>
    %c0_61 = arith.constant 0 : index
    %c0_62 = arith.constant 0 : index
    %45 = vector.load %arg13[%c0_61, %c0_62] : memref<128x128xf32, #tpu.memory_space<vmem>>, vector<128x128xf32>
    tpu.vector_store %arg13[%c0_61, %c0_62], %44 {strides = array<i32>} : memref<128x128xf32, #tpu.memory_space<vmem>>, vector<128x128xf32>,
    %c0_63 = arith.constant 0 : index
    %c2_64 = arith.constant 2 : index
    %c0_65 = arith.constant 0 : index
    %c0_66 = arith.constant 0 : index
    %46 = vector.load %arg1[%c0_63, %c2_64, %c0_65, %c0_66] : memref<2x10x10x32xbf16, #tpu.memory_space<vmem>>, vector<2x8x8x32xbf16>
    %47 = vector.shape_cast %46 : vector<2x8x8x32xbf16> to vector<128x32xbf16>
    %c6 = arith.constant 6 : index
    %c0_67 = arith.constant 0 : index
    %c0_68 = arith.constant 0 : index
    %48 = vector.load %arg2[%c6, %c0_67, %c0_68] : memref<9x32x128xbf16, #tpu.memory_space<vmem>>, vector<1x32x128xbf16>
    %49 = vector.shape_cast %48 : vector<1x32x128xbf16> to vector<32x128xbf16>
    %cst_69 = arith.constant dense<0.000000e+00> : vector<128x128xf32>
    %50 = tpu.matmul %47, %49, %cst_69 {dimension_numbers = #tpu.dot_dimension_numbers<[1], [0], [0], [1], [0, 0, 1, 1], [], []>} : vector<128x32xbf16>, vector<32x128xbf16>, vector<128x128xf32> -> vector<128x128xf32>
    %c0_70 = arith.constant 0 : index
    %c0_71 = arith.constant 0 : index
    %51 = vector.load %arg13[%c0_70, %c0_71] : memref<128x128xf32, #tpu.memory_space<vmem>>, vector<128x128xf32>
    %52 = arith.addf %51, %50 : vector<128x128xf32>
    %c0_72 = arith.constant 0 : index
    %c0_73 = arith.constant 0 : index
    %53 = vector.load %arg13[%c0_72, %c0_73] : memref<128x128xf32, #tpu.memory_space<vmem>>, vector<128x128xf32>
    tpu.vector_store %arg13[%c0_72, %c0_73], %52 {strides = array<i32>} : memref<128x128xf32, #tpu.memory_space<vmem>>, vector<128x128xf32>,
    %c0_74 = arith.constant 0 : index
    %c2_75 = arith.constant 2 : index
    %c1_76 = arith.constant 1 : index
    %c0_77 = arith.constant 0 : index
    %54 = vector.load %arg1[%c0_74, %c2_75, %c1_76, %c0_77] : memref<2x10x10x32xbf16, #tpu.memory_space<vmem>>, vector<2x8x8x32xbf16>
    %55 = vector.shape_cast %54 : vector<2x8x8x32xbf16> to vector<128x32xbf16>
    %c7 = arith.constant 7 : index
    %c0_78 = arith.constant 0 : index
    %c0_79 = arith.constant 0 : index
    %56 = vector.load %arg2[%c7, %c0_78, %c0_79] : memref<9x32x128xbf16, #tpu.memory_space<vmem>>, vector<1x32x128xbf16>
    %57 = vector.shape_cast %56 : vector<1x32x128xbf16> to vector<32x128xbf16>
    %cst_80 = arith.constant dense<0.000000e+00> : vector<128x128xf32>
    %58 = tpu.matmul %55, %57, %cst_80 {dimension_numbers = #tpu.dot_dimension_numbers<[1], [0], [0], [1], [0, 0, 1, 1], [], []>} : vector<128x32xbf16>, vector<32x128xbf16>, vector<128x128xf32> -> vector<128x128xf32>
    %c0_81 = arith.constant 0 : index
    %c0_82 = arith.constant 0 : index
    %59 = vector.load %arg13[%c0_81, %c0_82] : memref<128x128xf32, #tpu.memory_space<vmem>>, vector<128x128xf32>
    %60 = arith.addf %59, %58 : vector<128x128xf32>
    %c0_83 = arith.constant 0 : index
    %c0_84 = arith.constant 0 : index
    %61 = vector.load %arg13[%c0_83, %c0_84] : memref<128x128xf32, #tpu.memory_space<vmem>>, vector<128x128xf32>
    tpu.vector_store %arg13[%c0_83, %c0_84], %60 {strides = array<i32>} : memref<128x128xf32, #tpu.memory_space<vmem>>, vector<128x128xf32>,
    %c0_85 = arith.constant 0 : index
    %c2_86 = arith.constant 2 : index
    %c2_87 = arith.constant 2 : index
    %c0_88 = arith.constant 0 : index
    %62 = vector.load %arg1[%c0_85, %c2_86, %c2_87, %c0_88] : memref<2x10x10x32xbf16, #tpu.memory_space<vmem>>, vector<2x8x8x32xbf16>
    %63 = vector.shape_cast %62 : vector<2x8x8x32xbf16> to vector<128x32xbf16>
    %c8 = arith.constant 8 : index
    %c0_89 = arith.constant 0 : index
    %c0_90 = arith.constant 0 : index
    %64 = vector.load %arg2[%c8, %c0_89, %c0_90] : memref<9x32x128xbf16, #tpu.memory_space<vmem>>, vector<1x32x128xbf16>
    %65 = vector.shape_cast %64 : vector<1x32x128xbf16> to vector<32x128xbf16>
    %cst_91 = arith.constant dense<0.000000e+00> : vector<128x128xf32>
    %66 = tpu.matmul %63, %65, %cst_91 {dimension_numbers = #tpu.dot_dimension_numbers<[1], [0], [0], [1], [0, 0, 1, 1], [], []>} : vector<128x32xbf16>, vector<32x128xbf16>, vector<128x128xf32> -> vector<128x128xf32>
    %c0_92 = arith.constant 0 : index
    %c0_93 = arith.constant 0 : index
    %67 = vector.load %arg13[%c0_92, %c0_93] : memref<128x128xf32, #tpu.memory_space<vmem>>, vector<128x128xf32>
    %68 = arith.addf %67, %66 : vector<128x128xf32>
    %c0_94 = arith.constant 0 : index
    %c0_95 = arith.constant 0 : index
    %69 = vector.load %arg13[%c0_94, %c0_95] : memref<128x128xf32, #tpu.memory_space<vmem>>, vector<128x128xf32>
    tpu.vector_store %arg13[%c0_94, %c0_95], %68 {strides = array<i32>} : memref<128x128xf32, #tpu.memory_space<vmem>>, vector<128x128xf32>,
    %c0_96 = arith.constant 0 : index
    %c0_97 = arith.constant 0 : index
    %70 = vector.load %arg13[%c0_96, %c0_97] : memref<128x128xf32, #tpu.memory_space<vmem>>, vector<128x128xf32>
    %c0_98 = arith.constant 0 : index
    %c0_99 = arith.constant 0 : index
    %71 = vector.load %arg3[%c0_98, %c0_99] : memref<1x128xf32, #tpu.memory_space<vmem>>, vector<1x128xf32>
    %72 = vector.broadcast %71 : vector<1x128xf32> to vector<128x128xf32>
    %73 = arith.addf %70, %72 : vector<128x128xf32>
    %cst_100 = arith.constant 0.000000e+00 : f32
    %74 = vector.broadcast %cst_100 : f32 to vector<128x128xf32>
    %75 = arith.maximumf %73, %74 : vector<128x128xf32>
    %cst_101 = arith.constant 0.000000e+00 : bf16
    %76 = vector.broadcast %cst_101 : bf16 to vector<2x10x10x128xbf16>
    %c0_102 = arith.constant 0 : index
    %c0_103 = arith.constant 0 : index
    %c0_104 = arith.constant 0 : index
    %c0_105 = arith.constant 0 : index
    %77 = vector.load %arg11[%c0_102, %c0_103, %c0_104, %c0_105] : memref<2x10x10x128xbf16, #tpu.memory_space<vmem>>, vector<2x10x10x128xbf16>
    tpu.vector_store %arg11[%c0_102, %c0_103, %c0_104, %c0_105], %76 {strides = array<i32>} : memref<2x10x10x128xbf16, #tpu.memory_space<vmem>>, vector<2x10x10x128xbf16>,
    %78 = vector.shape_cast %75 : vector<128x128xf32> to vector<2x8x8x128xf32>
    %79 = arith.truncf %78 : vector<2x8x8x128xf32> to vector<2x8x8x128xbf16>
    %c0_106 = arith.constant 0 : index
    %c1_107 = arith.constant 1 : index
    %c1_108 = arith.constant 1 : index
    %c0_109 = arith.constant 0 : index
    %80 = vector.load %arg11[%c0_106, %c1_107, %c1_108, %c0_109] : memref<2x10x10x128xbf16, #tpu.memory_space<vmem>>, vector<2x8x8x128xbf16>
    tpu.vector_store %arg11[%c0_106, %c1_107, %c1_108, %c0_109], %79 {strides = array<i32>} : memref<2x10x10x128xbf16, #tpu.memory_space<vmem>>, vector<2x8x8x128xbf16>,
    %c0_110 = arith.constant 0 : index
    %c0_111 = arith.constant 0 : index
    %c0_112 = arith.constant 0 : index
    %c0_113 = arith.constant 0 : index
    %81 = vector.load %arg11[%c0_110, %c0_111, %c0_112, %c0_113] : memref<2x10x10x128xbf16, #tpu.memory_space<vmem>>, vector<2x8x8x128xbf16>
    %82 = vector.shape_cast %81 : vector<2x8x8x128xbf16> to vector<128x128xbf16>
    %c0_114 = arith.constant 0 : index
    %c0_115 = arith.constant 0 : index
    %c0_116 = arith.constant 0 : index
    %83 = vector.load %arg4[%c0_114, %c0_115, %c0_116] : memref<9x128x128xbf16, #tpu.memory_space<vmem>>, vector<1x128x128xbf16>
    %84 = vector.shape_cast %83 : vector<1x128x128xbf16> to vector<128x128xbf16>
    %cst_117 = arith.constant dense<0.000000e+00> : vector<128x128xf32>
    %85 = tpu.matmul %82, %84, %cst_117 {dimension_numbers = #tpu.dot_dimension_numbers<[1], [0], [0], [1], [0, 0, 1, 1], [], []>} : vector<128x128xbf16>, vector<128x128xbf16>, vector<128x128xf32> -> vector<128x128xf32>
    %c0_118 = arith.constant 0 : index
    %c0_119 = arith.constant 0 : index
    %86 = vector.load %arg13[%c0_118, %c0_119] : memref<128x128xf32, #tpu.memory_space<vmem>>, vector<128x128xf32>
    tpu.vector_store %arg13[%c0_118, %c0_119], %85 {strides = array<i32>} : memref<128x128xf32, #tpu.memory_space<vmem>>, vector<128x128xf32>,
    %c0_120 = arith.constant 0 : index
    %c0_121 = arith.constant 0 : index
    %c1_122 = arith.constant 1 : index
    %c0_123 = arith.constant 0 : index
    %87 = vector.load %arg11[%c0_120, %c0_121, %c1_122, %c0_123] : memref<2x10x10x128xbf16, #tpu.memory_space<vmem>>, vector<2x8x8x128xbf16>
    %88 = vector.shape_cast %87 : vector<2x8x8x128xbf16> to vector<128x128xbf16>
    %c1_124 = arith.constant 1 : index
    %c0_125 = arith.constant 0 : index
    %c0_126 = arith.constant 0 : index
    %89 = vector.load %arg4[%c1_124, %c0_125, %c0_126] : memref<9x128x128xbf16, #tpu.memory_space<vmem>>, vector<1x128x128xbf16>
    %90 = vector.shape_cast %89 : vector<1x128x128xbf16> to vector<128x128xbf16>
    %cst_127 = arith.constant dense<0.000000e+00> : vector<128x128xf32>
    %91 = tpu.matmul %88, %90, %cst_127 {dimension_numbers = #tpu.dot_dimension_numbers<[1], [0], [0], [1], [0, 0, 1, 1], [], []>} : vector<128x128xbf16>, vector<128x128xbf16>, vector<128x128xf32> -> vector<128x128xf32>
    %c0_128 = arith.constant 0 : index
    %c0_129 = arith.constant 0 : index
    %92 = vector.load %arg13[%c0_128, %c0_129] : memref<128x128xf32, #tpu.memory_space<vmem>>, vector<128x128xf32>
    %93 = arith.addf %92, %91 : vector<128x128xf32>
    %c0_130 = arith.constant 0 : index
    %c0_131 = arith.constant 0 : index
    %94 = vector.load %arg13[%c0_130, %c0_131] : memref<128x128xf32, #tpu.memory_space<vmem>>, vector<128x128xf32>
    tpu.vector_store %arg13[%c0_130, %c0_131], %93 {strides = array<i32>} : memref<128x128xf32, #tpu.memory_space<vmem>>, vector<128x128xf32>,
    %c0_132 = arith.constant 0 : index
    %c0_133 = arith.constant 0 : index
    %c2_134 = arith.constant 2 : index
    %c0_135 = arith.constant 0 : index
    %95 = vector.load %arg11[%c0_132, %c0_133, %c2_134, %c0_135] : memref<2x10x10x128xbf16, #tpu.memory_space<vmem>>, vector<2x8x8x128xbf16>
    %96 = vector.shape_cast %95 : vector<2x8x8x128xbf16> to vector<128x128xbf16>
    %c2_136 = arith.constant 2 : index
    %c0_137 = arith.constant 0 : index
    %c0_138 = arith.constant 0 : index
    %97 = vector.load %arg4[%c2_136, %c0_137, %c0_138] : memref<9x128x128xbf16, #tpu.memory_space<vmem>>, vector<1x128x128xbf16>
    %98 = vector.shape_cast %97 : vector<1x128x128xbf16> to vector<128x128xbf16>
    %cst_139 = arith.constant dense<0.000000e+00> : vector<128x128xf32>
    %99 = tpu.matmul %96, %98, %cst_139 {dimension_numbers = #tpu.dot_dimension_numbers<[1], [0], [0], [1], [0, 0, 1, 1], [], []>} : vector<128x128xbf16>, vector<128x128xbf16>, vector<128x128xf32> -> vector<128x128xf32>
    %c0_140 = arith.constant 0 : index
    %c0_141 = arith.constant 0 : index
    %100 = vector.load %arg13[%c0_140, %c0_141] : memref<128x128xf32, #tpu.memory_space<vmem>>, vector<128x128xf32>
    %101 = arith.addf %100, %99 : vector<128x128xf32>
    %c0_142 = arith.constant 0 : index
    %c0_143 = arith.constant 0 : index
    %102 = vector.load %arg13[%c0_142, %c0_143] : memref<128x128xf32, #tpu.memory_space<vmem>>, vector<128x128xf32>
    tpu.vector_store %arg13[%c0_142, %c0_143], %101 {strides = array<i32>} : memref<128x128xf32, #tpu.memory_space<vmem>>, vector<128x128xf32>,
    %c0_144 = arith.constant 0 : index
    %c1_145 = arith.constant 1 : index
    %c0_146 = arith.constant 0 : index
    %c0_147 = arith.constant 0 : index
    %103 = vector.load %arg11[%c0_144, %c1_145, %c0_146, %c0_147] : memref<2x10x10x128xbf16, #tpu.memory_space<vmem>>, vector<2x8x8x128xbf16>
    %104 = vector.shape_cast %103 : vector<2x8x8x128xbf16> to vector<128x128xbf16>
    %c3_148 = arith.constant 3 : index
    %c0_149 = arith.constant 0 : index
    %c0_150 = arith.constant 0 : index
    %105 = vector.load %arg4[%c3_148, %c0_149, %c0_150] : memref<9x128x128xbf16, #tpu.memory_space<vmem>>, vector<1x128x128xbf16>
    %106 = vector.shape_cast %105 : vector<1x128x128xbf16> to vector<128x128xbf16>
    %cst_151 = arith.constant dense<0.000000e+00> : vector<128x128xf32>
    %107 = tpu.matmul %104, %106, %cst_151 {dimension_numbers = #tpu.dot_dimension_numbers<[1], [0], [0], [1], [0, 0, 1, 1], [], []>} : vector<128x128xbf16>, vector<128x128xbf16>, vector<128x128xf32> -> vector<128x128xf32>
    %c0_152 = arith.constant 0 : index
    %c0_153 = arith.constant 0 : index
    %108 = vector.load %arg13[%c0_152, %c0_153] : memref<128x128xf32, #tpu.memory_space<vmem>>, vector<128x128xf32>
    %109 = arith.addf %108, %107 : vector<128x128xf32>
    %c0_154 = arith.constant 0 : index
    %c0_155 = arith.constant 0 : index
    %110 = vector.load %arg13[%c0_154, %c0_155] : memref<128x128xf32, #tpu.memory_space<vmem>>, vector<128x128xf32>
    tpu.vector_store %arg13[%c0_154, %c0_155], %109 {strides = array<i32>} : memref<128x128xf32, #tpu.memory_space<vmem>>, vector<128x128xf32>,
    %c0_156 = arith.constant 0 : index
    %c1_157 = arith.constant 1 : index
    %c1_158 = arith.constant 1 : index
    %c0_159 = arith.constant 0 : index
    %111 = vector.load %arg11[%c0_156, %c1_157, %c1_158, %c0_159] : memref<2x10x10x128xbf16, #tpu.memory_space<vmem>>, vector<2x8x8x128xbf16>
    %112 = vector.shape_cast %111 : vector<2x8x8x128xbf16> to vector<128x128xbf16>
    %c4_160 = arith.constant 4 : index
    %c0_161 = arith.constant 0 : index
    %c0_162 = arith.constant 0 : index
    %113 = vector.load %arg4[%c4_160, %c0_161, %c0_162] : memref<9x128x128xbf16, #tpu.memory_space<vmem>>, vector<1x128x128xbf16>
    %114 = vector.shape_cast %113 : vector<1x128x128xbf16> to vector<128x128xbf16>
    %cst_163 = arith.constant dense<0.000000e+00> : vector<128x128xf32>
    %115 = tpu.matmul %112, %114, %cst_163 {dimension_numbers = #tpu.dot_dimension_numbers<[1], [0], [0], [1], [0, 0, 1, 1], [], []>} : vector<128x128xbf16>, vector<128x128xbf16>, vector<128x128xf32> -> vector<128x128xf32>
    %c0_164 = arith.constant 0 : index
    %c0_165 = arith.constant 0 : index
    %116 = vector.load %arg13[%c0_164, %c0_165] : memref<128x128xf32, #tpu.memory_space<vmem>>, vector<128x128xf32>
    %117 = arith.addf %116, %115 : vector<128x128xf32>
    %c0_166 = arith.constant 0 : index
    %c0_167 = arith.constant 0 : index
    %118 = vector.load %arg13[%c0_166, %c0_167] : memref<128x128xf32, #tpu.memory_space<vmem>>, vector<128x128xf32>
    tpu.vector_store %arg13[%c0_166, %c0_167], %117 {strides = array<i32>} : memref<128x128xf32, #tpu.memory_space<vmem>>, vector<128x128xf32>,
    %c0_168 = arith.constant 0 : index
    %c1_169 = arith.constant 1 : index
    %c2_170 = arith.constant 2 : index
    %c0_171 = arith.constant 0 : index
    %119 = vector.load %arg11[%c0_168, %c1_169, %c2_170, %c0_171] : memref<2x10x10x128xbf16, #tpu.memory_space<vmem>>, vector<2x8x8x128xbf16>
    %120 = vector.shape_cast %119 : vector<2x8x8x128xbf16> to vector<128x128xbf16>
    %c5_172 = arith.constant 5 : index
    %c0_173 = arith.constant 0 : index
    %c0_174 = arith.constant 0 : index
    %121 = vector.load %arg4[%c5_172, %c0_173, %c0_174] : memref<9x128x128xbf16, #tpu.memory_space<vmem>>, vector<1x128x128xbf16>
    %122 = vector.shape_cast %121 : vector<1x128x128xbf16> to vector<128x128xbf16>
    %cst_175 = arith.constant dense<0.000000e+00> : vector<128x128xf32>
    %123 = tpu.matmul %120, %122, %cst_175 {dimension_numbers = #tpu.dot_dimension_numbers<[1], [0], [0], [1], [0, 0, 1, 1], [], []>} : vector<128x128xbf16>, vector<128x128xbf16>, vector<128x128xf32> -> vector<128x128xf32>
    %c0_176 = arith.constant 0 : index
    %c0_177 = arith.constant 0 : index
    %124 = vector.load %arg13[%c0_176, %c0_177] : memref<128x128xf32, #tpu.memory_space<vmem>>, vector<128x128xf32>
    %125 = arith.addf %124, %123 : vector<128x128xf32>
    %c0_178 = arith.constant 0 : index
    %c0_179 = arith.constant 0 : index
    %126 = vector.load %arg13[%c0_178, %c0_179] : memref<128x128xf32, #tpu.memory_space<vmem>>, vector<128x128xf32>
    tpu.vector_store %arg13[%c0_178, %c0_179], %125 {strides = array<i32>} : memref<128x128xf32, #tpu.memory_space<vmem>>, vector<128x128xf32>,
    %c0_180 = arith.constant 0 : index
    %c2_181 = arith.constant 2 : index
    %c0_182 = arith.constant 0 : index
    %c0_183 = arith.constant 0 : index
    %127 = vector.load %arg11[%c0_180, %c2_181, %c0_182, %c0_183] : memref<2x10x10x128xbf16, #tpu.memory_space<vmem>>, vector<2x8x8x128xbf16>
    %128 = vector.shape_cast %127 : vector<2x8x8x128xbf16> to vector<128x128xbf16>
    %c6_184 = arith.constant 6 : index
    %c0_185 = arith.constant 0 : index
    %c0_186 = arith.constant 0 : index
    %129 = vector.load %arg4[%c6_184, %c0_185, %c0_186] : memref<9x128x128xbf16, #tpu.memory_space<vmem>>, vector<1x128x128xbf16>
    %130 = vector.shape_cast %129 : vector<1x128x128xbf16> to vector<128x128xbf16>
    %cst_187 = arith.constant dense<0.000000e+00> : vector<128x128xf32>
    %131 = tpu.matmul %128, %130, %cst_187 {dimension_numbers = #tpu.dot_dimension_numbers<[1], [0], [0], [1], [0, 0, 1, 1], [], []>} : vector<128x128xbf16>, vector<128x128xbf16>, vector<128x128xf32> -> vector<128x128xf32>
    %c0_188 = arith.constant 0 : index
    %c0_189 = arith.constant 0 : index
    %132 = vector.load %arg13[%c0_188, %c0_189] : memref<128x128xf32, #tpu.memory_space<vmem>>, vector<128x128xf32>
    %133 = arith.addf %132, %131 : vector<128x128xf32>
    %c0_190 = arith.constant 0 : index
    %c0_191 = arith.constant 0 : index
    %134 = vector.load %arg13[%c0_190, %c0_191] : memref<128x128xf32, #tpu.memory_space<vmem>>, vector<128x128xf32>
    tpu.vector_store %arg13[%c0_190, %c0_191], %133 {strides = array<i32>} : memref<128x128xf32, #tpu.memory_space<vmem>>, vector<128x128xf32>,
    %c0_192 = arith.constant 0 : index
    %c2_193 = arith.constant 2 : index
    %c1_194 = arith.constant 1 : index
    %c0_195 = arith.constant 0 : index
    %135 = vector.load %arg11[%c0_192, %c2_193, %c1_194, %c0_195] : memref<2x10x10x128xbf16, #tpu.memory_space<vmem>>, vector<2x8x8x128xbf16>
    %136 = vector.shape_cast %135 : vector<2x8x8x128xbf16> to vector<128x128xbf16>
    %c7_196 = arith.constant 7 : index
    %c0_197 = arith.constant 0 : index
    %c0_198 = arith.constant 0 : index
    %137 = vector.load %arg4[%c7_196, %c0_197, %c0_198] : memref<9x128x128xbf16, #tpu.memory_space<vmem>>, vector<1x128x128xbf16>
    %138 = vector.shape_cast %137 : vector<1x128x128xbf16> to vector<128x128xbf16>
    %cst_199 = arith.constant dense<0.000000e+00> : vector<128x128xf32>
    %139 = tpu.matmul %136, %138, %cst_199 {dimension_numbers = #tpu.dot_dimension_numbers<[1], [0], [0], [1], [0, 0, 1, 1], [], []>} : vector<128x128xbf16>, vector<128x128xbf16>, vector<128x128xf32> -> vector<128x128xf32>
    %c0_200 = arith.constant 0 : index
    %c0_201 = arith.constant 0 : index
    %140 = vector.load %arg13[%c0_200, %c0_201] : memref<128x128xf32, #tpu.memory_space<vmem>>, vector<128x128xf32>
    %141 = arith.addf %140, %139 : vector<128x128xf32>
    %c0_202 = arith.constant 0 : index
    %c0_203 = arith.constant 0 : index
    %142 = vector.load %arg13[%c0_202, %c0_203] : memref<128x128xf32, #tpu.memory_space<vmem>>, vector<128x128xf32>
    tpu.vector_store %arg13[%c0_202, %c0_203], %141 {strides = array<i32>} : memref<128x128xf32, #tpu.memory_space<vmem>>, vector<128x128xf32>,
    %c0_204 = arith.constant 0 : index
    %c2_205 = arith.constant 2 : index
    %c2_206 = arith.constant 2 : index
    %c0_207 = arith.constant 0 : index
    %143 = vector.load %arg11[%c0_204, %c2_205, %c2_206, %c0_207] : memref<2x10x10x128xbf16, #tpu.memory_space<vmem>>, vector<2x8x8x128xbf16>
    %144 = vector.shape_cast %143 : vector<2x8x8x128xbf16> to vector<128x128xbf16>
    %c8_208 = arith.constant 8 : index
    %c0_209 = arith.constant 0 : index
    %c0_210 = arith.constant 0 : index
    %145 = vector.load %arg4[%c8_208, %c0_209, %c0_210] : memref<9x128x128xbf16, #tpu.memory_space<vmem>>, vector<1x128x128xbf16>
    %146 = vector.shape_cast %145 : vector<1x128x128xbf16> to vector<128x128xbf16>
    %cst_211 = arith.constant dense<0.000000e+00> : vector<128x128xf32>
    %147 = tpu.matmul %144, %146, %cst_211 {dimension_numbers = #tpu.dot_dimension_numbers<[1], [0], [0], [1], [0, 0, 1, 1], [], []>} : vector<128x128xbf16>, vector<128x128xbf16>, vector<128x128xf32> -> vector<128x128xf32>
    %c0_212 = arith.constant 0 : index
    %c0_213 = arith.constant 0 : index
    %148 = vector.load %arg13[%c0_212, %c0_213] : memref<128x128xf32, #tpu.memory_space<vmem>>, vector<128x128xf32>
    %149 = arith.addf %148, %147 : vector<128x128xf32>
    %c0_214 = arith.constant 0 : index
    %c0_215 = arith.constant 0 : index
    %150 = vector.load %arg13[%c0_214, %c0_215] : memref<128x128xf32, #tpu.memory_space<vmem>>, vector<128x128xf32>
    tpu.vector_store %arg13[%c0_214, %c0_215], %149 {strides = array<i32>} : memref<128x128xf32, #tpu.memory_space<vmem>>, vector<128x128xf32>,
    %c0_216 = arith.constant 0 : index
    %c0_217 = arith.constant 0 : index
    %151 = vector.load %arg13[%c0_216, %c0_217] : memref<128x128xf32, #tpu.memory_space<vmem>>, vector<128x128xf32>
    %c0_218 = arith.constant 0 : index
    %c0_219 = arith.constant 0 : index
    %152 = vector.load %arg5[%c0_218, %c0_219] : memref<1x128xf32, #tpu.memory_space<vmem>>, vector<1x128xf32>
    %153 = vector.broadcast %152 : vector<1x128xf32> to vector<128x128xf32>
    %154 = arith.addf %151, %153 : vector<128x128xf32>
    %cst_220 = arith.constant 0.000000e+00 : f32
    %155 = vector.broadcast %cst_220 : f32 to vector<128x128xf32>
    %156 = arith.maximumf %154, %155 : vector<128x128xf32>
    %cst_221 = arith.constant 0.000000e+00 : bf16
    %157 = vector.broadcast %cst_221 : bf16 to vector<2x10x10x128xbf16>
    %c0_222 = arith.constant 0 : index
    %c0_223 = arith.constant 0 : index
    %c0_224 = arith.constant 0 : index
    %c0_225 = arith.constant 0 : index
    %158 = vector.load %arg12[%c0_222, %c0_223, %c0_224, %c0_225] : memref<2x10x10x128xbf16, #tpu.memory_space<vmem>>, vector<2x10x10x128xbf16>
    tpu.vector_store %arg12[%c0_222, %c0_223, %c0_224, %c0_225], %157 {strides = array<i32>} : memref<2x10x10x128xbf16, #tpu.memory_space<vmem>>, vector<2x10x10x128xbf16>,
    %159 = vector.shape_cast %156 : vector<128x128xf32> to vector<2x8x8x128xf32>
    %160 = arith.truncf %159 : vector<2x8x8x128xf32> to vector<2x8x8x128xbf16>
    %c0_226 = arith.constant 0 : index
    %c1_227 = arith.constant 1 : index
    %c1_228 = arith.constant 1 : index
    %c0_229 = arith.constant 0 : index
    %161 = vector.load %arg12[%c0_226, %c1_227, %c1_228, %c0_229] : memref<2x10x10x128xbf16, #tpu.memory_space<vmem>>, vector<2x8x8x128xbf16>
    tpu.vector_store %arg12[%c0_226, %c1_227, %c1_228, %c0_229], %160 {strides = array<i32>} : memref<2x10x10x128xbf16, #tpu.memory_space<vmem>>, vector<2x8x8x128xbf16>,
    %c0_230 = arith.constant 0 : index
    %c0_231 = arith.constant 0 : index
    %c0_232 = arith.constant 0 : index
    %c0_233 = arith.constant 0 : index
    %162 = vector.load %arg12[%c0_230, %c0_231, %c0_232, %c0_233] : memref<2x10x10x128xbf16, #tpu.memory_space<vmem>>, vector<2x8x8x128xbf16>
    %163 = vector.shape_cast %162 : vector<2x8x8x128xbf16> to vector<128x128xbf16>
    %c0_234 = arith.constant 0 : index
    %c0_235 = arith.constant 0 : index
    %c0_236 = arith.constant 0 : index
    %164 = vector.load %arg6[%c0_234, %c0_235, %c0_236] : memref<9x128x128xbf16, #tpu.memory_space<vmem>>, vector<1x128x128xbf16>
    %165 = vector.shape_cast %164 : vector<1x128x128xbf16> to vector<128x128xbf16>
    %cst_237 = arith.constant dense<0.000000e+00> : vector<128x128xf32>
    %166 = tpu.matmul %163, %165, %cst_237 {dimension_numbers = #tpu.dot_dimension_numbers<[1], [0], [0], [1], [0, 0, 1, 1], [], []>} : vector<128x128xbf16>, vector<128x128xbf16>, vector<128x128xf32> -> vector<128x128xf32>
    %c0_238 = arith.constant 0 : index
    %c0_239 = arith.constant 0 : index
    %167 = vector.load %arg13[%c0_238, %c0_239] : memref<128x128xf32, #tpu.memory_space<vmem>>, vector<128x128xf32>
    tpu.vector_store %arg13[%c0_238, %c0_239], %166 {strides = array<i32>} : memref<128x128xf32, #tpu.memory_space<vmem>>, vector<128x128xf32>,
    %c0_240 = arith.constant 0 : index
    %c0_241 = arith.constant 0 : index
    %c1_242 = arith.constant 1 : index
    %c0_243 = arith.constant 0 : index
    %168 = vector.load %arg12[%c0_240, %c0_241, %c1_242, %c0_243] : memref<2x10x10x128xbf16, #tpu.memory_space<vmem>>, vector<2x8x8x128xbf16>
    %169 = vector.shape_cast %168 : vector<2x8x8x128xbf16> to vector<128x128xbf16>
    %c1_244 = arith.constant 1 : index
    %c0_245 = arith.constant 0 : index
    %c0_246 = arith.constant 0 : index
    %170 = vector.load %arg6[%c1_244, %c0_245, %c0_246] : memref<9x128x128xbf16, #tpu.memory_space<vmem>>, vector<1x128x128xbf16>
    %171 = vector.shape_cast %170 : vector<1x128x128xbf16> to vector<128x128xbf16>
    %cst_247 = arith.constant dense<0.000000e+00> : vector<128x128xf32>
    %172 = tpu.matmul %169, %171, %cst_247 {dimension_numbers = #tpu.dot_dimension_numbers<[1], [0], [0], [1], [0, 0, 1, 1], [], []>} : vector<128x128xbf16>, vector<128x128xbf16>, vector<128x128xf32> -> vector<128x128xf32>
    %c0_248 = arith.constant 0 : index
    %c0_249 = arith.constant 0 : index
    %173 = vector.load %arg13[%c0_248, %c0_249] : memref<128x128xf32, #tpu.memory_space<vmem>>, vector<128x128xf32>
    %174 = arith.addf %173, %172 : vector<128x128xf32>
    %c0_250 = arith.constant 0 : index
    %c0_251 = arith.constant 0 : index
    %175 = vector.load %arg13[%c0_250, %c0_251] : memref<128x128xf32, #tpu.memory_space<vmem>>, vector<128x128xf32>
    tpu.vector_store %arg13[%c0_250, %c0_251], %174 {strides = array<i32>} : memref<128x128xf32, #tpu.memory_space<vmem>>, vector<128x128xf32>,
    %c0_252 = arith.constant 0 : index
    %c0_253 = arith.constant 0 : index
    %c2_254 = arith.constant 2 : index
    %c0_255 = arith.constant 0 : index
    %176 = vector.load %arg12[%c0_252, %c0_253, %c2_254, %c0_255] : memref<2x10x10x128xbf16, #tpu.memory_space<vmem>>, vector<2x8x8x128xbf16>
    %177 = vector.shape_cast %176 : vector<2x8x8x128xbf16> to vector<128x128xbf16>
    %c2_256 = arith.constant 2 : index
    %c0_257 = arith.constant 0 : index
    %c0_258 = arith.constant 0 : index
    %178 = vector.load %arg6[%c2_256, %c0_257, %c0_258] : memref<9x128x128xbf16, #tpu.memory_space<vmem>>, vector<1x128x128xbf16>
    %179 = vector.shape_cast %178 : vector<1x128x128xbf16> to vector<128x128xbf16>
    %cst_259 = arith.constant dense<0.000000e+00> : vector<128x128xf32>
    %180 = tpu.matmul %177, %179, %cst_259 {dimension_numbers = #tpu.dot_dimension_numbers<[1], [0], [0], [1], [0, 0, 1, 1], [], []>} : vector<128x128xbf16>, vector<128x128xbf16>, vector<128x128xf32> -> vector<128x128xf32>
    %c0_260 = arith.constant 0 : index
    %c0_261 = arith.constant 0 : index
    %181 = vector.load %arg13[%c0_260, %c0_261] : memref<128x128xf32, #tpu.memory_space<vmem>>, vector<128x128xf32>
    %182 = arith.addf %181, %180 : vector<128x128xf32>
    %c0_262 = arith.constant 0 : index
    %c0_263 = arith.constant 0 : index
    %183 = vector.load %arg13[%c0_262, %c0_263] : memref<128x128xf32, #tpu.memory_space<vmem>>, vector<128x128xf32>
    tpu.vector_store %arg13[%c0_262, %c0_263], %182 {strides = array<i32>} : memref<128x128xf32, #tpu.memory_space<vmem>>, vector<128x128xf32>,
    %c0_264 = arith.constant 0 : index
    %c1_265 = arith.constant 1 : index
    %c0_266 = arith.constant 0 : index
    %c0_267 = arith.constant 0 : index
    %184 = vector.load %arg12[%c0_264, %c1_265, %c0_266, %c0_267] : memref<2x10x10x128xbf16, #tpu.memory_space<vmem>>, vector<2x8x8x128xbf16>
    %185 = vector.shape_cast %184 : vector<2x8x8x128xbf16> to vector<128x128xbf16>
    %c3_268 = arith.constant 3 : index
    %c0_269 = arith.constant 0 : index
    %c0_270 = arith.constant 0 : index
    %186 = vector.load %arg6[%c3_268, %c0_269, %c0_270] : memref<9x128x128xbf16, #tpu.memory_space<vmem>>, vector<1x128x128xbf16>
    %187 = vector.shape_cast %186 : vector<1x128x128xbf16> to vector<128x128xbf16>
    %cst_271 = arith.constant dense<0.000000e+00> : vector<128x128xf32>
    %188 = tpu.matmul %185, %187, %cst_271 {dimension_numbers = #tpu.dot_dimension_numbers<[1], [0], [0], [1], [0, 0, 1, 1], [], []>} : vector<128x128xbf16>, vector<128x128xbf16>, vector<128x128xf32> -> vector<128x128xf32>
    %c0_272 = arith.constant 0 : index
    %c0_273 = arith.constant 0 : index
    %189 = vector.load %arg13[%c0_272, %c0_273] : memref<128x128xf32, #tpu.memory_space<vmem>>, vector<128x128xf32>
    %190 = arith.addf %189, %188 : vector<128x128xf32>
    %c0_274 = arith.constant 0 : index
    %c0_275 = arith.constant 0 : index
    %191 = vector.load %arg13[%c0_274, %c0_275] : memref<128x128xf32, #tpu.memory_space<vmem>>, vector<128x128xf32>
    tpu.vector_store %arg13[%c0_274, %c0_275], %190 {strides = array<i32>} : memref<128x128xf32, #tpu.memory_space<vmem>>, vector<128x128xf32>,
    %c0_276 = arith.constant 0 : index
    %c1_277 = arith.constant 1 : index
    %c1_278 = arith.constant 1 : index
    %c0_279 = arith.constant 0 : index
    %192 = vector.load %arg12[%c0_276, %c1_277, %c1_278, %c0_279] : memref<2x10x10x128xbf16, #tpu.memory_space<vmem>>, vector<2x8x8x128xbf16>
    %193 = vector.shape_cast %192 : vector<2x8x8x128xbf16> to vector<128x128xbf16>
    %c4_280 = arith.constant 4 : index
    %c0_281 = arith.constant 0 : index
    %c0_282 = arith.constant 0 : index
    %194 = vector.load %arg6[%c4_280, %c0_281, %c0_282] : memref<9x128x128xbf16, #tpu.memory_space<vmem>>, vector<1x128x128xbf16>
    %195 = vector.shape_cast %194 : vector<1x128x128xbf16> to vector<128x128xbf16>
    %cst_283 = arith.constant dense<0.000000e+00> : vector<128x128xf32>
    %196 = tpu.matmul %193, %195, %cst_283 {dimension_numbers = #tpu.dot_dimension_numbers<[1], [0], [0], [1], [0, 0, 1, 1], [], []>} : vector<128x128xbf16>, vector<128x128xbf16>, vector<128x128xf32> -> vector<128x128xf32>
    %c0_284 = arith.constant 0 : index
    %c0_285 = arith.constant 0 : index
    %197 = vector.load %arg13[%c0_284, %c0_285] : memref<128x128xf32, #tpu.memory_space<vmem>>, vector<128x128xf32>
    %198 = arith.addf %197, %196 : vector<128x128xf32>
    %c0_286 = arith.constant 0 : index
    %c0_287 = arith.constant 0 : index
    %199 = vector.load %arg13[%c0_286, %c0_287] : memref<128x128xf32, #tpu.memory_space<vmem>>, vector<128x128xf32>
    tpu.vector_store %arg13[%c0_286, %c0_287], %198 {strides = array<i32>} : memref<128x128xf32, #tpu.memory_space<vmem>>, vector<128x128xf32>,
    %c0_288 = arith.constant 0 : index
    %c1_289 = arith.constant 1 : index
    %c2_290 = arith.constant 2 : index
    %c0_291 = arith.constant 0 : index
    %200 = vector.load %arg12[%c0_288, %c1_289, %c2_290, %c0_291] : memref<2x10x10x128xbf16, #tpu.memory_space<vmem>>, vector<2x8x8x128xbf16>
    %201 = vector.shape_cast %200 : vector<2x8x8x128xbf16> to vector<128x128xbf16>
    %c5_292 = arith.constant 5 : index
    %c0_293 = arith.constant 0 : index
    %c0_294 = arith.constant 0 : index
    %202 = vector.load %arg6[%c5_292, %c0_293, %c0_294] : memref<9x128x128xbf16, #tpu.memory_space<vmem>>, vector<1x128x128xbf16>
    %203 = vector.shape_cast %202 : vector<1x128x128xbf16> to vector<128x128xbf16>
    %cst_295 = arith.constant dense<0.000000e+00> : vector<128x128xf32>
    %204 = tpu.matmul %201, %203, %cst_295 {dimension_numbers = #tpu.dot_dimension_numbers<[1], [0], [0], [1], [0, 0, 1, 1], [], []>} : vector<128x128xbf16>, vector<128x128xbf16>, vector<128x128xf32> -> vector<128x128xf32>
    %c0_296 = arith.constant 0 : index
    %c0_297 = arith.constant 0 : index
    %205 = vector.load %arg13[%c0_296, %c0_297] : memref<128x128xf32, #tpu.memory_space<vmem>>, vector<128x128xf32>
    %206 = arith.addf %205, %204 : vector<128x128xf32>
    %c0_298 = arith.constant 0 : index
    %c0_299 = arith.constant 0 : index
    %207 = vector.load %arg13[%c0_298, %c0_299] : memref<128x128xf32, #tpu.memory_space<vmem>>, vector<128x128xf32>
    tpu.vector_store %arg13[%c0_298, %c0_299], %206 {strides = array<i32>} : memref<128x128xf32, #tpu.memory_space<vmem>>, vector<128x128xf32>,
    %c0_300 = arith.constant 0 : index
    %c2_301 = arith.constant 2 : index
    %c0_302 = arith.constant 0 : index
    %c0_303 = arith.constant 0 : index
    %208 = vector.load %arg12[%c0_300, %c2_301, %c0_302, %c0_303] : memref<2x10x10x128xbf16, #tpu.memory_space<vmem>>, vector<2x8x8x128xbf16>
    %209 = vector.shape_cast %208 : vector<2x8x8x128xbf16> to vector<128x128xbf16>
    %c6_304 = arith.constant 6 : index
    %c0_305 = arith.constant 0 : index
    %c0_306 = arith.constant 0 : index
    %210 = vector.load %arg6[%c6_304, %c0_305, %c0_306] : memref<9x128x128xbf16, #tpu.memory_space<vmem>>, vector<1x128x128xbf16>
    %211 = vector.shape_cast %210 : vector<1x128x128xbf16> to vector<128x128xbf16>
    %cst_307 = arith.constant dense<0.000000e+00> : vector<128x128xf32>
    %212 = tpu.matmul %209, %211, %cst_307 {dimension_numbers = #tpu.dot_dimension_numbers<[1], [0], [0], [1], [0, 0, 1, 1], [], []>} : vector<128x128xbf16>, vector<128x128xbf16>, vector<128x128xf32> -> vector<128x128xf32>
    %c0_308 = arith.constant 0 : index
    %c0_309 = arith.constant 0 : index
    %213 = vector.load %arg13[%c0_308, %c0_309] : memref<128x128xf32, #tpu.memory_space<vmem>>, vector<128x128xf32>
    %214 = arith.addf %213, %212 : vector<128x128xf32>
    %c0_310 = arith.constant 0 : index
    %c0_311 = arith.constant 0 : index
    %215 = vector.load %arg13[%c0_310, %c0_311] : memref<128x128xf32, #tpu.memory_space<vmem>>, vector<128x128xf32>
    tpu.vector_store %arg13[%c0_310, %c0_311], %214 {strides = array<i32>} : memref<128x128xf32, #tpu.memory_space<vmem>>, vector<128x128xf32>,
    %c0_312 = arith.constant 0 : index
    %c2_313 = arith.constant 2 : index
    %c1_314 = arith.constant 1 : index
    %c0_315 = arith.constant 0 : index
    %216 = vector.load %arg12[%c0_312, %c2_313, %c1_314, %c0_315] : memref<2x10x10x128xbf16, #tpu.memory_space<vmem>>, vector<2x8x8x128xbf16>
    %217 = vector.shape_cast %216 : vector<2x8x8x128xbf16> to vector<128x128xbf16>
    %c7_316 = arith.constant 7 : index
    %c0_317 = arith.constant 0 : index
    %c0_318 = arith.constant 0 : index
    %218 = vector.load %arg6[%c7_316, %c0_317, %c0_318] : memref<9x128x128xbf16, #tpu.memory_space<vmem>>, vector<1x128x128xbf16>
    %219 = vector.shape_cast %218 : vector<1x128x128xbf16> to vector<128x128xbf16>
    %cst_319 = arith.constant dense<0.000000e+00> : vector<128x128xf32>
    %220 = tpu.matmul %217, %219, %cst_319 {dimension_numbers = #tpu.dot_dimension_numbers<[1], [0], [0], [1], [0, 0, 1, 1], [], []>} : vector<128x128xbf16>, vector<128x128xbf16>, vector<128x128xf32> -> vector<128x128xf32>
    %c0_320 = arith.constant 0 : index
    %c0_321 = arith.constant 0 : index
    %221 = vector.load %arg13[%c0_320, %c0_321] : memref<128x128xf32, #tpu.memory_space<vmem>>, vector<128x128xf32>
    %222 = arith.addf %221, %220 : vector<128x128xf32>
    %c0_322 = arith.constant 0 : index
    %c0_323 = arith.constant 0 : index
    %223 = vector.load %arg13[%c0_322, %c0_323] : memref<128x128xf32, #tpu.memory_space<vmem>>, vector<128x128xf32>
    tpu.vector_store %arg13[%c0_322, %c0_323], %222 {strides = array<i32>} : memref<128x128xf32, #tpu.memory_space<vmem>>, vector<128x128xf32>,
    %c0_324 = arith.constant 0 : index
    %c2_325 = arith.constant 2 : index
    %c2_326 = arith.constant 2 : index
    %c0_327 = arith.constant 0 : index
    %224 = vector.load %arg12[%c0_324, %c2_325, %c2_326, %c0_327] : memref<2x10x10x128xbf16, #tpu.memory_space<vmem>>, vector<2x8x8x128xbf16>
    %225 = vector.shape_cast %224 : vector<2x8x8x128xbf16> to vector<128x128xbf16>
    %c8_328 = arith.constant 8 : index
    %c0_329 = arith.constant 0 : index
    %c0_330 = arith.constant 0 : index
    %226 = vector.load %arg6[%c8_328, %c0_329, %c0_330] : memref<9x128x128xbf16, #tpu.memory_space<vmem>>, vector<1x128x128xbf16>
    %227 = vector.shape_cast %226 : vector<1x128x128xbf16> to vector<128x128xbf16>
    %cst_331 = arith.constant dense<0.000000e+00> : vector<128x128xf32>
    %228 = tpu.matmul %225, %227, %cst_331 {dimension_numbers = #tpu.dot_dimension_numbers<[1], [0], [0], [1], [0, 0, 1, 1], [], []>} : vector<128x128xbf16>, vector<128x128xbf16>, vector<128x128xf32> -> vector<128x128xf32>
    %c0_332 = arith.constant 0 : index
    %c0_333 = arith.constant 0 : index
    %229 = vector.load %arg13[%c0_332, %c0_333] : memref<128x128xf32, #tpu.memory_space<vmem>>, vector<128x128xf32>
    %230 = arith.addf %229, %228 : vector<128x128xf32>
    %c0_334 = arith.constant 0 : index
    %c0_335 = arith.constant 0 : index
    %231 = vector.load %arg13[%c0_334, %c0_335] : memref<128x128xf32, #tpu.memory_space<vmem>>, vector<128x128xf32>
    tpu.vector_store %arg13[%c0_334, %c0_335], %230 {strides = array<i32>} : memref<128x128xf32, #tpu.memory_space<vmem>>, vector<128x128xf32>,
    %c0_336 = arith.constant 0 : index
    %c0_337 = arith.constant 0 : index
    %232 = vector.load %arg13[%c0_336, %c0_337] : memref<128x128xf32, #tpu.memory_space<vmem>>, vector<128x128xf32>
    %c0_338 = arith.constant 0 : index
    %c0_339 = arith.constant 0 : index
    %233 = vector.load %arg7[%c0_338, %c0_339] : memref<1x128xf32, #tpu.memory_space<vmem>>, vector<1x128xf32>
    %234 = vector.broadcast %233 : vector<1x128xf32> to vector<128x128xf32>
    %235 = arith.addf %232, %234 : vector<128x128xf32>
    %cst_340 = arith.constant 0.000000e+00 : f32
    %236 = vector.broadcast %cst_340 : f32 to vector<128x128xf32>
    %237 = arith.maximumf %235, %236 : vector<128x128xf32>
    %238 = arith.truncf %237 : vector<128x128xf32> to vector<128x128xbf16>
    %c0_341 = arith.constant 0 : index
    %c0_342 = arith.constant 0 : index
    %239 = vector.load %arg8[%c0_341, %c0_342] : memref<128x8xbf16, #tpu.memory_space<vmem>>, vector<128x8xbf16>
    %cst_343 = arith.constant dense<0.000000e+00> : vector<128x8xf32>
    %240 = tpu.matmul %238, %239, %cst_343 {dimension_numbers = #tpu.dot_dimension_numbers<[1], [0], [0], [1], [0, 0, 1, 1], [], []>} : vector<128x128xbf16>, vector<128x8xbf16>, vector<128x8xf32> -> vector<128x8xf32>
    %c0_344 = arith.constant 0 : index
    %c0_345 = arith.constant 0 : index
    %241 = vector.load %arg9[%c0_344, %c0_345] : memref<1x8xf32, #tpu.memory_space<vmem>>, vector<1x8xf32>
    %242 = vector.broadcast %241 : vector<1x8xf32> to vector<128x8xf32>
    %243 = arith.addf %240, %242 : vector<128x8xf32>
    %cst_346 = arith.constant 0.000000e+00 : f32
    %244 = vector.broadcast %cst_346 : f32 to vector<128x8xf32>
    %245 = arith.maximumf %243, %244 : vector<128x8xf32>
    %c0_347 = arith.constant 0 : index
    %c0_348 = arith.constant 0 : index
    %246 = vector.load %arg10[%c0_347, %c0_348] : memref<128x8xf32, #tpu.memory_space<vmem>>, vector<128x8xf32>
    tpu.vector_store %arg10[%c0_347, %c0_348], %245 {strides = array<i32>} : memref<128x8xf32, #tpu.memory_space<vmem>>, vector<128x8xf32>,
    return
  }
  func.func @transform_0(%arg0: i32) -> (i32, i32, i32, i32) {
    %c0_i32 = arith.constant 0 : i32
    %c0_i32_0 = arith.constant 0 : i32
    %c0_i32_1 = arith.constant 0 : i32
    %c0_i32_2 = arith.constant 0 : i32
    return %arg0, %c0_i32, %c0_i32_0, %c0_i32_1 : i32, i32, i32, i32
  }
  func.func @transform_1(%arg0: i32) -> (i32, i32, i32) {
    %c0_i32 = arith.constant 0 : i32
    %c0_i32_0 = arith.constant 0 : i32
    %c0_i32_1 = arith.constant 0 : i32
    %c0_i32_2 = arith.constant 0 : i32
    return %c0_i32, %c0_i32_0, %c0_i32_1 : i32, i32, i32
  }
  func.func @transform_2(%arg0: i32) -> (i32, i32) {
    %c0_i32 = arith.constant 0 : i32
    %c0_i32_0 = arith.constant 0 : i32
    %c0_i32_1 = arith.constant 0 : i32
    return %c0_i32, %c0_i32_0 : i32, i32
  }
  func.func @transform_3(%arg0: i32) -> (i32, i32, i32) {
    %c0_i32 = arith.constant 0 : i32
    %c0_i32_0 = arith.constant 0 : i32
    %c0_i32_1 = arith.constant 0 : i32
    %c0_i32_2 = arith.constant 0 : i32
    return %c0_i32, %c0_i32_0, %c0_i32_1 : i32, i32, i32
  }
  func.func @transform_4(%arg0: i32) -> (i32, i32) {
    %c0_i32 = arith.constant 0 : i32
    %c0_i32_0 = arith.constant 0 : i32
    %c0_i32_1 = arith.constant 0 : i32
    return %c0_i32, %c0_i32_0 : i32, i32
  }
  func.func @transform_5(%arg0: i32) -> (i32, i32, i32) {
    %c0_i32 = arith.constant 0 : i32
    %c0_i32_0 = arith.constant 0 : i32
    %c0_i32_1 = arith.constant 0 : i32
    %c0_i32_2 = arith.constant 0 : i32
    return %c0_i32, %c0_i32_0, %c0_i32_1 : i32, i32, i32
  }
  func.func @transform_6(%arg0: i32) -> (i32, i32) {
    %c0_i32 = arith.constant 0 : i32
    %c0_i32_0 = arith.constant 0 : i32
    %c0_i32_1 = arith.constant 0 : i32
    return %c0_i32, %c0_i32_0 : i32, i32
  }
  func.func @transform_7(%arg0: i32) -> (i32, i32) {
    %c0_i32 = arith.constant 0 : i32
    %c0_i32_0 = arith.constant 0 : i32
    %c0_i32_1 = arith.constant 0 : i32
    return %c0_i32, %c0_i32_0 : i32, i32
  }
  func.func @transform_8(%arg0: i32) -> (i32, i32) {
    %c0_i32 = arith.constant 0 : i32
    %c0_i32_0 = arith.constant 0 : i32
    %c0_i32_1 = arith.constant 0 : i32
    return %c0_i32, %c0_i32_0 : i32, i32
  }
  func.func @transform_9(%arg0: i32) -> (i32, i32) {
    %c0_i32 = arith.constant 0 : i32
    %c0_i32_0 = arith.constant 0 : i32
    return %arg0, %c0_i32 : i32, i32
  }
}

</mosaic_0001>

<bundles_post_ra>
// kernel: chessbot_forward.3
= control target key start
LH: loop header
LB: loop body
LE: loop exit
PB: predicated region body
PF: predicated region fallthrough
CT: control target
= control target key end

     0   :  { %s2059_s0 = inlined_call_operand.vmem [shape: f32[2,512], index: 0, kind: input, shape index: {}]   ;;  %s2060_s1 = inlined_call_operand.vmem [shape: f32[512,64], index: 1, kind: input, shape index: {}]   ;;  %s2061_s2 = inlined_call_operand.vmem [shape: f32[1,64], index: 2, kind: input, shape index: {}]   ;;  %s2062_s3 = inlined_call_operand.vmem [shape: f32[512,64], index: 3, kind: input, shape index: {}]   ;;  %s2063_s4 = inlined_call_operand.vmem [shape: f32[1,64], index: 4, kind: input, shape index: {}]   ;;  %s2064_s5 = inlined_call_operand.vmem [shape: f32[512,64], index: 5, kind: input, shape index: {}]   ;;  %s2065_s6 = inlined_call_operand.vmem [shape: f32[1,64], index: 6, kind: input, shape index: {}]   ;;  %s2066_s7 = inlined_call_operand.vmem [shape: f32[64,1], index: 7, kind: input, shape index: {}]   ;;  %s2067_s8 = inlined_call_operand.<no memory space> [shape: f32[1,1], index: 8, kind: input, shape index: {}]   ;;  %s2068_s9 = inlined_call_operand.hbm [shape: f32[2,64], index: 9, kind: output, shape index: {0}]   ;;  %s2069_s10 = inlined_call_operand.hbm [shape: f32[2,64], index: 10, kind: output, shape index: {1}]   ;;  %s2070_s11 = inlined_call_operand.vmem [shape: f32[2,1], index: 11, kind: output, shape index: {2}]  }
   0x1   :  { %v17_v0 = vstv %s2067_s8 }
   0x2   :  { %18 = vst [vmem:[#allocation2] sm:$0x1] %v17_v0 }
   0x3   :  { %19 = vsyncpa [#allocation4], 0  ;;  %v56_v1 = vld [vmem:[%s2060_s1 + $0x80] sm:$0xff]  ;;  %v57_v2 = vld [vmem:[%s2060_s1 + $0x88] sm:$0xff]  ;;  %v1327_v48 = vmov 1983009808   ;;  %v116_v50 = vlaneseq }
   0x4   :  { %v40_v3 = vld [vmem:[%s2060_s1] sm:$0xff]  ;;  %v1066_v4 = vpack.c.bf16 %v57_v2, %v56_v1  ;;  %v41_v5 = vld [vmem:[%s2060_s1 + $0x8] sm:$0xff]  ;;  %v58_v12 = vld [vmem:[%s2060_s1 + $0x90] sm:$0xff]  ;;  %v114_v49 = vunpack.c.l.s4 %v1327_v48 }
   0x5   :  { %v88_v6 = vld [vmem:[%s2060_s1 + $0x180] sm:$0xff]  ;;  %v89_v7 = vld [vmem:[%s2060_s1 + $0x188] sm:$0xff]  ;;  %v1068_v8 = vpack.c.bf16 %v41_v5, %v40_v3  ;;  %v59_v14 = vld [vmem:[%s2060_s1 + $0x98] sm:$0xff]  ;;  %v117_v1 = vshrl.u32 %v116_v50, 7 }
   0x6   :  { %v1098_v9 = vpack.c.bf16 %v89_v7, %v88_v6  ;;  %v72_v10 = vld [vmem:[%s2060_s1 + $0x100] sm:$0xff]  ;;  %v73_v11 = vld [vmem:[%s2060_s1 + $0x108] sm:$0xff]  ;;  %1067 = vmatprep.subr.bf16.mxu0 %v1066_v4  ;;  %v42_v15 = vld [vmem:[%s2060_s1 + $0x10] sm:$0xff]  ;;  %v1070_v17 = vpack.c.bf16 %v59_v14, %v58_v12  ;;  %v115_v0 = vunpack.c.0.s8 %v114_v49 }
   0x7   :  { %v1100_v13 = vpack.c.bf16 %v73_v11, %v72_v10  ;;  %v43_v16 = vld [vmem:[%s2060_s1 + $0x18] sm:$0xff]  ;;  %1069 = vmatpush3.bf16.msra.mxu0 %v1068_v8  ;;  %v90_v19 = vld [vmem:[%s2060_s1 + $0x190] sm:$0xff]  ;;  %v60_v24 = vld [vmem:[%s2060_s1 + $0xa0] sm:$0xff] }
   0x8   :  { %1099 = vmatprep.subr.bf16.mxu1 %v1098_v9  ;;  %v1072_v18 = vpack.c.bf16 %v43_v16, %v42_v15  ;;  %v91_v20 = vld [vmem:[%s2060_s1 + $0x198] sm:$0xff]  ;;  %v74_v21 = vld [vmem:[%s2060_s1 + $0x110] sm:$0xff]  ;;  %v61_v25 = vld [vmem:[%s2060_s1 + $0xa8] sm:$0xff]  ;;  %1071 = vmatprep.subr.bf16.mxu0 %v1070_v17  ;;  %v118_v14 = vsub.s32 %v115_v0, %v117_v1 }
   0x9   :  { %1101 = vmatpush3.bf16.msra.mxu1 %v1100_v13  ;;  %v1102_v22 = vpack.c.bf16 %v91_v20, %v90_v19  ;;  %v75_v23 = vld [vmem:[%s2060_s1 + $0x118] sm:$0xff]  ;;  %v1074_v27 = vpack.c.bf16 %v61_v25, %v60_v24  ;;  %v44_v28 = vld [vmem:[%s2060_s1 + $0x20] sm:$0xff]  ;;  %v45_v29 = vld [vmem:[%s2060_s1 + $0x28] sm:$0xff] }
   0xa   :  { %v1104_v26 = vpack.c.bf16 %v75_v23, %v74_v21  ;;  %v92_v30 = vld [vmem:[%s2060_s1 + $0x1a0] sm:$0xff]  ;;  %v93_v31 = vld [vmem:[%s2060_s1 + $0x1a8] sm:$0xff]  ;;  %v1076_v34 = vpack.c.bf16 %v45_v29, %v44_v28  ;;  %v62_v36 = vld [vmem:[%s2060_s1 + $0xb0] sm:$0xff] }
   0xb   :  { %1103 = vmatprep.subr.bf16.mxu1 %v1102_v22  ;;  %v76_v32 = vld [vmem:[%s2060_s1 + $0x120] sm:$0xff]  ;;  %v77_v33 = vld [vmem:[%s2060_s1 + $0x128] sm:$0xff]  ;;  %1073 = vmatpush3.bf16.msra.mxu0 %v1072_v18  ;;  %v1106_v35 = vpack.c.bf16 %v93_v31, %v92_v30  ;;  %v63_v37 = vld [vmem:[%s2060_s1 + $0xb8] sm:$0xff] }
   0xc   :  { %v46_v38 = vld [vmem:[%s2060_s1 + $0x30] sm:$0xff]  ;;  %1075 = vmatprep.subr.bf16.mxu0 %v1074_v27  ;;  %v1108_v39 = vpack.c.bf16 %v77_v33, %v76_v32  ;;  %v1078_v40 = vpack.c.bf16 %v63_v37, %v62_v36  ;;  %v47_v41 = vld [vmem:[%s2060_s1 + $0x38] sm:$0xff]  ;;  %v64_v47 = vld [vmem:[%s2060_s1 + $0xc0] sm:$0xff] }
   0xd   :  { %1105 = vmatpush3.bf16.msra.mxu1 %v1104_v26  ;;  %v94_v42 = vld [vmem:[%s2060_s1 + $0x1b0] sm:$0xff]  ;;  %v95_v43 = vld [vmem:[%s2060_s1 + $0x1b8] sm:$0xff]  ;;  %v65_v51 = vld [vmem:[%s2060_s1 + $0xc8] sm:$0xff]  ;;  %v1080_v52 = vpack.c.bf16 %v47_v41, %v46_v38 }
   0xe   :  { %1107 = vmatprep.subr.bf16.mxu1 %v1106_v35  ;;  %v1110_v44 = vpack.c.bf16 %v95_v43, %v94_v42  ;;  %v78_v45 = vld [vmem:[%s2060_s1 + $0x130] sm:$0xff]  ;;  %v79_v46 = vld [vmem:[%s2060_s1 + $0x138] sm:$0xff]  ;;  %v96_v53 = vld [vmem:[%s2060_s1 + $0x1c0] sm:$0xff]  ;;  %v1082_v56 = vpack.c.bf16 %v65_v51, %v64_v47 }
   0xf   :  { %1077 = vmatpush3.bf16.msra.mxu0 %v1076_v34  ;;  %v97_v54 = vld [vmem:[%s2060_s1 + $0x1c8] sm:$0xff]  ;;  %v1112_v55 = vpack.c.bf16 %v79_v46, %v78_v45  ;;  %v48_v57 = vld [vmem:[%s2060_s1 + $0x40] sm:$0xff]  ;;  %v66_v62 = vld [vmem:[%s2060_s1 + $0xd0] sm:$0xff] }
  0x10   :  { %1079 = vmatprep.subr.bf16.mxu0 %v1078_v40  ;;  %v49_v58 = vld [vmem:[%s2060_s1 + $0x48] sm:$0xff]  ;;  %v80_v59 = vld [vmem:[%s2060_s1 + $0x140] sm:$0xff]  ;;  %v1114_v60 = vpack.c.bf16 %v97_v54, %v96_v53  ;;  %v67_v63 = vld [vmem:[%s2060_s1 + $0xd8] sm:$0xff] }
  0x11   :  { %1109 = vmatpush3.bf16.msra.mxu1 %v1108_v39  ;;  %v81_v61 = vld [vmem:[%s2060_s1 + $0x148] sm:$0xff]  ;;  %v98_v2 = vld [vmem:[%s2060_s1 + $0x1d0] sm:$0xff]  ;;  %v99_v3 = vld [vmem:[%s2060_s1 + $0x1d8] sm:$0xff]  ;;  %v1084_v4 = vpack.c.bf16 %v49_v58, %v48_v57  ;;  %v1086_v6 = vpack.c.bf16 %v67_v63, %v66_v62 }
  0x12   :  { %1111 = vmatprep.subr.bf16.mxu1 %v1110_v44  ;;  %v1116_v5 = vpack.c.bf16 %v81_v61, %v80_v59  ;;  %v50_v7 = vld [vmem:[%s2060_s1 + $0x50] sm:$0xff]  ;;  %v51_v8 = vld [vmem:[%s2060_s1 + $0x58] sm:$0xff]  ;;  %v1118_v10 = vpack.c.bf16 %v99_v3, %v98_v2  ;;  %v68_v12 = vld [vmem:[%s2060_s1 + $0xe0] sm:$0xff] }
  0x13   :  { %1081 = vmatpush3.bf16.msra.mxu0 %v1080_v52  ;;  %v82_v9 = vld [vmem:[%s2060_s1 + $0x150] sm:$0xff]  ;;  %v83_v11 = vld [vmem:[%s2060_s1 + $0x158] sm:$0xff]  ;;  %v69_v13 = vld [vmem:[%s2060_s1 + $0xe8] sm:$0xff]  ;;  %v1088_v17 = vpack.c.bf16 %v51_v8, %v50_v7 }
  0x14   :  { %1083 = vmatprep.subr.bf16.mxu0 %v1082_v56  ;;  %v100_v15 = vld [vmem:[%s2060_s1 + $0x1e0] sm:$0xff]  ;;  %v101_v16 = vld [vmem:[%s2060_s1 + $0x1e8] sm:$0xff]  ;;  %v1120_v19 = vpack.c.bf16 %v83_v11, %v82_v9  ;;  %v1090_v20 = vpack.c.bf16 %v69_v13, %v68_v12  ;;  %v70_v26 = vld [vmem:[%s2060_s1 + $0xf0] sm:$0xff] }
  0x15   :  { %1113 = vmatpush3.bf16.msra.mxu1 %v1112_v55  ;;  %v52_v18 = vld [vmem:[%s2060_s1 + $0x60] sm:$0xff]  ;;  %v53_v21 = vld [vmem:[%s2060_s1 + $0x68] sm:$0xff]  ;;  %v1122_v24 = vpack.c.bf16 %v101_v16, %v100_v15  ;;  %v71_v27 = vld [vmem:[%s2060_s1 + $0xf8] sm:$0xff] }
  0x16   :  { %1115 = vmatprep.subr.bf16.mxu1 %v1114_v60  ;;  %v84_v22 = vld [vmem:[%s2060_s1 + $0x160] sm:$0xff]  ;;  %v85_v25 = vld [vmem:[%s2060_s1 + $0x168] sm:$0xff]  ;;  %v102_v30 = vld [vmem:[%s2060_s1 + $0x1f0] sm:$0xff]  ;;  %v1092_v32 = vpack.c.bf16 %v53_v21, %v52_v18  ;;  %v1094_v36 = vpack.c.bf16 %v71_v27, %v70_v26 }
  0x17   :  { %1085 = vmatpush3.bf16.msra.mxu0 %v1084_v4  ;;  %v39_v23 = vld [vmem:[%s2059_s0] sm:$0xff]  ;;  %v103_v31 = vld [vmem:[%s2060_s1 + $0x1f8] sm:$0xff]  ;;  %v1124_v35 = vpack.c.bf16 %v85_v25, %v84_v22  ;;  %v54_v37 = vld [vmem:[%s2060_s1 + $0x70] sm:$0xff] }
  0x18   :  { %1087 = vmatprep.subr.bf16.mxu0 %v1086_v6  ;;  %v1573_v28 = vrot.slane %v39_v23, %v118_v14  ;;  %v112_v29 = vcombine.high %v39_v23, %v39_v23  ;;  %v55_v38 = vld [vmem:[%s2060_s1 + $0x78] sm:$0xff]  ;;  %v86_v39 = vld [vmem:[%s2060_s1 + $0x170] sm:$0xff]  ;;  %v1126_v40 = vpack.c.bf16 %v103_v31, %v102_v30  ;;  %v291_v42 = vld [vmem:[%s2062_s3 + $0x80] sm:$0xff] }
  0x19   :  { %1117 = vmatpush3.bf16.msra.mxu1 %v1116_v5  ;;  %v87_v41 = vld [vmem:[%s2060_s1 + $0x178] sm:$0xff]  ;;  %v292_v43 = vld [vmem:[%s2062_s3 + $0x88] sm:$0xff]  ;;  %v323_v45 = vld [vmem:[%s2062_s3 + $0x180] sm:$0xff]  ;;  %v1096_v47 = vpack.c.bf16 %v55_v38, %v54_v37 }
  0x1a   :  { %1119 = vmatprep.subr.bf16.mxu1 %v1118_v10  ;;  %v1583_v33 = vcombine.high %v1573_v28, %v1573_v28  ;;  %v1585_v34 = vrot.slane %v112_v29, %v118_v14  ;;  %v324_v46 = vld [vmem:[%s2062_s3 + $0x188] sm:$0xff]  ;;  %v1128_v48 = vpack.c.bf16 %v87_v41, %v86_v39  ;;  %v1130_v49 = vpack.c.bf16 %v292_v43, %v291_v42  ;;  %v275_v50 = vld [vmem:[%s2062_s3] sm:$0xff]  ;;  %v293_v55 = vld [vmem:[%s2062_s3 + $0x90] sm:$0xff] }
  0x1b   :  { %1089 = vmatpush3.bf16.msra.mxu0 %v1088_v17  ;;  %v276_v51 = vld [vmem:[%s2062_s3 + $0x8] sm:$0xff]  ;;  %v307_v52 = vld [vmem:[%s2062_s3 + $0x100] sm:$0xff]  ;;  %v1162_v53 = vpack.c.bf16 %v324_v46, %v323_v45  ;;  %v294_v56 = vld [vmem:[%s2062_s3 + $0x98] sm:$0xff] }
  0x1c   :  { %1091 = vmatprep.subr.bf16.mxu0 %v1090_v20  ;;  %197 = vmatprep.mubr.f32.mxu0 %v1583_v33  ;;  %v1608_v44 = vcombine.high %v1585_v34, %v1585_v34  ;;  %v308_v54 = vld [vmem:[%s2062_s3 + $0x108] sm:$0xff]  ;;  %v325_v57 = vld [vmem:[%s2062_s3 + $0x190] sm:$0xff]  ;;  %v326_v58 = vld [vmem:[%s2062_s3 + $0x198] sm:$0xff]  ;;  %v1132_v59 = vpack.c.bf16 %v276_v51, %v275_v50  ;;  %v1134_v61 = vpack.c.bf16 %v294_v56, %v293_v55 }
  0x1d   :  { %1121 = vmatpush3.bf16.msra.mxu1 %v1120_v19  ;;  %v1164_v60 = vpack.c.bf16 %v308_v54, %v307_v52  ;;  %v277_v62 = vld [vmem:[%s2062_s3 + $0x10] sm:$0xff]  ;;  %v278_v63 = vld [vmem:[%s2062_s3 + $0x18] sm:$0xff]  ;;  %v1166_v1 = vpack.c.bf16 %v326_v58, %v325_v57  ;;  %v295_v3 = vld [vmem:[%s2062_s3 + $0xa0] sm:$0xff] }
  0x1e   :  { %1123 = vmatprep.subr.bf16.mxu1 %v1122_v24  ;;  %267 = vmatprep.mubr.f32.mxu1 %v1608_v44  ;;  %v309_v0 = vld [vmem:[%s2062_s3 + $0x110] sm:$0xff]  ;;  %v310_v2 = vld [vmem:[%s2062_s3 + $0x118] sm:$0xff]  ;;  %v296_v4 = vld [vmem:[%s2062_s3 + $0xa8] sm:$0xff]  ;;  %v1136_v7 = vpack.c.bf16 %v278_v63, %v277_v62 }
  0x1f   :  { %1093 = vmatpush3.bf16.msra.mxu0 %v1092_v32  ;;  %v327_v5 = vld [vmem:[%s2062_s3 + $0x1a0] sm:$0xff]  ;;  %v328_v6 = vld [vmem:[%s2062_s3 + $0x1a8] sm:$0xff]  ;;  %v1168_v8 = vpack.c.bf16 %v310_v2, %v309_v0  ;;  %v1138_v9 = vpack.c.bf16 %v296_v4, %v295_v3  ;;  %v297_v15 = vld [vmem:[%s2062_s3 + $0xb0] sm:$0xff] }
  0x20   :  { %1095 = vmatprep.subr.bf16.mxu0 %v1094_v36  ;;  %v279_v10 = vld [vmem:[%s2062_s3 + $0x20] sm:$0xff]  ;;  %v280_v11 = vld [vmem:[%s2062_s3 + $0x28] sm:$0xff]  ;;  %v1170_v13 = vpack.c.bf16 %v328_v6, %v327_v5  ;;  %v298_v16 = vld [vmem:[%s2062_s3 + $0xb8] sm:$0xff] }
  0x21   :  { %1125 = vmatpush3.bf16.msra.mxu1 %v1124_v35  ;;  %v311_v12 = vld [vmem:[%s2062_s3 + $0x120] sm:$0xff]  ;;  %v312_v14 = vld [vmem:[%s2062_s3 + $0x128] sm:$0xff]  ;;  %v329_v17 = vld [vmem:[%s2062_s3 + $0x1b0] sm:$0xff]  ;;  %v1140_v19 = vpack.c.bf16 %v280_v11, %v279_v10  ;;  %v1142_v21 = vpack.c.bf16 %v298_v16, %v297_v15 }
  0x22   :  { %1127 = vmatprep.subr.bf16.mxu1 %v1126_v40  ;;  %v330_v18 = vld [vmem:[%s2062_s3 + $0x1b8] sm:$0xff]  ;;  %v1172_v20 = vpack.c.bf16 %v312_v14, %v311_v12  ;;  %v281_v22 = vld [vmem:[%s2062_s3 + $0x30] sm:$0xff]  ;;  %v299_v27 = vld [vmem:[%s2062_s3 + $0xc0] sm:$0xff] }
  0x23   :  { %1097 = vmatpush3.bf16.msra.mxu0 %v1096_v47  ;;  %v282_v23 = vld [vmem:[%s2062_s3 + $0x38] sm:$0xff]  ;;  %v313_v24 = vld [vmem:[%s2062_s3 + $0x130] sm:$0xff]  ;;  %v1174_v25 = vpack.c.bf16 %v330_v18, %v329_v17  ;;  %v300_v29 = vld [vmem:[%s2062_s3 + $0xc8] sm:$0xff] }
  0x24   :  { %1131 = vmatprep.subr.bf16.mxu0 %v1130_v49  ;;  %v314_v26 = vld [vmem:[%s2062_s3 + $0x138] sm:$0xff]  ;;  %v331_v30 = vld [vmem:[%s2062_s3 + $0x1c0] sm:$0xff]  ;;  %v332_v31 = vld [vmem:[%s2062_s3 + $0x1c8] sm:$0xff]  ;;  %v1144_v32 = vpack.c.bf16 %v282_v23, %v281_v22  ;;  %v1146_v36 = vpack.c.bf16 %v300_v29, %v299_v27 }
  0x25   :  { %1129 = vmatpush3.bf16.msra.mxu1 %v1128_v48  ;;  %v1176_v35 = vpack.c.bf16 %v314_v26, %v313_v24  ;;  %v283_v37 = vld [vmem:[%s2062_s3 + $0x40] sm:$0xff]  ;;  %v284_v38 = vld [vmem:[%s2062_s3 + $0x48] sm:$0xff]  ;;  %v1178_v40 = vpack.c.bf16 %v332_v31, %v331_v30  ;;  %v301_v42 = vld [vmem:[%s2062_s3 + $0xd0] sm:$0xff] }
  0x26   :  { %1163 = vmatprep.subr.bf16.mxu1 %v1162_v53  ;;  %198 = vmatmul.mubr.f32.vlgmr.msra.gmra.mrb[0].mxu0 %v1573_v28  ;;  %v315_v39 = vld [vmem:[%s2062_s3 + $0x140] sm:$0xff]  ;;  %v316_v41 = vld [vmem:[%s2062_s3 + $0x148] sm:$0xff]  ;;  %v302_v43 = vld [vmem:[%s2062_s3 + $0xd8] sm:$0xff]  ;;  %v1148_v47 = vpack.c.bf16 %v284_v38, %v283_v37 }
  0x27   :  { %1133 = vmatpush3.bf16.msra.mxu0 %v1132_v59  ;;  %410 = vmatprep.mubr.f32.mxu0 %v1583_v33  ;;  %v333_v45 = vld [vmem:[%s2062_s3 + $0x1d0] sm:$0xff]  ;;  %v334_v46 = vld [vmem:[%s2062_s3 + $0x1d8] sm:$0xff]  ;;  %v1180_v48 = vpack.c.bf16 %v316_v41, %v315_v39  ;;  %v1150_v49 = vpack.c.bf16 %v302_v43, %v301_v42  ;;  %v303_v55 = vld [vmem:[%s2062_s3 + $0xe0] sm:$0xff] }
  0x28   :  { %268 = vmatmul.mubr.f32.vlgmr.msra.gmra.mrb[0].mxu1 %v1585_v34  ;;  %1135 = vmatprep.subr.bf16.mxu0 %v1134_v61  ;;  %v285_v50 = vld [vmem:[%s2062_s3 + $0x50] sm:$0xff]  ;;  %v286_v51 = vld [vmem:[%s2062_s3 + $0x58] sm:$0xff]  ;;  %v1182_v53 = vpack.c.bf16 %v334_v46, %v333_v45  ;;  %v304_v56 = vld [vmem:[%s2062_s3 + $0xe8] sm:$0xff] }
  0x29   :  { %1165 = vmatpush3.bf16.msra.mxu1 %v1164_v60  ;;  %480 = vmatprep.mubr.f32.mxu1 %v1608_v44  ;;  %v317_v52 = vld [vmem:[%s2062_s3 + $0x150] sm:$0xff]  ;;  %v318_v54 = vld [vmem:[%s2062_s3 + $0x158] sm:$0xff]  ;;  %v335_v57 = vld [vmem:[%s2062_s3 + $0x1e0] sm:$0xff]  ;;  %v1152_v59 = vpack.c.bf16 %v286_v51, %v285_v50  ;;  %v1154_v61 = vpack.c.bf16 %v304_v56, %v303_v55 }
  0x2a   :  { %1167 = vmatprep.subr.bf16.mxu1 %v1166_v1  ;;  %v336_v58 = vld [vmem:[%s2062_s3 + $0x1e8] sm:$0xff]  ;;  %v1184_v60 = vpack.c.bf16 %v318_v54, %v317_v52  ;;  %v287_v62 = vld [vmem:[%s2062_s3 + $0x60] sm:$0xff]  ;;  %v305_v3 = vld [vmem:[%s2062_s3 + $0xf0] sm:$0xff] }
  0x2b   :  { %1137 = vmatpush3.bf16.msra.mxu0 %v1136_v7  ;;  %v288_v63 = vld [vmem:[%s2062_s3 + $0x68] sm:$0xff]  ;;  %v319_v0 = vld [vmem:[%s2062_s3 + $0x160] sm:$0xff]  ;;  %v1186_v1 = vpack.c.bf16 %v336_v58, %v335_v57  ;;  %v306_v4 = vld [vmem:[%s2062_s3 + $0xf8] sm:$0xff] }
  0x2c   :  { %1139 = vmatprep.subr.bf16.mxu0 %v1138_v9  ;;  %v320_v2 = vld [vmem:[%s2062_s3 + $0x168] sm:$0xff]  ;;  %v337_v5 = vld [vmem:[%s2062_s3 + $0x1f0] sm:$0xff]  ;;  %v338_v6 = vld [vmem:[%s2062_s3 + $0x1f8] sm:$0xff]  ;;  %v1156_v7 = vpack.c.bf16 %v288_v63, %v287_v62  ;;  %v1158_v9 = vpack.c.bf16 %v306_v4, %v305_v3 }
  0x2d   :  { %1169 = vmatpush3.bf16.msra.mxu1 %v1168_v8  ;;  %v1188_v8 = vpack.c.bf16 %v320_v2, %v319_v0  ;;  %v289_v10 = vld [vmem:[%s2062_s3 + $0x70] sm:$0xff]  ;;  %v290_v11 = vld [vmem:[%s2062_s3 + $0x78] sm:$0xff]  ;;  %v503_v15 = vld [vmem:[%s2064_s5 + $0x80] sm:$0xff] }
  0x2e   :  { %1171 = vmatprep.subr.bf16.mxu1 %v1170_v13  ;;  %v321_v12 = vld [vmem:[%s2062_s3 + $0x170] sm:$0xff]  ;;  %v1190_v13 = vpack.c.bf16 %v338_v6, %v337_v5  ;;  %v322_v14 = vld [vmem:[%s2062_s3 + $0x178] sm:$0xff]  ;;  %v504_v16 = vld [vmem:[%s2064_s5 + $0x88] sm:$0xff] }
  0x2f   :  { %1141 = vmatpush3.bf16.msra.mxu0 %v1140_v19  ;;  %v535_v17 = vld [vmem:[%s2064_s5 + $0x180] sm:$0xff]  ;;  %v536_v18 = vld [vmem:[%s2064_s5 + $0x188] sm:$0xff]  ;;  %v1160_v19 = vpack.c.bf16 %v290_v11, %v289_v10  ;;  %v505_v27 = vld [vmem:[%s2064_s5 + $0x90] sm:$0xff] }
  0x30   :  { %1143 = vmatprep.subr.bf16.mxu0 %v1142_v21  ;;  %v1194_v21 = vpack.c.bf16 %v504_v16, %v503_v15  ;;  %v487_v22 = vld [vmem:[%s2064_s5] sm:$0xff]  ;;  %v488_v23 = vld [vmem:[%s2064_s5 + $0x8] sm:$0xff]  ;;  %v506_v29 = vld [vmem:[%s2064_s5 + $0x98] sm:$0xff] }
  0x31   :  { %1173 = vmatpush3.bf16.msra.mxu1 %v1172_v20  ;;  %v1192_v20 = vpack.c.bf16 %v322_v14, %v321_v12  ;;  %v519_v24 = vld [vmem:[%s2064_s5 + $0x100] sm:$0xff]  ;;  %v520_v26 = vld [vmem:[%s2064_s5 + $0x108] sm:$0xff]  ;;  %v537_v30 = vld [vmem:[%s2064_s5 + $0x190] sm:$0xff] }
  0x32   :  { %1175 = vmatprep.subr.bf16.mxu1 %v1174_v25  ;;  %v1226_v25 = vpack.c.bf16 %v536_v18, %v535_v17  ;;  %v538_v31 = vld [vmem:[%s2064_s5 + $0x198] sm:$0xff] }
  0x33   :  { %1145 = vmatpush3.bf16.msra.mxu0 %v1144_v32  ;;  %v1196_v32 = vpack.c.bf16 %v488_v23, %v487_v22 }
  0x34   :  { %1147 = vmatprep.subr.bf16.mxu0 %v1146_v36 }
  0x35   :  { %1177 = vmatpush3.bf16.msra.mxu1 %v1176_v35 }
  0x36   :  { %1179 = vmatprep.subr.bf16.mxu1 %v1178_v40 }
  0x37   :  { %1149 = vmatpush3.bf16.msra.mxu0 %v1148_v47 }
  0x38   :  { %1151 = vmatprep.subr.bf16.mxu0 %v1150_v49 }
  0x39   :  { %1181 = vmatpush3.bf16.msra.mxu1 %v1180_v48 }
  0x3a   :  { %1183 = vmatprep.subr.bf16.mxu1 %v1182_v53 }
  0x3b   :  { %1153 = vmatpush3.bf16.msra.mxu0 %v1152_v59 }
  0x3c   :  { %1155 = vmatprep.subr.bf16.mxu0 %v1154_v61 }
  0x3d   :  { %1185 = vmatpush3.bf16.msra.mxu1 %v1184_v60 }
  0x3e   :  { %1187 = vmatprep.subr.bf16.mxu1 %v1186_v1 }
  0x3f   :  { %1157 = vmatpush3.bf16.msra.mxu0 %v1156_v7 }
  0x40   :  { %1159 = vmatprep.subr.bf16.mxu0 %v1158_v9 }
  0x41   :  { %1189 = vmatpush3.bf16.msra.mxu1 %v1188_v8 }
  0x42   :  { %1191 = vmatprep.subr.bf16.mxu1 %v1190_v13 }
  0x43   :  { %1161 = vmatpush3.bf16.msra.mxu0 %v1160_v19 }
  0x44   :  { %20 = vsyncpa [#allocation6], 0  ;;  %1195 = vmatprep.subr.bf16.mxu0 %v1194_v21  ;;  %v1228_v35 = vpack.c.bf16 %v520_v26, %v519_v24  ;;  %v1198_v36 = vpack.c.bf16 %v506_v29, %v505_v27  ;;  %v489_v37 = vld [vmem:[%s2064_s5 + $0x10] sm:$0xff]  ;;  %v490_v38 = vld [vmem:[%s2064_s5 + $0x18] sm:$0xff]  ;;  %v1230_v40 = vpack.c.bf16 %v538_v31, %v537_v30  ;;  %vm1329_vm0 = vmmov 0   ;;  %s1332_s13 = smov [#allocation5]  }
  0x45   :  { %1193 = vmatpush3.bf16.msra.mxu1 %v1192_v20  ;;  %v521_v39 = vld [vmem:[%s2064_s5 + $0x110] sm:$0xff]  ;;  %v522_v41 = vld [vmem:[%s2064_s5 + $0x118] sm:$0xff]  ;;  %v507_v42 = vld [vmem:[%s2064_s5 + $0xa0] sm:$0xff]  ;;  %v1200_v47 = vpack.c.bf16 %v490_v38, %v489_v37  ;;  %vm273_vm1 = vcmask 517120   ;;  %vm714_vm2 = vcmask 523264   ;;  %s807_s14 = sshll.u32 %s1332_s13, 4  ;;  %s808_s14 = int_to_ptr.vmem [resolvable:$true] %s807_s14 }
  0x46   :  { %1227 = vmatprep.subr.bf16.mxu1 %v1226_v25  ;;  %v508_v43 = vld [vmem:[%s2064_s5 + $0xa8] sm:$0xff]  ;;  %411 = vmatmul.mubr.f32.vlgmr.msra.gmra.mrb[2].mxu0 %v1573_v28  ;;  %v539_v45 = vld [vmem:[%s2064_s5 + $0x1a0] sm:$0xff]  ;;  %v1232_v48 = vpack.c.bf16 %v522_v41, %v521_v39  ;;  %v509_v55 = vld [vmem:[%s2064_s5 + $0xb0] sm:$0xff] }
  0x47   :  { %v540_v46 = vld [vmem:[%s2064_s5 + $0x1a8] sm:$0xff]  ;;  %1197 = vmatpush3.bf16.msra.mxu0 %v1196_v32  ;;  %v1202_v49 = vpack.c.bf16 %v508_v43, %v507_v42  ;;  %v491_v50 = vld [vmem:[%s2064_s5 + $0x20] sm:$0xff]  ;;  %v510_v56 = vld [vmem:[%s2064_s5 + $0xb8] sm:$0xff]  ;;  %622 = vmatprep.mubr.f32.mxu0 %v1583_v33 }
  0x48   :  { %481 = vmatmul.mubr.f32.vlgmr.msra.gmra.mrb[2].mxu1 %v1585_v34  ;;  %1199 = vmatprep.subr.bf16.mxu0 %v1198_v36  ;;  %v492_v51 = vld [vmem:[%s2064_s5 + $0x28] sm:$0xff]  ;;  %v523_v52 = vld [vmem:[%s2064_s5 + $0x120] sm:$0xff]  ;;  %v1234_v53 = vpack.c.bf16 %v540_v46, %v539_v45  ;;  %v541_v57 = vld [vmem:[%s2064_s5 + $0x1b0] sm:$0xff]  ;;  %v1206_v61 = vpack.c.bf16 %v510_v56, %v509_v55 }
  0x49   :  { %1229 = vmatpush3.bf16.msra.mxu1 %v1228_v35  ;;  %v524_v54 = vld [vmem:[%s2064_s5 + $0x128] sm:$0xff]  ;;  %v542_v58 = vld [vmem:[%s2064_s5 + $0x1b8] sm:$0xff]  ;;  %692 = vmatprep.mubr.f32.mxu1 %v1608_v44  ;;  %v1204_v59 = vpack.c.bf16 %v492_v51, %v491_v50  ;;  %v493_v33 = vld [vmem:[%s2064_s5 + $0x30] sm:$0xff] }
  0x4a   :  { %1231 = vmatprep.subr.bf16.mxu1 %v1230_v40  ;;  %v1236_v60 = vpack.c.bf16 %v524_v54, %v523_v52  ;;  %v494_v62 = vld [vmem:[%s2064_s5 + $0x38] sm:$0xff]  ;;  %v525_v63 = vld [vmem:[%s2064_s5 + $0x130] sm:$0xff]  ;;  %v1238_v44 = vpack.c.bf16 %v542_v58, %v541_v57  ;;  %v511_v1 = vld [vmem:[%s2064_s5 + $0xc0] sm:$0xff]  ;;  %v1328_v58 = vmov 0.0|0.0  }
  0x4b   :  { %1201 = vmatpush3.bf16.msra.mxu0 %v1200_v47  ;;  %v526_v0 = vld [vmem:[%s2064_s5 + $0x138] sm:$0xff]  ;;  %v512_v2 = vld [vmem:[%s2064_s5 + $0xc8] sm:$0xff]  ;;  %v543_v3 = vld [vmem:[%s2064_s5 + $0x1c0] sm:$0xff]  ;;  %v1208_v5 = vpack.c.bf16 %v494_v62, %v493_v33 }
  0x4c   :  { %1203 = vmatprep.subr.bf16.mxu0 %v1202_v49  ;;  %v544_v4 = vld [vmem:[%s2064_s5 + $0x1c8] sm:$0xff]  ;;  %v1240_v6 = vpack.c.bf16 %v526_v0, %v525_v63  ;;  %v1210_v7 = vpack.c.bf16 %v512_v2, %v511_v1  ;;  %v495_v8 = vld [vmem:[%s2064_s5 + $0x40] sm:$0xff]  ;;  %v513_v13 = vld [vmem:[%s2064_s5 + $0xd0] sm:$0xff]  ;;  %v1330_v0 = vmov 0.0  }
  0x4d   :  { %1233 = vmatpush3.bf16.msra.mxu1 %v1232_v48  ;;  %v496_v9 = vld [vmem:[%s2064_s5 + $0x48] sm:$0xff]  ;;  %v527_v10 = vld [vmem:[%s2064_s5 + $0x140] sm:$0xff]  ;;  %v1242_v11 = vpack.c.bf16 %v544_v4, %v543_v3  ;;  %v514_v14 = vld [vmem:[%s2064_s5 + $0xd8] sm:$0xff] }
  0x4e   :  { %1235 = vmatprep.subr.bf16.mxu1 %v1234_v53  ;;  %v528_v12 = vld [vmem:[%s2064_s5 + $0x148] sm:$0xff]  ;;  %v545_v15 = vld [vmem:[%s2064_s5 + $0x1d0] sm:$0xff]  ;;  %v546_v16 = vld [vmem:[%s2064_s5 + $0x1d8] sm:$0xff]  ;;  %v1212_v17 = vpack.c.bf16 %v496_v9, %v495_v8  ;;  %v1214_v19 = vpack.c.bf16 %v514_v14, %v513_v13 }
  0x4f   :  { %1205 = vmatpush3.bf16.msra.mxu0 %v1204_v59  ;;  %v1244_v18 = vpack.c.bf16 %v528_v12, %v527_v10  ;;  %v497_v20 = vld [vmem:[%s2064_s5 + $0x50] sm:$0xff]  ;;  %v498_v21 = vld [vmem:[%s2064_s5 + $0x58] sm:$0xff]  ;;  %v1246_v23 = vpack.c.bf16 %v546_v16, %v545_v15  ;;  %v515_v25 = vld [vmem:[%s2064_s5 + $0xe0] sm:$0xff] }
  0x50   :  { %1207 = vmatprep.subr.bf16.mxu0 %v1206_v61  ;;  %v529_v22 = vld [vmem:[%s2064_s5 + $0x150] sm:$0xff]  ;;  %v530_v24 = vld [vmem:[%s2064_s5 + $0x158] sm:$0xff]  ;;  %v516_v26 = vld [vmem:[%s2064_s5 + $0xe8] sm:$0xff]  ;;  %v1216_v30 = vpack.c.bf16 %v498_v21, %v497_v20 }
  0x51   :  { %1237 = vmatpush3.bf16.msra.mxu1 %v1236_v60  ;;  %v547_v27 = vld [vmem:[%s2064_s5 + $0x1e0] sm:$0xff]  ;;  %v548_v29 = vld [vmem:[%s2064_s5 + $0x1e8] sm:$0xff]  ;;  %v1248_v31 = vpack.c.bf16 %v530_v24, %v529_v22  ;;  %v1218_v32 = vpack.c.bf16 %v516_v26, %v515_v25  ;;  %v517_v40 = vld [vmem:[%s2064_s5 + $0xf0] sm:$0xff] }
  0x52   :  { %1239 = vmatprep.subr.bf16.mxu1 %v1238_v44  ;;  %v499_v35 = vld [vmem:[%s2064_s5 + $0x60] sm:$0xff]  ;;  %v500_v36 = vld [vmem:[%s2064_s5 + $0x68] sm:$0xff]  ;;  %v1250_v38 = vpack.c.bf16 %v548_v29, %v547_v27  ;;  %v518_v41 = vld [vmem:[%s2064_s5 + $0xf8] sm:$0xff] }
  0x53   :  { %1209 = vmatpush3.bf16.msra.mxu0 %v1208_v5  ;;  %v531_v37 = vld [vmem:[%s2064_s5 + $0x160] sm:$0xff]  ;;  %v532_v39 = vld [vmem:[%s2064_s5 + $0x168] sm:$0xff]  ;;  %v549_v42 = vld [vmem:[%s2064_s5 + $0x1f0] sm:$0xff]  ;;  %v1220_v45 = vpack.c.bf16 %v500_v36, %v499_v35  ;;  %v1222_v47 = vpack.c.bf16 %v518_v41, %v517_v40 }
  0x54   :  { %1211 = vmatprep.subr.bf16.mxu0 %v1210_v7  ;;  %v550_v43 = vld [vmem:[%s2064_s5 + $0x1f8] sm:$0xff]  ;;  %v1252_v46 = vpack.c.bf16 %v532_v39, %v531_v37  ;;  %v501_v48 = vld [vmem:[%s2064_s5 + $0x70] sm:$0xff]  ;;  %v699_v55 = vld [vmem:[%s2066_s7] sm:$0xff] }
  0x55   :  { %1241 = vmatpush3.bf16.msra.mxu1 %v1240_v6  ;;  %v502_v49 = vld [vmem:[%s2064_s5 + $0x78] sm:$0xff]  ;;  %v1254_v50 = vpack.c.bf16 %v550_v43, %v549_v42  ;;  %v533_v51 = vld [vmem:[%s2064_s5 + $0x170] sm:$0xff]  ;;  %v700_v56 = vld [vmem:[%s2066_s7 + $0x8] sm:$0xff] }
  0x56   :  { %1243 = vmatprep.subr.bf16.mxu1 %v1242_v11  ;;  %v534_v52 = vld [vmem:[%s2064_s5 + $0x178] sm:$0xff]  ;;  %v1224_v53 = vpack.c.bf16 %v502_v49, %v501_v48  ;;  %v701_v57 = vld [vmem:[%s2066_s7 + $0x10] sm:$0xff]  ;;  %v1259_v59 = vpack.c.bf16 %v700_v56, %v699_v55  ;;  %v703_v60 = vld [vmem:[%s2066_s7 + $0x20] sm:$0xff] }
  0x57   :  { %1213 = vmatpush3.bf16.msra.mxu0 %v1212_v17  ;;  %v1256_v54 = vpack.c.bf16 %v534_v52, %v533_v51  ;;  %v704_v61 = vld [vmem:[%s2066_s7 + $0x28] sm:$0xff]  ;;  %v705_v62 = vld [vmem:[%s2066_s7 + $0x30] sm:$0xff]  ;;  %v706_v63 = vld [vmem:[%s2066_s7 + $0x38] sm:$0xff] }
  0x58   :  { %1215 = vmatprep.subr.bf16.mxu0 %v1214_v19  ;;  %v1265_v33 = vpack.c.bf16 %v704_v61, %v703_v60  ;;  %v1268_v44 = vpack.c.bf16 %v706_v63, %v705_v62  ;;  %v823_v2 = vld [vmem:[%s2061_s2] ss:$0 sm:$0xff] }
  0x59   :  { %1245 = vmatpush3.bf16.msra.mxu1 %v1244_v18  ;;  %v824_v11 = vld [vmem:[%s2063_s4] ss:$0 sm:$0xff]  ;;  %s1331_s4 = smov [#allocation3]  }
  0x5a   :  { %1247 = vmatprep.subr.bf16.mxu1 %v1246_v23  ;;  %v825_v20 = vld [vmem:[%s2065_s6] ss:$0 sm:$0xff]  ;;  %s797_s12 = sshll.u32 %s1331_s4, 4  ;;  %s798_s12 = int_to_ptr.vmem [resolvable:$true] %s797_s12 }
  0x5b   :  { %1217 = vmatpush3.bf16.msra.mxu0 %v1216_v30  ;;  %s1279_s1 = scalar_lea.vmem %s798_s12, 32  ;;  %p1284_p1 = scmp.lt.s32.totalorder %s798_s12, %s798_s12 }
  0x5c   :  { %1219 = vmatprep.subr.bf16.mxu0 %v1218_v32  ;;  %p1280_p0 = scmp.ne.s32.totalorder %s798_s12, %s1279_s1  ;;  %p1285_p2 = scmp.lt.s32.totalorder %s1279_s1, %s1279_s1 }
  0x5d   :  { %1249 = vmatpush3.bf16.msra.mxu1 %v1248_v31 }
  0x5e   :  { %1251 = vmatprep.subr.bf16.mxu1 %v1250_v38  ;;  %p1286_p3 = por %p1285_p2, %p1284_p1 }
  0x5f   :  { %1221 = vmatpush3.bf16.msra.mxu0 %v1220_v45 }
  0x60   :  { %1223 = vmatprep.subr.bf16.mxu0 %v1222_v47  ;;  %p1287_p4 = pnand %p1286_p3, %p1280_p0 }
  0x61   :  { %1253 = vmatpush3.bf16.msra.mxu1 %v1252_v46 }
  0x62   :  { %1255 = vmatprep.subr.bf16.mxu1 %v1254_v50 }
  0x63   :  { %1225 = vmatpush3.bf16.msra.mxu0 %v1224_v53 }
  0x64   :  { %1258 = vmatprep.subr.bf16.mxu0 %v1328_v58 }
  0x65   :  { %1257 = vmatpush3.bf16.msra.mxu1 %v1256_v54 }
  0x66   :  { %623 = vmatmul.mubr.f32.vlgmr.msra.gmra.mrb[4].mxu0 %v1573_v28  ;;  %v702_v28 = vld [vmem:[%s2066_s7 + $0x18] sm:$0xff] }
  0x67   :  { %1260 = vmatpush3.bf16.msra.mxu0 %v1259_v59  ;;  %1063 = vmatprep.mubr.msk.f32.mxu0 %vm1329_vm0, %v1330_v0 }
  0x68   :  { %693 = vmatmul.mubr.f32.vlgmr.msra.gmra.mrb[4].mxu1 %v1585_v34  ;;  %v1262_v34 = vpack.c.bf16 %v702_v28, %v701_v57  ;;  %1261 = vmatprep.subr.bf16.mxu0 %v1328_v58 }
  0x6b   :  { %1263 = vmatpush3.bf16.msra.mxu0 %v1262_v34 }
  0x6c   :  { %1264 = vmatprep.subr.bf16.mxu0 %v1328_v58 }
  0x6f   :  { %1266 = vmatpush3.bf16.msra.mxu0 %v1265_v33 }
  0x70   :  { %1267 = vmatprep.subr.bf16.mxu0 %v1328_v58 }
  0x73   :  { %1269 = vmatpush3.bf16.msra.mxu0 %v1268_v44 }
  0xf9   :  { %v860_v1 = vpop.f32.mrb[0].mxu0 }
  0xfa   :  { %v861_v3 = vpop.f32.mrb[1].mxu0 }
  0xfb   :  { %v895_v4 = vpop.f32.mrb[0].mxu1  ;;  %v862_v5 = vadd.f32 %v861_v3, %v860_v1 }
  0xfc   :  { %v896_v6 = vpop.f32.mrb[1].mxu1 }
  0xfd   :  { %v897_v7 = vadd.f32 %v896_v6, %v895_v4  ;;  %v200_v8 = vadd.f32 %v862_v5, %v823_v2 }
  0xff   :  { %v270_v9 = vadd.f32 %v897_v7, %v200_v8 }
 0x101   :  { %274 = vst.msk [vmem:[#allocation3] sm:$0x3] %vm273_vm1, %v270_v9 }
 0x119   :  { %v930_v10 = vpop.f32.mrb[2].mxu0 }
 0x11a   :  { %v931_v12 = vpop.f32.mrb[3].mxu0 }
 0x11b   :  { %v965_v13 = vpop.f32.mrb[2].mxu1  ;;  %v932_v14 = vadd.f32 %v931_v12, %v930_v10 }
 0x11c   :  { %v966_v15 = vpop.f32.mrb[3].mxu1 }
 0x11d   :  { %v967_v16 = vadd.f32 %v966_v15, %v965_v13  ;;  %v413_v17 = vadd.f32 %v932_v14, %v824_v11 }
 0x11f   :  { %v483_v18 = vadd.f32 %v967_v16, %v413_v17 }
 0x121   :  { %486 = vst.msk [vmem:[#allocation5] sm:$0x3] %vm273_vm1, %v483_v18 }
 0x139   :  { %v1000_v19 = vpop.f32.mrb[4].mxu0 }
 0x13a   :  { %v1001_v21 = vpop.f32.mrb[5].mxu0 }
 0x13b   :  { %v1035_v22 = vpop.f32.mrb[4].mxu1  ;;  %v1002_v23 = vadd.f32 %v1001_v21, %v1000_v19 }
 0x13c   :  { %v1036_v24 = vpop.f32.mrb[5].mxu1 }
 0x13d   :  { %v1037_v25 = vadd.f32 %v1036_v24, %v1035_v22  ;;  %v625_v26 = vadd.f32 %v1002_v23, %v825_v20 }
 0x13f   :  { %v695_v27 = vadd.f32 %v1037_v25, %v625_v26 }
 0x141   :  { %v698_v29 = vmax.f32 %v695_v27, 0.0 }
 0x143   :  { %1064 = vmatmul.mubr.msk.f32.vlgmr.msra.gmra.mrb[6].mxu0 %vm714_vm2, %v698_v29 }
 0x144   :  { %1290 = shalt.err (!%p1287_p4)
}
 0x145   :  { %s1291_s16 = scalar_lea.hbm %s2068_s9, 32 }
 0x146   :  { %p1292_p5 = scmp.ne.s32.totalorder %s2068_s9, %s1291_s16  ;;  %p1295_p6 = scmp.lt.u32.totalorder %s1291_s16, %s2068_s9 }
 0x148   :  { %p1297_p7 = pnand %p1295_p6, %p1292_p5 }
 0x14a   :  { %1300 = shalt.err (!%p1297_p7)
}
 0x14b   :  { %800 = dma.vmem_to_hbm [thread:$0]  %s798_s12, 32, %s2068_s9, [#allocation4]  }
 0x14c   :  { %s1301_s21 = scalar_lea.vmem %s808_s14, 32  ;;  %p1306_p9 = scmp.lt.s32.totalorder %s808_s14, %s808_s14 }
 0x14d   :  { %p1302_p8 = scmp.ne.s32.totalorder %s808_s14, %s1301_s21  ;;  %p1307_p10 = scmp.lt.s32.totalorder %s1301_s21, %s1301_s21 }
 0x14f   :  { %p1308_p11 = por %p1307_p10, %p1306_p9 }
 0x151   :  { %p1309_p12 = pnand %p1308_p11, %p1302_p8 }
 0x153   :  { %1312 = shalt.err (!%p1309_p12)
}
 0x154   :  { %s1313_s24 = scalar_lea.hbm %s2069_s10, 32 }
 0x155   :  { %p1314_p13 = scmp.ne.s32.totalorder %s2069_s10, %s1313_s24  ;;  %p1317_p0 = scmp.lt.u32.totalorder %s1313_s24, %s2069_s10 }
 0x157   :  { %p1319_p1 = pnand %p1317_p0, %p1314_p13 }
 0x159   :  { %1322 = shalt.err (!%p1319_p1)
}
 0x15a   :  { %810 = dma.vmem_to_hbm [thread:$0]  %s808_s14, 32, %s2069_s10, [#allocation6]   ;;  %v826_v30 = vld [vmem:[#allocation2] ss:$0 sm:$0xff]  ;;  %vm789_vm3 = vcmask 1024  }
 0x216   :  { %v784_v31 = vpop.f32.mrb[6].mxu0 }
 0x217   :  { %v785_v32 = vadd.f32 %v826_v30, %v784_v31  ;;  %v1065_v35 = vpop.f32.mrb[7].mxu0 }
 0x219   :  { %1277 = vtanh.f32 %v785_v32 }
 0x223   :  { %v1278_v36 = vpop.eup %1277 }
 0x224   :  { %790 = vst.msk [vmem:[%s2070_s11] sm:$0x3] %vm789_vm3, %v1278_v36 }
 0x225   :  { %1323 = dma.done.wait [#allocation4], 32  }
 0x226   :  { %1324 = vsyncadd [#allocation4], 4294967264 }
 0x227   :  { %1325 = dma.done.wait [#allocation6], 32  }
 0x228   :  { %1326 = vsyncadd [#allocation6], 4294967264 }
 0x229   :  { %821 = vsyncpa [#allocation4], 1 }
 0x22a   :  { %822 = vsyncpa [#allocation6], 1 }

// kernel: chessbot_forward.2
= control target key start
LH: loop header
LB: loop body
LE: loop exit
PB: predicated region body
PF: predicated region fallthrough
CT: control target
= control target key end

     0   :  { %14 = vsyncpa [#allocation6], 0  ;;  %s16054_s0 = inlined_call_operand.vmem [shape: bf16[2,10,10,32], index: 0, kind: input, shape index: {}]   ;;  %s16055_s1 = inlined_call_operand.hbm [shape: bf16[9,32,128], index: 1, kind: input, shape index: {}]   ;;  %s16056_s2 = inlined_call_operand.vmem [shape: f32[1,128], index: 2, kind: input, shape index: {}]   ;;  %s16057_s3 = inlined_call_operand.hbm [shape: bf16[9,128,128], index: 3, kind: input, shape index: {}]   ;;  %s16058_s4 = inlined_call_operand.vmem [shape: f32[1,128], index: 4, kind: input, shape index: {}]   ;;  %s16059_s5 = inlined_call_operand.vmem [shape: bf16[9,128,128], index: 5, kind: input, shape index: {}]   ;;  %s16060_s6 = inlined_call_operand.vmem [shape: f32[1,128], index: 6, kind: input, shape index: {}]   ;;  %s16061_s7 = inlined_call_operand.vmem [shape: bf16[128,8], index: 7, kind: input, shape index: {}]   ;;  %s16062_s8 = inlined_call_operand.hbm [shape: f32[1,8], index: 8, kind: input, shape index: {}]   ;;  %s16063_s9 = inlined_call_operand.vmem [shape: f32[128,8], index: 9, kind: output, shape index: {}]  }
   0x1   :  { %15 = vsyncpa [#allocation8], 0  ;;  %s13924_s30 = smov [#allocation7]   ;;  %s13925_s11 = smov [#allocation5]  }
   0x2   :  { %s37_s10 = sshll.u32 %s13924_s30, 4  ;;  %s23_s12 = sshll.u32 %s13925_s11, 4  ;;  %s38_s10 = int_to_ptr.vmem [resolvable:$true] %s37_s10  ;;  %s13980_s12 = int_to_ptr.vmem [resolvable:$true] %s23_s12 }
   0x3   :  { %s13854_s15 = scalar_lea.hbm %s16057_s3, 9216 }
   0x4   :  { %p13855_p0 = scmp.ne.s32.totalorder %s16057_s3, %s13854_s15  ;;  %p13858_p1 = scmp.lt.u32.totalorder %s13854_s15, %s16057_s3 }
   0x6   :  { %p13860_p2 = pnand %p13858_p1, %p13855_p0 }
   0x8   :  { %13863 = shalt.err (!%p13860_p2)
}
   0x9   :  { %s13864_s20 = scalar_lea.vmem %s38_s10, 9216  ;;  %p13869_p4 = scmp.lt.s32.totalorder %s38_s10, %s38_s10 }
   0xa   :  { %p13865_p3 = scmp.ne.s32.totalorder %s38_s10, %s13864_s20  ;;  %p13870_p5 = scmp.lt.s32.totalorder %s13864_s20, %s13864_s20 }
   0xc   :  { %p13871_p6 = por %p13870_p5, %p13869_p4 }
   0xe   :  { %p13872_p7 = pnand %p13871_p6, %p13865_p3 }
  0x10   :  { %13875 = shalt.err (!%p13872_p7)
}
  0x11   :  { %s13926_s21 = smov 64   ;;  %s13927_s22 = smov 4  }
  0x12   :  { %43 = dma.hbm_to_vmem [thread:$0]  %s16057_s3, 9216, %s38_s10, [#allocation8], %s13926_s21, %s13926_s21, %s13927_s22  }
  0x13   :  { %s13876_s27 = scalar_lea.hbm %s16055_s1, 2304 }
  0x14   :  { %p13877_p8 = scmp.ne.s32.totalorder %s16055_s1, %s13876_s27  ;;  %p13880_p9 = scmp.lt.u32.totalorder %s13876_s27, %s16055_s1 }
  0x16   :  { %p13882_p10 = pnand %p13880_p9, %p13877_p8 }
  0x18   :  { %13885 = shalt.err (!%p13882_p10)
}
  0x19   :  { %s13886_s13 = scalar_lea.vmem %s13980_s12, 2304  ;;  %p13891_p12 = scmp.lt.s32.totalorder %s13980_s12, %s13980_s12 }
  0x1a   :  { %p13887_p11 = scmp.ne.s32.totalorder %s13980_s12, %s13886_s13  ;;  %p13892_p13 = scmp.lt.s32.totalorder %s13886_s13, %s13886_s13 }
  0x1c   :  { %p13893_p0 = por %p13892_p13, %p13891_p12 }
  0x1e   :  { %p13894_p1 = pnand %p13893_p0, %p13887_p11 }
  0x20   :  { %13897 = shalt.err (!%p13894_p1)
}
  0x21   :  { %29 = dma.hbm_to_vmem [thread:$0]  %s16055_s1, 2304, %s13980_s12, [#allocation6], %s13926_s21, %s13926_s21, %s13927_s22  }
  0x22   :  { %s13928_s14 = smov [#allocation9]   ;;  %s13898_s18 = scalar_lea.hbm %s16062_s8, 16 }
  0x23   :  { %s58_s15 = sshll.u32 %s13928_s14, 4  ;;  %p13899_p2 = scmp.ne.s32.totalorder %s16062_s8, %s13898_s18  ;;  %s59_s15 = int_to_ptr.vmem [resolvable:$true] %s58_s15 }
  0x24   :  { %p13902_p3 = scmp.lt.u32.totalorder %s13898_s18, %s16062_s8 }
  0x26   :  { %p13904_p4 = pnand %p13902_p3, %p13899_p2 }
  0x28   :  { %13907 = shalt.err (!%p13904_p4)
}
  0x29   :  { %s13908_s25 = scalar_lea.vmem %s59_s15, 16  ;;  %s13912_s1 = scalar_lea.vmem %s59_s15, 32 }
  0x2a   :  { %p13909_p5 = scmp.ne.s32.totalorder %s59_s15, %s13908_s25  ;;  %p13913_p6 = scmp.lt.s32.totalorder %s59_s15, %s59_s15 }
  0x2b   :  { %p13914_p7 = scmp.lt.s32.totalorder %s13912_s1, %s13908_s25 }
  0x2d   :  { %p13915_p8 = por %p13914_p7, %p13913_p6 }
  0x2f   :  { %p13916_p9 = pnand %p13915_p8, %p13909_p5 }
  0x31   :  { %13919 = shalt.err (!%p13916_p9)
}
  0x32   :  { %61 = dma.hbm_to_vmem [thread:$0]  %s16062_s8, 16, %s59_s15, [#allocation8]  }
  0x33   :  { %13920 = dma.done.wait [#allocation6], 2304  }
  0x34   :  { %13921 = vsyncadd [#allocation6], 4294964992 }
  0x35   :  { %13922 = dma.done.wait [#allocation8], 9232  }
  0x36   :  { %13923 = vsyncadd [#allocation8], 4294958064  ;;  %v13612_v0 = vld [vmem:[#allocation5] sm:$0xff]   ;;  %vm314_vm0 = vsmask.f32 3328  ;;  %v13614_v2 = vld [vmem:[#allocation5 + $0x8] sm:$0xff]  }
  0x37   :  { %v13613_v1 = vld [vmem:[#allocation5 + $0x40] sm:$0xff]   ;;  %vm315_vm1 = vsmask.f32 7440  ;;  %12434 = vmatprep.subr.bf16.mxu1 %v13612_v0  ;;  %v13615_v3 = vld [vmem:[#allocation5 + $0x48] sm:$0xff]   ;;  %vm144_vm2 = vcmask 261120   ;;  %v14042_v20 = vld [vmem:[#allocation5 + $0x50] sm:$0xff]  }
  0x38   :  { %12435 = vmatpush3.bf16.msra.mxu1 %v13612_v0  ;;  %12514 = vmatprep.subr.bf16.mxu0 %v13613_v1  ;;  %v13616_v4 = vld [vmem:[%s16054_s0] ss:$8 sps:$4 sm:$0xff]   ;;  %v13617_v5 = vld [vmem:[%s16054_s0 + $0x10] ss:$8 sps:$4 sm:$0xff]   ;;  %v11187_v7 = vld [vmem:[%s16054_s0 + $0xc] sm:$0x1] }
  0x39   :  { %12515 = vmatpush3.bf16.msra.mxu0 %v13613_v1  ;;  %12436 = vmatprep.subr.bf16.mxu1 %v13614_v2  ;;  %v11186_v6 = vld [vmem:[%s16054_s0 + $0x8] sm:$0xf]  ;;  %v11188_v8 = vld [vmem:[%s16054_s0 + $0x10] sm:$0xf]  ;;  %v11189_v9 = vld [vmem:[%s16054_s0 + $0x14] sm:$0x1] }
  0x3a   :  { %12516 = vmatprep.subr.bf16.mxu0 %v13615_v3  ;;  %12438 = vmatprep.mubr.msk.bf16.mxu1 %vm144_vm2, %v13616_v4  ;;  %v1368_v10 = vshrl.u32 %v11186_v6, 16  ;;  %v1371_v11 = vshll.u32 %v11186_v6, 16  ;;  %v1377_v12 = vshll.u32 %v11187_v7, 16  ;;  %v1382_v13 = vshrl.u32 %v11188_v8, 16  ;;  %v11190_v23 = vld [vmem:[%s16054_s0 + $0x18] sm:$0xf]  ;;  %vm14060_vm3 = vmor %vm314_vm0, %vm315_vm1 }
  0x3b   :  { %v1385_v14 = vshll.u32 %v11188_v8, 16  ;;  %v1391_v15 = vshll.u32 %v11189_v9, 16  ;;  %v11191_v24 = vld [vmem:[%s16054_s0 + $0x1c] sm:$0x1]  ;;  %v11192_v26 = vld [vmem:[%s16054_s0 + $0x20] sm:$0xf] }
  0x3c   :  { %12437 = vmatpush3.bf16.msra.mxu1 %v13614_v2  ;;  %v1370_v16 = vrot.slane %v1368_v10, 4  ;;  %v1373_v17 = vrot.slane %v1371_v11, 5  ;;  %v1379_v18 = vrot.slane %v1377_v12, 5  ;;  %v1384_v19 = vrot.slane %v1382_v13, 4  ;;  %v11193_v27 = vld [vmem:[%s16054_s0 + $0x24] sm:$0x1] }
  0x3d   :  { %12517 = vmatpush3.bf16.msra.mxu0 %v13615_v3  ;;  %v1387_v21 = vrot.slane %v1385_v14, 5  ;;  %v1393_v22 = vrot.slane %v1391_v15, 5  ;;  %v1396_v28 = vshrl.u32 %v11190_v23, 16  ;;  %v1399_v29 = vshll.u32 %v11190_v23, 16  ;;  %v13626_v35 = vld [vmem:[#allocation5 + $0x10] sm:$0xff]   ;;  %v13627_v48 = vld [vmem:[#allocation5 + $0x18] sm:$0xff]  }
  0x3e   :  { %v1374_v25 = vor.u32 %v1373_v17, %v1370_v16  ;;  %12534 = vmatprep.subr.bf16.mxu0 %v14042_v20  ;;  %v1405_v32 = vshll.u32 %v11191_v24, 16  ;;  %v1410_v33 = vshrl.u32 %v11192_v26, 16  ;;  %v1413_v34 = vshll.u32 %v11192_v26, 16  ;;  %v13619_v44 = vld [vmem:[%s16054_s0 + $0x20] ss:$8 sps:$4 sm:$0xff]   ;;  %12454 = vmatprep.subr.bf16.mxu1 %v13626_v35  ;;  %v13623_v10 = vld [vmem:[#allocation5 + $0x58] sm:$0xff]  }
  0x3f   :  { %12439 = vmatmul.mubr.msk.bf16.vlgmr.msra.gmra.mrb[0].mxu1 %vm144_vm2, %v13617_v5  ;;  %v1388_v31 = vor.u32 %v1387_v21, %v1384_v19  ;;  %v1398_v37 = vrot.slane %v1396_v28, 4  ;;  %v1401_v38 = vrot.slane %v1399_v29, 5  ;;  %v1419_v39 = vshll.u32 %v11193_v27, 16  ;;  %v13620_v51 = vld [vmem:[%s16054_s0 + $0x30] ss:$8 sps:$4 sm:$0xff]   ;;  %v14105_v16 = vld [vmem:[#allocation5 + $0x20] sm:$0xff]  }
  0x40   :  { %v1375_v36 = vrot.slane %v1374_v25, 4  ;;  %v1407_v41 = vrot.slane %v1405_v32, 5  ;;  %v1412_v42 = vrot.slane %v1410_v33, 4  ;;  %v1415_v43 = vrot.slane %v1413_v34, 5  ;;  %12455 = vmatpush3.bf16.msra.mxu1 %v13626_v35  ;;  %12442 = vmatprep.mubr.msk.bf16.mxu1 %vm144_vm2, %v13619_v44  ;;  %v11194_v52 = vld [vmem:[%s16054_s0 + $0x28] sm:$0xf] }
  0x41   :  { %v1389_v40 = vrot.slane %v1388_v31, 4  ;;  %v1402_v46 = vor.u32 %v1401_v38, %v1398_v37  ;;  %v1421_v47 = vrot.slane %v1419_v39, 5  ;;  %v11195_v53 = vld [vmem:[%s16054_s0 + $0x2c] sm:$0x1]  ;;  %v11196_v56 = vld [vmem:[%s16054_s0 + $0x30] sm:$0xf]  ;;  %12456 = vmatprep.subr.bf16.mxu1 %v13627_v48 }
  0x42   :  { %v1380_v45 = vsel %vm14060_vm3, %v1375_v36, %v1379_v18  ;;  %v1416_v50 = vor.u32 %v1415_v43, %v1412_v42  ;;  %v11197_v57 = vld [vmem:[%s16054_s0 + $0x34] sm:$0x1]  ;;  %v1424_v58 = vshrl.u32 %v11194_v52, 16  ;;  %v1427_v60 = vshll.u32 %v11194_v52, 16  ;;  %v11198_v63 = vld [vmem:[%s16054_s0 + $0x38] sm:$0xf] }
  0x43   :  { %v1394_v49 = vsel %vm14060_vm3, %v1389_v40, %v1393_v22  ;;  %v1403_v55 = vrot.slane %v1402_v46, 4  ;;  %v1433_v61 = vshll.u32 %v11195_v53, 16  ;;  %v1438_v62 = vshrl.u32 %v11196_v56, 16  ;;  %v11199_v4 = vld [vmem:[%s16054_s0 + $0x3c] sm:$0x1]  ;;  %v14113_v31 = vld [vmem:[#allocation5 + $0x60] sm:$0xff]  }
  0x44   :  { %v11218_v54 = vcombine.low %v1380_v45, %v1394_v49  ;;  %v1417_v59 = vrot.slane %v1416_v50, 4  ;;  %v1426_v1 = vrot.slane %v1424_v58, 4  ;;  %v1441_v2 = vshll.u32 %v11196_v56, 16  ;;  %12457 = vmatpush3.bf16.msra.mxu1 %v13627_v48  ;;  %v11200_v9 = vld [vmem:[%s16054_s0 + $0x40] sm:$0xf] }
  0x45   :  { %v1408_v0 = vsel %vm14060_vm3, %v1403_v55, %v1407_v41  ;;  %v1447_v3 = vshll.u32 %v11197_v57, 16  ;;  %v1429_v6 = vrot.slane %v1427_v60, 5  ;;  %v1435_v7 = vrot.slane %v1433_v61, 5  ;;  %v11201_v14 = vld [vmem:[%s16054_s0 + $0x44] sm:$0x1]  ;;  %12474 = vmatprep.subr.bf16.mxu1 %v14105_v16 }
  0x46   :  { %12518 = vmatprep.mubr.msk.bf16.mxu0 %vm144_vm2, %v11218_v54  ;;  %v1422_v5 = vsel %vm14060_vm3, %v1417_v59, %v1421_v47  ;;  %v1440_v8 = vrot.slane %v1438_v62, 4  ;;  %v1443_v12 = vrot.slane %v1441_v2, 5  ;;  %v1452_v15 = vshrl.u32 %v11198_v63, 16  ;;  %v13621_v29 = vld [vmem:[%s16054_s0 + $0x50] ss:$8 sps:$4 sm:$0xff]  }
  0x47   :  { %12443 = vmatmul.mubr.msk.bf16.gmra.mrb[4].mxu1 %vm144_vm2, %v13620_v51  ;;  %v11219_v11 = vcombine.low %v1408_v0, %v1422_v5  ;;  %v1449_v13 = vrot.slane %v1447_v3, 5  ;;  %v1430_v17 = vor.u32 %v1429_v6, %v1426_v1  ;;  %v1455_v18 = vshll.u32 %v11198_v63, 16  ;;  %v11202_v38 = vld [vmem:[%s16054_s0 + $0x58] sm:$0xf]  ;;  %v11203_v41 = vld [vmem:[%s16054_s0 + $0x5c] sm:$0x1] }
  0x48   :  { %v1461_v19 = vshll.u32 %v11199_v4, 16  ;;  %v1466_v21 = vshrl.u32 %v11200_v9, 16  ;;  %v1444_v22 = vor.u32 %v1443_v12, %v1440_v8  ;;  %v1454_v23 = vrot.slane %v1452_v15, 4  ;;  %12446 = vmatprep.mubr.msk.bf16.mxu1 %vm144_vm2, %v13621_v29  ;;  %v11204_v42 = vld [vmem:[%s16054_s0 + $0x60] sm:$0xf] }
  0x49   :  { %12519 = vmatmul.mubr.msk.bf16.vlgmr.msra.gmra.mrb[0].mxu0 %vm144_vm2, %v11219_v11  ;;  %v1469_v24 = vshll.u32 %v11200_v9, 16  ;;  %v1475_v25 = vshll.u32 %v11201_v14, 16  ;;  %v1431_v26 = vrot.slane %v1430_v17, 4  ;;  %v1457_v27 = vrot.slane %v1455_v18, 5  ;;  %v11205_v43 = vld [vmem:[%s16054_s0 + $0x64] sm:$0x1] }
  0x4a   :  { %12535 = vmatpush3.bf16.msra.mxu0 %v14042_v20  ;;  %v1468_v28 = vrot.slane %v1466_v21, 4  ;;  %v1445_v32 = vrot.slane %v1444_v22, 4  ;;  %v1463_v33 = vrot.slane %v1461_v19, 5  ;;  %v13622_v20 = vld [vmem:[%s16054_s0 + $0x60] ss:$8 sps:$4 sm:$0xff]   ;;  %v1480_v46 = vshrl.u32 %v11202_v38, 16 }
  0x4b   :  { %v1471_v34 = vrot.slane %v1469_v24, 5  ;;  %v1477_v35 = vrot.slane %v1475_v25, 5  ;;  %12536 = vmatprep.subr.bf16.mxu0 %v13623_v10  ;;  %v1436_v36 = vsel %vm14060_vm3, %v1431_v26, %v1435_v7  ;;  %v1458_v37 = vor.u32 %v1457_v27, %v1454_v23  ;;  %v11206_v56 = vld [vmem:[%s16054_s0 + $0x68] sm:$0xf]  ;;  %v11207_v61 = vld [vmem:[%s16054_s0 + $0x6c] sm:$0x1] }
  0x4c   :  { %v1450_v39 = vsel %vm14060_vm3, %v1445_v32, %v1449_v13  ;;  %v1483_v47 = vshll.u32 %v11202_v38, 16  ;;  %v1489_v49 = vshll.u32 %v11203_v41, 16  ;;  %v1494_v50 = vshrl.u32 %v11204_v42, 16  ;;  %v11208_v1 = vld [vmem:[%s16054_s0 + $0x70] sm:$0xf] }
  0x4d   :  { %v1472_v40 = vor.u32 %v1471_v34, %v1468_v28  ;;  %v11220_v44 = vcombine.low %v1436_v36, %v1450_v39  ;;  %v1459_v45 = vrot.slane %v1458_v37, 4  ;;  %v1497_v51 = vshll.u32 %v11204_v42, 16  ;;  %v11209_v2 = vld [vmem:[%s16054_s0 + $0x74] sm:$0x1]  ;;  %v13624_v17 = vld [vmem:[%s16054_s0 + $0x70] ss:$8 sps:$4 sm:$0xff]  }
  0x4e   :  { %12537 = vmatpush3.bf16.msra.mxu0 %v13623_v10  ;;  %v1482_v53 = vrot.slane %v1480_v46, 4  ;;  %v1485_v54 = vrot.slane %v1483_v47, 5  ;;  %v1503_v55 = vshll.u32 %v11205_v43, 16  ;;  %v1491_v58 = vrot.slane %v1489_v49, 5  ;;  %v13625_v24 = vld [vmem:[%s16054_s0 + $0x80] ss:$8 sps:$4 sm:$0xff]  }
  0x4f   :  { %12447 = vmatmul.mubr.msk.bf16.gmra.mrb[8].mxu1 %vm144_vm2, %v13622_v20  ;;  %v1473_v48 = vrot.slane %v1472_v40, 4  ;;  %12554 = vmatprep.subr.bf16.mxu0 %v14113_v31  ;;  %v1464_v52 = vsel %vm14060_vm3, %v1459_v45, %v1463_v33  ;;  %v1496_v59 = vrot.slane %v1494_v50, 4  ;;  %v1499_v60 = vrot.slane %v1497_v51, 5  ;;  %v11210_v27 = vld [vmem:[%s16054_s0 + $0x78] sm:$0xf] }
  0x50   :  { %12522 = vmatprep.mubr.msk.bf16.mxu0 %vm144_vm2, %v11220_v44  ;;  %v1486_v63 = vor.u32 %v1485_v54, %v1482_v53  ;;  %v1505_v0 = vrot.slane %v1503_v55, 5  ;;  %v1508_v3 = vshrl.u32 %v11206_v56, 16  ;;  %v1511_v5 = vshll.u32 %v11206_v56, 16  ;;  %12450 = vmatprep.mubr.msk.bf16.mxu1 %vm144_vm2, %v13624_v17  ;;  %v11211_v28 = vld [vmem:[%s16054_s0 + $0x7c] sm:$0x1] }
  0x51   :  { %v1478_v57 = vsel %vm14060_vm3, %v1473_v48, %v1477_v35  ;;  %v1500_v4 = vor.u32 %v1499_v60, %v1496_v59  ;;  %v1517_v6 = vshll.u32 %v11207_v61, 16  ;;  %v1522_v7 = vshrl.u32 %v11208_v1, 16  ;;  %v11212_v29 = vld [vmem:[%s16054_s0 + $0x80] sm:$0xf]  ;;  %v11213_v33 = vld [vmem:[%s16054_s0 + $0x84] sm:$0x1] }
  0x52   :  { %v11221_v62 = vcombine.low %v1464_v52, %v1478_v57  ;;  %v1487_v8 = vrot.slane %v1486_v63, 4  ;;  %v1510_v9 = vrot.slane %v1508_v3, 4  ;;  %v1525_v10 = vshll.u32 %v11208_v1, 16  ;;  %v11214_v40 = vld [vmem:[%s16054_s0 + $0x88] sm:$0xf] }
  0x53   :  { %v1531_v11 = vshll.u32 %v11209_v2, 16  ;;  %v1501_v12 = vrot.slane %v1500_v4, 4  ;;  %v1513_v13 = vrot.slane %v1511_v5, 5  ;;  %v1519_v14 = vrot.slane %v1517_v6, 5  ;;  %v11215_v45 = vld [vmem:[%s16054_s0 + $0x8c] sm:$0x1] }
  0x54   :  { %12523 = vmatmul.mubr.msk.bf16.gmra.mrb[4].mxu0 %vm144_vm2, %v11221_v62  ;;  %v1524_v15 = vrot.slane %v1522_v7, 4  ;;  %v1492_v18 = vsel %vm14060_vm3, %v1487_v8, %v1491_v58  ;;  %v1527_v19 = vrot.slane %v1525_v10, 5  ;;  %v1536_v34 = vshrl.u32 %v11210_v27, 16  ;;  %v11216_v50 = vld [vmem:[%s16054_s0 + $0x90] sm:$0xf] }
  0x55   :  { %v1533_v21 = vrot.slane %v1531_v11, 5  ;;  %v1506_v22 = vsel %vm14060_vm3, %v1501_v12, %v1505_v0  ;;  %v1514_v23 = vor.u32 %v1513_v13, %v1510_v9  ;;  %v1539_v35 = vshll.u32 %v11210_v27, 16  ;;  %v11217_v53 = vld [vmem:[%s16054_s0 + $0x94] sm:$0x1]  ;;  %v282_v0 = vld [vmem:[%s16054_s0] sm:$0xf] }
  0x56   :  { %v11222_v25 = vcombine.low %v1492_v18, %v1506_v22  ;;  %v1528_v26 = vor.u32 %v1527_v19, %v1524_v15  ;;  %v1545_v36 = vshll.u32 %v11211_v28, 16  ;;  %v1550_v20 = vshrl.u32 %v11212_v29, 16  ;;  %v283_v5 = vld [vmem:[%s16054_s0 + $0x4] sm:$0x1]  ;;  %v284_v9 = vld [vmem:[%s16054_s0 + $0x8] sm:$0xf] }
  0x57   :  { %v1515_v32 = vrot.slane %v1514_v23, 4  ;;  %12451 = vmatmul.mubr.msk.bf16.gmra.mrb[12].mxu1 %vm144_vm2, %v13625_v24  ;;  %v1553_v38 = vshll.u32 %v11212_v29, 16  ;;  %v1559_v39 = vshll.u32 %v11213_v33, 16  ;;  %v1538_v42 = vrot.slane %v1536_v34, 4  ;;  %v285_v10 = vld [vmem:[%s16054_s0 + $0xc] sm:$0x1] }
  0x58   :  { %12526 = vmatprep.mubr.msk.bf16.mxu0 %vm144_vm2, %v11222_v25  ;;  %v1529_v37 = vrot.slane %v1528_v26, 4  ;;  %v1541_v43 = vrot.slane %v1539_v35, 5  ;;  %v1547_v44 = vrot.slane %v1545_v36, 5  ;;  %v1552_v47 = vrot.slane %v1550_v20, 4  ;;  %v286_v17 = vld [vmem:[%s16054_s0 + $0x10] sm:$0xf] }
  0x59   :  { %v1520_v41 = vsel %vm14060_vm3, %v1515_v32, %v1519_v14  ;;  %v1555_v48 = vrot.slane %v1553_v38, 5  ;;  %v1561_v49 = vrot.slane %v1559_v39, 5  ;;  %v1564_v54 = vshrl.u32 %v11214_v40, 16  ;;  %v287_v18 = vld [vmem:[%s16054_s0 + $0x14] sm:$0x1] }
  0x5a   :  { %v1534_v46 = vsel %vm14060_vm3, %v1529_v37, %v1533_v21  ;;  %v1542_v52 = vor.u32 %v1541_v43, %v1538_v42  ;;  %v1567_v55 = vshll.u32 %v11214_v40, 16  ;;  %v1573_v57 = vshll.u32 %v11215_v45, 16  ;;  %v288_v24 = vld [vmem:[%s16054_s0 + $0x18] sm:$0xf]  ;;  %v289_v29 = vld [vmem:[%s16054_s0 + $0x1c] sm:$0x1] }
  0x5b   :  { %v11223_v51 = vcombine.low %v1520_v41, %v1534_v46  ;;  %v1556_v56 = vor.u32 %v1555_v48, %v1552_v47  ;;  %v1578_v58 = vshrl.u32 %v11216_v50, 16  ;;  %v1581_v59 = vshll.u32 %v11216_v50, 16  ;;  %v11236_v36 = vld [vmem:[%s16054_s0 + $0x8] sm:$0xe]  ;;  %v11237_v40 = vld [vmem:[%s16054_s0 + $0xc] sm:$0x1] }
  0x5c   :  { %v1543_v60 = vrot.slane %v1542_v52, 4  ;;  %v1566_v61 = vrot.slane %v1564_v54, 4  ;;  %v1569_v62 = vrot.slane %v1567_v55, 5  ;;  %v1587_v63 = vshll.u32 %v11217_v53, 16  ;;  %v11238_v41 = vld [vmem:[%s16054_s0 + $0x10] sm:$0xe] }
  0x5d   :  { %12527 = vmatmul.mubr.msk.bf16.gmra.mrb[8].mxu0 %vm144_vm2, %v11223_v51  ;;  %vm815_vm4 = vcmask 1042432   ;;  %vm816_vm5 = vcmask 1046532   ;;  %v1557_v1 = vrot.slane %v1556_v56, 4  ;;  %v1575_v2 = vrot.slane %v1573_v57, 5  ;;  %v11239_v46 = vld [vmem:[%s16054_s0 + $0x14] sm:$0x1] }
  0x5e   :  { %v1580_v3 = vrot.slane %v1578_v58, 4  ;;  %v1583_v4 = vrot.slane %v1581_v59, 5  ;;  %v1548_v6 = vsel %vm14060_vm3, %v1543_v60, %v1547_v44  ;;  %v1570_v7 = vor.u32 %v1569_v62, %v1566_v61  ;;  %vm14247_vm6 = vmor %vm815_vm4, %vm816_vm5  ;;  %v11240_v60 = vld [vmem:[%s16054_s0 + $0x18] sm:$0xe]  ;;  %v11241_v61 = vld [vmem:[%s16054_s0 + $0x1c] sm:$0x1] }
  0x5f   :  { %v1589_v8 = vrot.slane %v1587_v63, 5  ;;  %v318_v11 = vshrl.u32 %v282_v0, 16  ;;  %v1562_v12 = vsel %vm14060_vm3, %v1557_v1, %v1561_v49  ;;  %v321_v14 = vshll.u32 %v282_v0, 16 }
  0x60   :  { %v1584_v13 = vor.u32 %v1583_v4, %v1580_v3  ;;  %v327_v15 = vshll.u32 %v283_v5, 16  ;;  %v11224_v19 = vcombine.low %v1548_v6, %v1562_v12  ;;  %v1571_v21 = vrot.slane %v1570_v7, 4  ;;  %v11243_v6 = vld [vmem:[%s16054_s0 + $0x24] sm:$0x1]  ;;  %v290_v12 = vld [vmem:[%s16054_s0 + $0x20] sm:$0xf] }
  0x61   :  { %v320_v22 = vrot.slane %v318_v11, 4  ;;  %v332_v23 = vshrl.u32 %v284_v9, 16  ;;  %v323_v26 = vrot.slane %v321_v14, 5  ;;  %v335_v28 = vshll.u32 %v284_v9, 16 }
  0x62   :  { %v1585_v25 = vrot.slane %v1584_v13, 4  ;;  %v329_v27 = vrot.slane %v327_v15, 5  ;;  %12530 = vmatprep.mubr.msk.bf16.mxu0 %vm144_vm2, %v11224_v19  ;;  %v1576_v32 = vsel %vm14060_vm3, %v1571_v21, %v1575_v2  ;;  %v341_v34 = vshll.u32 %v285_v10, 16  ;;  %v11242_v2 = vld [vmem:[%s16054_s0 + $0x20] sm:$0xe] }
  0x63   :  { %v334_v33 = vrot.slane %v332_v23, 4  ;;  %v346_v35 = vshrl.u32 %v286_v17, 16  ;;  %v324_v20 = vor.u32 %v323_v26, %v320_v22  ;;  %v337_v38 = vrot.slane %v335_v28, 5  ;;  %v291_v13 = vld [vmem:[%s16054_s0 + $0x24] sm:$0x1] }
  0x64   :  { %v1590_v37 = vsel %vm14060_vm3, %v1585_v25, %v1589_v8  ;;  %v349_v39 = vshll.u32 %v286_v17, 16  ;;  %v343_v43 = vrot.slane %v341_v34, 5  ;;  %v355_v45 = vshll.u32 %v287_v18, 16  ;;  %v292_v19 = vld [vmem:[%s16054_s0 + $0x28] sm:$0xf] }
  0x65   :  { %v11225_v42 = vcombine.low %v1576_v32, %v1590_v37  ;;  %v348_v44 = vrot.slane %v346_v35, 4  ;;  %v325_v47 = vrot.slane %v324_v20, 4  ;;  %v338_v48 = vor.u32 %v337_v38, %v334_v33  ;;  %v294_v32 = vld [vmem:[%s16054_s0 + $0x30] sm:$0xf]  ;;  %v13629_v33 = vld [vmem:[#allocation5 + $0x68] sm:$0xff]  }
  0x66   :  { %v351_v49 = vrot.slane %v349_v39, 5  ;;  %v360_v50 = vshrl.u32 %v288_v24, 16  ;;  %v357_v51 = vrot.slane %v355_v45, 5  ;;  %v363_v52 = vshll.u32 %v288_v24, 16  ;;  %v293_v24 = vld [vmem:[%s16054_s0 + $0x2c] sm:$0x1] }
  0x67   :  { %12531 = vmatmul.mubr.msk.bf16.gmra.mrb[12].mxu0 %vm144_vm2, %v11225_v42  ;;  %v369_v53 = vshll.u32 %v289_v29, 16  ;;  %v11268_v54 = vrot.slane %v11236_v36, 9  ;;  %v330_v55 = vsel %vm14060_vm3, %v325_v47, %v329_v27  ;;  %v339_v56 = vrot.slane %v338_v48, 4  ;;  %v295_v20 = vld [vmem:[%s16054_s0 + $0x34] sm:$0x1]  ;;  %v13631_v45 = vld [vmem:[#allocation5 + $0x28] sm:$0xff]  }
  0x68   :  { %v352_v57 = vor.u32 %v351_v49, %v348_v44  ;;  %v362_v58 = vrot.slane %v360_v50, 4  ;;  %v365_v62 = vrot.slane %v363_v52, 5  ;;  %v1867_v0 = vrot.slane %v11237_v40, 5  ;;  %v296_v38 = vld [vmem:[%s16054_s0 + $0x38] sm:$0xf] }
  0x69   :  { %v371_v63 = vrot.slane %v369_v53, 5  ;;  %v11269_v1 = vrot.slane %v11238_v41, 9  ;;  %v344_v3 = vsel %vm14060_vm3, %v339_v56, %v343_v43  ;;  %v1871_v5 = vrot.slane %v11239_v46, 5  ;;  %v297_v43 = vld [vmem:[%s16054_s0 + $0x3c] sm:$0x1]  ;;  %v14315_v56 = vld [vmem:[#allocation5 + $0x70] sm:$0xff]  }
  0x6a   :  { %v353_v4 = vrot.slane %v352_v57, 4  ;;  %v11270_v7 = vrot.slane %v11240_v60, 9  ;;  %v11100_v8 = vcombine.low %v330_v55, %v344_v3  ;;  %v366_v9 = vor.u32 %v365_v62, %v362_v58  ;;  %v11244_v44 = vld [vmem:[%s16054_s0 + $0x28] sm:$0xe]  ;;  %v11245_v50 = vld [vmem:[%s16054_s0 + $0x2c] sm:$0x1] }
  0x6b   :  { %v1868_v10 = vsel %vm14247_vm6, %v11268_v54, %v1867_v0  ;;  %v1875_v11 = vrot.slane %v11241_v61, 5  ;;  %v1872_v15 = vsel %vm14247_vm6, %v11269_v1, %v1871_v5  ;;  %v11271_v17 = vrot.slane %v11242_v2, 9  ;;  %v11246_v55 = vld [vmem:[%s16054_s0 + $0x30] sm:$0xe]  ;;  %v11247_v62 = vld [vmem:[%s16054_s0 + $0x34] sm:$0x1] }
  0x6c   :  { %v358_v14 = vsel %vm14060_vm3, %v353_v4, %v357_v51  ;;  %v1879_v18 = vrot.slane %v11243_v6, 5  ;;  %12458 = vmatprep.mubr.msk.bf16.mxu1 %vm144_vm2, %v11100_v8  ;;  %v367_v21 = vrot.slane %v366_v9, 4  ;;  %v11284_v22 = vcombine.low %v1868_v10, %v1872_v15  ;;  %v11248_v3 = vld [vmem:[%s16054_s0 + $0x38] sm:$0xe]  ;;  %v11249_v8 = vld [vmem:[%s16054_s0 + $0x3c] sm:$0x1] }
  0x6d   :  { %v1876_v23 = vsel %vm14247_vm6, %v11270_v7, %v1875_v11  ;;  %v374_v25 = vshrl.u32 %v290_v12, 16  ;;  %v377_v27 = vshll.u32 %v290_v12, 16  ;;  %v383_v28 = vshll.u32 %v291_v13, 16  ;;  %v11250_v12 = vld [vmem:[%s16054_s0 + $0x40] sm:$0xe] }
  0x6e   :  { %v1880_v26 = vsel %vm14247_vm6, %v11271_v17, %v1879_v18  ;;  %v388_v29 = vshrl.u32 %v292_v19, 16  ;;  %v372_v34 = vsel %vm14060_vm3, %v367_v21, %v371_v63  ;;  %12538 = vmatprep.mubr.msk.bf16.mxu0 %vm144_vm2, %v11284_v22  ;;  %v391_v37 = vshll.u32 %v292_v19, 16  ;;  %v11251_v13 = vld [vmem:[%s16054_s0 + $0x44] sm:$0x1]  ;;  %v298_v19 = vld [vmem:[%s16054_s0 + $0x50] sm:$0xf] }
  0x6f   :  { %v11285_v35 = vcombine.low %v1876_v23, %v1880_v26  ;;  %v376_v36 = vrot.slane %v374_v25, 4  ;;  %v11101_v39 = vcombine.low %v358_v14, %v372_v34  ;;  %v379_v40 = vrot.slane %v377_v27, 5  ;;  %v299_v25 = vld [vmem:[%s16054_s0 + $0x54] sm:$0x1] }
  0x70   :  { %v385_v41 = vrot.slane %v383_v28, 5  ;;  %v390_v42 = vrot.slane %v388_v29, 4  ;;  %v393_v46 = vrot.slane %v391_v37, 5  ;;  %v397_v47 = vshll.u32 %v293_v24, 16 }
  0x71   :  { %12539 = vmatmul.mubr.msk.bf16.vlgmr.msra.gmra.mrb[0].mxu0 %vm144_vm2, %v11285_v35  ;;  %v402_v48 = vshrl.u32 %v294_v32, 16  ;;  %v405_v49 = vshll.u32 %v294_v32, 16  ;;  %12459 = vmatmul.mubr.msk.bf16.vlgmr.msra.gmra.mrb[0].mxu1 %vm144_vm2, %v11101_v39  ;;  %v380_v51 = vor.u32 %v379_v40, %v376_v36  ;;  %v411_v52 = vshll.u32 %v295_v20, 16  ;;  %v300_v32 = vld [vmem:[%s16054_s0 + $0x58] sm:$0xf] }
  0x72   :  { %12555 = vmatpush3.bf16.msra.mxu0 %v14113_v31  ;;  %v416_v53 = vshrl.u32 %v296_v38, 16  ;;  %v419_v54 = vshll.u32 %v296_v38, 16  ;;  %v394_v57 = vor.u32 %v393_v46, %v390_v42  ;;  %v399_v58 = vrot.slane %v397_v47, 5  ;;  %12475 = vmatpush3.bf16.msra.mxu1 %v14105_v16  ;;  %v14321_v31 = vld [vmem:[#allocation5 + $0x30] sm:$0xff]   ;;  %v301_v36 = vld [vmem:[%s16054_s0 + $0x5c] sm:$0x1] }
  0x73   :  { %v404_v60 = vrot.slane %v402_v48, 4  ;;  %v407_v61 = vrot.slane %v405_v49, 5  ;;  %12556 = vmatprep.subr.bf16.mxu0 %v13629_v33  ;;  %v381_v63 = vrot.slane %v380_v51, 4  ;;  %v413_v0 = vrot.slane %v411_v52, 5  ;;  %12476 = vmatprep.subr.bf16.mxu1 %v13631_v45  ;;  %v302_v20 = vld [vmem:[%s16054_s0 + $0x60] sm:$0xf] }
  0x74   :  { %v418_v1 = vrot.slane %v416_v53, 4  ;;  %v421_v2 = vrot.slane %v419_v54, 5  ;;  %v395_v4 = vrot.slane %v394_v57, 4  ;;  %v425_v6 = vshll.u32 %v297_v43, 16  ;;  %v303_v42 = vld [vmem:[%s16054_s0 + $0x64] sm:$0x1] }
  0x75   :  { %v408_v5 = vor.u32 %v407_v61, %v404_v60  ;;  %v11272_v7 = vrot.slane %v11244_v44, 9  ;;  %v386_v16 = vsel %vm14060_vm3, %v381_v63, %v385_v41  ;;  %v1883_v10 = vrot.slane %v11245_v50, 5  ;;  %v304_v43 = vld [vmem:[%s16054_s0 + $0x68] sm:$0xf]  ;;  %v305_v48 = vld [vmem:[%s16054_s0 + $0x6c] sm:$0x1] }
  0x76   :  { %v422_v9 = vor.u32 %v421_v2, %v418_v1  ;;  %v11273_v11 = vrot.slane %v11246_v55, 9  ;;  %12557 = vmatpush3.bf16.msra.mxu0 %v13629_v33  ;;  %v400_v14 = vsel %vm14060_vm3, %v395_v4, %v399_v58  ;;  %v427_v17 = vrot.slane %v425_v6, 5  ;;  %12477 = vmatpush3.bf16.msra.mxu1 %v13631_v45  ;;  %v11252_v53 = vld [vmem:[%s16054_s0 + $0x58] sm:$0xe]  ;;  %v11253_v60 = vld [vmem:[%s16054_s0 + $0x5c] sm:$0x1] }
  0x77   :  { %v409_v15 = vrot.slane %v408_v5, 4  ;;  %v1887_v18 = vrot.slane %v11247_v62, 5  ;;  %12574 = vmatprep.subr.bf16.mxu0 %v14315_v56  ;;  %v11102_v21 = vcombine.low %v386_v16, %v400_v14  ;;  %v1884_v23 = vsel %vm14247_vm6, %v11272_v7, %v1883_v10  ;;  %12494 = vmatprep.subr.bf16.mxu1 %v14321_v31  ;;  %v11254_v61 = vld [vmem:[%s16054_s0 + $0x60] sm:$0xe]  ;;  %v11255_v6 = vld [vmem:[%s16054_s0 + $0x64] sm:$0x1] }
  0x78   :  { %v423_v22 = vrot.slane %v422_v9, 4  ;;  %v11274_v24 = vrot.slane %v11248_v3, 9  ;;  %v1891_v28 = vrot.slane %v11249_v8, 5  ;;  %v11275_v29 = vrot.slane %v11250_v12, 9  ;;  %v11256_v10 = vld [vmem:[%s16054_s0 + $0x68] sm:$0xe] }
  0x79   :  { %v414_v26 = vsel %vm14060_vm3, %v409_v15, %v413_v0  ;;  %v1888_v27 = vsel %vm14247_vm6, %v11273_v11, %v1887_v18  ;;  %12462 = vmatprep.mubr.msk.bf16.mxu1 %vm144_vm2, %v11102_v21  ;;  %v1895_v35 = vrot.slane %v11251_v13, 5  ;;  %v430_v37 = vshrl.u32 %v298_v19, 16  ;;  %v11257_v15 = vld [vmem:[%s16054_s0 + $0x6c] sm:$0x1] }
  0x7a   :  { %v428_v33 = vsel %vm14060_vm3, %v423_v22, %v427_v17  ;;  %v11286_v34 = vcombine.low %v1884_v23, %v1888_v27  ;;  %v1892_v39 = vsel %vm14247_vm6, %v11274_v24, %v1891_v28  ;;  %v433_v40 = vshll.u32 %v298_v19, 16  ;;  %v11258_v22 = vld [vmem:[%s16054_s0 + $0x70] sm:$0xe]  ;;  %v11259_v27 = vld [vmem:[%s16054_s0 + $0x74] sm:$0x1] }
  0x7b   :  { %v11103_v38 = vcombine.low %v414_v26, %v428_v33  ;;  %v439_v41 = vshll.u32 %v299_v25, 16  ;;  %v1896_v44 = vsel %vm14247_vm6, %v11275_v29, %v1895_v35  ;;  %v432_v45 = vrot.slane %v430_v37, 4  ;;  %v306_v28 = vld [vmem:[%s16054_s0 + $0x70] sm:$0xf]  ;;  %v307_v35 = vld [vmem:[%s16054_s0 + $0x74] sm:$0x1] }
  0x7c   :  { %12542 = vmatprep.mubr.msk.bf16.mxu0 %vm144_vm2, %v11286_v34  ;;  %v444_v46 = vshrl.u32 %v300_v32, 16  ;;  %v447_v47 = vshll.u32 %v300_v32, 16  ;;  %v11287_v49 = vcombine.low %v1892_v39, %v1896_v44  ;;  %v435_v50 = vrot.slane %v433_v40, 5  ;;  %v309_v40 = vld [vmem:[%s16054_s0 + $0x7c] sm:$0x1] }
  0x7d   :  { %12463 = vmatmul.mubr.msk.bf16.gmra.mrb[4].mxu1 %vm144_vm2, %v11103_v38  ;;  %v441_v51 = vrot.slane %v439_v41, 5  ;;  %v453_v52 = vshll.u32 %v301_v36, 16  ;;  %v458_v57 = vshrl.u32 %v302_v20, 16  ;;  %v461_v58 = vshll.u32 %v302_v20, 16  ;;  %v308_v36 = vld [vmem:[%s16054_s0 + $0x78] sm:$0xf] }
  0x7e   :  { %v446_v54 = vrot.slane %v444_v46, 4  ;;  %v449_v55 = vrot.slane %v447_v47, 5  ;;  %12543 = vmatmul.mubr.msk.bf16.gmra.mrb[4].mxu0 %vm144_vm2, %v11287_v49  ;;  %v436_v62 = vor.u32 %v435_v50, %v432_v45  ;;  %v467_v0 = vshll.u32 %v303_v42, 16  ;;  %v310_v45 = vld [vmem:[%s16054_s0 + $0x80] sm:$0xf] }
  0x7f   :  { %v455_v63 = vrot.slane %v453_v52, 5  ;;  %v472_v1 = vshrl.u32 %v304_v43, 16  ;;  %v460_v3 = vrot.slane %v458_v57, 4  ;;  %v463_v4 = vrot.slane %v461_v58, 5  ;;  %v311_v46 = vld [vmem:[%s16054_s0 + $0x84] sm:$0x1] }
  0x80   :  { %v450_v2 = vor.u32 %v449_v55, %v446_v54  ;;  %v475_v5 = vshll.u32 %v304_v43, 16  ;;  %v437_v7 = vrot.slane %v436_v62, 4  ;;  %v469_v8 = vrot.slane %v467_v0, 5  ;;  %v312_v55 = vld [vmem:[%s16054_s0 + $0x88] sm:$0xf] }
  0x81   :  { %v474_v16 = vrot.slane %v472_v1, 4  ;;  %v481_v9 = vshll.u32 %v305_v48, 16  ;;  %v464_v12 = vor.u32 %v463_v4, %v460_v3  ;;  %v11276_v14 = vrot.slane %v11252_v53, 9  ;;  %v313_v62 = vld [vmem:[%s16054_s0 + $0x8c] sm:$0x1] }
  0x82   :  { %v451_v11 = vrot.slane %v450_v2, 4  ;;  %v477_v13 = vrot.slane %v475_v5, 5  ;;  %v442_v17 = vsel %vm14060_vm3, %v437_v7, %v441_v51  ;;  %v1899_v19 = vrot.slane %v11253_v60, 5  ;;  %v11261_v4 = vld [vmem:[%s16054_s0 + $0x7c] sm:$0x1] }
  0x83   :  { %v483_v18 = vrot.slane %v481_v9, 5  ;;  %v11277_v21 = vrot.slane %v11254_v61, 9  ;;  %v465_v24 = vrot.slane %v464_v12, 4  ;;  %v1903_v26 = vrot.slane %v11255_v6, 5  ;;  %v11262_v5 = vld [vmem:[%s16054_s0 + $0x80] sm:$0xe] }
  0x84   :  { %v456_v23 = vsel %vm14060_vm3, %v451_v11, %v455_v63  ;;  %v478_v25 = vor.u32 %v477_v13, %v474_v16  ;;  %v1900_v32 = vsel %vm14247_vm6, %v11276_v14, %v1899_v19  ;;  %v11278_v33 = vrot.slane %v11256_v10, 9  ;;  %v11260_v63 = vld [vmem:[%s16054_s0 + $0x78] sm:$0xe]  ;;  %v11263_v9 = vld [vmem:[%s16054_s0 + $0x84] sm:$0x1] }
  0x85   :  { %v11104_v29 = vcombine.low %v442_v17, %v456_v23  ;;  %v1907_v34 = vrot.slane %v11257_v15, 5  ;;  %v470_v37 = vsel %vm14060_vm3, %v465_v24, %v469_v8  ;;  %v1904_v38 = vsel %vm14247_vm6, %v11277_v21, %v1903_v26  ;;  %v11264_v14 = vld [vmem:[%s16054_s0 + $0x88] sm:$0xe]  ;;  %v11265_v21 = vld [vmem:[%s16054_s0 + $0x8c] sm:$0x1] }
  0x86   :  { %v479_v20 = vrot.slane %v478_v25, 4  ;;  %v11279_v39 = vrot.slane %v11258_v22, 9  ;;  %v11288_v41 = vcombine.low %v1900_v32, %v1904_v38  ;;  %v1911_v43 = vrot.slane %v11259_v27, 5  ;;  %v11266_v26 = vld [vmem:[%s16054_s0 + $0x90] sm:$0xe] }
  0x87   :  { %12466 = vmatprep.mubr.msk.bf16.mxu1 %vm144_vm2, %v11104_v29  ;;  %v1908_v42 = vsel %vm14247_vm6, %v11278_v33, %v1907_v34  ;;  %v486_v44 = vshrl.u32 %v306_v28, 16  ;;  %v489_v48 = vshll.u32 %v306_v28, 16  ;;  %v495_v49 = vshll.u32 %v307_v35, 16  ;;  %v11267_v33 = vld [vmem:[%s16054_s0 + $0x94] sm:$0x1] }
  0x88   :  { %v484_v47 = vsel %vm14060_vm3, %v479_v20, %v483_v18  ;;  %v500_v50 = vshrl.u32 %v308_v36, 16  ;;  %12546 = vmatprep.mubr.msk.bf16.mxu0 %vm144_vm2, %v11288_v41  ;;  %v1912_v52 = vsel %vm14247_vm6, %v11279_v39, %v1911_v43  ;;  %v503_v54 = vshll.u32 %v308_v36, 16  ;;  %v751_v41 = vld [vmem:[%s16054_s0] sm:$0xe] }
  0x89   :  { %v11105_v51 = vcombine.low %v470_v37, %v484_v47  ;;  %v488_v53 = vrot.slane %v486_v44, 4  ;;  %v11289_v57 = vcombine.low %v1908_v42, %v1912_v52  ;;  %v491_v58 = vrot.slane %v489_v48, 5  ;;  %v752_v42 = vld [vmem:[%s16054_s0 + $0x4] sm:$0x1]  ;;  %v753_v47 = vld [vmem:[%s16054_s0 + $0x8] sm:$0xe] }
  0x8a   :  { %v497_v60 = vrot.slane %v495_v49, 5  ;;  %v502_v61 = vrot.slane %v500_v50, 4  ;;  %v505_v0 = vrot.slane %v503_v54, 5  ;;  %v509_v1 = vshll.u32 %v309_v40, 16  ;;  %v754_v48 = vld [vmem:[%s16054_s0 + $0xc] sm:$0x1] }
  0x8b   :  { %12467 = vmatmul.mubr.msk.bf16.gmra.mrb[8].mxu1 %vm144_vm2, %v11105_v51  ;;  %v514_v2 = vshrl.u32 %v310_v45, 16  ;;  %v517_v3 = vshll.u32 %v310_v45, 16  ;;  %12547 = vmatmul.mubr.msk.bf16.gmra.mrb[8].mxu0 %vm144_vm2, %v11289_v57  ;;  %v492_v6 = vor.u32 %v491_v58, %v488_v53  ;;  %v523_v7 = vshll.u32 %v311_v46, 16  ;;  %v755_v53 = vld [vmem:[%s16054_s0 + $0x10] sm:$0xe] }
  0x8c   :  { %v528_v8 = vshrl.u32 %v312_v55, 16  ;;  %v531_v16 = vshll.u32 %v312_v55, 16  ;;  %v506_v10 = vor.u32 %v505_v0, %v502_v61  ;;  %v511_v11 = vrot.slane %v509_v1, 5  ;;  %v756_v54 = vld [vmem:[%s16054_s0 + $0x14] sm:$0x1] }
  0x8d   :  { %v516_v12 = vrot.slane %v514_v2, 4  ;;  %v519_v13 = vrot.slane %v517_v3, 5  ;;  %v493_v15 = vrot.slane %v492_v6, 4  ;;  %v525_v17 = vrot.slane %v523_v7, 5  ;;  %v757_v61 = vld [vmem:[%s16054_s0 + $0x18] sm:$0xe] }
  0x8e   :  { %v530_v18 = vrot.slane %v528_v8, 4  ;;  %v533_v19 = vrot.slane %v531_v16, 5  ;;  %v507_v22 = vrot.slane %v506_v10, 4  ;;  %v537_v24 = vshll.u32 %v313_v62, 16  ;;  %v758_v62 = vld [vmem:[%s16054_s0 + $0x1c] sm:$0x1] }
  0x8f   :  { %v520_v23 = vor.u32 %v519_v13, %v516_v12  ;;  %v11280_v25 = vrot.slane %v11260_v63, 9  ;;  %v498_v27 = vsel %vm14060_vm3, %v493_v15, %v497_v60  ;;  %v1915_v29 = vrot.slane %v11261_v4, 5  ;;  %v13632_v7 = vld [vmem:[%s16054_s0 + $0x10] ss:$8 sps:$4 sm:$0xff]   ;;  %v760_v13 = vld [vmem:[%s16054_s0 + $0x24] sm:$0x1] }
  0x90   :  { %v534_v28 = vor.u32 %v533_v19, %v530_v18  ;;  %v11281_v32 = vrot.slane %v11262_v5, 9  ;;  %v512_v34 = vsel %vm14060_vm3, %v507_v22, %v511_v11  ;;  %v539_v36 = vrot.slane %v537_v24, 5  ;;  %v759_v11 = vld [vmem:[%s16054_s0 + $0x20] sm:$0xe]  ;;  %v762_v15 = vld [vmem:[%s16054_s0 + $0x2c] sm:$0x1] }
  0x91   :  { %v521_v35 = vrot.slane %v520_v23, 4  ;;  %v1919_v37 = vrot.slane %v11263_v9, 5  ;;  %v11106_v20 = vcombine.low %v498_v27, %v512_v34  ;;  %v1916_v39 = vsel %vm14247_vm6, %v11280_v25, %v1915_v29  ;;  %v763_v23 = vld [vmem:[%s16054_s0 + $0x30] sm:$0xe]  ;;  %v13643_v24 = vld [vmem:[#allocation5 + $0x38] sm:$0xff]  }
  0x92   :  { %v535_v38 = vrot.slane %v534_v28, 4  ;;  %v11282_v40 = vrot.slane %v11264_v14, 9  ;;  %v1923_v45 = vrot.slane %v11265_v21, 5  ;;  %v11283_v46 = vrot.slane %v11266_v26, 9  ;;  %v761_v14 = vld [vmem:[%s16054_s0 + $0x28] sm:$0xe] }
  0x93   :  { %v526_v43 = vsel %vm14060_vm3, %v521_v35, %v525_v17  ;;  %v1920_v44 = vsel %vm14247_vm6, %v11281_v32, %v1919_v37  ;;  %12470 = vmatprep.mubr.msk.bf16.mxu1 %vm144_vm2, %v11106_v20  ;;  %v1927_v51 = vrot.slane %v11267_v33, 5  ;;  %v11118_v52 = vrot.slane %v751_v41, 9  ;;  %v13634_v17 = vld [vmem:[%s16054_s0 + $0x20] ss:$8 sps:$4 sm:$0xff]   ;;  %v764_v25 = vld [vmem:[%s16054_s0 + $0x34] sm:$0x1] }
  0x94   :  { %v540_v49 = vsel %vm14060_vm3, %v535_v38, %v539_v36  ;;  %v11290_v50 = vcombine.low %v1916_v39, %v1920_v44  ;;  %v1924_v57 = vsel %vm14247_vm6, %v11282_v40, %v1923_v45  ;;  %v820_v58 = vrot.slane %v752_v42, 5  ;;  %v765_v26 = vld [vmem:[%s16054_s0 + $0x38] sm:$0xe]  ;;  %v766_v27 = vld [vmem:[%s16054_s0 + $0x3c] sm:$0x1] }
  0x95   :  { %v11107_v55 = vcombine.low %v526_v43, %v540_v49  ;;  %v11119_v60 = vrot.slane %v753_v47, 9  ;;  %v1928_v63 = vsel %vm14247_vm6, %v11283_v46, %v1927_v51  ;;  %v824_v0 = vrot.slane %v754_v48, 5  ;;  %v13635_v37 = vld [vmem:[%s16054_s0 + $0x30] ss:$8 sps:$4 sm:$0xff]   ;;  %v768_v41 = vld [vmem:[%s16054_s0 + $0x54] sm:$0x1] }
  0x96   :  { %12550 = vmatprep.mubr.msk.bf16.mxu0 %vm144_vm2, %v11290_v50  ;;  %v11120_v1 = vrot.slane %v755_v53, 9  ;;  %v828_v2 = vrot.slane %v756_v54, 5  ;;  %v11291_v3 = vcombine.low %v1924_v57, %v1928_v63  ;;  %v821_v4 = vsel %vm14247_vm6, %v11118_v52, %v820_v58  ;;  %v767_v20 = vld [vmem:[%s16054_s0 + $0x50] sm:$0xe]  ;;  %v13638_v38 = vld [vmem:[#allocation5 + $0x78] sm:$0xff]   ;;  %v14587_v48 = vld [vmem:[#allocation5 + $0x80] sm:$0xff]  }
  0x97   :  { %12471 = vmatmul.mubr.msk.bf16.gmra.mrb[12].mxu1 %vm144_vm2, %v11107_v55  ;;  %v11121_v5 = vrot.slane %v757_v61, 9  ;;  %v832_v6 = vrot.slane %v758_v62, 5  ;;  %v825_v8 = vsel %vm14247_vm6, %v11119_v60, %v824_v0  ;;  %v11122_v18 = vrot.slane %v759_v11, 9  ;;  %v769_v42 = vld [vmem:[%s16054_s0 + $0x58] sm:$0xe] }
  0x98   :  { %v829_v16 = vsel %vm14247_vm6, %v11120_v1, %v828_v2  ;;  %12551 = vmatmul.mubr.msk.bf16.gmra.mrb[12].mxu0 %vm144_vm2, %v11291_v3  ;;  %v11134_v9 = vcombine.low %v821_v4, %v825_v8  ;;  %v836_v19 = vrot.slane %v760_v13, 5  ;;  %v11123_v21 = vrot.slane %v761_v14, 9  ;;  %v770_v43 = vld [vmem:[%s16054_s0 + $0x5c] sm:$0x1]  ;;  %v771_v47 = vld [vmem:[%s16054_s0 + $0x60] sm:$0xe] }
  0x99   :  { %v833_v10 = vsel %vm14247_vm6, %v11121_v5, %v832_v6  ;;  %12558 = vmatprep.mubr.msk.bf16.mxu0 %vm144_vm2, %v13632_v7  ;;  %v840_v22 = vrot.slane %v762_v15, 5  ;;  %v11124_v32 = vrot.slane %v763_v23, 9  ;;  %v844_v33 = vrot.slane %v764_v25, 5  ;;  %v773_v50 = vld [vmem:[%s16054_s0 + $0x68] sm:$0xe] }
  0x9a   :  { %v11135_v12 = vcombine.low %v829_v16, %v833_v10  ;;  %12478 = vmatprep.mubr.msk.bf16.mxu1 %vm144_vm2, %v11134_v9  ;;  %v837_v28 = vsel %vm14247_vm6, %v11122_v18, %v836_v19  ;;  %v11125_v35 = vrot.slane %v765_v26, 9  ;;  %v848_v36 = vrot.slane %v766_v27, 5  ;;  %v13636_v57 = vld [vmem:[%s16054_s0 + $0x40] ss:$8 sps:$4 sm:$0xff]   ;;  %v775_v63 = vld [vmem:[%s16054_s0 + $0x70] sm:$0xe] }
  0x9b   :  { %v841_v29 = vsel %vm14247_vm6, %v11123_v21, %v840_v22  ;;  %v845_v39 = vsel %vm14247_vm6, %v11124_v32, %v844_v33  ;;  %v11126_v44 = vrot.slane %v767_v20, 9  ;;  %v852_v45 = vrot.slane %v768_v41, 5  ;;  %v13637_v62 = vld [vmem:[%s16054_s0 + $0x60] ss:$8 sps:$4 sm:$0xff]   ;;  %v776_v2 = vld [vmem:[%s16054_s0 + $0x74] sm:$0x1] }
  0x9c   :  { %v11136_v34 = vcombine.low %v837_v28, %v841_v29  ;;  %v849_v40 = vsel %vm14247_vm6, %v11125_v35, %v848_v36  ;;  %v11127_v46 = vrot.slane %v769_v42, 9  ;;  %v856_v49 = vrot.slane %v770_v43, 5  ;;  %v777_v3 = vld [vmem:[%s16054_s0 + $0x78] sm:$0xe]  ;;  %v778_v4 = vld [vmem:[%s16054_s0 + $0x7c] sm:$0x1] }
  0x9d   :  { %v11128_v51 = vrot.slane %v771_v47, 9  ;;  %v11137_v52 = vcombine.low %v845_v39, %v849_v40  ;;  %v853_v53 = vsel %vm14247_vm6, %v11126_v44, %v852_v45  ;;  %v11129_v55 = vrot.slane %v773_v50, 9  ;;  %v779_v16 = vld [vmem:[%s16054_s0 + $0x80] sm:$0xe]  ;;  %v780_v9 = vld [vmem:[%s16054_s0 + $0x84] sm:$0x1] }
  0x9e   :  { %v857_v58 = vsel %vm14247_vm6, %v11127_v46, %v856_v49  ;;  %v11130_v5 = vrot.slane %v775_v63, 9  ;;  %v868_v6 = vrot.slane %v776_v2, 5  ;;  %v11131_v7 = vrot.slane %v777_v3, 9  ;;  %v781_v10 = vld [vmem:[%s16054_s0 + $0x88] sm:$0xe] }
  0x9f   :  { %12479 = vmatmul.mubr.msk.bf16.vlgmr.msra.gmra.mrb[0].mxu1 %vm144_vm2, %v11135_v12  ;;  %v11138_v61 = vcombine.low %v853_v53, %v857_v58  ;;  %v872_v8 = vrot.slane %v778_v4, 5  ;;  %v782_v11 = vld [vmem:[%s16054_s0 + $0x8c] sm:$0x1]  ;;  %v11132_v14 = vrot.slane %v779_v16, 9  ;;  %v876_v15 = vrot.slane %v780_v9, 5 }
  0xa0   :  { %12482 = vmatprep.mubr.msk.bf16.mxu1 %vm144_vm2, %v11136_v34  ;;  %12495 = vmatpush3.bf16.msra.mxu1 %v14321_v31  ;;  %v772_v31 = vld [vmem:[%s16054_s0 + $0x64] sm:$0x1]  ;;  %v869_v12 = vsel %vm14247_vm6, %v11130_v5, %v868_v6  ;;  %v11133_v18 = vrot.slane %v781_v10, 9  ;;  %v880_v19 = vrot.slane %v782_v11, 5  ;;  %v13639_v22 = vld [vmem:[%s16054_s0 + $0x70] ss:$8 sps:$4 sm:$0xff]  }
  0xa1   :  { %12559 = vmatmul.mubr.msk.bf16.vlgmr.msra.gmra.mrb[0].mxu0 %vm144_vm2, %v13634_v17  ;;  %12496 = vmatprep.subr.bf16.mxu1 %v13643_v24  ;;  %v860_v54 = vrot.slane %v772_v31, 5  ;;  %v873_v13 = vsel %vm14247_vm6, %v11131_v7, %v872_v8  ;;  %v13641_v23 = vld [vmem:[%s16054_s0 + $0x80] ss:$8 sps:$4 sm:$0xff]   ;;  %v11336_v26 = vld [vmem:[%s16054_s0 + $0x10] sm:$0xf]  ;;  %vm3506_vm7 = vcmask 1043456  }
  0xa2   :  { %12575 = vmatpush3.bf16.msra.mxu0 %v14315_v56  ;;  %12562 = vmatprep.mubr.msk.bf16.mxu0 %vm144_vm2, %v13635_v37  ;;  %v774_v56 = vld [vmem:[%s16054_s0 + $0x6c] sm:$0x1]  ;;  %v11140_v21 = vcombine.low %v869_v12, %v873_v13  ;;  %v881_v25 = vsel %vm14247_vm6, %v11133_v18, %v880_v19  ;;  %v11337_v27 = vld [vmem:[%s16054_s0 + $0x14] sm:$0x1]  ;;  %v11338_v28 = vld [vmem:[%s16054_s0 + $0x18] sm:$0xf] }
  0xa3   :  { %12576 = vmatprep.subr.bf16.mxu0 %v13638_v38  ;;  %v864_v60 = vrot.slane %v774_v56, 5  ;;  %v861_v0 = vsel %vm14247_vm6, %v11128_v51, %v860_v54  ;;  %v11339_v29 = vld [vmem:[%s16054_s0 + $0x1c] sm:$0x1]  ;;  %v2415_v32 = vshrl.u32 %v11336_v26, 16  ;;  %v2418_v33 = vshll.u32 %v11336_v26, 16 }
  0xa4   :  { %12497 = vmatpush3.bf16.msra.mxu1 %v13643_v24  ;;  %v877_v24 = vsel %vm14247_vm6, %v11132_v14, %v876_v15  ;;  %v2424_v34 = vshll.u32 %v11337_v27, 16  ;;  %v2429_v35 = vshrl.u32 %v11338_v28, 16  ;;  %v13644_v37 = vld [vmem:[%s16054_s0 + $0x8] ss:$8 sps:$4 sm:$0xff]   ;;  %v2432_v20 = vshll.u32 %v11338_v28, 16 }
  0xa5   :  { %v865_v1 = vsel %vm14247_vm6, %v11129_v55, %v864_v60  ;;  %v11141_v36 = vcombine.low %v877_v24, %v881_v25  ;;  %v13642_v39 = vld [vmem:[%s16054_s0 + $0x90] ss:$8 sps:$4 sm:$0xff]   ;;  %v2417_v40 = vrot.slane %v2415_v32, 4  ;;  %v2420_v41 = vrot.slane %v2418_v33, 5  ;;  %v11340_v44 = vld [vmem:[%s16054_s0 + $0x20] sm:$0xf] }
  0xa6   :  { %12577 = vmatpush3.bf16.msra.mxu0 %v13638_v38  ;;  %v11139_v17 = vcombine.low %v861_v0, %v865_v1  ;;  %v2438_v38 = vshll.u32 %v11339_v29, 16  ;;  %v2426_v42 = vrot.slane %v2424_v34, 5  ;;  %v2431_v43 = vrot.slane %v2429_v35, 4  ;;  %v11341_v47 = vld [vmem:[%s16054_s0 + $0x24] sm:$0x1]  ;;  %v13651_v35 = vld [vmem:[#allocation5 + $0x88] sm:$0xff]  }
  0xa7   :  { %12483 = vmatmul.mubr.msk.bf16.gmra.mrb[4].mxu1 %vm144_vm2, %v11137_v52  ;;  %12594 = vmatprep.subr.bf16.mxu0 %v14587_v48  ;;  %v2434_v45 = vrot.slane %v2432_v20, 5  ;;  %v11342_v49 = vld [vmem:[%s16054_s0 + $0x28] sm:$0xf]  ;;  %v2421_v31 = vor.u32 %v2420_v41, %v2417_v40  ;;  %v11343_v50 = vld [vmem:[%s16054_s0 + $0x2c] sm:$0x1]  ;;  %v2443_v51 = vshrl.u32 %v11340_v44, 16 }
  0xa8   :  { %12486 = vmatprep.mubr.msk.bf16.mxu1 %vm144_vm2, %v11138_v61  ;;  %v2440_v46 = vrot.slane %v2438_v38, 5  ;;  %v2446_v52 = vshll.u32 %v11340_v44, 16  ;;  %v2452_v53 = vshll.u32 %v11341_v47, 16  ;;  %v2457_v54 = vshrl.u32 %v11342_v49, 16  ;;  %v13645_v1 = vld [vmem:[%s16054_s0 + $0x18] ss:$8 sps:$4 sm:$0xff]  }
  0xa9   :  { %12563 = vmatmul.mubr.msk.bf16.gmra.mrb[4].mxu0 %vm144_vm2, %v13636_v57  ;;  %v2435_v56 = vor.u32 %v2434_v45, %v2431_v43  ;;  %v2460_v55 = vshll.u32 %v11342_v49, 16  ;;  %v2466_v57 = vshll.u32 %v11343_v50, 16  ;;  %v2422_v58 = vrot.slane %v2421_v31, 4  ;;  %v13647_v8 = vld [vmem:[%s16054_s0 + $0x28] ss:$8 sps:$4 sm:$0xff]  }
  0xaa   :  { %12566 = vmatprep.mubr.msk.bf16.mxu0 %vm144_vm2, %v13637_v62  ;;  %v2445_v60 = vrot.slane %v2443_v51, 4  ;;  %v2448_v61 = vrot.slane %v2446_v52, 5  ;;  %v2459_v63 = vrot.slane %v2457_v54, 4  ;;  %v2454_v4 = vrot.slane %v2452_v53, 5  ;;  %v11344_v16 = vld [vmem:[%s16054_s0 + $0x30] sm:$0xf] }
  0xab   :  { %v2436_v62 = vrot.slane %v2435_v56, 4  ;;  %v2462_v0 = vrot.slane %v2460_v55, 5  ;;  %v2427_v2 = vsel %vm14060_vm3, %v2422_v58, %v2426_v42  ;;  %v2468_v5 = vrot.slane %v2466_v57, 5  ;;  %v11345_v9 = vld [vmem:[%s16054_s0 + $0x34] sm:$0x1] }
  0xac   :  { %v2449_v3 = vor.u32 %v2448_v61, %v2445_v60  ;;  %v11346_v10 = vld [vmem:[%s16054_s0 + $0x38] sm:$0xf]  ;;  %v11347_v13 = vld [vmem:[%s16054_s0 + $0x3c] sm:$0x1]  ;;  %v2471_v14 = vshrl.u32 %v11344_v16, 16  ;;  %v2474_v15 = vshll.u32 %v11344_v16, 16 }
  0xad   :  { %v2441_v6 = vsel %vm14060_vm3, %v2436_v62, %v2440_v46  ;;  %v2463_v7 = vor.u32 %v2462_v0, %v2459_v63  ;;  %v2480_v18 = vshll.u32 %v11345_v9, 16  ;;  %v2485_v19 = vshrl.u32 %v11346_v10, 16  ;;  %v11349_v27 = vld [vmem:[%s16054_s0 + $0x44] sm:$0x1]  ;;  %v11350_v34 = vld [vmem:[%s16054_s0 + $0x48] sm:$0xf] }
  0xae   :  { %v11368_v11 = vcombine.low %v2427_v2, %v2441_v6  ;;  %v2450_v12 = vrot.slane %v2449_v3, 4  ;;  %v2473_v24 = vrot.slane %v2471_v14, 4  ;;  %v2476_v25 = vrot.slane %v2474_v15, 5  ;;  %v11351_v38 = vld [vmem:[%s16054_s0 + $0x4c] sm:$0x1] }
  0xaf   :  { %12487 = vmatmul.mubr.msk.bf16.gmra.mrb[8].mxu1 %vm144_vm2, %v11139_v17  ;;  %v2464_v17 = vrot.slane %v2463_v7, 4  ;;  %v2494_v26 = vshll.u32 %v11347_v13, 16  ;;  %v2482_v29 = vrot.slane %v2480_v18, 5  ;;  %v2487_v32 = vrot.slane %v2485_v19, 4  ;;  %v13648_v44 = vld [vmem:[%s16054_s0 + $0x38] ss:$8 sps:$4 sm:$0xff]  }
  0xb0   :  { %12490 = vmatprep.mubr.msk.bf16.mxu1 %vm144_vm2, %v11140_v21  ;;  %v2488_v21 = vshll.u32 %v11346_v10, 16  ;;  %v2508_v42 = vshll.u32 %v11349_v27, 16  ;;  %v2513_v43 = vshrl.u32 %v11350_v34, 16  ;;  %v2516_v47 = vshll.u32 %v11350_v34, 16  ;;  %v13649_v52 = vld [vmem:[%s16054_s0 + $0x58] ss:$8 sps:$4 sm:$0xff]  }
  0xb1   :  { %12567 = vmatmul.mubr.msk.bf16.gmra.mrb[8].mxu0 %vm144_vm2, %v13639_v22  ;;  %v11348_v22 = vld [vmem:[%s16054_s0 + $0x40] sm:$0xf]  ;;  %v2469_v28 = vsel %vm14060_vm3, %v2464_v17, %v2468_v5  ;;  %v2496_v20 = vrot.slane %v2494_v26, 5  ;;  %v2522_v49 = vshll.u32 %v11351_v38, 16  ;;  %v11353_v60 = vld [vmem:[%s16054_s0 + $0x64] sm:$0x1] }
  0xb2   :  { %12570 = vmatprep.mubr.msk.bf16.mxu0 %vm144_vm2, %v13641_v23  ;;  %v2455_v23 = vsel %vm14060_vm3, %v2450_v12, %v2454_v4  ;;  %v2490_v33 = vrot.slane %v2488_v21, 5  ;;  %v2502_v41 = vshll.u32 %v11348_v22, 16  ;;  %v2515_v51 = vrot.slane %v2513_v43, 4  ;;  %v11354_v61 = vld [vmem:[%s16054_s0 + $0x68] sm:$0xf] }
  0xb3   :  { %v2510_v56 = vrot.slane %v2508_v42, 5  ;;  %v2518_v54 = vrot.slane %v2516_v47, 5  ;;  %v2524_v55 = vrot.slane %v2522_v49, 5  ;;  %v11355_v0 = vld [vmem:[%s16054_s0 + $0x6c] sm:$0x1]  ;;  %v2536_v4 = vshll.u32 %v11353_v60, 16 }
  0xb4   :  { %v2491_v40 = vor.u32 %v2490_v33, %v2487_v32  ;;  %v2504_v50 = vrot.slane %v2502_v41, 5  ;;  %v2541_v5 = vshrl.u32 %v11354_v61, 16  ;;  %v2544_v6 = vshll.u32 %v11354_v61, 16  ;;  %v11356_v10 = vld [vmem:[%s16054_s0 + $0x70] sm:$0xf] }
  0xb5   :  { %v2519_v63 = vor.u32 %v2518_v54, %v2515_v51  ;;  %v2550_v9 = vshll.u32 %v11355_v0, 16  ;;  %v2538_v12 = vrot.slane %v2536_v4, 5  ;;  %v11357_v15 = vld [vmem:[%s16054_s0 + $0x74] sm:$0x1]  ;;  %v13650_v18 = vld [vmem:[%s16054_s0 + $0x68] ss:$8 sps:$4 sm:$0xff]  }
  0xb6   :  { %v2492_v31 = vrot.slane %v2491_v40, 4  ;;  %v2543_v13 = vrot.slane %v2541_v5, 4  ;;  %v2546_v14 = vrot.slane %v2544_v6, 5  ;;  %v2558_v27 = vshll.u32 %v11356_v10, 16  ;;  %v13653_v5 = vld [vmem:[%s16054_s0 + $0x88] ss:$8 sps:$4 sm:$0xff]  }
  0xb7   :  { %12491 = vmatmul.mubr.msk.bf16.gmra.mrb[12].mxu1 %vm144_vm2, %v11141_v36  ;;  %v11369_v36 = vcombine.low %v2455_v23, %v2469_v28  ;;  %v2520_v7 = vrot.slane %v2519_v63, 4  ;;  %v2552_v21 = vrot.slane %v2550_v9, 5  ;;  %v11359_v23 = vld [vmem:[%s16054_s0 + $0x7c] sm:$0x1]  ;;  %v2564_v28 = vshll.u32 %v11357_v15, 16 }
  0xb8   :  { %12498 = vmatprep.mubr.msk.bf16.mxu1 %vm144_vm2, %v13644_v37  ;;  %v2477_v37 = vor.u32 %v2476_v25, %v2473_v24  ;;  %v2497_v57 = vsel %vm14060_vm3, %v2492_v31, %v2496_v20  ;;  %v2555_v24 = vshrl.u32 %v11356_v10, 16  ;;  %v2547_v26 = vor.u32 %v2546_v14, %v2543_v13  ;;  %v11362_v31 = vld [vmem:[%s16054_s0 + $0x88] sm:$0xf]  ;;  %v11386_v13 = vld [vmem:[%s16054_s0 + $0x10] sm:$0xe] }
  0xb9   :  { %12571 = vmatmul.mubr.msk.bf16.gmra.mrb[12].mxu0 %vm144_vm2, %v13642_v39  ;;  %v2499_v39 = vshrl.u32 %v11348_v22, 16  ;;  %v2525_v17 = vsel %vm14060_vm3, %v2520_v7, %v2524_v55  ;;  %v11358_v22 = vld [vmem:[%s16054_s0 + $0x78] sm:$0xf]  ;;  %v2578_v20 = vshll.u32 %v11359_v23, 16  ;;  %v2566_v43 = vrot.slane %v2564_v28, 5 }
  0xba   :  { %12578 = vmatprep.mubr.msk.bf16.mxu0 %vm144_vm2, %v11368_v11  ;;  %v2478_v45 = vrot.slane %v2477_v37, 4  ;;  %v2557_v32 = vrot.slane %v2555_v24, 4  ;;  %v2569_v33 = vshrl.u32 %v11358_v22, 16  ;;  %v2572_v34 = vshll.u32 %v11358_v22, 16  ;;  %v11387_v14 = vld [vmem:[%s16054_s0 + $0x14] sm:$0x1] }
  0xbb   :  { %v2501_v46 = vrot.slane %v2499_v39, 4  ;;  %v2560_v37 = vrot.slane %v2558_v27, 5  ;;  %v2597_v54 = vshrl.u32 %v11362_v31, 16  ;;  %v2600_v55 = vshll.u32 %v11362_v31, 16 }
  0xbc   :  { %v2483_v53 = vsel %vm14060_vm3, %v2478_v45, %v2482_v29  ;;  %v2571_v39 = vrot.slane %v2569_v33, 4  ;;  %v2574_v40 = vrot.slane %v2572_v34, 5  ;;  %v11360_v45 = vld [vmem:[%s16054_s0 + $0x80] sm:$0xf]  ;;  %vm3507_vm8 = vsmask.f32 7938 }
  0xbd   :  { %v2505_v58 = vor.u32 %v2504_v50, %v2501_v46  ;;  %v11370_v62 = vcombine.low %v2483_v53, %v2497_v57  ;;  %v2561_v42 = vor.u32 %v2560_v37, %v2557_v32  ;;  %v11361_v46 = vld [vmem:[%s16054_s0 + $0x84] sm:$0x1]  ;;  %v11363_v50 = vld [vmem:[%s16054_s0 + $0x8c] sm:$0x1]  ;;  %v2583_v51 = vshrl.u32 %v11360_v45, 16  ;;  %vm15094_vm11 = vmand %vm3506_vm7, %vm3507_vm8 }
  0xbe   :  { %v2575_v49 = vor.u32 %v2574_v40, %v2571_v39  ;;  %v11364_v57 = vld [vmem:[%s16054_s0 + $0x90] sm:$0xf]  ;;  %v2606_v61 = vshll.u32 %v11363_v50, 16  ;;  %v11418_v32 = vrot.slane %v11386_v13, 9  ;;  %v11390_v33 = vld [vmem:[%s16054_s0 + $0x20] sm:$0xe] }
  0xbf   :  { %12499 = vmatmul.mubr.msk.bf16.vlgmr.msra.gmra.mrb[0].mxu1 %vm144_vm2, %v13645_v1  ;;  %v2506_v3 = vrot.slane %v2505_v58, 4  ;;  %v2562_v53 = vrot.slane %v2561_v42, 4  ;;  %v2914_v37 = vrot.slane %v11387_v14, 5  ;;  %v11392_v42 = vld [vmem:[%s16054_s0 + $0x28] sm:$0xe]  ;;  %vm3512_vm9 = vcmask 1040384  }
  0xc0   :  { %12502 = vmatprep.mubr.msk.bf16.mxu1 %vm144_vm2, %v13647_v8  ;;  %v2576_v58 = vrot.slane %v2575_v49, 4  ;;  %v2608_v7 = vrot.slane %v2606_v61, 5  ;;  %v11395_v49 = vld [vmem:[%s16054_s0 + $0x34] sm:$0x1]  ;;  %vm3513_vm10 = vsmask.f32 256 }
  0xc1   :  { %12579 = vmatmul.mubr.msk.bf16.vlgmr.msra.gmra.mrb[0].mxu0 %vm144_vm2, %v11369_v36  ;;  %v2511_v11 = vsel %vm14060_vm3, %v2506_v3, %v2510_v56  ;;  %v2548_v36 = vrot.slane %v2547_v26, 4  ;;  %v2592_v56 = vshll.u32 %v11361_v46, 16  ;;  %v2567_v63 = vsel %vm14060_vm3, %v2562_v53, %v2566_v43  ;;  %v11366_v3 = vld [vmem:[%s16054_s0 + $0x98] sm:$0xf]  ;;  %v11389_v26 = vld [vmem:[%s16054_s0 + $0x1c] sm:$0x1]  ;;  %vm15101_vm12 = vmand %vm3512_vm9, %vm3513_vm10 }
  0xc2   :  { %12595 = vmatpush3.bf16.msra.mxu0 %v14587_v48  ;;  %v11352_v48 = vld [vmem:[%s16054_s0 + $0x60] sm:$0xf]  ;;  %12582 = vmatprep.mubr.msk.bf16.mxu0 %vm144_vm2, %v11370_v62  ;;  %v11371_v25 = vcombine.low %v2511_v11, %v2525_v17  ;;  %v11365_v62 = vld [vmem:[%s16054_s0 + $0x94] sm:$0x1]  ;;  %v2614_v11 = vshll.u32 %v11364_v57, 16  ;;  %v11420_v46 = vrot.slane %v11390_v33, 9 }
  0xc3   :  { %12596 = vmatprep.subr.bf16.mxu0 %v13651_v35  ;;  %v2527_v1 = vshrl.u32 %v11352_v48, 16  ;;  %v2530_v2 = vshll.u32 %v11352_v48, 16  ;;  %v2553_v41 = vsel %vm14060_vm3, %v2548_v36, %v2552_v21  ;;  %v2585_v48 = vrot.slane %v2583_v51, 4  ;;  %v11388_v21 = vld [vmem:[%s16054_s0 + $0x18] sm:$0xe] }
  0xc4   :  { %v2594_v0 = vrot.slane %v2592_v56, 5  ;;  %v2616_v23 = vrot.slane %v2614_v11, 5  ;;  %v11419_v40 = vrot.slane %v11388_v21, 9  ;;  %v11393_v43 = vld [vmem:[%s16054_s0 + $0x2c] sm:$0x1]  ;;  %vm11059_vm13 = vcmask 64512  }
  0xc5   :  { %v2529_v8 = vrot.slane %v2527_v1, 4  ;;  %v2532_v16 = vrot.slane %v2530_v2, 5  ;;  %v2599_v1 = vrot.slane %v2597_v54, 4  ;;  %v2602_v2 = vrot.slane %v2600_v55, 5  ;;  %v11397_v53 = vld [vmem:[%s16054_s0 + $0x3c] sm:$0x1] }
  0xc6   :  { %12597 = vmatpush3.bf16.msra.mxu0 %v13651_v35  ;;  %v13652_v35 = vld [vmem:[%s16054_s0 + $0x78] ss:$8 sps:$4 sm:$0xff]   ;;  %v11421_v54 = vrot.slane %v11392_v42, 9  ;;  %v2926_v55 = vrot.slane %v11393_v43, 5  ;;  %v11417_v43 = vld [vmem:[%s16054_s0 + $0x9c] sm:$0x1] }
  0xc7   :  { %12503 = vmatmul.mubr.msk.bf16.gmra.mrb[4].mxu1 %vm144_vm2, %v13648_v44  ;;  %v2533_v19 = vor.u32 %v2532_v16, %v2529_v8  ;;  %v2580_v44 = vrot.slane %v2578_v20, 5  ;;  %v11367_v8 = vld [vmem:[%s16054_s0 + $0x9c] sm:$0x1]  ;;  %v2611_v16 = vshrl.u32 %v11364_v57, 16  ;;  %v2603_v10 = vor.u32 %v2602_v2, %v2599_v1  ;;  %v11391_v20 = vld [vmem:[%s16054_s0 + $0x24] sm:$0x1] }
  0xc8   :  { %12506 = vmatprep.mubr.msk.bf16.mxu1 %vm144_vm2, %v13649_v52  ;;  %v2586_v52 = vshll.u32 %v11360_v45, 16  ;;  %v2915_v45 = vsel %vm14247_vm6, %v11418_v32, %v2914_v37  ;;  %v2922_v51 = vrot.slane %v11391_v20, 5  ;;  %v11398_v57 = vld [vmem:[%s16054_s0 + $0x40] sm:$0xe]  ;;  %v2927_v14 = vsel %vm14247_vm6, %v11421_v54, %v2926_v55  ;;  %v11411_v32 = vld [vmem:[%s16054_s0 + $0x84] sm:$0x1] }
  0xc9   :  { %v2534_v29 = vrot.slane %v2533_v19, 4  ;;  %12583 = vmatmul.mubr.msk.bf16.gmra.mrb[4].mxu0 %vm144_vm2, %v11371_v25  ;;  %v2581_v4 = vsel %vm14060_vm3, %v2576_v58, %v2580_v44  ;;  %v2613_v17 = vrot.slane %v2611_v16, 4  ;;  %v2628_v19 = vshll.u32 %v11366_v3, 16  ;;  %v11399_v58 = vld [vmem:[%s16054_s0 + $0x44] sm:$0x1] }
  0xca   :  { %v2588_v60 = vrot.slane %v2586_v52, 5  ;;  %v11373_v9 = vcombine.low %v2567_v63, %v2581_v4  ;;  %v2604_v22 = vrot.slane %v2603_v10, 4  ;;  %v2634_v25 = vshll.u32 %v11367_v8, 16  ;;  %v11396_v52 = vld [vmem:[%s16054_s0 + $0x38] sm:$0xe] }
  0xcb   :  { %v2539_v38 = vsel %vm14060_vm3, %v2534_v29, %v2538_v12  ;;  %v2620_v12 = vshll.u32 %v11365_v62, 16  ;;  %v2630_v29 = vrot.slane %v2628_v19, 5  ;;  %v2930_v62 = vrot.slane %v11395_v49, 5  ;;  %v11400_v63 = vld [vmem:[%s16054_s0 + $0x48] sm:$0xe] }
  0xcc   :  { %v11372_v47 = vcombine.low %v2539_v38, %v2553_v41  ;;  %v2589_v6 = vor.u32 %v2588_v60, %v2585_v48  ;;  %v2609_v34 = vsel %vm14060_vm3, %v2604_v22, %v2608_v7  ;;  %v2636_v36 = vrot.slane %v2634_v25, 5  ;;  %v11402_v4 = vld [vmem:[%s16054_s0 + $0x60] sm:$0xe]  ;;  %v11404_v8 = vld [vmem:[%s16054_s0 + $0x68] sm:$0xe] }
  0xcd   :  { %v2622_v24 = vrot.slane %v2620_v12, 5  ;;  %v2918_v41 = vrot.slane %v11389_v26, 5  ;;  %v11423_v2 = vrot.slane %v11396_v52, 9  ;;  %v2938_v7 = vrot.slane %v11399_v58, 5  ;;  %v11405_v10 = vld [vmem:[%s16054_s0 + $0x6c] sm:$0x1] }
  0xce   :  { %12586 = vmatprep.mubr.msk.bf16.mxu0 %vm144_vm2, %v11372_v47  ;;  %v2590_v15 = vrot.slane %v2589_v6, 4  ;;  %v11394_v47 = vld [vmem:[%s16054_s0 + $0x30] sm:$0xe]  ;;  %v11424_v6 = vrot.slane %v11398_v57, 9  ;;  %v11425_v16 = vrot.slane %v11400_v63, 9  ;;  %v11426_v11 = vrot.slane %v11402_v4, 9 }
  0xcf   :  { %12507 = vmatmul.mubr.msk.bf16.gmra.mrb[8].mxu1 %vm144_vm2, %v13650_v18  ;;  %v2625_v18 = vshrl.u32 %v11366_v3, 16  ;;  %v2919_v50 = vsel %vm14247_vm6, %v11419_v40, %v2918_v41  ;;  %v11422_v61 = vrot.slane %v11394_v47, 9  ;;  %v2934_v3 = vrot.slane %v11397_v53, 5  ;;  %v11407_v19 = vld [vmem:[%s16054_s0 + $0x74] sm:$0x1] }
  0xd0   :  { %12510 = vmatprep.mubr.msk.bf16.mxu1 %vm144_vm2, %v13652_v35  ;;  %v2595_v27 = vsel %vm14060_vm3, %v2590_v15, %v2594_v0  ;;  %v2617_v35 = vor.u32 %v2616_v23, %v2613_v17  ;;  %v11434_v60 = vcombine.low %v2915_v45, %v2919_v50  ;;  %v11401_v0 = vld [vmem:[%s16054_s0 + $0x4c] sm:$0x1]  ;;  %v2923_v13 = vsel %vm14247_vm6, %v11420_v46, %v2922_v51  ;;  %v11408_v23 = vld [vmem:[%s16054_s0 + $0x78] sm:$0xe]  ;;  %v11414_v40 = vld [vmem:[%s16054_s0 + $0x90] sm:$0xe] }
  0xd1   :  { %12587 = vmatmul.mubr.msk.bf16.gmra.mrb[8].mxu0 %vm144_vm2, %v11373_v9  ;;  %v2627_v28 = vrot.slane %v2625_v18, 4  ;;  %v11374_v38 = vcombine.low %v2595_v27, %v2609_v34  ;;  %v2942_v9 = vrot.slane %v11401_v0, 5  ;;  %v11427_v15 = vrot.slane %v11404_v8, 9  ;;  %v11406_v18 = vld [vmem:[%s16054_s0 + $0x70] sm:$0xe]  ;;  %v13655_v0 = vld [vmem:[#allocation7 + $0x8] sm:$0xff]  }
  0xd2   :  { %v2618_v44 = vrot.slane %v2617_v35, 4  ;;  %v2950_v17 = vrot.slane %v11405_v10, 5  ;;  %v2931_v21 = vsel %vm14247_vm6, %v11422_v61, %v2930_v62  ;;  %v2935_v22 = vsel %vm14247_vm6, %v11423_v2, %v2934_v3  ;;  %v11412_v34 = vld [vmem:[%s16054_s0 + $0x88] sm:$0xe]  ;;  %v11413_v35 = vld [vmem:[%s16054_s0 + $0x8c] sm:$0x1] }
  0xd3   :  { %v2631_v39 = vor.u32 %v2630_v29, %v2627_v28  ;;  %12590 = vmatprep.mubr.msk.bf16.mxu0 %vm144_vm2, %v11374_v38  ;;  %v11428_v25 = vrot.slane %v11406_v18, 9  ;;  %v2954_v26 = vrot.slane %v11407_v19, 5  ;;  %v11429_v27 = vrot.slane %v11408_v23, 9  ;;  %v11410_v29 = vld [vmem:[%s16054_s0 + $0x80] sm:$0xe]  ;;  %v13654_v63 = vld [vmem:[#allocation7] sm:$0xff]  }
  0xd4   :  { %v2623_v56 = vsel %vm14060_vm3, %v2618_v44, %v2622_v24  ;;  %v11409_v24 = vld [vmem:[%s16054_s0 + $0x7c] sm:$0x1]  ;;  %v11435_v33 = vcombine.low %v2923_v13, %v2927_v14  ;;  %v2962_v37 = vrot.slane %v11411_v32, 5  ;;  %v11436_v20 = vcombine.low %v2931_v21, %v2935_v22  ;;  %v11415_v41 = vld [vmem:[%s16054_s0 + $0x94] sm:$0x1]  ;;  %12614 = vmatprep.subr.bf16.mxu1 %v13654_v63  ;;  %v13657_v3 = vld [vmem:[#allocation7 + $0x18] sm:$0xff]  }
  0xd5   :  { %v2632_v31 = vrot.slane %v2631_v39, 4  ;;  %v2958_v28 = vrot.slane %v11409_v24, 5  ;;  %v11431_v38 = vrot.slane %v11412_v34, 9  ;;  %v2966_v39 = vrot.slane %v11413_v35, 5  ;;  %v11416_v42 = vld [vmem:[%s16054_s0 + $0x98] sm:$0xe]  ;;  %12615 = vmatpush3.bf16.msra.mxu1 %v13654_v63 }
  0xd6   :  { %v11432_v44 = vrot.slane %v11414_v40, 9  ;;  %v2970_v45 = vrot.slane %v11415_v41, 5  ;;  %v11433_v46 = vrot.slane %v11416_v42, 9  ;;  %v2974_v47 = vrot.slane %v11417_v43, 5  ;;  %12616 = vmatprep.subr.bf16.mxu1 %v13655_v0  ;;  %v13658_v4 = vld [vmem:[#allocation7 + $0x20] sm:$0xff]  }
  0xd7   :  { %12511 = vmatmul.mubr.msk.bf16.gmra.mrb[12].mxu1 %vm144_vm2, %v13653_v5  ;;  %v2637_v48 = vsel %vm14060_vm3, %v2632_v31, %v2636_v36  ;;  %v11403_v5 = vld [vmem:[%s16054_s0 + $0x64] sm:$0x1]  ;;  %v11430_v36 = vrot.slane %v11410_v29, 9  ;;  %v2939_v49 = vsel %vm14247_vm6, %v11424_v6, %v2938_v7  ;;  %v2943_v31 = vsel %vm14247_vm6, %v11425_v16, %v2942_v9  ;;  %v13661_v7 = vld [vmem:[#allocation7 + $0x38] sm:$0xff]   ;;  %v15051_v8 = vld [vmem:[#allocation7 + $0x40] sm:$0xff]  }
  0xd8   :  { %v11375_v1 = vcombine.low %v2623_v56, %v2637_v48  ;;  %v2946_v12 = vrot.slane %v11403_v5, 5  ;;  %v2951_v51 = vsel %vm14247_vm6, %v11427_v15, %v2950_v17  ;;  %v11437_v52 = vcombine.low %v2939_v49, %v2943_v31  ;;  %v13659_v5 = vld [vmem:[#allocation7 + $0x28] sm:$0xff]   ;;  %v13660_v6 = vld [vmem:[#allocation7 + $0x30] sm:$0xff]  }
  0xd9   :  { %v2955_v56 = vsel %vm14247_vm6, %v11428_v25, %v2954_v26  ;;  %v2959_v54 = vsel %vm14247_vm6, %v11429_v27, %v2958_v28  ;;  %v2963_v55 = vsel %vm14247_vm6, %v11430_v36, %v2962_v37  ;;  %v2967_v57 = vsel %vm14247_vm6, %v11431_v38, %v2966_v39  ;;  %12617 = vmatpush3.bf16.msra.mxu1 %v13655_v0  ;;  %v15077_v34 = vld [vmem:[%s16056_s2] ss:$0 sm:$0xff] }
  0xda   :  { %12591 = vmatmul.mubr.msk.bf16.gmra.mrb[12].mxu0 %vm144_vm2, %v11375_v1  ;;  %v2947_v50 = vsel %vm14247_vm6, %v11426_v11, %v2946_v12  ;;  %v11439_v58 = vcombine.low %v2955_v56, %v2959_v54  ;;  %v11440_v48 = vcombine.low %v2963_v55, %v2967_v57  ;;  %v2975_v61 = vsel %vm14247_vm6, %v11433_v46, %v2974_v47  ;;  %v13656_v1 = vld [vmem:[#allocation7 + $0x10] sm:$0xff]  }
  0xdb   :  { %12598 = vmatprep.mubr.msk.bf16.mxu0 %vm144_vm2, %v11434_v60  ;;  %v11438_v53 = vcombine.low %v2947_v50, %v2951_v51  ;;  %v2971_v60 = vsel %vm14247_vm6, %v11432_v44, %v2970_v45  ;;  %12618 = vmatprep.subr.bf16.mxu1 %v13656_v1  ;;  %v13929_v2 = vmov 0  }
  0xdc   :  { %v11441_v62 = vcombine.low %v2971_v60, %v2975_v61  ;;  %3247 = vst [vmem:[#allocation2 + $0x18] sm:$0xf] %v13929_v2  ;;  %3248 = vst [vmem:[#allocation2 + $0x1c] sm:$0x1] %v13929_v2 }
  0xdd   :  { %12619 = vmatpush3.bf16.msra.mxu1 %v13656_v1  ;;  %3241 = vst [vmem:[#allocation2] sm:$0xf] %v13929_v2  ;;  %3242 = vst [vmem:[#allocation2 + $0x4] sm:$0x1] %v13929_v2 }
  0xde   :  { %3243 = vst [vmem:[#allocation2 + $0x8] sm:$0xf] %v13929_v2  ;;  %3244 = vst [vmem:[#allocation2 + $0xc] sm:$0x1] %v13929_v2  ;;  %12620 = vmatprep.subr.bf16.mxu1 %v13657_v3 }
  0xdf   :  { %3245 = vst [vmem:[#allocation2 + $0x10] sm:$0xf] %v13929_v2  ;;  %3246 = vst [vmem:[#allocation2 + $0x14] sm:$0x1] %v13929_v2 }
  0xe0   :  { %3249 = vst [vmem:[#allocation2 + $0x20] sm:$0xf] %v13929_v2  ;;  %3250 = vst [vmem:[#allocation2 + $0x24] sm:$0x1] %v13929_v2 }
  0xe1   :  { %3251 = vst [vmem:[#allocation2 + $0x28] sm:$0xf] %v13929_v2  ;;  %3252 = vst [vmem:[#allocation2 + $0x2c] sm:$0x1] %v13929_v2  ;;  %12621 = vmatpush3.bf16.msra.mxu1 %v13657_v3 }
  0xe2   :  { %12599 = vmatmul.mubr.msk.bf16.vlgmr.msra.gmra.mrb[0].mxu0 %vm144_vm2, %v11435_v33  ;;  %3253 = vst [vmem:[#allocation2 + $0x30] sm:$0xf] %v13929_v2  ;;  %3254 = vst [vmem:[#allocation2 + $0x34] sm:$0x1] %v13929_v2  ;;  %12622 = vmatprep.subr.bf16.mxu1 %v13658_v4 }
  0xe3   :  { %12602 = vmatprep.mubr.msk.bf16.mxu0 %vm144_vm2, %v11436_v20  ;;  %3255 = vst [vmem:[#allocation2 + $0x38] sm:$0xf] %v13929_v2  ;;  %3256 = vst [vmem:[#allocation2 + $0x3c] sm:$0x1] %v13929_v2  ;;  %v3527_v3 = vld [vmem:[#allocation2 + $0x1c] sm:$0x1] }
  0xe4   :  { %3257 = vst [vmem:[#allocation2 + $0x40] sm:$0xf] %v13929_v2  ;;  %3258 = vst [vmem:[#allocation2 + $0x44] sm:$0x1] %v13929_v2  ;;  %v3849_v26 = vld [vmem:[#allocation2] sm:$0xf] }
  0xe5   :  { %3259 = vst [vmem:[#allocation2 + $0x48] sm:$0xf] %v13929_v2  ;;  %3260 = vst [vmem:[#allocation2 + $0x4c] sm:$0x1] %v13929_v2  ;;  %12623 = vmatpush3.bf16.msra.mxu1 %v13658_v4  ;;  %v3882_v27 = vshrl.u32 %v3849_v26, 16  ;;  %v3885_v28 = vshll.u32 %v3849_v26, 16 }
  0xe6   :  { %3261 = vst [vmem:[#allocation2 + $0x50] sm:$0xf] %v13929_v2  ;;  %3262 = vst [vmem:[#allocation2 + $0x54] sm:$0x1] %v13929_v2  ;;  %12624 = vmatprep.subr.bf16.mxu1 %v13659_v5  ;;  %v15081_v45 = vld [vmem:[#allocation2 + $0x4] sm:$0x1] }
  0xe7   :  { %3263 = vst [vmem:[#allocation2 + $0x58] sm:$0xf] %v13929_v2  ;;  %3264 = vst [vmem:[#allocation2 + $0x5c] sm:$0x1] %v13929_v2  ;;  %v3884_v29 = vrot.slane %v3882_v27, 4  ;;  %v3887_v32 = vrot.slane %v3885_v28, 5 }
  0xe8   :  { %3265 = vst [vmem:[#allocation2 + $0x60] sm:$0xf] %v13929_v2  ;;  %3266 = vst [vmem:[#allocation2 + $0x64] sm:$0x1] %v13929_v2  ;;  %v3891_v54 = vshll.u32 %v15081_v45, 16 }
  0xe9   :  { %3267 = vst [vmem:[#allocation2 + $0x68] sm:$0xf] %v13929_v2  ;;  %3268 = vst [vmem:[#allocation2 + $0x6c] sm:$0x1] %v13929_v2  ;;  %12625 = vmatpush3.bf16.msra.mxu1 %v13659_v5  ;;  %v3888_v42 = vor.u32 %v3887_v32, %v3884_v29  ;;  %v3515_v32 = vld [vmem:[#allocation2 + $0xc] sm:$0x1] }
  0xea   :  { %12603 = vmatmul.mubr.msk.bf16.gmra.mrb[4].mxu0 %vm144_vm2, %v11437_v52  ;;  %3269 = vst [vmem:[#allocation2 + $0x70] sm:$0xf] %v13929_v2  ;;  %3270 = vst [vmem:[#allocation2 + $0x74] sm:$0x1] %v13929_v2  ;;  %12626 = vmatprep.subr.bf16.mxu1 %v13660_v6 }
  0xeb   :  { %12606 = vmatprep.mubr.msk.bf16.mxu0 %vm144_vm2, %v11438_v53  ;;  %3271 = vst [vmem:[#allocation2 + $0x78] sm:$0xf] %v13929_v2  ;;  %3272 = vst [vmem:[#allocation2 + $0x7c] sm:$0x1] %v13929_v2  ;;  %v15085_v56 = vrot.slane %v3888_v42, 4 }
  0xec   :  { %3273 = vst [vmem:[#allocation2 + $0x80] sm:$0xf] %v13929_v2  ;;  %3274 = vst [vmem:[#allocation2 + $0x84] sm:$0x1] %v13929_v2 }
  0xed   :  { %3275 = vst [vmem:[#allocation2 + $0x88] sm:$0xf] %v13929_v2  ;;  %3276 = vst [vmem:[#allocation2 + $0x8c] sm:$0x1] %v13929_v2  ;;  %12627 = vmatpush3.bf16.msra.mxu1 %v13660_v6  ;;  %v3865_v37 = vld [vmem:[#allocation2 + $0x50] sm:$0xf] }
  0xee   :  { %3277 = vst [vmem:[#allocation2 + $0x90] sm:$0xf] %v13929_v2  ;;  %3278 = vst [vmem:[#allocation2 + $0x94] sm:$0x1] %v13929_v2  ;;  %12628 = vmatprep.subr.bf16.mxu1 %v13661_v7  ;;  %v3994_v46 = vshrl.u32 %v3865_v37, 16  ;;  %v3997_v47 = vshll.u32 %v3865_v37, 16 }
  0xef   :  { %3279 = vst [vmem:[#allocation2 + $0x98] sm:$0xf] %v13929_v2  ;;  %3280 = vst [vmem:[#allocation2 + $0x9c] sm:$0x1] %v13929_v2 }
  0xf0   :  { %7057 = vst [vmem:[#allocation3] sm:$0xf] %v13929_v2  ;;  %7058 = vst [vmem:[#allocation3 + $0x4] sm:$0x1] %v13929_v2  ;;  %v15090_v60 = vrot.slane %v3997_v47, 5 }
  0xf1   :  { %7059 = vst [vmem:[#allocation3 + $0x8] sm:$0xf] %v13929_v2  ;;  %7060 = vst [vmem:[#allocation3 + $0xc] sm:$0x1] %v13929_v2  ;;  %12629 = vmatpush3.bf16.msra.mxu1 %v13661_v7 }
  0xf2   :  { %12607 = vmatmul.mubr.msk.bf16.gmra.mrb[8].mxu0 %vm144_vm2, %v11439_v58  ;;  %7061 = vst [vmem:[#allocation3 + $0x10] sm:$0xf] %v13929_v2  ;;  %7062 = vst [vmem:[#allocation3 + $0x14] sm:$0x1] %v13929_v2  ;;  %12646 = vmatprep.subr.bf16.mxu1 %v15051_v8 }
  0xf3   :  { %12610 = vmatprep.mubr.msk.bf16.mxu0 %vm144_vm2, %v11440_v48  ;;  %7063 = vst [vmem:[#allocation3 + $0x18] sm:$0xf] %v13929_v2  ;;  %7064 = vst [vmem:[#allocation3 + $0x1c] sm:$0x1] %v13929_v2  ;;  %v15088_v48 = vrot.slane %v3994_v46, 4 }
  0xf4   :  { %7065 = vst [vmem:[#allocation3 + $0x20] sm:$0xf] %v13929_v2  ;;  %7066 = vst [vmem:[#allocation3 + $0x24] sm:$0x1] %v13929_v2 }
  0xf5   :  { %7067 = vst [vmem:[#allocation3 + $0x28] sm:$0xf] %v13929_v2  ;;  %7068 = vst [vmem:[#allocation3 + $0x2c] sm:$0x1] %v13929_v2 }
  0xf6   :  { %7069 = vst [vmem:[#allocation3 + $0x30] sm:$0xf] %v13929_v2  ;;  %7070 = vst [vmem:[#allocation3 + $0x34] sm:$0x1] %v13929_v2 }
  0xf7   :  { %7071 = vst [vmem:[#allocation3 + $0x38] sm:$0xf] %v13929_v2  ;;  %7072 = vst [vmem:[#allocation3 + $0x3c] sm:$0x1] %v13929_v2 }
  0xf8   :  { %7073 = vst [vmem:[#allocation3 + $0x40] sm:$0xf] %v13929_v2  ;;  %7074 = vst [vmem:[#allocation3 + $0x44] sm:$0x1] %v13929_v2 }
  0xf9   :  { %7075 = vst [vmem:[#allocation3 + $0x48] sm:$0xf] %v13929_v2  ;;  %7076 = vst [vmem:[#allocation3 + $0x4c] sm:$0x1] %v13929_v2 }
  0xfa   :  { %12611 = vmatmul.mubr.msk.bf16.gmra.mrb[12].mxu0 %vm144_vm2, %v11441_v62  ;;  %7077 = vst [vmem:[#allocation3 + $0x50] sm:$0xf] %v13929_v2  ;;  %7078 = vst [vmem:[#allocation3 + $0x54] sm:$0x1] %v13929_v2 }
  0xfb   :  { %7079 = vst [vmem:[#allocation3 + $0x58] sm:$0xf] %v13929_v2  ;;  %7080 = vst [vmem:[#allocation3 + $0x5c] sm:$0x1] %v13929_v2 }
  0xfc   :  { %7081 = vst [vmem:[#allocation3 + $0x60] sm:$0xf] %v13929_v2  ;;  %7082 = vst [vmem:[#allocation3 + $0x64] sm:$0x1] %v13929_v2 }
  0xfd   :  { %7083 = vst [vmem:[#allocation3 + $0x68] sm:$0xf] %v13929_v2  ;;  %7084 = vst [vmem:[#allocation3 + $0x6c] sm:$0x1] %v13929_v2 }
  0xfe   :  { %7085 = vst [vmem:[#allocation3 + $0x70] sm:$0xf] %v13929_v2  ;;  %7086 = vst [vmem:[#allocation3 + $0x74] sm:$0x1] %v13929_v2 }
  0xff   :  { %7087 = vst [vmem:[#allocation3 + $0x78] sm:$0xf] %v13929_v2  ;;  %7088 = vst [vmem:[#allocation3 + $0x7c] sm:$0x1] %v13929_v2 }
 0x100   :  { %7089 = vst [vmem:[#allocation3 + $0x80] sm:$0xf] %v13929_v2  ;;  %7090 = vst [vmem:[#allocation3 + $0x84] sm:$0x1] %v13929_v2 }
 0x101   :  { %7091 = vst [vmem:[#allocation3 + $0x88] sm:$0xf] %v13929_v2  ;;  %7092 = vst [vmem:[#allocation3 + $0x8c] sm:$0x1] %v13929_v2 }
 0x102   :  { %7093 = vst [vmem:[#allocation3 + $0x90] sm:$0xf] %v13929_v2  ;;  %7094 = vst [vmem:[#allocation3 + $0x94] sm:$0x1] %v13929_v2 }
 0x103   :  { %7095 = vst [vmem:[#allocation3 + $0x98] sm:$0xf] %v13929_v2  ;;  %7096 = vst [vmem:[#allocation3 + $0x9c] sm:$0x1] %v13929_v2  ;;  %v3524_v2 = vld [vmem:[#allocation2 + $0x18] sm:$0xf] }
 0x192   :  { %v12500_v16 = vpop.f32.mrb[0].mxu1 }
 0x193   :  { %v1224_v9 = vpop.f32.mrb[1].mxu1 }
 0x194   :  { %v12501_v10 = vpop.f32.mrb[2].mxu1 }
 0x195   :  { %v1227_v11 = vpop.f32.mrb[3].mxu1 }
 0x19a   :  { %v12504_v12 = vpop.f32.mrb[4].mxu1 }
 0x19b   :  { %v1240_v13 = vpop.f32.mrb[5].mxu1 }
 0x19c   :  { %v15054_v14 = vpop.f32.mrb[6].mxu1 }
 0x19d   :  { %v15056_v15 = vpop.f32.mrb[7].mxu1 }
 0x1a2   :  { %v15058_v17 = vpop.f32.mrb[8].mxu1 }
 0x1a3   :  { %v15060_v18 = vpop.f32.mrb[9].mxu1 }
 0x1a4   :  { %v15062_v19 = vpop.f32.mrb[10].mxu1 }
 0x1a5   :  { %v15064_v21 = vpop.f32.mrb[11].mxu1 }
 0x1aa   :  { %v15066_v22 = vpop.f32.mrb[12].mxu1 }
 0x1ab   :  { %v15068_v23 = vpop.f32.mrb[13].mxu1 }
 0x1ac   :  { %v15070_v24 = vpop.f32.mrb[14].mxu1 }
 0x1ad   :  { %v15072_v25 = vpop.f32.mrb[15].mxu1 }
 0x1b5   :  { %v12600_v33 = vpop.f32.mrb[0].mxu0 }
 0x1b6   :  { %v13222_v35 = vadd.f32 %v12600_v33, %v12500_v16  ;;  %v3075_v36 = vpop.f32.mrb[1].mxu0 }
 0x1b7   :  { %v13223_v20 = vadd.f32 %v3075_v36, %v1224_v9  ;;  %v12601_v38 = vpop.f32.mrb[2].mxu0 }
 0x1b8   :  { %v3211_v39 = vadd.f32 %v13222_v35, %v15077_v34  ;;  %v13224_v40 = vadd.f32 %v12601_v38, %v12501_v10  ;;  %v3078_v41 = vpop.f32.mrb[3].mxu0 }
 0x1b9   :  { %v3209_v43 = vadd.f32 %v13223_v20, %v15077_v34  ;;  %v13225_v44 = vadd.f32 %v3078_v41, %v1227_v11  ;;  %v3509_v11 = vld [vmem:[#allocation2 + $0x8] sm:$0xf] }
 0x1ba   :  { %v3227_v49 = vmax.f32 %v3211_v39, 0.0  ;;  %v3212_v31 = vadd.f32 %v13224_v40, %v15077_v34  ;;  %v3530_v39 = vld [vmem:[#allocation2 + $0x20] sm:$0xf] }
 0x1bb   :  { %v3225_v50 = vmax.f32 %v3209_v43, 0.0  ;;  %v3210_v51 = vadd.f32 %v13225_v44, %v15077_v34  ;;  %v3533_v43 = vld [vmem:[#allocation2 + $0x24] sm:$0x1] }
 0x1bc   :  { %v12010_v52 = vpack.c.bf16 %v3227_v49, %v3227_v49  ;;  %v3228_v53 = vmax.f32 %v3212_v31, 0.0 }
 0x1bd   :  { %v12008_v55 = vpack.c.bf16 %v3225_v50, %v3225_v50  ;;  %v3226_v57 = vmax.f32 %v3210_v51, 0.0  ;;  %v12604_v58 = vpop.f32.mrb[4].mxu0  ;;  %v3518_v51 = vld [vmem:[#allocation2 + $0x10] sm:$0xf] }
 0x1be   :  { %v3362_v61 = vshrl.u32 %v12010_v52, 16  ;;  %v3365_v62 = vshll.u32 %v12010_v52, 16  ;;  %v12011_v63 = vpack.c.bf16 %v3228_v53, %v3228_v53  ;;  %v13226_v0 = vadd.f32 %v12604_v58, %v12504_v12  ;;  %v3091_v1 = vpop.f32.mrb[5].mxu0  ;;  %v3521_v52 = vld [vmem:[#allocation2 + $0x14] sm:$0x1] }
 0x1bf   :  { %v3346_v4 = vshrl.u32 %v12008_v55, 16  ;;  %v3349_v5 = vshll.u32 %v12008_v55, 16  ;;  %v12009_v6 = vpack.c.bf16 %v3226_v57, %v3226_v57  ;;  %v13227_v7 = vadd.f32 %v3091_v1, %v1240_v13  ;;  %v12605_v16 = vpop.f32.mrb[6].mxu0 }
 0x1c0   :  { %v3364_v9 = vrot.slane %v3362_v61, 7  ;;  %v3370_v26 = vshrl.u32 %v12011_v63, 16  ;;  %v3373_v27 = vshll.u32 %v12011_v63, 16  ;;  %v3215_v12 = vadd.f32 %v13226_v0, %v15077_v34  ;;  %v3094_v28 = vpop.f32.mrb[7].mxu0 }
 0x1c1   :  { %v3348_v13 = vrot.slane %v3346_v4, 7  ;;  %v3354_v33 = vshrl.u32 %v12009_v6, 16  ;;  %v3357_v35 = vshll.u32 %v12009_v6, 16  ;;  %v3213_v36 = vadd.f32 %v13227_v7, %v15077_v34 }
 0x1c2   :  { %v3367_v37 = vor.u32 %v3365_v62, %v3364_v9  ;;  %v3368_v20 = vrot.slane %v3364_v9, 4  ;;  %v3372_v38 = vrot.slane %v3370_v26, 7  ;;  %v3231_v40 = vmax.f32 %v3215_v12, 0.0 }
 0x1c3   :  { %v3351_v41 = vor.u32 %v3349_v5, %v3348_v13  ;;  %v3352_v42 = vrot.slane %v3348_v13, 4  ;;  %v3356_v44 = vrot.slane %v3354_v33, 7  ;;  %v3229_v46 = vmax.f32 %v3213_v36, 0.0 }
 0x1c4   :  { %v3525_v47 = vsel %vm15094_vm11, %v3367_v37, %v3524_v2  ;;  %v3528_v49 = vsel %vm15101_vm12, %v3368_v20, %v3527_v3  ;;  %v3375_v31 = vor.u32 %v3373_v27, %v3372_v38  ;;  %v3376_v50 = vrot.slane %v3372_v38, 4  ;;  %v3536_v20 = vld [vmem:[#allocation2 + $0x28] sm:$0xf]  ;;  %v3539_v38 = vld [vmem:[#allocation2 + $0x2c] sm:$0x1] }
 0x1c5   :  { %3526 = vst [vmem:[#allocation2 + $0x18] sm:$0xf] %v3525_v47  ;;  %3529 = vst [vmem:[#allocation2 + $0x1c] sm:$0x1] %v3528_v49  ;;  %v3510_v53 = vsel %vm15094_vm11, %v3351_v41, %v3509_v11  ;;  %v3516_v55 = vsel %vm15101_vm12, %v3352_v42, %v3515_v32  ;;  %v3359_v57 = vor.u32 %v3357_v35, %v3356_v44  ;;  %v3360_v58 = vrot.slane %v3356_v44, 4  ;;  %v12608_v61 = vpop.f32.mrb[8].mxu0 }
 0x1c6   :  { %3511 = vst [vmem:[#allocation2 + $0x8] sm:$0xf] %v3510_v53  ;;  %3517 = vst [vmem:[#allocation2 + $0xc] sm:$0x1] %v3516_v55  ;;  %v3531_v62 = vsel %vm15094_vm11, %v3375_v31, %v3530_v39  ;;  %v3534_v63 = vsel %vm15101_vm12, %v3376_v50, %v3533_v43  ;;  %v12014_v0 = vpack.c.bf16 %v3231_v40, %v3231_v40  ;;  %v3107_v2 = vpop.f32.mrb[9].mxu0 }
 0x1c7   :  { %v12012_v1 = vpack.c.bf16 %v3229_v46, %v3229_v46  ;;  %3532 = vst [vmem:[#allocation2 + $0x20] sm:$0xf] %v3531_v62  ;;  %3535 = vst [vmem:[#allocation2 + $0x24] sm:$0x1] %v3534_v63  ;;  %v3519_v3 = vsel %vm15094_vm11, %v3359_v57, %v3518_v51  ;;  %v3522_v4 = vsel %vm15101_vm12, %v3360_v58, %v3521_v52  ;;  %v12609_v7 = vpop.f32.mrb[10].mxu0 }
 0x1c8   :  { %v13228_v5 = vadd.f32 %v12605_v16, %v15054_v14  ;;  %v13229_v6 = vadd.f32 %v3094_v28, %v15056_v15  ;;  %3520 = vst [vmem:[#allocation2 + $0x10] sm:$0xf] %v3519_v3  ;;  %3523 = vst [vmem:[#allocation2 + $0x14] sm:$0x1] %v3522_v4  ;;  %v3394_v9 = vshrl.u32 %v12014_v0, 16  ;;  %v3397_v11 = vshll.u32 %v12014_v0, 16 }
 0x1c9   :  { %v3378_v26 = vshrl.u32 %v12012_v1, 16  ;;  %v3381_v27 = vshll.u32 %v12012_v1, 16  ;;  %v3110_v12 = vpop.f32.mrb[11].mxu0  ;;  %v13230_v33 = vadd.f32 %v12608_v61, %v15058_v17  ;;  %v13231_v35 = vadd.f32 %v3107_v2, %v15060_v18  ;;  %v3548_v14 = vld [vmem:[#allocation2 + $0x38] sm:$0xf] }
 0x1ca   :  { %v3216_v13 = vadd.f32 %v13228_v5, %v15077_v34  ;;  %v3214_v32 = vadd.f32 %v13229_v6, %v15077_v34  ;;  %v3396_v36 = vrot.slane %v3394_v9, 7  ;;  %v3551_v16 = vld [vmem:[#allocation2 + $0x3c] sm:$0x1]  ;;  %v13232_v28 = vadd.f32 %v12609_v7, %v15062_v19  ;;  %v3554_v0 = vld [vmem:[#allocation2 + $0x40] sm:$0xf] }
 0x1cb   :  { %v3380_v15 = vrot.slane %v3378_v26, 7  ;;  %v13233_v37 = vadd.f32 %v3110_v12, %v15064_v21  ;;  %v3219_v41 = vadd.f32 %v13230_v33, %v15077_v34  ;;  %v3217_v42 = vadd.f32 %v13231_v35, %v15077_v34  ;;  %v13665_v7 = vld [vmem:[#allocation7 + $0x48] sm:$0xff]  }
 0x1cc   :  { %v3232_v39 = vmax.f32 %v3216_v13, 0.0  ;;  %v3230_v40 = vmax.f32 %v3214_v32, 0.0  ;;  %v3399_v43 = vor.u32 %v3397_v11, %v3396_v36  ;;  %v3400_v17 = vrot.slane %v3396_v36, 4  ;;  %v3557_v11 = vld [vmem:[#allocation2 + $0x44] sm:$0x1] }
 0x1cd   :  { %v3383_v44 = vor.u32 %v3381_v27, %v3380_v15  ;;  %v3384_v18 = vrot.slane %v3380_v15, 4  ;;  %v3235_v49 = vmax.f32 %v3219_v41, 0.0  ;;  %v3233_v31 = vmax.f32 %v3217_v42, 0.0  ;;  %v12612_v50 = vpop.f32.mrb[12].mxu0  ;;  %v13662_v55 = vld [vmem:[#allocation2] ss:$8 sps:$4 sm:$0xff]  }
 0x1ce   :  { %v12015_v46 = vpack.c.bf16 %v3232_v39, %v3232_v39  ;;  %v12013_v47 = vpack.c.bf16 %v3230_v40, %v3230_v40  ;;  %v3549_v19 = vsel %vm15094_vm11, %v3399_v43, %v3548_v14  ;;  %v3552_v21 = vsel %vm15101_vm12, %v3400_v17, %v3551_v16  ;;  %v3123_v53 = vpop.f32.mrb[13].mxu0  ;;  %12630 = vmatprep.mubr.bf16.mxu1 %v13662_v55  ;;  %v3542_v27 = vld [vmem:[#allocation2 + $0x30] sm:$0xf]  ;;  %v3545_v32 = vld [vmem:[#allocation2 + $0x34] sm:$0x1] }
 0x1cf   :  { %v3537_v51 = vsel %vm15094_vm11, %v3383_v44, %v3536_v20  ;;  %v3540_v52 = vsel %vm15101_vm12, %v3384_v18, %v3539_v38  ;;  %3550 = vst [vmem:[#allocation2 + $0x38] sm:$0xf] %v3549_v19  ;;  %3553 = vst [vmem:[#allocation2 + $0x3c] sm:$0x1] %v3552_v21  ;;  %v15140_v63 = vpop.f32.mrb[14].mxu0  ;;  %v12018_v1 = vpack.c.bf16 %v3235_v49, %v3235_v49  ;;  %v13667_v18 = vld [vmem:[#allocation7 + $0x50] sm:$0xff]  }
 0x1d0   :  { %3538 = vst [vmem:[#allocation2 + $0x28] sm:$0xf] %v3537_v51  ;;  %3541 = vst [vmem:[#allocation2 + $0x2c] sm:$0x1] %v3540_v52  ;;  %v3402_v57 = vshrl.u32 %v12015_v46, 16  ;;  %v3405_v58 = vshll.u32 %v12015_v46, 16  ;;  %v12016_v2 = vpack.c.bf16 %v3233_v31, %v3233_v31  ;;  %v3220_v3 = vadd.f32 %v13232_v28, %v15077_v34 }
 0x1d1   :  { %v3386_v61 = vshrl.u32 %v12013_v47, 16  ;;  %v3389_v62 = vshll.u32 %v12013_v47, 16  ;;  %v3218_v4 = vadd.f32 %v13233_v37, %v15077_v34  ;;  %v15144_v5 = vpop.f32.mrb[15].mxu0  ;;  %v13664_v6 = vld [vmem:[#allocation2 + $0x10] ss:$8 sps:$4 sm:$0xff]   ;;  %v13234_v12 = vadd.f32 %v12612_v50, %v15066_v22 }
 0x1d2   :  { %v3404_v9 = vrot.slane %v3402_v57, 7  ;;  %v13235_v13 = vadd.f32 %v3123_v53, %v15068_v23  ;;  %v3426_v33 = vshrl.u32 %v12018_v1, 16  ;;  %v3429_v35 = vshll.u32 %v12018_v1, 16  ;;  %12631 = vmatmul.mubr.bf16.vlgmr.msra.gmra.mrb[16].mxu1 %v13664_v6  ;;  %v3572_v20 = vld [vmem:[#allocation2 + $0x68] sm:$0xf] }
 0x1d3   :  { %v3388_v26 = vrot.slane %v3386_v61, 7  ;;  %v3410_v36 = vshrl.u32 %v12016_v2, 16  ;;  %v3413_v14 = vshll.u32 %v12016_v2, 16  ;;  %12647 = vmatpush3.bf16.msra.mxu1 %v15051_v8  ;;  %v3575_v39 = vld [vmem:[#allocation2 + $0x6c] sm:$0x1]  ;;  %v3236_v41 = vmax.f32 %v3220_v3, 0.0 }
 0x1d4   :  { %v3407_v16 = vor.u32 %v3405_v58, %v3404_v9  ;;  %v3408_v15 = vrot.slane %v3404_v9, 4  ;;  %v3428_v38 = vrot.slane %v3426_v33, 7  ;;  %v3234_v22 = vmax.f32 %v3218_v4, 0.0  ;;  %12648 = vmatprep.subr.bf16.mxu1 %v13665_v7  ;;  %v3560_v44 = vld [vmem:[#allocation2 + $0x58] sm:$0xf]  ;;  %v13669_v61 = vld [vmem:[#allocation7 + $0x58] sm:$0xff]  }
 0x1d5   :  { %v3391_v28 = vor.u32 %v3389_v62, %v3388_v26  ;;  %v3392_v37 = vrot.slane %v3388_v26, 4  ;;  %v3412_v40 = vrot.slane %v3410_v36, 7  ;;  %v3563_v8 = vld [vmem:[#allocation2 + $0x5c] sm:$0x1]  ;;  %v12019_v19 = vpack.c.bf16 %v3236_v41, %v3236_v41  ;;  %v3851_v62 = vld [vmem:[#allocation2 + $0x8] sm:$0xf] }
 0x1d6   :  { %v3555_v23 = vsel %vm15094_vm11, %v3407_v16, %v3554_v0  ;;  %v3558_v42 = vsel %vm15101_vm12, %v3408_v15, %v3557_v11  ;;  %v3431_v46 = vor.u32 %v3429_v35, %v3428_v38  ;;  %v3432_v47 = vrot.slane %v3428_v38, 4  ;;  %v3578_v4 = vld [vmem:[#allocation2 + $0x70] sm:$0xf]  ;;  %v3566_v33 = vld [vmem:[#allocation2 + $0x60] sm:$0xf] }
 0x1d7   :  { %v3543_v43 = vsel %vm15094_vm11, %v3391_v28, %v3542_v27  ;;  %v3546_v17 = vsel %vm15101_vm12, %v3392_v37, %v3545_v32  ;;  %3556 = vst [vmem:[#allocation2 + $0x40] sm:$0xf] %v3555_v23  ;;  %3559 = vst [vmem:[#allocation2 + $0x44] sm:$0x1] %v3558_v42  ;;  %v3415_v49 = vor.u32 %v3413_v14, %v3412_v40  ;;  %v3416_v31 = vrot.slane %v3412_v40, 4  ;;  %v13671_v28 = vld [vmem:[#allocation7 + $0x60] sm:$0xff]  }
 0x1d8   :  { %3544 = vst [vmem:[#allocation2 + $0x30] sm:$0xf] %v3543_v43  ;;  %3547 = vst [vmem:[#allocation2 + $0x34] sm:$0x1] %v3546_v17  ;;  %v13666_v50 = vld [vmem:[#allocation2 + $0x20] ss:$8 sps:$4 sm:$0xff]   ;;  %v12017_v21 = vpack.c.bf16 %v3234_v22, %v3234_v22  ;;  %v3223_v51 = vadd.f32 %v13234_v12, %v15077_v34  ;;  %v3221_v52 = vadd.f32 %v13235_v13, %v15077_v34  ;;  %12649 = vmatpush3.bf16.msra.mxu1 %v13665_v7 }
 0x1d9   :  { %v3573_v53 = vsel %vm15094_vm11, %v3431_v46, %v3572_v20  ;;  %v3576_v55 = vsel %vm15101_vm12, %v3432_v47, %v3575_v39  ;;  %v3561_v57 = vsel %vm15094_vm11, %v3415_v49, %v3560_v44  ;;  %v3564_v58 = vsel %vm15101_vm12, %v3416_v31, %v3563_v8  ;;  %12634 = vmatprep.mubr.bf16.mxu1 %v13666_v50  ;;  %v3581_v27 = vld [vmem:[#allocation2 + $0x74] sm:$0x1]  ;;  %v3569_v35 = vld [vmem:[#allocation2 + $0x64] sm:$0x1]  ;;  %v3596_v42 = vld [vmem:[#allocation2 + $0x88] sm:$0xf] }
 0x1da   :  { %3574 = vst [vmem:[#allocation2 + $0x68] sm:$0xf] %v3573_v53  ;;  %3577 = vst [vmem:[#allocation2 + $0x6c] sm:$0x1] %v3576_v55  ;;  %v3434_v0 = vshrl.u32 %v12019_v19, 16  ;;  %v3437_v1 = vshll.u32 %v12019_v19, 16  ;;  %12650 = vmatprep.subr.bf16.mxu1 %v13667_v18  ;;  %v13236_v9 = vadd.f32 %v15140_v63, %v15070_v24  ;;  %v13237_v11 = vadd.f32 %v15144_v5, %v15072_v25 }
 0x1db   :  { %3562 = vst [vmem:[#allocation2 + $0x58] sm:$0xf] %v3561_v57  ;;  %3565 = vst [vmem:[#allocation2 + $0x5c] sm:$0x1] %v3564_v58  ;;  %v3418_v2 = vshrl.u32 %v12017_v21, 16  ;;  %v3421_v3 = vshll.u32 %v12017_v21, 16 }
 0x1dc   :  { %v3239_v6 = vmax.f32 %v3223_v51, 0.0  ;;  %v3237_v7 = vmax.f32 %v3221_v52, 0.0  ;;  %v3436_v26 = vrot.slane %v3434_v0, 7  ;;  %12651 = vmatpush3.bf16.msra.mxu1 %v13667_v18  ;;  %v3896_v13 = vshrl.u32 %v3851_v62, 16  ;;  %v3599_v43 = vld [vmem:[#allocation2 + $0x8c] sm:$0x1] }
 0x1dd   :  { %v3420_v12 = vrot.slane %v3418_v2, 7  ;;  %v3899_v32 = vshll.u32 %v3851_v62, 16  ;;  %v3224_v16 = vadd.f32 %v13236_v9, %v15077_v34  ;;  %v3222_v15 = vadd.f32 %v13237_v11, %v15077_v34  ;;  %12652 = vmatprep.subr.bf16.mxu1 %v13669_v61  ;;  %v3584_v17 = vld [vmem:[#allocation2 + $0x78] sm:$0xf]  ;;  %v3587_v44 = vld [vmem:[#allocation2 + $0x7c] sm:$0x1] }
 0x1de   :  { %v12022_v36 = vpack.c.bf16 %v3239_v6, %v3239_v6  ;;  %v12020_v14 = vpack.c.bf16 %v3237_v7, %v3237_v7  ;;  %v3439_v24 = vor.u32 %v3437_v1, %v3436_v26  ;;  %v3440_v63 = vrot.slane %v3436_v26, 4  ;;  %v13673_v8 = vld [vmem:[#allocation7 + $0x68] sm:$0xff]   ;;  %v3852_v55 = vld [vmem:[#allocation2 + $0xc] sm:$0x1]  ;;  %v3853_v0 = vld [vmem:[#allocation2 + $0x10] sm:$0xf] }
 0x1df   :  { %v3423_v37 = vor.u32 %v3421_v3, %v3420_v12  ;;  %v3424_v25 = vrot.slane %v3420_v12, 4  ;;  %v13668_v5 = vld [vmem:[#allocation2 + $0x30] ss:$8 sps:$4 sm:$0xff]   ;;  %v3240_v47 = vmax.f32 %v3224_v16, 0.0  ;;  %v3238_v49 = vmax.f32 %v3222_v15, 0.0 }
 0x1e0   :  { %v3458_v20 = vshrl.u32 %v12022_v36, 16  ;;  %v3461_v38 = vshll.u32 %v12022_v36, 16  ;;  %v3442_v39 = vshrl.u32 %v12020_v14, 16  ;;  %v3445_v40 = vshll.u32 %v12020_v14, 16  ;;  %12635 = vmatmul.mubr.bf16.gmra.mrb[20].mxu1 %v13668_v5  ;;  %v15195_v7 = vld [vmem:[#allocation2 + $0x54] sm:$0x1] }
 0x1e1   :  { %v3579_v41 = vsel %vm15094_vm11, %v3439_v24, %v3578_v4  ;;  %v3582_v22 = vsel %vm15101_vm12, %v3440_v63, %v3581_v27  ;;  %v3567_v34 = vsel %vm15094_vm11, %v3423_v37, %v3566_v33  ;;  %v3570_v23 = vsel %vm15101_vm12, %v3424_v25, %v3569_v35  ;;  %12653 = vmatpush3.bf16.msra.mxu1 %v13669_v61  ;;  %v3602_v11 = vld [vmem:[#allocation2 + $0x90] sm:$0xf]  ;;  %v3605_v26 = vld [vmem:[#allocation2 + $0x94] sm:$0x1]  ;;  %v3590_v12 = vld [vmem:[#allocation2 + $0x80] sm:$0xf] }
 0x1e2   :  { %3580 = vst [vmem:[#allocation2 + $0x70] sm:$0xf] %v3579_v41  ;;  %3583 = vst [vmem:[#allocation2 + $0x74] sm:$0x1] %v3582_v22  ;;  %v3460_v18 = vrot.slane %v3458_v20, 7  ;;  %v3444_v46 = vrot.slane %v3442_v39, 7  ;;  %12654 = vmatprep.subr.bf16.mxu1 %v13671_v28  ;;  %v12023_v57 = vpack.c.bf16 %v3240_v47, %v3240_v47  ;;  %v12021_v58 = vpack.c.bf16 %v3238_v49, %v3238_v49 }
 0x1e3   :  { %3568 = vst [vmem:[#allocation2 + $0x60] sm:$0xf] %v3567_v34  ;;  %3571 = vst [vmem:[#allocation2 + $0x64] sm:$0x1] %v3570_v23  ;;  %v13670_v31 = vld [vmem:[#allocation2 + $0x50] ss:$8 sps:$4 sm:$0xff]   ;;  %v4000_v61 = vor.u32 %v15090_v60, %v15088_v48 }
 0x1e4   :  { %v3898_v50 = vrot.slane %v3896_v13, 4  ;;  %v3901_v19 = vrot.slane %v3899_v32, 5  ;;  %v3463_v21 = vor.u32 %v3461_v38, %v3460_v18  ;;  %v3464_v51 = vrot.slane %v3460_v18, 4  ;;  %12638 = vmatprep.mubr.bf16.mxu1 %v13670_v31  ;;  %v13675_v48 = vld [vmem:[#allocation7 + $0x70] sm:$0xff]   ;;  %v3855_v32 = vld [vmem:[#allocation2 + $0x18] sm:$0xf] }
 0x1e5   :  { %v3447_v52 = vor.u32 %v3445_v40, %v3444_v46  ;;  %v3448_v53 = vrot.slane %v3444_v46, 4  ;;  %v15183_v62 = vrot.slane %v3891_v54, 5  ;;  %12655 = vmatpush3.bf16.msra.mxu1 %v13671_v28  ;;  %v3466_v45 = vshrl.u32 %v12023_v57, 16  ;;  %v3593_v13 = vld [vmem:[#allocation2 + $0x84] sm:$0x1]  ;;  %v13677_v38 = vld [vmem:[#allocation7 + $0x78] sm:$0xff]  }
 0x1e6   :  { %v3597_v1 = vsel %vm15094_vm11, %v3463_v21, %v3596_v42  ;;  %v3600_v2 = vsel %vm15101_vm12, %v3464_v51, %v3599_v43  ;;  %v3450_v54 = vshrl.u32 %v12021_v58, 16  ;;  %12656 = vmatprep.subr.bf16.mxu1 %v13673_v8  ;;  %v3902_v60 = vor.u32 %v3901_v19, %v3898_v50  ;;  %v3854_v41 = vld [vmem:[#allocation2 + $0x14] sm:$0x1]  ;;  %v3857_v18 = vld [vmem:[#allocation2 + $0x20] sm:$0xf] }
 0x1e7   :  { %v3585_v3 = vsel %vm15094_vm11, %v3447_v52, %v3584_v17  ;;  %v3588_v4 = vsel %vm15101_vm12, %v3448_v53, %v3587_v44  ;;  %3598 = vst [vmem:[#allocation2 + $0x88] sm:$0xf] %v3597_v1  ;;  %3601 = vst [vmem:[#allocation2 + $0x8c] sm:$0x1] %v3600_v2  ;;  %v3905_v6 = vshll.u32 %v3852_v55, 16  ;;  %v3469_v9 = vshll.u32 %v12023_v57, 16 }
 0x1e8   :  { %3586 = vst [vmem:[#allocation2 + $0x78] sm:$0xf] %v3585_v3  ;;  %3589 = vst [vmem:[#allocation2 + $0x7c] sm:$0x1] %v3588_v4  ;;  %v3453_v27 = vshll.u32 %v12021_v58, 16  ;;  %v3910_v33 = vshrl.u32 %v3853_v0, 16  ;;  %v3894_v49 = vsel %vm14060_vm3, %v15085_v56, %v15183_v62 }
 0x1e9   :  { %v3913_v35 = vshll.u32 %v3853_v0, 16  ;;  %v3468_v36 = vrot.slane %v3466_v45, 7  ;;  %v3452_v14 = vrot.slane %v3450_v54, 7  ;;  %12657 = vmatpush3.bf16.msra.mxu1 %v13673_v8  ;;  %v15197_v24 = vrot.slane %v4000_v61, 4  ;;  %v15208_v44 = vld [vmem:[#allocation7 + $0x80] sm:$0xff]  }
 0x1ea   :  { %v13672_v16 = vld [vmem:[#allocation2 + $0x60] ss:$8 sps:$4 sm:$0xff]   ;;  %v3912_v15 = vrot.slane %v3910_v33, 4  ;;  %v4003_v63 = vshll.u32 %v15195_v7, 16  ;;  %12658 = vmatprep.subr.bf16.mxu1 %v13675_v48  ;;  %v3903_v39 = vrot.slane %v3902_v60, 4  ;;  %v3907_v40 = vrot.slane %v3905_v6, 5 }
 0x1eb   :  { %v3915_v28 = vrot.slane %v3913_v35, 5  ;;  %v3471_v37 = vor.u32 %v3469_v9, %v3468_v36  ;;  %v3472_v25 = vrot.slane %v3468_v36, 4  ;;  %v3455_v5 = vor.u32 %v3453_v27, %v3452_v14  ;;  %12639 = vmatmul.mubr.bf16.gmra.mrb[24].mxu1 %v13672_v16  ;;  %v3856_v8 = vld [vmem:[#allocation2 + $0x1c] sm:$0x1]  ;;  %v3859_v46 = vld [vmem:[#allocation2 + $0x28] sm:$0xf] }
 0x1ec   :  { %v3456_v20 = vrot.slane %v3452_v14, 4  ;;  %v3924_v34 = vshrl.u32 %v3855_v32, 16  ;;  %v3927_v50 = vshll.u32 %v3855_v32, 16  ;;  %v3858_v19 = vld [vmem:[#allocation2 + $0x24] sm:$0x1]  ;;  %v3908_v51 = vsel %vm14060_vm3, %v3903_v39, %v3907_v40 }
 0x1ed   :  { %v3916_v22 = vor.u32 %v3915_v28, %v3912_v15  ;;  %v3603_v23 = vsel %vm15094_vm11, %v3471_v37, %v3602_v11  ;;  %v3606_v42 = vsel %vm15101_vm12, %v3472_v25, %v3605_v26  ;;  %v3591_v43 = vsel %vm15094_vm11, %v3455_v5, %v3590_v12  ;;  %12659 = vmatpush3.bf16.msra.mxu1 %v13675_v48  ;;  %v3860_v21 = vld [vmem:[#allocation2 + $0x2c] sm:$0x1]  ;;  %v3861_v57 = vld [vmem:[#allocation2 + $0x30] sm:$0xf]  ;;  %v3863_v2 = vld [vmem:[#allocation2 + $0x38] sm:$0xf] }
 0x1ee   :  { %v3594_v17 = vsel %vm15101_vm12, %v3456_v20, %v3593_v13  ;;  %3604 = vst [vmem:[#allocation2 + $0x90] sm:$0xf] %v3603_v23  ;;  %3607 = vst [vmem:[#allocation2 + $0x94] sm:$0x1] %v3606_v42  ;;  %12660 = vmatprep.subr.bf16.mxu1 %v13677_v38  ;;  %v3926_v31 = vrot.slane %v3924_v34, 4  ;;  %v3938_v52 = vshrl.u32 %v3857_v18, 16  ;;  %v11485_v13 = vcombine.low %v3894_v49, %v3908_v51 }
 0x1ef   :  { %3592 = vst [vmem:[#allocation2 + $0x80] sm:$0xf] %v3591_v43  ;;  %3595 = vst [vmem:[#allocation2 + $0x84] sm:$0x1] %v3594_v17  ;;  %v13674_v47 = vld [vmem:[#allocation2 + $0x70] ss:$8 sps:$4 sm:$0xff]  }
 0x1f0   :  { %12642 = vmatprep.mubr.bf16.mxu1 %v13674_v47  ;;  %v3941_v53 = vshll.u32 %v3857_v18, 16  ;;  %v3952_v55 = vshrl.u32 %v3859_v46, 16  ;;  %v3917_v58 = vrot.slane %v3916_v22, 4  ;;  %v3919_v0 = vshll.u32 %v3854_v41, 16  ;;  %v3862_v11 = vld [vmem:[#allocation2 + $0x34] sm:$0x1] }
 0x1f1   :  { %v3929_v61 = vrot.slane %v3927_v50, 5  ;;  %v3955_v1 = vshll.u32 %v3859_v46, 16  ;;  %12661 = vmatpush3.bf16.msra.mxu1 %v13677_v38  ;;  %v3933_v56 = vshll.u32 %v3856_v8, 16  ;;  %v3940_v62 = vrot.slane %v3938_v52, 4  ;;  %v3867_v28 = vld [vmem:[#allocation2 + $0x58] sm:$0xf] }
 0x1f2   :  { %v3943_v3 = vrot.slane %v3941_v53, 5  ;;  %v3954_v4 = vrot.slane %v3952_v55, 4  ;;  %12678 = vmatprep.subr.bf16.mxu1 %v15208_v44  ;;  %v3961_v48 = vshll.u32 %v3860_v21, 16  ;;  %v3966_v60 = vshrl.u32 %v3861_v57, 16  ;;  %v3864_v5 = vld [vmem:[#allocation2 + $0x3c] sm:$0x1] }
 0x1f3   :  { %v3930_v45 = vor.u32 %v3929_v61, %v3926_v31  ;;  %v3957_v54 = vrot.slane %v3955_v1, 5  ;;  %v3947_v9 = vshll.u32 %v3858_v19, 16  ;;  %v3969_v26 = vshll.u32 %v3861_v57, 16  ;;  %v3868_v23 = vld [vmem:[#allocation2 + $0x5c] sm:$0x1] }
 0x1f4   :  { %v3944_v6 = vor.u32 %v3943_v3, %v3940_v62  ;;  %v3980_v27 = vshrl.u32 %v3863_v2, 16  ;;  %v3921_v32 = vrot.slane %v3919_v0, 5  ;;  %v15219_v35 = vrot.slane %v4003_v63, 5  ;;  %v3869_v63 = vld [vmem:[#allocation2 + $0x60] sm:$0xf] }
 0x1f5   :  { %v3958_v33 = vor.u32 %v3957_v54, %v3954_v4  ;;  %v3931_v36 = vrot.slane %v3930_v45, 4  ;;  %v3968_v16 = vrot.slane %v3966_v60, 4  ;;  %v3971_v15 = vrot.slane %v3969_v26, 5  ;;  %v3870_v47 = vld [vmem:[#allocation2 + $0x64] sm:$0x1] }
 0x1f6   :  { %v13676_v12 = vld [vmem:[#allocation2 + $0x80] ss:$8 sps:$4 sm:$0xff]   ;;  %v3945_v14 = vrot.slane %v3944_v6, 4  ;;  %v3963_v25 = vrot.slane %v3961_v48, 5  ;;  %v3982_v20 = vrot.slane %v3980_v27, 4  ;;  %v3983_v38 = vshll.u32 %v3863_v2, 16 }
 0x1f7   :  { %12643 = vmatmul.mubr.bf16.gmra.mrb[28].mxu1 %v13676_v12  ;;  %v3959_v37 = vrot.slane %v3958_v33, 4  ;;  %v3922_v39 = vsel %vm14060_vm3, %v3917_v58, %v3921_v32  ;;  %v3935_v40 = vrot.slane %v3933_v56, 5  ;;  %v3949_v41 = vrot.slane %v3947_v9, 5  ;;  %v3871_v49 = vld [vmem:[#allocation2 + $0x68] sm:$0xf]  ;;  %v13679_v58 = vld [vmem:[#allocation7 + $0x88] sm:$0xff]  }
 0x1f8   :  { %12662 = vmatprep.mubr.bf16.mxu1 %v11485_v13  ;;  %v3975_v7 = vshll.u32 %v3862_v11, 16  ;;  %v3985_v34 = vrot.slane %v3983_v38, 5  ;;  %v4008_v42 = vshrl.u32 %v3867_v28, 16  ;;  %v4011_v43 = vshll.u32 %v3867_v28, 16  ;;  %v3873_v57 = vld [vmem:[#allocation2 + $0x70] sm:$0xf] }
 0x1f9   :  { %v3964_v22 = vsel %vm14060_vm3, %v3959_v37, %v3963_v25  ;;  %v3936_v17 = vsel %vm14060_vm3, %v3931_v36, %v3935_v40  ;;  %v3950_v8 = vsel %vm14060_vm3, %v3945_v14, %v3949_v41  ;;  %v3972_v18 = vor.u32 %v3971_v15, %v3968_v16  ;;  %v15229_v1 = vld [vmem:[#allocation2 + $0x6c] sm:$0x1]  ;;  %v3875_v62 = vld [vmem:[#allocation2 + $0x78] sm:$0xf]  ;;  %v13680_v48 = vld [vmem:[#allocation7 + $0x90] sm:$0xff]  }
 0x1fa   :  { %v3989_v46 = vshll.u32 %v3864_v5, 16  ;;  %v3986_v31 = vor.u32 %v3985_v34, %v3982_v20  ;;  %v4010_v50 = vrot.slane %v4008_v42, 4  ;;  %v4013_v19 = vrot.slane %v4011_v43, 5  ;;  %v3876_v11 = vld [vmem:[#allocation2 + $0x7c] sm:$0x1] }
 0x1fb   :  { %v4022_v21 = vshrl.u32 %v3869_v63, 16  ;;  %v11486_v51 = vcombine.low %v3922_v39, %v3936_v17  ;;  %v11487_v52 = vcombine.low %v3950_v8, %v3964_v22  ;;  %v3977_v53 = vrot.slane %v3975_v7, 5  ;;  %v3877_v16 = vld [vmem:[#allocation2 + $0x80] sm:$0xf]  ;;  %v3879_v38 = vld [vmem:[#allocation2 + $0x88] sm:$0xf] }
 0x1fc   :  { %v4025_v55 = vshll.u32 %v3869_v63, 16  ;;  %v4014_v0 = vor.u32 %v4013_v19, %v4010_v50  ;;  %v4017_v61 = vshll.u32 %v3868_v23, 16  ;;  %v4031_v2 = vshll.u32 %v3870_v47, 16  ;;  %v13681_v22 = vld [vmem:[#allocation7 + $0x98] sm:$0xff]  }
 0x1fd   :  { %v4036_v56 = vshrl.u32 %v3871_v49, 16  ;;  %v3973_v3 = vrot.slane %v3972_v18, 4  ;;  %v4024_v4 = vrot.slane %v4022_v21, 4  ;;  %v4039_v54 = vshll.u32 %v3871_v49, 16  ;;  %v3878_v21 = vld [vmem:[#allocation2 + $0x84] sm:$0x1] }
 0x1fe   :  { %v4027_v45 = vrot.slane %v4025_v55, 5  ;;  %v3987_v60 = vrot.slane %v3986_v31, 4  ;;  %v3991_v6 = vrot.slane %v3989_v46, 5  ;;  %v4015_v9 = vrot.slane %v4014_v0, 4  ;;  %v13682_v46 = vld [vmem:[#allocation7 + $0xa0] sm:$0xff]  }
 0x1ff   :  { %12663 = vmatmul.mubr.bf16.vlgmr.msra.gmra.mrb[16].mxu1 %v11486_v51  ;;  %v4050_v26 = vshrl.u32 %v3873_v57, 16  ;;  %v4006_v27 = vsel %vm14060_vm3, %v15197_v24, %v15219_v35  ;;  %v4038_v12 = vrot.slane %v4036_v56, 4  ;;  %v4041_v13 = vrot.slane %v4039_v54, 5  ;;  %v3874_v35 = vld [vmem:[#allocation2 + $0x74] sm:$0x1] }
 0x200   :  { %12679 = vmatpush3.bf16.msra.mxu1 %v15208_v44  ;;  %12666 = vmatprep.mubr.bf16.mxu1 %v11487_v52  ;;  %v4019_v32 = vrot.slane %v4017_v61, 5  ;;  %v4033_v33 = vrot.slane %v4031_v2, 5  ;;  %v4053_v14 = vshll.u32 %v3873_v57, 16  ;;  %v3978_v15 = vsel %vm14060_vm3, %v3973_v3, %v3977_v53  ;;  %v4348_v2 = vld [vmem:[#allocation2 + $0x4] sm:$0x1] }
 0x201   :  { %12680 = vmatprep.subr.bf16.mxu1 %v13679_v58  ;;  %v4052_v36 = vrot.slane %v4050_v26, 4  ;;  %v4028_v28 = vor.u32 %v4027_v45, %v4024_v4  ;;  %v4045_v44 = vshll.u32 %v15229_v1, 16  ;;  %v4064_v37 = vshrl.u32 %v3875_v62, 16  ;;  %v4347_v1 = vld [vmem:[#allocation2] sm:$0xe] }
 0x202   :  { %v3992_v25 = vsel %vm14060_vm3, %v3987_v60, %v3991_v6  ;;  %v4020_v24 = vsel %vm14060_vm3, %v4015_v9, %v4019_v32  ;;  %v4055_v5 = vrot.slane %v4053_v14, 5  ;;  %v4067_v20 = vshll.u32 %v3875_v62, 16  ;;  %v4349_v56 = vld [vmem:[#allocation2 + $0x8] sm:$0xe]  ;;  %v3880_v4 = vld [vmem:[#allocation2 + $0x8c] sm:$0x1] }
 0x203   :  { %v4042_v39 = vor.u32 %v4041_v13, %v4038_v12  ;;  %v4066_v40 = vrot.slane %v4064_v37, 4  ;;  %v4073_v41 = vshll.u32 %v3876_v11, 16  ;;  %v4078_v7 = vshrl.u32 %v3877_v16, 16  ;;  %v4350_v60 = vld [vmem:[#allocation2 + $0xc] sm:$0x1]  ;;  %v13683_v11 = vld [vmem:[#allocation7 + $0xa8] sm:$0xff]  }
 0x204   :  { %12681 = vmatpush3.bf16.msra.mxu1 %v13679_v58  ;;  %v11488_v63 = vcombine.low %v3978_v15, %v3992_v25  ;;  %v4056_v34 = vor.u32 %v4055_v5, %v4052_v36  ;;  %v4069_v23 = vrot.slane %v4067_v20, 5  ;;  %v4081_v42 = vshll.u32 %v3877_v16, 16  ;;  %v13684_v15 = vld [vmem:[#allocation7 + $0xb0] sm:$0xff]   ;;  %v4357_v20 = vld [vmem:[#allocation2 + $0x28] sm:$0xe] }
 0x205   :  { %12682 = vmatprep.subr.bf16.mxu1 %v13680_v48  ;;  %v11489_v43 = vcombine.low %v4006_v27, %v4020_v24  ;;  %v4029_v17 = vrot.slane %v4028_v28, 4  ;;  %v4080_v8 = vrot.slane %v4078_v7, 4  ;;  %v4092_v18 = vshrl.u32 %v3879_v38, 16  ;;  %v4351_v24 = vld [vmem:[#allocation2 + $0x10] sm:$0xe] }
 0x206   :  { %v4059_v47 = vshll.u32 %v3874_v35, 16  ;;  %v4070_v49 = vor.u32 %v4069_v23, %v4066_v40  ;;  %v4083_v31 = vrot.slane %v4081_v42, 5  ;;  %v4043_v50 = vrot.slane %v4042_v39, 4  ;;  %v4352_v35 = vld [vmem:[#allocation2 + $0x14] sm:$0x1]  ;;  %v13685_v40 = vld [vmem:[#allocation7 + $0xb8] sm:$0xff]  }
 0x207   :  { %12667 = vmatmul.mubr.bf16.gmra.mrb[20].mxu1 %v11488_v63  ;;  %v4075_v19 = vrot.slane %v4073_v41, 5  ;;  %v4094_v51 = vrot.slane %v4092_v18, 4  ;;  %v4095_v52 = vshll.u32 %v3879_v38, 16  ;;  %v4057_v53 = vrot.slane %v4056_v34, 4  ;;  %v4358_v38 = vld [vmem:[#allocation2 + $0x2c] sm:$0x1] }
 0x208   :  { %12683 = vmatpush3.bf16.msra.mxu1 %v13680_v48  ;;  %12670 = vmatprep.mubr.bf16.mxu1 %v11489_v43  ;;  %v4071_v55 = vrot.slane %v4070_v49, 4  ;;  %v4034_v57 = vsel %vm14060_vm3, %v4029_v17, %v4033_v33  ;;  %v4047_v58 = vrot.slane %v4045_v44, 5  ;;  %v4084_v0 = vor.u32 %v4083_v31, %v4080_v8  ;;  %v4353_v41 = vld [vmem:[#allocation2 + $0x18] sm:$0xe]  ;;  %v4354_v7 = vld [vmem:[#allocation2 + $0x1c] sm:$0x1] }
 0x209   :  { %12684 = vmatprep.subr.bf16.mxu1 %v13681_v22  ;;  %v4097_v61 = vrot.slane %v4095_v52, 5  ;;  %v4061_v62 = vrot.slane %v4059_v47, 5  ;;  %v4087_v54 = vshll.u32 %v3878_v21, 16  ;;  %v4101_v12 = vshll.u32 %v3880_v4, 16  ;;  %v4355_v23 = vld [vmem:[#allocation2 + $0x20] sm:$0xe] }
 0x20a   :  { %v4076_v3 = vsel %vm14060_vm3, %v4071_v55, %v4075_v19  ;;  %v4048_v45 = vsel %vm14060_vm3, %v4043_v50, %v4047_v58  ;;  %v4085_v27 = vrot.slane %v4084_v0, 4  ;;  %v11501_v13 = vrot.slane %v4347_v1, 9  ;;  %v4356_v42 = vld [vmem:[#allocation2 + $0x24] sm:$0x1]  ;;  %v4359_v19 = vld [vmem:[#allocation2 + $0x30] sm:$0xe] }
 0x20b   :  { %v4098_v48 = vor.u32 %v4097_v61, %v4094_v51  ;;  %v11490_v6 = vcombine.low %v4034_v57, %v4048_v45  ;;  %v4062_v9 = vsel %vm14060_vm3, %v4057_v53, %v4061_v62  ;;  %v4413_v32 = vrot.slane %v4348_v2, 5  ;;  %v4360_v21 = vld [vmem:[#allocation2 + $0x34] sm:$0x1]  ;;  %v4363_v51 = vld [vmem:[#allocation2 + $0x50] sm:$0xe]  ;;  %v13687_v61 = vld [vmem:[#allocation7 + $0xc8] sm:$0xff]  }
 0x20c   :  { %12685 = vmatpush3.bf16.msra.mxu1 %v13681_v22  ;;  %v11491_v26 = vcombine.low %v4062_v9, %v4076_v3  ;;  %v11502_v33 = vrot.slane %v4349_v56, 9  ;;  %v4417_v36 = vrot.slane %v4350_v60, 5  ;;  %v4089_v14 = vrot.slane %v4087_v54, 5  ;;  %v4364_v53 = vld [vmem:[#allocation2 + $0x54] sm:$0x1]  ;;  %v13688_v9 = vld [vmem:[#allocation7 + $0xd0] sm:$0xff]  }
 0x20d   :  { %12686 = vmatprep.subr.bf16.mxu1 %v13682_v46  ;;  %v4099_v16 = vrot.slane %v4098_v48, 4  ;;  %v4103_v44 = vrot.slane %v4101_v12, 5  ;;  %v4414_v37 = vsel %vm14247_vm6, %v11501_v13, %v4413_v32  ;;  %v11503_v22 = vrot.slane %v4351_v24, 9  ;;  %v4365_v55 = vld [vmem:[#allocation2 + $0x58] sm:$0xe] }
 0x20e   :  { %v4090_v28 = vsel %vm14060_vm3, %v4085_v27, %v4089_v14  ;;  %v4418_v25 = vsel %vm14247_vm6, %v11502_v33, %v4417_v36  ;;  %v4421_v34 = vrot.slane %v4352_v35, 5  ;;  %v11506_v43 = vrot.slane %v4357_v20, 9  ;;  %v4366_v57 = vld [vmem:[#allocation2 + $0x5c] sm:$0x1]  ;;  %v4361_v1 = vld [vmem:[#allocation2 + $0x38] sm:$0xe] }
 0x20f   :  { %12671 = vmatmul.mubr.bf16.gmra.mrb[24].mxu1 %v11490_v6  ;;  %v4104_v5 = vsel %vm14060_vm3, %v4099_v16, %v4103_v44  ;;  %v11517_v63 = vcombine.low %v4414_v37, %v4418_v25  ;;  %v4433_v17 = vrot.slane %v4358_v38, 5  ;;  %v11504_v8 = vrot.slane %v4353_v41, 9  ;;  %v4362_v2 = vld [vmem:[#allocation2 + $0x3c] sm:$0x1]  ;;  %v4367_v12 = vld [vmem:[#allocation2 + $0x60] sm:$0xe] }
 0x210   :  { %12687 = vmatpush3.bf16.msra.mxu1 %v13682_v46  ;;  %12674 = vmatprep.mubr.bf16.mxu1 %v11491_v26  ;;  %v11492_v39 = vcombine.low %v4090_v28, %v4104_v5  ;;  %v4425_v18 = vrot.slane %v4354_v7, 5  ;;  %v13686_v46 = vld [vmem:[#allocation7 + $0xc0] sm:$0xff]   ;;  %v11505_v47 = vrot.slane %v4355_v23, 9  ;;  %v4429_v49 = vrot.slane %v4356_v42, 5  ;;  %v4368_v13 = vld [vmem:[#allocation2 + $0x64] sm:$0x1] }
 0x211   :  { %12688 = vmatprep.subr.bf16.mxu1 %v13683_v11  ;;  %v4422_v31 = vsel %vm14247_vm6, %v11503_v22, %v4421_v34  ;;  %v4434_v50 = vsel %vm14247_vm6, %v11506_v43, %v4433_v17  ;;  %v11507_v62 = vrot.slane %v4359_v19, 9  ;;  %v4437_v3 = vrot.slane %v4360_v21, 5  ;;  %v4373_v33 = vld [vmem:[#allocation2 + $0x78] sm:$0xe]  ;;  %v4374_v36 = vld [vmem:[#allocation2 + $0x7c] sm:$0x1] }
 0x212   :  { %v4426_v52 = vsel %vm14247_vm6, %v11504_v8, %v4425_v18  ;;  %v4430_v0 = vsel %vm14247_vm6, %v11505_v47, %v4429_v49  ;;  %v11509_v4 = vrot.slane %v4363_v51, 9  ;;  %v4445_v45 = vrot.slane %v4364_v53, 5  ;;  %v13689_v16 = vld [vmem:[#allocation7 + $0xd8] sm:$0xff]   ;;  %v4371_v24 = vld [vmem:[#allocation2 + $0x70] sm:$0xe]  ;;  %v13691_v8 = vld [vmem:[#allocation7 + $0xe8] sm:$0xff]  }
 0x213   :  { %v11518_v58 = vcombine.low %v4422_v31, %v4426_v52  ;;  %v11519_v56 = vcombine.low %v4430_v0, %v4434_v50  ;;  %v11510_v54 = vrot.slane %v4365_v55, 9  ;;  %v4449_v48 = vrot.slane %v4366_v57, 5  ;;  %v4370_v28 = vld [vmem:[#allocation2 + $0x6c] sm:$0x1]  ;;  %v4372_v35 = vld [vmem:[#allocation2 + $0x74] sm:$0x1] }
 0x214   :  { %12689 = vmatpush3.bf16.msra.mxu1 %v13683_v11  ;;  %v11508_v60 = vrot.slane %v4361_v1, 9  ;;  %v4441_v6 = vrot.slane %v4362_v2, 5  ;;  %v4438_v11 = vsel %vm14247_vm6, %v11507_v62, %v4437_v3  ;;  %v4446_v26 = vsel %vm14247_vm6, %v11509_v4, %v4445_v45  ;;  %v4375_v34 = vld [vmem:[#allocation2 + $0x80] sm:$0xe]  ;;  %v4376_v23 = vld [vmem:[#allocation2 + $0x84] sm:$0x1] }
 0x215   :  { %12690 = vmatprep.subr.bf16.mxu1 %v13684_v15  ;;  %v4450_v27 = vsel %vm14247_vm6, %v11510_v54, %v4449_v48  ;;  %v11511_v37 = vrot.slane %v4367_v12, 9  ;;  %v4453_v25 = vrot.slane %v4368_v13, 5  ;;  %v11514_v5 = vrot.slane %v4373_v33, 9  ;;  %v4377_v18 = vld [vmem:[#allocation2 + $0x88] sm:$0xe]  ;;  %v13692_v21 = vld [vmem:[#allocation7 + $0xf0] sm:$0xff]  }
 0x216   :  { %v4442_v32 = vsel %vm14247_vm6, %v11508_v60, %v4441_v6  ;;  %v11521_v44 = vcombine.low %v4446_v26, %v4450_v27  ;;  %v4465_v20 = vrot.slane %v4374_v36, 5  ;;  %v11513_v41 = vrot.slane %v4371_v24, 9  ;;  %v13694_v55 = vld [vmem:[#allocation7 + $0xf8] sm:$0xff]   ;;  %v13696_v0 = vld [vmem:[#allocation2 + $0x18] ss:$8 sps:$4 sm:$0xff]  }
 0x217   :  { %12675 = vmatmul.mubr.bf16.gmra.mrb[28].mxu1 %v11492_v39  ;;  %v11520_v14 = vcombine.low %v4438_v11, %v4442_v32  ;;  %v4457_v39 = vrot.slane %v4370_v28, 5  ;;  %v4461_v7 = vrot.slane %v4372_v35, 5  ;;  %v11515_v49 = vrot.slane %v4375_v34, 9  ;;  %v13693_v57 = vld [vmem:[#allocation2 + $0x8] ss:$8 sps:$4 sm:$0xff]   ;;  %v13699_v62 = vld [vmem:[#allocation7 + $0x110] sm:$0xff]  }
 0x218   :  { %12691 = vmatpush3.bf16.msra.mxu1 %v13684_v15  ;;  %12694 = vmatprep.mubr.bf16.mxu1 %v11517_v63  ;;  %v4369_v15 = vld [vmem:[#allocation2 + $0x68] sm:$0xe]  ;;  %v4454_v63 = vsel %vm14247_vm6, %v11511_v37, %v4453_v25  ;;  %v4466_v22 = vsel %vm14247_vm6, %v11514_v5, %v4465_v20  ;;  %v4469_v31 = vrot.slane %v4376_v23, 5  ;;  %v11516_v50 = vrot.slane %v4377_v18, 9  ;;  %v4997_v60 = vld [vmem:[#allocation2 + $0x20] sm:$0xf] }
 0x219   :  { %12692 = vmatprep.subr.bf16.mxu1 %v13685_v40  ;;  %v11512_v38 = vrot.slane %v4369_v15, 9  ;;  %v4462_v17 = vsel %vm14247_vm6, %v11513_v41, %v4461_v7  ;;  %v13697_v1 = vld [vmem:[#allocation2 + $0x28] ss:$8 sps:$4 sm:$0xff]   ;;  %v13700_v6 = vld [vmem:[#allocation2 + $0x38] ss:$8 sps:$4 sm:$0xff]   ;;  %v5066_v36 = vshrl.u32 %v4997_v60, 16 }
 0x21a   :  { %v11523_v47 = vcombine.low %v4462_v17, %v4466_v22  ;;  %v4470_v51 = vsel %vm14247_vm6, %v11515_v49, %v4469_v31  ;;  %v4991_v2 = vld [vmem:[#allocation2 + $0x8] sm:$0xf]  ;;  %v4995_v13 = vld [vmem:[#allocation2 + $0x18] sm:$0xf]  ;;  %v4992_v32 = vld [vmem:[#allocation2 + $0xc] sm:$0x1] }
 0x21b   :  { %v4458_v42 = vsel %vm14247_vm6, %v11512_v38, %v4457_v39  ;;  %v5024_v3 = vshrl.u32 %v4991_v2, 16  ;;  %v5027_v4 = vshll.u32 %v4991_v2, 16  ;;  %v13702_v48 = vld [vmem:[#allocation7 + $0x118] sm:$0xff]   ;;  %v4994_v33 = vld [vmem:[#allocation2 + $0x14] sm:$0x1]  ;;  %v5055_v37 = vshll.u32 %v4995_v13, 16 }
 0x21c   :  { %12693 = vmatpush3.bf16.msra.mxu1 %v13685_v40  ;;  %v13690_v40 = vld [vmem:[#allocation7 + $0xe0] sm:$0xff]   ;;  %v11522_v43 = vcombine.low %v4454_v63, %v4458_v42  ;;  %v4999_v15 = vld [vmem:[#allocation2 + $0x28] sm:$0xf]  ;;  %v4996_v35 = vld [vmem:[#allocation2 + $0x1c] sm:$0x1]  ;;  %v5068_v20 = vrot.slane %v5066_v36, 4 }
 0x21d   :  { %12710 = vmatprep.subr.bf16.mxu1 %v13686_v46  ;;  %v5026_v11 = vrot.slane %v5024_v3, 4  ;;  %v5029_v26 = vrot.slane %v5027_v4, 5  ;;  %v5001_v28 = vld [vmem:[#allocation2 + $0x30] sm:$0xf]  ;;  %v4998_v5 = vld [vmem:[#allocation2 + $0x24] sm:$0x1] }
 0x21e   :  { %v5080_v39 = vshrl.u32 %v4999_v15, 16  ;;  %v5033_v41 = vshll.u32 %v4992_v32, 16  ;;  %v5047_v7 = vshll.u32 %v4994_v33, 16  ;;  %v5094_v63 = vshrl.u32 %v5001_v28, 16  ;;  %v13704_v34 = vld [vmem:[#allocation2 + $0x68] ss:$8 sps:$4 sm:$0xff]  }
 0x21f   :  { %12695 = vmatmul.mubr.bf16.vlgmr.msra.gmra.mrb[16].mxu1 %v11518_v58  ;;  %v13695_v58 = vld [vmem:[#allocation7 + $0x100] sm:$0xff]   ;;  %v5030_v25 = vor.u32 %v5029_v26, %v5026_v11  ;;  %v5097_v22 = vshll.u32 %v5001_v28, 16  ;;  %v13706_v23 = vld [vmem:[#allocation7 + $0x128] sm:$0xff]   ;;  %v5061_v18 = vshll.u32 %v4996_v35, 16  ;;  %v5009_v2 = vld [vmem:[#allocation2 + $0x60] sm:$0xf] }
 0x220   :  { %12711 = vmatpush3.bf16.msra.mxu1 %v13686_v46  ;;  %12698 = vmatprep.mubr.bf16.mxu1 %v11519_v56  ;;  %v4378_v46 = vld [vmem:[#allocation2 + $0x8c] sm:$0x1]  ;;  %v4993_v56 = vld [vmem:[#allocation2 + $0x10] sm:$0xf]  ;;  %v13705_v49 = vld [vmem:[#allocation2 + $0x78] ss:$8 sps:$4 sm:$0xff]  }
 0x221   :  { %12712 = vmatprep.subr.bf16.mxu1 %v13687_v61  ;;  %v4473_v19 = vrot.slane %v4378_v46, 5  ;;  %v5038_v45 = vshrl.u32 %v4993_v56, 16  ;;  %v5041_v54 = vshll.u32 %v4993_v56, 16  ;;  %v5031_v17 = vrot.slane %v5030_v25, 4  ;;  %v5007_v11 = vld [vmem:[#allocation2 + $0x58] sm:$0xf] }
 0x222   :  { %v5075_v46 = vshll.u32 %v4998_v5, 16  ;;  %v5063_v3 = vrot.slane %v5061_v18, 5  ;;  %v13709_v28 = vld [vmem:[#allocation7 + $0x138] sm:$0xff]   ;;  %v5139_v25 = vshll.u32 %v5007_v11, 16 }
 0x223   :  { %v4474_v52 = vsel %vm14247_vm6, %v11516_v50, %v4473_v19  ;;  %v5040_v27 = vrot.slane %v5038_v45, 4  ;;  %v5043_v12 = vrot.slane %v5041_v54, 5  ;;  %v5082_v50 = vrot.slane %v5080_v39, 4  ;;  %v5002_v45 = vld [vmem:[#allocation2 + $0x34] sm:$0x1] }
 0x224   :  { %12713 = vmatpush3.bf16.msra.mxu1 %v13687_v61  ;;  %v11524_v53 = vcombine.low %v4470_v51, %v4474_v52  ;;  %v13698_v61 = vld [vmem:[#allocation7 + $0x108] sm:$0xff]   ;;  %v5035_v51 = vrot.slane %v5033_v41, 5  ;;  %v5049_v52 = vrot.slane %v5047_v7, 5  ;;  %v5077_v4 = vrot.slane %v5075_v46, 5  ;;  %v5013_v41 = vld [vmem:[#allocation2 + $0x70] sm:$0xf] }
 0x225   :  { %12714 = vmatprep.subr.bf16.mxu1 %v13688_v9  ;;  %v5044_v24 = vor.u32 %v5043_v12, %v5040_v27  ;;  %v5004_v54 = vld [vmem:[#allocation2 + $0x3c] sm:$0x1]  ;;  %v5150_v12 = vshrl.u32 %v5009_v2, 16  ;;  %v5103_v33 = vshll.u32 %v5002_v45, 16  ;;  %v5141_v46 = vrot.slane %v5139_v25, 5 }
 0x226   :  { %v5036_v56 = vsel %vm14060_vm3, %v5031_v17, %v5035_v51  ;;  %v5015_v51 = vld [vmem:[#allocation2 + $0x78] sm:$0xf] }
 0x227   :  { %12699 = vmatmul.mubr.bf16.gmra.mrb[20].mxu1 %v11520_v14  ;;  %v5069_v14 = vshll.u32 %v4997_v60, 16  ;;  %v5152_v39 = vrot.slane %v5150_v12, 4  ;;  %v5195_v45 = vshll.u32 %v5015_v51, 16 }
 0x228   :  { %12715 = vmatpush3.bf16.msra.mxu1 %v13688_v9  ;;  %12702 = vmatprep.mubr.bf16.mxu1 %v11521_v44  ;;  %v13701_v9 = vld [vmem:[#allocation2 + $0x58] ss:$8 sps:$4 sm:$0xff]   ;;  %v5052_v44 = vshrl.u32 %v4995_v13, 16  ;;  %v5153_v13 = vshll.u32 %v5009_v2, 16 }
 0x229   :  { %12716 = vmatprep.subr.bf16.mxu1 %v13689_v16  ;;  %v5071_v38 = vrot.slane %v5069_v14, 5  ;;  %v5197_v25 = vrot.slane %v5195_v45, 5  ;;  %v5020_v45 = vld [vmem:[#allocation2 + $0x8c] sm:$0x1] }
 0x22a   :  { %v5054_v42 = vrot.slane %v5052_v44, 4  ;;  %v5117_v44 = vshll.u32 %v5004_v54, 16 }
 0x22b   :  { %v5072_v31 = vor.u32 %v5071_v38, %v5068_v20 }
 0x22c   :  { %12717 = vmatpush3.bf16.msra.mxu1 %v13689_v16  ;;  %v13703_v16 = vld [vmem:[#allocation7 + $0x120] sm:$0xff]  }
 0x22d   :  { %12718 = vmatprep.subr.bf16.mxu1 %v13690_v40 }
 0x22f   :  { %12703 = vmatmul.mubr.bf16.gmra.mrb[24].mxu1 %v11522_v43  ;;  %v5057_v43 = vrot.slane %v5055_v37, 5  ;;  %v5136_v37 = vshrl.u32 %v5007_v11, 16 }
 0x230   :  { %12719 = vmatpush3.bf16.msra.mxu1 %v13690_v40  ;;  %12706 = vmatprep.mubr.bf16.mxu1 %v11523_v47  ;;  %v5083_v40 = vshll.u32 %v4999_v15, 16  ;;  %v5003_v47 = vld [vmem:[#allocation2 + $0x38] sm:$0xf] }
 0x231   :  { %12720 = vmatprep.subr.bf16.mxu1 %v13691_v8  ;;  %v5138_v18 = vrot.slane %v5136_v37, 4 }
 0x232   :  { %v5085_v19 = vrot.slane %v5083_v40, 5  ;;  %v5155_v40 = vrot.slane %v5153_v13, 5  ;;  %v5021_v13 = vld [vmem:[#allocation2 + $0x90] sm:$0xf] }
 0x234   :  { %12721 = vmatpush3.bf16.msra.mxu1 %v13691_v8  ;;  %v5045_v8 = vrot.slane %v5044_v24, 4  ;;  %v5086_v60 = vor.u32 %v5085_v19, %v5082_v50  ;;  %v5010_v50 = vld [vmem:[#allocation2 + $0x64] sm:$0x1]  ;;  %v5178_v19 = vshrl.u32 %v5013_v41, 16 }
 0x235   :  { %12722 = vmatprep.subr.bf16.mxu1 %v13692_v21 }
 0x236   :  { %v5087_v35 = vrot.slane %v5086_v60, 4  ;;  %v5012_v60 = vld [vmem:[#allocation2 + $0x6c] sm:$0x1] }
 0x237   :  { %12707 = vmatmul.mubr.bf16.gmra.mrb[28].mxu1 %v11524_v53  ;;  %v5096_v53 = vrot.slane %v5094_v63, 4 }
 0x238   :  { %12723 = vmatpush3.bf16.msra.mxu1 %v13692_v21  ;;  %12726 = vmatprep.mubr.bf16.mxu1 %v13693_v57  ;;  %v13707_v21 = vld [vmem:[#allocation7 + $0x130] sm:$0xff]  }
 0x239   :  { %12724 = vmatprep.subr.bf16.mxu1 %v13694_v55  ;;  %v5005_v57 = vld [vmem:[#allocation2 + $0x40] sm:$0xf] }
 0x23c   :  { %12725 = vmatpush3.bf16.msra.mxu1 %v13694_v55  ;;  %v5099_v55 = vrot.slane %v5097_v22, 5  ;;  %v5105_v22 = vrot.slane %v5103_v33, 5 }
 0x23d   :  { %12742 = vmatprep.subr.bf16.mxu1 %v13695_v58 }
 0x23e   :  { %v5100_v27 = vor.u32 %v5099_v55, %v5096_v53  ;;  %v5156_v53 = vor.u32 %v5155_v40, %v5152_v39  ;;  %v5237_v39 = vshll.u32 %v5021_v13, 16 }
 0x23f   :  { %12727 = vmatmul.mubr.bf16.vlgmr.msra.gmra.mrb[16].mxu1 %v13696_v0  ;;  %v5000_v0 = vld [vmem:[#allocation2 + $0x2c] sm:$0x1] }
 0x240   :  { %12743 = vmatpush3.bf16.msra.mxu1 %v13695_v58  ;;  %12730 = vmatprep.mubr.bf16.mxu1 %v13697_v1  ;;  %v5058_v58 = vor.u32 %v5057_v43, %v5054_v42  ;;  %v5111_v1 = vshll.u32 %v5003_v47, 16  ;;  %v5089_v26 = vshll.u32 %v5000_v0, 16  ;;  %v5101_v38 = vrot.slane %v5100_v27, 4  ;;  %v5017_v42 = vld [vmem:[#allocation2 + $0x80] sm:$0xf]  ;;  %v13710_v43 = vld [vmem:[#allocation7 + $0x140] sm:$0xff]  }
 0x241   :  { %12744 = vmatprep.subr.bf16.mxu1 %v13698_v61  ;;  %v5206_v55 = vshrl.u32 %v5017_v42, 16 }
 0x242   :  { %v5059_v32 = vrot.slane %v5058_v58, 4  ;;  %v5113_v14 = vrot.slane %v5111_v1, 5  ;;  %v5091_v63 = vrot.slane %v5089_v26, 5  ;;  %v5157_v26 = vrot.slane %v5156_v53, 4 }
 0x243   :  { %v5208_v27 = vrot.slane %v5206_v55, 4 }
 0x244   :  { %12745 = vmatpush3.bf16.msra.mxu1 %v13698_v61  ;;  %v5108_v61 = vshrl.u32 %v5003_v47, 16  ;;  %v5064_v7 = vsel %vm14060_vm3, %v5059_v32, %v5063_v3  ;;  %v5011_v47 = vld [vmem:[#allocation2 + $0x68] sm:$0xf]  ;;  %v5159_v3 = vshll.u32 %v5010_v50, 16  ;;  %v13712_v32 = vld [vmem:[#allocation7 + $0x150] sm:$0xff]  }
 0x245   :  { %12746 = vmatprep.subr.bf16.mxu1 %v13699_v62  ;;  %v5164_v1 = vshrl.u32 %v5011_v47, 16  ;;  %v5167_v2 = vshll.u32 %v5011_v47, 16 }
 0x246   :  { %v5110_v36 = vrot.slane %v5108_v61, 4  ;;  %v5008_v61 = vld [vmem:[#allocation2 + $0x5c] sm:$0x1] }
 0x247   :  { %12731 = vmatmul.mubr.bf16.gmra.mrb[20].mxu1 %v13700_v6  ;;  %v5122_v6 = vshrl.u32 %v5005_v57, 16  ;;  %v5145_v11 = vshll.u32 %v5008_v61, 16 }
 0x248   :  { %12747 = vmatpush3.bf16.msra.mxu1 %v13699_v62  ;;  %12734 = vmatprep.mubr.bf16.mxu1 %v13701_v9  ;;  %v5050_v62 = vsel %vm14060_vm3, %v5045_v8, %v5049_v52  ;;  %v5125_v9 = vshll.u32 %v5005_v57, 16  ;;  %v15295_v8 = vrot.slane %v5117_v44, 5  ;;  %v5106_v52 = vsel %vm14060_vm3, %v5101_v38, %v5105_v22 }
 0x249   :  { %12748 = vmatprep.subr.bf16.mxu1 %v13702_v48  ;;  %v11549_v15 = vcombine.low %v5036_v56, %v5050_v62  ;;  %v5124_v5 = vrot.slane %v5122_v6, 4  ;;  %v5209_v57 = vshll.u32 %v5017_v42, 16  ;;  %v13711_v56 = vld [vmem:[#allocation7 + $0x148] sm:$0xff]   ;;  %v5142_v62 = vor.u32 %v5141_v46, %v5138_v18  ;;  %v13713_v18 = vld [vmem:[#allocation7 + $0x158] sm:$0xff]  }
 0x24a   :  { %v5127_v20 = vrot.slane %v5125_v9, 5  ;;  %v5180_v6 = vrot.slane %v5178_v19, 4  ;;  %v5161_v44 = vrot.slane %v5159_v3, 5  ;;  %v5234_v38 = vshrl.u32 %v5021_v13, 16 }
 0x24b   :  { %v5211_v12 = vrot.slane %v5209_v57, 5  ;;  %v5147_v40 = vrot.slane %v5145_v11, 5  ;;  %v5239_v19 = vrot.slane %v5237_v39, 5  ;;  %v5229_v13 = vshll.u32 %v5020_v45, 16 }
 0x24c   :  { %12749 = vmatpush3.bf16.msra.mxu1 %v13702_v48  ;;  %v5073_v48 = vrot.slane %v5072_v31, 4  ;;  %v5128_v31 = vor.u32 %v5127_v20, %v5124_v5  ;;  %v5018_v20 = vld [vmem:[#allocation2 + $0x84] sm:$0x1]  ;;  %v5236_v50 = vrot.slane %v5234_v38, 4 }
 0x24d   :  { %12750 = vmatprep.subr.bf16.mxu1 %v13703_v16  ;;  %v5215_v47 = vshll.u32 %v5018_v20, 16  ;;  %v5495_v20 = vld [vmem:[#allocation2 + $0x20] sm:$0xe]  ;;  %v5496_v38 = vld [vmem:[#allocation2 + $0x24] sm:$0x1] }
 0x24e   :  { %v5078_v24 = vsel %vm14060_vm3, %v5073_v48, %v5077_v4  ;;  %v5192_v4 = vshrl.u32 %v5015_v51, 16  ;;  %v5129_v48 = vrot.slane %v5128_v31, 4 }
 0x24f   :  { %12735 = vmatmul.mubr.bf16.gmra.mrb[24].mxu1 %v13704_v34  ;;  %v5006_v34 = vld [vmem:[#allocation2 + $0x44] sm:$0x1]  ;;  %v11550_v17 = vcombine.low %v5064_v7, %v5078_v24  ;;  %v5019_v24 = vld [vmem:[#allocation2 + $0x88] sm:$0xf]  ;;  %v5173_v7 = vshll.u32 %v5012_v60, 16  ;;  %v5217_v61 = vrot.slane %v5215_v47, 5 }
 0x250   :  { %12751 = vmatpush3.bf16.msra.mxu1 %v13703_v16  ;;  %12738 = vmatprep.mubr.bf16.mxu1 %v13705_v49  ;;  %v13708_v16 = vld [vmem:[#allocation2 + $0x88] ss:$8 sps:$4 sm:$0xff]   ;;  %v5092_v49 = vsel %vm14060_vm3, %v5087_v35, %v5091_v63  ;;  %v5131_v0 = vshll.u32 %v5006_v34, 16  ;;  %v5194_v37 = vrot.slane %v5192_v4, 4  ;;  %v5212_v63 = vor.u32 %v5211_v12, %v5208_v27  ;;  %v13715_v27 = vld [vmem:[#allocation7 + $0x168] sm:$0xff]  }
 0x251   :  { %12752 = vmatprep.subr.bf16.mxu1 %v13706_v23  ;;  %v11551_v54 = vcombine.low %v5092_v49, %v5106_v52  ;;  %v5220_v42 = vshrl.u32 %v5019_v24, 16 }
 0x252   :  { %v5198_v46 = vor.u32 %v5197_v25, %v5194_v37  ;;  %v5213_v51 = vrot.slane %v5212_v63, 4 }
 0x253   :  { %v5222_v55 = vrot.slane %v5220_v42, 4 }
 0x254   :  { %12753 = vmatpush3.bf16.msra.mxu1 %v13706_v23  ;;  %v5114_v23 = vor.u32 %v5113_v14, %v5110_v36  ;;  %v5133_v36 = vrot.slane %v5131_v0, 5  ;;  %v5014_v14 = vld [vmem:[#allocation2 + $0x74] sm:$0x1]  ;;  %v5199_v0 = vrot.slane %v5198_v46, 4  ;;  %v5218_v4 = vsel %vm14060_vm3, %v5213_v51, %v5217_v61  ;;  %v5507_v61 = vld [vmem:[#allocation2 + $0x60] sm:$0xe] }
 0x255   :  { %12754 = vmatprep.subr.bf16.mxu1 %v13707_v21  ;;  %v5187_v34 = vshll.u32 %v5014_v14, 16 }
 0x256   :  { %v5115_v58 = vrot.slane %v5114_v23, 4  ;;  %v5134_v35 = vsel %vm14060_vm3, %v5129_v48, %v5133_v36  ;;  %v5016_v23 = vld [vmem:[#allocation2 + $0x7c] sm:$0x1]  ;;  %v5490_v36 = vld [vmem:[#allocation2 + $0xc] sm:$0x1] }
 0x257   :  { %12739 = vmatmul.mubr.bf16.gmra.mrb[28].mxu1 %v13708_v16  ;;  %v5166_v16 = vrot.slane %v5164_v1, 4  ;;  %v5189_v53 = vrot.slane %v5187_v34, 5  ;;  %v5022_v1 = vld [vmem:[#allocation2 + $0x94] sm:$0x1]  ;;  %v5555_v25 = vrot.slane %v5490_v36, 5 }
 0x258   :  { %12755 = vmatpush3.bf16.msra.mxu1 %v13707_v21  ;;  %12758 = vmatprep.mubr.bf16.mxu1 %v11549_v15  ;;  %v5181_v21 = vshll.u32 %v5013_v41, 16  ;;  %v5120_v33 = vsel %vm14060_vm3, %v5115_v58, %v15295_v8  ;;  %v5169_v15 = vrot.slane %v5167_v2, 5  ;;  %v5162_v41 = vsel %vm14060_vm3, %v5157_v26, %v5161_v44  ;;  %v13714_v58 = vld [vmem:[#allocation7 + $0x160] sm:$0xff]   ;;  %v13716_v44 = vld [vmem:[#allocation7 + $0x170] sm:$0xff]   ;;  %v5493_v34 = vld [vmem:[#allocation2 + $0x18] sm:$0xe] }
 0x259   :  { %12756 = vmatprep.subr.bf16.mxu1 %v13709_v28  ;;  %v5175_v2 = vrot.slane %v5173_v7, 5  ;;  %v5243_v60 = vshll.u32 %v5022_v1, 16  ;;  %v5508_v1 = vld [vmem:[#allocation2 + $0x64] sm:$0x1] }
 0x25a   :  { %v5183_v9 = vrot.slane %v5181_v21, 5  ;;  %v5170_v22 = vor.u32 %v5169_v15, %v5166_v16  ;;  %v5201_v21 = vshll.u32 %v5016_v23, 16  ;;  %v5494_v23 = vld [vmem:[#allocation2 + $0x1c] sm:$0x1] }
 0x25c   :  { %12757 = vmatpush3.bf16.msra.mxu1 %v13709_v28  ;;  %v5143_v28 = vrot.slane %v5142_v62, 4  ;;  %v5184_v5 = vor.u32 %v5183_v9, %v5180_v6  ;;  %v5171_v52 = vrot.slane %v5170_v22, 4  ;;  %v5240_v62 = vor.u32 %v5239_v19, %v5236_v50  ;;  %v5491_v6 = vld [vmem:[#allocation2 + $0x10] sm:$0xe]  ;;  %v5492_v9 = vld [vmem:[#allocation2 + $0x14] sm:$0x1] }
 0x25d   :  { %12774 = vmatprep.subr.bf16.mxu1 %v13710_v43  ;;  %v5203_v3 = vrot.slane %v5201_v21, 5  ;;  %v11566_v14 = vrot.slane %v5491_v6, 9  ;;  %v5559_v16 = vrot.slane %v5492_v9, 5  ;;  %v13717_v22 = vld [vmem:[#allocation7 + $0x178] sm:$0xff]   ;;  %v5563_v50 = vrot.slane %v5494_v23, 5  ;;  %v13718_v21 = vld [vmem:[#allocation7 + $0x180] sm:$0xff]  }
 0x25e   :  { %v5148_v8 = vsel %vm14060_vm3, %v5143_v28, %v5147_v40  ;;  %v5185_v31 = vrot.slane %v5184_v5, 4  ;;  %v5245_v28 = vrot.slane %v5243_v60, 5  ;;  %v5499_v40 = vld [vmem:[#allocation2 + $0x30] sm:$0xe]  ;;  %v13751_v19 = vld [vmem:[%s16059_s5 + $0x8] sm:$0xff]   ;;  %v11574_v9 = vrot.slane %v5507_v61, 9 }
 0x25f   :  { %12759 = vmatmul.mubr.bf16.vlgmr.msra.gmra.mrb[16].mxu1 %v11550_v17  ;;  %v11552_v17 = vcombine.low %v5120_v33, %v5134_v35  ;;  %v11553_v49 = vcombine.low %v5148_v8, %v5162_v41  ;;  %v5204_v26 = vsel %vm14060_vm3, %v5199_v0, %v5203_v3  ;;  %v5489_v33 = vld [vmem:[#allocation2 + $0x8] sm:$0xe]  ;;  %v5560_v5 = vsel %vm14247_vm6, %v11566_v14, %v5559_v16  ;;  %v5500_v41 = vld [vmem:[#allocation2 + $0x34] sm:$0x1]  ;;  %v5501_v3 = vld [vmem:[#allocation2 + $0x38] sm:$0xe] }
 0x260   :  { %12775 = vmatpush3.bf16.msra.mxu1 %v13710_v43  ;;  %12762 = vmatprep.mubr.bf16.mxu1 %v11551_v54  ;;  %v5223_v43 = vshll.u32 %v5019_v24, 16  ;;  %v5176_v54 = vsel %vm14060_vm3, %v5171_v52, %v5175_v2  ;;  %v11555_v12 = vcombine.low %v5204_v26, %v5218_v4  ;;  %v11565_v37 = vrot.slane %v5489_v33, 9  ;;  %v5497_v8 = vld [vmem:[#allocation2 + $0x28] sm:$0xe]  ;;  %v5502_v4 = vld [vmem:[#allocation2 + $0x3c] sm:$0x1] }
 0x261   :  { %12776 = vmatprep.subr.bf16.mxu1 %v13711_v56  ;;  %v5231_v24 = vrot.slane %v5229_v13, 5  ;;  %v11570_v46 = vrot.slane %v5499_v40, 9  ;;  %v5575_v47 = vrot.slane %v5500_v41, 5  ;;  %v11569_v51 = vrot.slane %v5497_v8, 9  ;;  %v5505_v60 = vld [vmem:[#allocation2 + $0x58] sm:$0xe] }
 0x262   :  { %v5225_v57 = vrot.slane %v5223_v43, 5  ;;  %v5556_v63 = vsel %vm14247_vm6, %v11565_v37, %v5555_v25  ;;  %v11568_v43 = vrot.slane %v5495_v20, 9  ;;  %v5506_v6 = vld [vmem:[#allocation2 + $0x5c] sm:$0x1]  ;;  %v11571_v26 = vrot.slane %v5501_v3, 9  ;;  %v13722_v23 = vld [vmem:[#allocation7 + $0x1a0] sm:$0xff]  }
 0x263   :  { %v11581_v42 = vcombine.low %v5556_v63, %v5560_v5  ;;  %v11573_v13 = vrot.slane %v5505_v60, 9  ;;  %v5511_v14 = vld [vmem:[#allocation2 + $0x70] sm:$0xe]  ;;  %v5512_v16 = vld [vmem:[#allocation2 + $0x74] sm:$0x1] }
 0x264   :  { %12777 = vmatpush3.bf16.msra.mxu1 %v13711_v56  ;;  %v5190_v56 = vsel %vm14060_vm3, %v5185_v31, %v5189_v53  ;;  %v5226_v48 = vor.u32 %v5225_v57, %v5222_v55  ;;  %v11567_v31 = vrot.slane %v5493_v34, 9  ;;  %v5576_v55 = vsel %vm14247_vm6, %v11570_v46, %v5575_v47  ;;  %v5503_v57 = vld [vmem:[#allocation2 + $0x40] sm:$0xe]  ;;  %v5510_v5 = vld [vmem:[#allocation2 + $0x6c] sm:$0x1] }
 0x265   :  { %12778 = vmatprep.subr.bf16.mxu1 %v13712_v32  ;;  %v11554_v11 = vcombine.low %v5176_v54, %v5190_v56  ;;  %v11572_v54 = vrot.slane %v5503_v57, 9  ;;  %v5513_v40 = vld [vmem:[#allocation2 + $0x78] sm:$0xe]  ;;  %v5514_v41 = vld [vmem:[#allocation2 + $0x7c] sm:$0x1]  ;;  %v5595_v34 = vrot.slane %v5510_v5, 5 }
 0x266   :  { %v5227_v15 = vrot.slane %v5226_v48, 4  ;;  %v5564_v0 = vsel %vm14247_vm6, %v11567_v31, %v5563_v50  ;;  %v5520_v46 = vld [vmem:[#allocation2 + $0x94] sm:$0x1]  ;;  %v13723_v50 = vld [vmem:[#allocation7 + $0x1a8] sm:$0xff]   ;;  %v13728_v3 = vld [vmem:[#allocation2 + $0x20] ss:$8 sps:$4 sm:$0xff]  }
 0x267   :  { %12763 = vmatmul.mubr.bf16.gmra.mrb[20].mxu1 %v11552_v17  ;;  %v5567_v17 = vrot.slane %v5496_v38, 5  ;;  %v11576_v38 = vrot.slane %v5511_v14, 9  ;;  %v6135_v14 = vld [vmem:[#allocation2 + $0x14] sm:$0x1] }
 0x268   :  { %12779 = vmatpush3.bf16.msra.mxu1 %v13712_v32  ;;  %12766 = vmatprep.mubr.bf16.mxu1 %v11553_v49  ;;  %v5241_v32 = vrot.slane %v5240_v62, 4  ;;  %v5232_v39 = vsel %vm14060_vm3, %v5227_v15, %v5231_v24  ;;  %v13750_v49 = vld [vmem:[%s16059_s5] sm:$0xff]   ;;  %v13719_v62 = vld [vmem:[#allocation7 + $0x188] sm:$0xff]   ;;  %v13721_v24 = vld [vmem:[#allocation7 + $0x198] sm:$0xff]  }
 0x269   :  { %12780 = vmatprep.subr.bf16.mxu1 %v13713_v18  ;;  %12902 = vmatprep.subr.bf16.mxu0 %v13750_v49  ;;  %v5568_v53 = vsel %vm14247_vm6, %v11568_v43, %v5567_v17  ;;  %v5603_v43 = vrot.slane %v5514_v41, 5  ;;  %v13735_v5 = vld [vmem:[#allocation7 + $0x1e0] sm:$0xff]   ;;  %v6139_v41 = vld [vmem:[#allocation2 + $0x24] sm:$0x1] }
 0x26a   :  { %v5246_v35 = vsel %vm14060_vm3, %v5241_v32, %v5245_v28  ;;  %12903 = vmatpush3.bf16.msra.mxu0 %v13750_v49  ;;  %v11582_v2 = vcombine.low %v5564_v0, %v5568_v53  ;;  %v5587_v32 = vrot.slane %v5506_v6, 5  ;;  %v5515_v28 = vld [vmem:[#allocation2 + $0x80] sm:$0xe]  ;;  %v5615_v53 = vrot.slane %v5520_v46, 5 }
 0x26b   :  { %v11556_v7 = vcombine.low %v5232_v39, %v5246_v35  ;;  %12904 = vmatprep.subr.bf16.mxu0 %v13751_v19  ;;  %v5509_v35 = vld [vmem:[#allocation2 + $0x68] sm:$0xe]  ;;  %v5599_v39 = vrot.slane %v5512_v16, 5  ;;  %v13731_v6 = vld [vmem:[#allocation7 + $0x1d0] sm:$0xff]  }
 0x26c   :  { %12781 = vmatpush3.bf16.msra.mxu1 %v13713_v18  ;;  %v5498_v18 = vld [vmem:[#allocation2 + $0x2c] sm:$0x1]  ;;  %v5588_v25 = vsel %vm14247_vm6, %v11573_v13, %v5587_v32 }
 0x26d   :  { %12782 = vmatprep.subr.bf16.mxu1 %v13714_v58  ;;  %v5571_v52 = vrot.slane %v5498_v18, 5  ;;  %v5600_v17 = vsel %vm14247_vm6, %v11576_v38, %v5599_v39  ;;  %v5519_v18 = vld [vmem:[#allocation2 + $0x90] sm:$0xe]  ;;  %v6176_v38 = vshll.u32 %v6135_v14, 16 }
 0x26e   :  { %12905 = vmatpush3.bf16.msra.mxu0 %v13751_v19  ;;  %v5517_v19 = vld [vmem:[#allocation2 + $0x88] sm:$0xe] }
 0x26f   :  { %12767 = vmatmul.mubr.bf16.gmra.mrb[24].mxu1 %v11554_v11  ;;  %v5572_v56 = vsel %vm14247_vm6, %v11569_v51, %v5571_v52  ;;  %v5591_v11 = vrot.slane %v5508_v1, 5  ;;  %v11580_v52 = vrot.slane %v5519_v18, 9 }
 0x270   :  { %12783 = vmatpush3.bf16.msra.mxu1 %v13714_v58  ;;  %12770 = vmatprep.mubr.bf16.mxu1 %v11555_v12  ;;  %v5504_v58 = vld [vmem:[#allocation2 + $0x44] sm:$0x1]  ;;  %v11583_v45 = vcombine.low %v5572_v56, %v5576_v55  ;;  %v11579_v55 = vrot.slane %v5517_v19, 9  ;;  %v13725_v56 = vld [vmem:[#allocation2 + $0x10] ss:$8 sps:$4 sm:$0xff]  }
 0x271   :  { %12784 = vmatprep.subr.bf16.mxu1 %v13715_v27  ;;  %v5583_v48 = vrot.slane %v5504_v58, 5  ;;  %v13720_v12 = vld [vmem:[#allocation7 + $0x190] sm:$0xff]   ;;  %v5592_v36 = vsel %vm14247_vm6, %v11574_v9, %v5591_v11  ;;  %v5616_v0 = vsel %vm14247_vm6, %v11580_v52, %v5615_v53  ;;  %v6136_v9 = vld [vmem:[#allocation2 + $0x18] sm:$0xf]  ;;  %v6140_v11 = vld [vmem:[#allocation2 + $0x28] sm:$0xf] }
 0x272   :  { %v11585_v20 = vcombine.low %v5588_v25, %v5592_v36  ;;  %v13724_v58 = vld [vmem:[#allocation7 + $0x1b0] sm:$0xff]   ;;  %v6181_v13 = vshrl.u32 %v6136_v9, 16  ;;  %v6184_v32 = vshll.u32 %v6136_v9, 16  ;;  %v6209_v16 = vshrl.u32 %v6140_v11, 16 }
 0x273   :  { %v5584_v33 = vsel %vm14247_vm6, %v11572_v54, %v5583_v48  ;;  %v13729_v54 = vld [vmem:[#allocation2 + $0x30] ss:$8 sps:$4 sm:$0xff]   ;;  %v13732_v36 = vld [vmem:[#allocation2 + $0x40] ss:$8 sps:$4 sm:$0xff]  }
 0x274   :  { %12785 = vmatpush3.bf16.msra.mxu1 %v13715_v27  ;;  %v5579_v27 = vrot.slane %v5502_v4, 5  ;;  %v13730_v4 = vld [vmem:[#allocation7 + $0x1c8] sm:$0xff]   ;;  %v6183_v39 = vrot.slane %v6181_v13, 4 }
 0x275   :  { %12786 = vmatprep.subr.bf16.mxu1 %v13716_v44 }
 0x276   :  { %v5580_v15 = vsel %vm14247_vm6, %v11571_v26, %v5579_v27  ;;  %v13734_v26 = vld [vmem:[#allocation7 + $0x1d8] sm:$0xff]  }
 0x277   :  { %12771 = vmatmul.mubr.bf16.gmra.mrb[28].mxu1 %v11556_v7  ;;  %v11584_v37 = vcombine.low %v5580_v15, %v5584_v33  ;;  %v11578_v7 = vrot.slane %v5515_v28, 9  ;;  %v6138_v33 = vld [vmem:[#allocation2 + $0x20] sm:$0xf]  ;;  %v6212_v15 = vshll.u32 %v6140_v11, 16 }
 0x278   :  { %12787 = vmatpush3.bf16.msra.mxu1 %v13716_v44  ;;  %12790 = vmatprep.mubr.bf16.mxu1 %v11581_v42  ;;  %v5516_v44 = vld [vmem:[#allocation2 + $0x84] sm:$0x1]  ;;  %v11577_v42 = vrot.slane %v5513_v40, 9  ;;  %v13733_v28 = vld [vmem:[#allocation2 + $0x60] ss:$8 sps:$4 sm:$0xff]   ;;  %v6195_v25 = vshrl.u32 %v6138_v33, 16 }
 0x279   :  { %12788 = vmatprep.subr.bf16.mxu1 %v13717_v22  ;;  %v5607_v63 = vrot.slane %v5516_v44, 5  ;;  %v6142_v44 = vld [vmem:[#allocation2 + $0x30] sm:$0xf]  ;;  %v6186_v40 = vrot.slane %v6184_v32, 5 }
 0x27a   :  { %v5604_v31 = vsel %vm14247_vm6, %v11577_v42, %v5603_v43  ;;  %v6197_v18 = vrot.slane %v6195_v25, 4  ;;  %v6149_v25 = vld [vmem:[#allocation2 + $0x4c] sm:$0x1] }
 0x27b   :  { %v5608_v8 = vsel %vm14247_vm6, %v11578_v7, %v5607_v63  ;;  %v6141_v7 = vld [vmem:[#allocation2 + $0x2c] sm:$0x1]  ;;  %v6211_v63 = vrot.slane %v6209_v16, 4  ;;  %v6147_v16 = vld [vmem:[#allocation2 + $0x44] sm:$0x1] }
 0x27c   :  { %12789 = vmatpush3.bf16.msra.mxu1 %v13717_v22  ;;  %v11575_v22 = vrot.slane %v5509_v35, 9  ;;  %v11587_v51 = vcombine.low %v5604_v31, %v5608_v8  ;;  %v6144_v35 = vld [vmem:[#allocation2 + $0x38] sm:$0xf]  ;;  %v6187_v31 = vor.u32 %v6186_v40, %v6183_v39  ;;  %v6218_v19 = vshll.u32 %v6141_v7, 16  ;;  %v13741_v7 = vld [vmem:[#allocation7 + $0x1f8] sm:$0xff]  }
 0x27d   :  { %12806 = vmatprep.subr.bf16.mxu1 %v13718_v21  ;;  %v6237_v42 = vshrl.u32 %v6144_v35, 16  ;;  %v6240_v43 = vshll.u32 %v6144_v35, 16  ;;  %v13740_v40 = vld [vmem:[#allocation2 + $0x90] ss:$8 sps:$4 sm:$0xff]  }
 0x27e   :  { %v5596_v47 = vsel %vm14247_vm6, %v11575_v22, %v5595_v34  ;;  %v6214_v22 = vrot.slane %v6212_v15, 5  ;;  %v6223_v34 = vshrl.u32 %v6142_v44, 16  ;;  %v6220_v13 = vrot.slane %v6218_v19, 5  ;;  %v6153_v19 = vld [vmem:[#allocation2 + $0x6c] sm:$0x1] }
 0x27f   :  { %12791 = vmatmul.mubr.bf16.vlgmr.msra.gmra.mrb[16].mxu1 %v11582_v2  ;;  %v11586_v49 = vcombine.low %v5596_v47, %v5600_v17  ;;  %v13726_v2 = vld [vmem:[#allocation7 + $0x1b8] sm:$0xff]   ;;  %v13736_v17 = vld [vmem:[#allocation2 + $0x70] ss:$8 sps:$4 sm:$0xff]   ;;  %v6146_v47 = vld [vmem:[#allocation2 + $0x40] sm:$0xf] }
 0x280   :  { %12807 = vmatpush3.bf16.msra.mxu1 %v13718_v21  ;;  %12794 = vmatprep.mubr.bf16.mxu1 %v11583_v45  ;;  %v5518_v21 = vld [vmem:[#allocation2 + $0x8c] sm:$0x1]  ;;  %v6134_v45 = vld [vmem:[#allocation2 + $0x10] sm:$0xf]  ;;  %v6215_v53 = vor.u32 %v6214_v22, %v6211_v63 }
 0x281   :  { %12808 = vmatprep.subr.bf16.mxu1 %v13719_v62  ;;  %v5611_v57 = vrot.slane %v5518_v21, 5  ;;  %v6167_v48 = vshrl.u32 %v6134_v45, 16  ;;  %v6170_v60 = vshll.u32 %v6134_v45, 16  ;;  %v6148_v21 = vld [vmem:[#allocation2 + $0x48] sm:$0xf] }
 0x282   :  { %v6265_v45 = vshrl.u32 %v6148_v21, 16 }
 0x283   :  { %v5612_v61 = vsel %vm14247_vm6, %v11579_v55, %v5611_v57  ;;  %v6169_v27 = vrot.slane %v6167_v48, 4  ;;  %v6225_v55 = vrot.slane %v6223_v34, 4  ;;  %v6188_v48 = vrot.slane %v6187_v31, 4  ;;  %v6151_v31 = vld [vmem:[#allocation2 + $0x64] sm:$0x1] }
 0x284   :  { %12809 = vmatpush3.bf16.msra.mxu1 %v13719_v62  ;;  %v11588_v1 = vcombine.low %v5612_v61, %v5616_v0  ;;  %v13727_v62 = vld [vmem:[#allocation7 + $0x1c0] sm:$0xff]   ;;  %v13737_v0 = vld [vmem:[#allocation2 + $0x80] ss:$8 sps:$4 sm:$0xff]   ;;  %v6239_v61 = vrot.slane %v6237_v42, 4  ;;  %v6260_v34 = vshll.u32 %v6147_v16, 16 }
 0x285   :  { %12810 = vmatprep.subr.bf16.mxu1 %v13720_v12  ;;  %v6162_v16 = vld [vmem:[#allocation2 + $0x90] sm:$0xf] }
 0x287   :  { %12795 = vmatmul.mubr.bf16.gmra.mrb[20].mxu1 %v11584_v37  ;;  %v6137_v37 = vld [vmem:[#allocation2 + $0x1c] sm:$0x1] }
 0x288   :  { %12811 = vmatpush3.bf16.msra.mxu1 %v13720_v12  ;;  %12798 = vmatprep.mubr.bf16.mxu1 %v11585_v20  ;;  %v6172_v12 = vrot.slane %v6170_v60, 5  ;;  %v6190_v8 = vshll.u32 %v6137_v37, 16 }
 0x289   :  { %12812 = vmatprep.subr.bf16.mxu1 %v13721_v24 }
 0x28a   :  { %v6173_v20 = vor.u32 %v6172_v12, %v6169_v27  ;;  %v6216_v12 = vrot.slane %v6215_v53, 4  ;;  %v6158_v53 = vld [vmem:[#allocation2 + $0x80] sm:$0xf] }
 0x28c   :  { %12813 = vmatpush3.bf16.msra.mxu1 %v13721_v24  ;;  %v6198_v24 = vshll.u32 %v6138_v33, 16  ;;  %v6174_v52 = vrot.slane %v6173_v20, 4  ;;  %v6152_v33 = vld [vmem:[#allocation2 + $0x68] sm:$0xf]  ;;  %v6221_v63 = vsel %vm14060_vm3, %v6216_v12, %v6220_v13 }
 0x28d   :  { %12814 = vmatprep.subr.bf16.mxu1 %v13722_v23  ;;  %v6296_v39 = vshll.u32 %v6152_v33, 16 }
 0x28e   :  { %v6200_v46 = vrot.slane %v6198_v24, 5  ;;  %v6267_v24 = vrot.slane %v6265_v45, 4 }
 0x28f   :  { %12799 = vmatmul.mubr.bf16.gmra.mrb[24].mxu1 %v11586_v49  ;;  %v6178_v49 = vrot.slane %v6176_v38, 5  ;;  %v6293_v38 = vshrl.u32 %v6152_v33, 16 }
 0x290   :  { %12815 = vmatpush3.bf16.msra.mxu1 %v13722_v23  ;;  %12802 = vmatprep.mubr.bf16.mxu1 %v11587_v51  ;;  %v6226_v23 = vshll.u32 %v6142_v44, 16  ;;  %v13738_v51 = vld [vmem:[#allocation7 + $0x1e8] sm:$0xff]  }
 0x291   :  { %12816 = vmatprep.subr.bf16.mxu1 %v13723_v50  ;;  %v6179_v27 = vsel %vm14060_vm3, %v6174_v52, %v6178_v49  ;;  %v6298_v52 = vrot.slane %v6296_v39, 5  ;;  %v13744_v39 = vld [vmem:[#allocation7 + $0x210] sm:$0xff]  }
 0x292   :  { %v6228_v57 = vrot.slane %v6226_v23, 5 }
 0x294   :  { %12817 = vmatpush3.bf16.msra.mxu1 %v13723_v50  ;;  %v6204_v50 = vshll.u32 %v6139_v41, 16  ;;  %v6229_v32 = vor.u32 %v6228_v57, %v6225_v55  ;;  %v13742_v55 = vld [vmem:[#allocation7 + $0x200] sm:$0xff]  }
 0x295   :  { %12818 = vmatprep.subr.bf16.mxu1 %v13724_v58 }
 0x296   :  { %v6206_v60 = vrot.slane %v6204_v50, 5  ;;  %v6230_v22 = vrot.slane %v6229_v32, 4 }
 0x297   :  { %12803 = vmatmul.mubr.bf16.gmra.mrb[28].mxu1 %v11588_v1  ;;  %v6242_v1 = vrot.slane %v6240_v43, 5 }
 0x298   :  { %12819 = vmatpush3.bf16.msra.mxu1 %v13724_v58  ;;  %12822 = vmatprep.mubr.bf16.mxu1 %v13725_v56  ;;  %v6150_v58 = vld [vmem:[#allocation2 + $0x60] sm:$0xf]  ;;  %v6254_v56 = vshll.u32 %v6146_v47, 16 }
 0x299   :  { %12820 = vmatprep.subr.bf16.mxu1 %v13726_v2  ;;  %v6279_v9 = vshrl.u32 %v6150_v58, 16  ;;  %v6282_v11 = vshll.u32 %v6150_v58, 16  ;;  %v6243_v14 = vor.u32 %v6242_v1, %v6239_v61  ;;  %v6262_v58 = vrot.slane %v6260_v34, 5  ;;  %v6159_v34 = vld [vmem:[#allocation2 + $0x84] sm:$0x1] }
 0x29b   :  { %v6284_v20 = vrot.slane %v6282_v11, 5  ;;  %v6244_v42 = vrot.slane %v6243_v14, 4 }
 0x29c   :  { %12821 = vmatpush3.bf16.msra.mxu1 %v13726_v2  ;;  %v6251_v2 = vshrl.u32 %v6146_v47, 16 }
 0x29d   :  { %12838 = vmatprep.subr.bf16.mxu1 %v13727_v62 }
 0x29e   :  { %v6253_v15 = vrot.slane %v6251_v2, 4 }
 0x29f   :  { %12823 = vmatmul.mubr.bf16.vlgmr.msra.gmra.mrb[16].mxu1 %v13728_v3  ;;  %v6201_v3 = vor.u32 %v6200_v46, %v6197_v18 }
 0x2a0   :  { %12839 = vmatpush3.bf16.msra.mxu1 %v13727_v62  ;;  %12826 = vmatprep.mubr.bf16.mxu1 %v13729_v54  ;;  %v6192_v62 = vrot.slane %v6190_v8, 5  ;;  %v6268_v54 = vshll.u32 %v6148_v21, 16  ;;  %v6156_v8 = vld [vmem:[#allocation2 + $0x78] sm:$0xf] }
 0x2a1   :  { %12840 = vmatprep.subr.bf16.mxu1 %v13730_v4  ;;  %v6202_v44 = vrot.slane %v6201_v3, 4  ;;  %v6321_v61 = vshrl.u32 %v6156_v8, 16  ;;  %v6324_v1 = vshll.u32 %v6156_v8, 16  ;;  %v6288_v3 = vshll.u32 %v6151_v31, 16 }
 0x2a2   :  { %v6270_v35 = vrot.slane %v6268_v54, 5  ;;  %v6193_v41 = vsel %vm14060_vm3, %v6188_v48, %v6192_v62  ;;  %v6302_v54 = vshll.u32 %v6153_v19, 16  ;;  %v6335_v48 = vshrl.u32 %v6158_v53, 16 }
 0x2a3   :  { %v11613_v23 = vcombine.low %v6179_v27, %v6193_v41  ;;  %v6207_v18 = vsel %vm14060_vm3, %v6202_v44, %v6206_v60  ;;  %v6338_v60 = vshll.u32 %v6158_v53, 16  ;;  %v13743_v27 = vld [vmem:[#allocation7 + $0x208] sm:$0xff]   ;;  %v6323_v12 = vrot.slane %v6321_v61, 4 }
 0x2a4   :  { %12841 = vmatpush3.bf16.msra.mxu1 %v13730_v4  ;;  %v6143_v4 = vld [vmem:[#allocation2 + $0x34] sm:$0x1]  ;;  %v6271_v49 = vor.u32 %v6270_v35, %v6267_v24  ;;  %v11614_v50 = vcombine.low %v6207_v18, %v6221_v63  ;;  %v6326_v13 = vrot.slane %v6324_v1, 5  ;;  %v6290_v14 = vrot.slane %v6288_v3, 5  ;;  %v6157_v41 = vld [vmem:[#allocation2 + $0x7c] sm:$0x1] }
 0x2a5   :  { %12842 = vmatprep.subr.bf16.mxu1 %v13731_v6  ;;  %v6337_v44 = vrot.slane %v6335_v48, 4  ;;  %v6330_v31 = vshll.u32 %v6157_v41, 16  ;;  %v13746_v3 = vld [vmem:[#allocation7 + $0x220] sm:$0xff]  }
 0x2a6   :  { %v6272_v45 = vrot.slane %v6271_v49, 4  ;;  %v6163_v48 = vld [vmem:[#allocation2 + $0x94] sm:$0x1] }
 0x2a7   :  { %12827 = vmatmul.mubr.bf16.gmra.mrb[20].mxu1 %v13732_v36  ;;  %v6232_v36 = vshll.u32 %v6143_v4, 16  ;;  %v6160_v4 = vld [vmem:[#allocation2 + $0x88] sm:$0xf] }
 0x2a8   :  { %12843 = vmatpush3.bf16.msra.mxu1 %v13731_v6  ;;  %12830 = vmatprep.mubr.bf16.mxu1 %v13733_v28  ;;  %v6145_v6 = vld [vmem:[#allocation2 + $0x3c] sm:$0x1]  ;;  %v6256_v28 = vrot.slane %v6254_v56, 5  ;;  %v6349_v32 = vshrl.u32 %v6160_v4, 16  ;;  %v6352_v33 = vshll.u32 %v6160_v4, 16 }
 0x2a9   :  { %12844 = vmatprep.subr.bf16.mxu1 %v13734_v26  ;;  %v6246_v37 = vshll.u32 %v6145_v6, 16  ;;  %v6234_v46 = vrot.slane %v6232_v36, 5 }
 0x2aa   :  { %v6257_v43 = vor.u32 %v6256_v28, %v6253_v15  ;;  %v6304_v28 = vrot.slane %v6302_v54, 5  ;;  %v6351_v63 = vrot.slane %v6349_v32, 4  ;;  %v6632_v32 = vld [vmem:[#allocation2 + $0x10] sm:$0xe] }
 0x2ab   :  { %v6248_v47 = vrot.slane %v6246_v37, 5  ;;  %v6235_v57 = vsel %vm14060_vm3, %v6230_v22, %v6234_v46  ;;  %v6340_v37 = vrot.slane %v6338_v60, 5  ;;  %v6354_v22 = vrot.slane %v6352_v33, 5  ;;  %v6633_v33 = vld [vmem:[#allocation2 + $0x14] sm:$0x1] }
 0x2ac   :  { %12845 = vmatpush3.bf16.msra.mxu1 %v13734_v26  ;;  %v13739_v26 = vld [vmem:[#allocation7 + $0x1f0] sm:$0xff]   ;;  %v6258_v56 = vrot.slane %v6257_v43, 4 }
 0x2ad   :  { %12846 = vmatprep.subr.bf16.mxu1 %v13735_v5  ;;  %v6249_v2 = vsel %vm14060_vm3, %v6244_v42, %v6248_v47  ;;  %v6366_v42 = vshll.u32 %v6162_v16, 16  ;;  %v6341_v18 = vor.u32 %v6340_v37, %v6337_v44  ;;  %v6355_v53 = vor.u32 %v6354_v22, %v6351_v63  ;;  %v6638_v22 = vld [vmem:[#allocation2 + $0x28] sm:$0xe] }
 0x2ae   :  { %v11615_v36 = vcombine.low %v6235_v57, %v6249_v2  ;;  %v6263_v15 = vsel %vm14060_vm3, %v6258_v56, %v6262_v58  ;;  %v6165_v2 = vld [vmem:[#allocation2 + $0x9c] sm:$0x1] }
 0x2af   :  { %12831 = vmatmul.mubr.bf16.gmra.mrb[24].mxu1 %v13736_v17  ;;  %v6274_v17 = vshll.u32 %v6149_v25, 16  ;;  %v6164_v25 = vld [vmem:[#allocation2 + $0x98] sm:$0xf]  ;;  %v6368_v57 = vrot.slane %v6366_v42, 5  ;;  %v6342_v61 = vrot.slane %v6341_v18, 4  ;;  %v6356_v54 = vrot.slane %v6355_v53, 4 }
 0x2b0   :  { %12847 = vmatpush3.bf16.msra.mxu1 %v13735_v5  ;;  %12834 = vmatprep.mubr.bf16.mxu1 %v13737_v0  ;;  %v6281_v5 = vrot.slane %v6279_v9, 4  ;;  %v6154_v0 = vld [vmem:[#allocation2 + $0x70] sm:$0xf]  ;;  %v6377_v43 = vshrl.u32 %v6164_v25, 16  ;;  %v6641_v42 = vld [vmem:[#allocation2 + $0x34] sm:$0x1] }
 0x2b1   :  { %12848 = vmatprep.subr.bf16.mxu1 %v13738_v51  ;;  %v6276_v62 = vrot.slane %v6274_v17, 5  ;;  %v6307_v11 = vshrl.u32 %v6154_v0, 16  ;;  %v6380_v17 = vshll.u32 %v6164_v25, 16  ;;  %v6636_v18 = vld [vmem:[#allocation2 + $0x20] sm:$0xe] }
 0x2b2   :  { %v6285_v21 = vor.u32 %v6284_v20, %v6281_v5  ;;  %v6155_v5 = vld [vmem:[#allocation2 + $0x74] sm:$0x1]  ;;  %v6379_v58 = vrot.slane %v6377_v43, 4 }
 0x2b3   :  { %v6277_v24 = vsel %vm14060_vm3, %v6272_v45, %v6276_v62  ;;  %v6309_v20 = vrot.slane %v6307_v11, 4  ;;  %v6316_v8 = vshll.u32 %v6155_v5, 16  ;;  %v6332_v62 = vrot.slane %v6330_v31, 5 }
 0x2b4   :  { %12849 = vmatpush3.bf16.msra.mxu1 %v13738_v51  ;;  %v6295_v51 = vrot.slane %v6293_v38, 4  ;;  %v6286_v6 = vrot.slane %v6285_v21, 4  ;;  %v11616_v46 = vcombine.low %v6263_v15, %v6277_v24  ;;  %v13745_v21 = vld [vmem:[#allocation7 + $0x218] sm:$0xff]   ;;  %v6386_v11 = vshll.u32 %v6165_v2, 16  ;;  %v6634_v15 = vld [vmem:[#allocation2 + $0x18] sm:$0xe] }
 0x2b5   :  { %12850 = vmatprep.subr.bf16.mxu1 %v13739_v26  ;;  %v6318_v4 = vrot.slane %v6316_v8, 5  ;;  %v6635_v24 = vld [vmem:[#allocation2 + $0x1c] sm:$0x1]  ;;  %v6698_v5 = vrot.slane %v6633_v33, 5  ;;  %v13749_v8 = vld [vmem:[#allocation7 + $0x238] sm:$0xff]  }
 0x2b6   :  { %v6299_v9 = vor.u32 %v6298_v52, %v6295_v51  ;;  %v6344_v52 = vshll.u32 %v6159_v34, 16  ;;  %v6388_v25 = vrot.slane %v6386_v11, 5  ;;  %v6639_v34 = vld [vmem:[#allocation2 + $0x2c] sm:$0x1]  ;;  %v6646_v2 = vld [vmem:[#allocation2 + $0x48] sm:$0xe] }
 0x2b7   :  { %12835 = vmatmul.mubr.bf16.gmra.mrb[28].mxu1 %v13740_v40  ;;  %v6291_v40 = vsel %vm14060_vm3, %v6286_v6, %v6290_v14  ;;  %v6710_v31 = vrot.slane %v6639_v34, 5  ;;  %v11636_v11 = vrot.slane %v6646_v2, 9  ;;  %v13755_v2 = vld [vmem:[%s16059_s5 + $0x28] sm:$0xff]  }
 0x2b8   :  { %12851 = vmatpush3.bf16.msra.mxu1 %v13739_v26  ;;  %12854 = vmatprep.mubr.bf16.mxu1 %v11613_v23  ;;  %v6310_v26 = vshll.u32 %v6154_v0, 16  ;;  %v6300_v35 = vrot.slane %v6299_v9, 4  ;;  %v6363_v23 = vshrl.u32 %v6162_v16, 16  ;;  %v6382_v0 = vrot.slane %v6380_v17, 5  ;;  %v13747_v16 = vld [vmem:[#allocation7 + $0x228] sm:$0xff]  }
 0x2b9   :  { %12852 = vmatprep.subr.bf16.mxu1 %v13741_v7  ;;  %v6346_v45 = vrot.slane %v6344_v52, 5  ;;  %v11631_v52 = vrot.slane %v6636_v18, 9  ;;  %v6661_v18 = vld [vmem:[#allocation2 + $0x94] sm:$0x1] }
 0x2ba   :  { %v6312_v38 = vrot.slane %v6310_v26, 5  ;;  %v6305_v47 = vsel %vm14060_vm3, %v6300_v35, %v6304_v28  ;;  %v6383_v9 = vor.u32 %v6382_v0, %v6379_v58  ;;  %v11629_v35 = vrot.slane %v6632_v32, 9  ;;  %v6644_v0 = vld [vmem:[#allocation2 + $0x40] sm:$0xe] }
 0x2bb   :  { %v11617_v19 = vcombine.low %v6291_v40, %v6305_v47  ;;  %v6347_v26 = vsel %vm14060_vm3, %v6342_v61, %v6346_v45  ;;  %v6702_v40 = vrot.slane %v6635_v24, 5 }
 0x2bc   :  { %12853 = vmatpush3.bf16.msra.mxu1 %v13741_v7  ;;  %v6327_v7 = vor.u32 %v6326_v13, %v6323_v12  ;;  %v6313_v49 = vor.u32 %v6312_v38, %v6309_v20  ;;  %v6372_v13 = vshll.u32 %v6163_v48, 16  ;;  %v6384_v37 = vrot.slane %v6383_v9, 4  ;;  %v13748_v38 = vld [vmem:[#allocation7 + $0x230] sm:$0xff]  }
 0x2bd   :  { %12870 = vmatprep.subr.bf16.mxu1 %v13742_v55  ;;  %v6699_v63 = vsel %vm14247_vm6, %v11629_v35, %v6698_v5  ;;  %v11635_v48 = vrot.slane %v6644_v0, 9  ;;  %v6652_v35 = vld [vmem:[#allocation2 + $0x70] sm:$0xe]  ;;  %v6653_v5 = vld [vmem:[#allocation2 + $0x74] sm:$0x1] }
 0x2be   :  { %v6328_v51 = vrot.slane %v6327_v7, 4  ;;  %v6314_v56 = vrot.slane %v6313_v49, 4  ;;  %v6374_v20 = vrot.slane %v6372_v13, 5  ;;  %v6389_v7 = vsel %vm14060_vm3, %v6384_v37, %v6388_v25  ;;  %v6657_v37 = vld [vmem:[#allocation2 + $0x84] sm:$0x1]  ;;  %v13752_v0 = vld [vmem:[%s16059_s5 + $0x10] sm:$0xff]  }
 0x2bf   :  { %12855 = vmatmul.mubr.bf16.vlgmr.msra.gmra.mrb[16].mxu1 %v11614_v50  ;;  %v6161_v50 = vld [vmem:[#allocation2 + $0x8c] sm:$0x1]  ;;  %v11632_v49 = vrot.slane %v6638_v22, 9  ;;  %v11639_v22 = vrot.slane %v6652_v35, 9  ;;  %v6738_v34 = vrot.slane %v6653_v5, 5  ;;  %12906 = vmatprep.subr.bf16.mxu0 %v13752_v0 }
 0x2c0   :  { %12871 = vmatpush3.bf16.msra.mxu1 %v13742_v55  ;;  %12858 = vmatprep.mubr.bf16.mxu1 %v11615_v36  ;;  %v6365_v55 = vrot.slane %v6363_v23, 4  ;;  %v6358_v1 = vshll.u32 %v6161_v50, 16  ;;  %v6333_v60 = vsel %vm14060_vm3, %v6328_v51, %v6332_v62  ;;  %v6319_v12 = vsel %vm14060_vm3, %v6314_v56, %v6318_v4  ;;  %v6640_v23 = vld [vmem:[#allocation2 + $0x30] sm:$0xe]  ;;  %v6642_v50 = vld [vmem:[#allocation2 + $0x38] sm:$0xe] }
 0x2c1   :  { %12872 = vmatprep.subr.bf16.mxu1 %v13743_v27  ;;  %v11618_v36 = vcombine.low %v6319_v12, %v6333_v60  ;;  %v6714_v51 = vrot.slane %v6641_v42, 5  ;;  %v6711_v58 = vsel %vm14247_vm6, %v11632_v49, %v6710_v31  ;;  %v6647_v56 = vld [vmem:[#allocation2 + $0x4c] sm:$0x1]  ;;  %v6649_v4 = vld [vmem:[#allocation2 + $0x64] sm:$0x1]  ;;  %v6739_v49 = vsel %vm14247_vm6, %v11639_v22, %v6738_v34  ;;  %12907 = vmatpush3.bf16.msra.mxu0 %v13752_v0 }
 0x2c2   :  { %v6369_v6 = vor.u32 %v6368_v57, %v6365_v55  ;;  %v11634_v55 = vrot.slane %v6642_v50, 9  ;;  %v6650_v60 = vld [vmem:[#allocation2 + $0x68] sm:$0xe]  ;;  %v6730_v13 = vrot.slane %v6649_v4, 5  ;;  %v7659_v4 = vld [vmem:[#allocation3] sm:$0xf] }
 0x2c3   :  { %v11638_v32 = vrot.slane %v6650_v60, 9  ;;  %v7660_v60 = vld [vmem:[#allocation3 + $0x4] sm:$0x1]  ;;  %v7334_v34 = vld [vmem:[#allocation3 + $0x18] sm:$0xf] }
 0x2c4   :  { %12873 = vmatpush3.bf16.msra.mxu1 %v13743_v27  ;;  %v6360_v27 = vrot.slane %v6358_v1, 5  ;;  %v6370_v44 = vrot.slane %v6369_v6, 4  ;;  %v6645_v1 = vld [vmem:[#allocation2 + $0x44] sm:$0x1] }
 0x2c5   :  { %12874 = vmatprep.subr.bf16.mxu1 %v13744_v39  ;;  %v6722_v9 = vrot.slane %v6645_v1, 5  ;;  %v13754_v1 = vld [vmem:[%s16059_s5 + $0x20] sm:$0xff]  }
 0x2c6   :  { %v6361_v14 = vsel %vm14060_vm3, %v6356_v54, %v6360_v27  ;;  %v6375_v41 = vsel %vm14060_vm3, %v6370_v44, %v6374_v20  ;;  %v6651_v27 = vld [vmem:[#allocation2 + $0x6c] sm:$0x1]  ;;  %v6656_v44 = vld [vmem:[#allocation2 + $0x80] sm:$0xe] }
 0x2c7   :  { %12859 = vmatmul.mubr.bf16.gmra.mrb[20].mxu1 %v11616_v46  ;;  %v11619_v28 = vcombine.low %v6347_v26, %v6361_v14  ;;  %v11620_v43 = vcombine.low %v6375_v41, %v6389_v7  ;;  %v6637_v46 = vld [vmem:[#allocation2 + $0x24] sm:$0x1]  ;;  %v6726_v26 = vrot.slane %v6647_v56, 5  ;;  %v6734_v33 = vrot.slane %v6651_v27, 5  ;;  %v6659_v41 = vld [vmem:[#allocation2 + $0x8c] sm:$0x1] }
 0x2c8   :  { %12875 = vmatpush3.bf16.msra.mxu1 %v13744_v39  ;;  %12862 = vmatprep.mubr.bf16.mxu1 %v11617_v19  ;;  %v11630_v39 = vrot.slane %v6634_v15, 9  ;;  %v6643_v19 = vld [vmem:[#allocation2 + $0x3c] sm:$0x1]  ;;  %v6706_v53 = vrot.slane %v6637_v46, 5  ;;  %v6654_v15 = vld [vmem:[#allocation2 + $0x78] sm:$0xe] }
 0x2c9   :  { %12876 = vmatprep.subr.bf16.mxu1 %v13745_v21  ;;  %v6718_v57 = vrot.slane %v6643_v19, 5  ;;  %v6727_v14 = vsel %vm14247_vm6, %v11636_v11, %v6726_v26  ;;  %v6735_v24 = vsel %vm14247_vm6, %v11638_v32, %v6734_v33  ;;  %v11641_v7 = vrot.slane %v6656_v44, 9  ;;  %v6662_v46 = vld [vmem:[#allocation2 + $0x98] sm:$0xe]  ;;  %v13756_v56 = vld [vmem:[%s16059_s5 + $0x30] sm:$0xff]  }
 0x2ca   :  { %v6703_v17 = vsel %vm14247_vm6, %v11630_v39, %v6702_v40  ;;  %v6707_v62 = vsel %vm14247_vm6, %v11631_v52, %v6706_v53  ;;  %v6658_v40 = vld [vmem:[#allocation2 + $0x88] sm:$0xe]  ;;  %v6750_v42 = vrot.slane %v6659_v41, 5  ;;  %v11644_v52 = vrot.slane %v6662_v46, 9 }
 0x2cb   :  { %v11645_v47 = vcombine.low %v6699_v63, %v6703_v17  ;;  %v11646_v45 = vcombine.low %v6707_v62, %v6711_v58  ;;  %v6719_v54 = vsel %vm14247_vm6, %v11634_v55, %v6718_v57  ;;  %v6746_v63 = vrot.slane %v6657_v37, 5  ;;  %v6660_v17 = vld [vmem:[#allocation2 + $0x90] sm:$0xe]  ;;  %v13757_v62 = vld [vmem:[%s16059_s5 + $0x38] sm:$0xff]   ;;  %v15459_v37 = vld [vmem:[#allocation3 + $0x54] sm:$0x1] }
 0x2cc   :  { %12877 = vmatpush3.bf16.msra.mxu1 %v13745_v21  ;;  %v11633_v21 = vrot.slane %v6640_v23, 9  ;;  %v11642_v23 = vrot.slane %v6658_v40, 9  ;;  %v11643_v19 = vrot.slane %v6660_v17, 9  ;;  %v7322_v46 = vld [vmem:[#allocation3 + $0x8] sm:$0xf] }
 0x2cd   :  { %12878 = vmatprep.subr.bf16.mxu1 %v13746_v3 }
 0x2ce   :  { %v6715_v61 = vsel %vm14247_vm6, %v11633_v21, %v6714_v51  ;;  %v6751_v50 = vsel %vm14247_vm6, %v11642_v23, %v6750_v42  ;;  %v6754_v51 = vrot.slane %v6661_v18, 5  ;;  %v7337_v23 = vld [vmem:[#allocation3 + $0x1c] sm:$0x1] }
 0x2cf   :  { %12863 = vmatmul.mubr.bf16.gmra.mrb[24].mxu1 %v11618_v36  ;;  %v11647_v6 = vcombine.low %v6715_v61, %v6719_v54  ;;  %v6723_v36 = vsel %vm14247_vm6, %v11635_v48, %v6722_v9  ;;  %v13753_v61 = vld [vmem:[%s16059_s5 + $0x18] sm:$0xff]   ;;  %v7695_v54 = vshll.u32 %v7659_v4, 16  ;;  %v15451_v48 = vld [vmem:[%s16058_s4] ss:$0 sm:$0xff] }
 0x2d0   :  { %12879 = vmatpush3.bf16.msra.mxu1 %v13746_v3  ;;  %12866 = vmatprep.mubr.bf16.mxu1 %v11619_v28  ;;  %v6648_v3 = vld [vmem:[#allocation2 + $0x60] sm:$0xe]  ;;  %v6655_v28 = vld [vmem:[#allocation2 + $0x7c] sm:$0x1]  ;;  %v11648_v25 = vcombine.low %v6723_v36, %v6727_v14  ;;  %v6755_v55 = vsel %vm14247_vm6, %v11643_v19, %v6754_v51 }
 0x2d1   :  { %12880 = vmatprep.subr.bf16.mxu1 %v13747_v16  ;;  %v11637_v12 = vrot.slane %v6648_v3, 9  ;;  %v6742_v39 = vrot.slane %v6655_v28, 5  ;;  %12908 = vmatprep.subr.bf16.mxu0 %v13753_v61  ;;  %v15445_v3 = vld [vmem:[%s16059_s5 + $0x40] sm:$0xff]   ;;  %v7697_v9 = vrot.slane %v7695_v54, 5 }
 0x2d2   :  { %12909 = vmatpush3.bf16.msra.mxu0 %v13753_v61  ;;  %v7340_v61 = vld [vmem:[#allocation3 + $0x20] sm:$0xf] }
 0x2d3   :  { %12910 = vmatprep.subr.bf16.mxu0 %v13754_v1 }
 0x2d4   :  { %12881 = vmatpush3.bf16.msra.mxu1 %v13747_v16  ;;  %v6731_v16 = vsel %vm14247_vm6, %v11637_v12, %v6730_v13  ;;  %v7701_v12 = vshll.u32 %v7660_v60, 16 }
 0x2d5   :  { %12882 = vmatprep.subr.bf16.mxu1 %v13748_v38  ;;  %v11649_v20 = vcombine.low %v6731_v16, %v6735_v24 }
 0x2d6   :  { %12911 = vmatpush3.bf16.msra.mxu0 %v13754_v1  ;;  %v15461_v35 = vrot.slane %v7701_v12, 5 }
 0x2d7   :  { %12867 = vmatmul.mubr.bf16.gmra.mrb[28].mxu1 %v11620_v43  ;;  %12912 = vmatprep.subr.bf16.mxu0 %v13755_v2 }
 0x2d8   :  { %12883 = vmatpush3.bf16.msra.mxu1 %v13748_v38  ;;  %12886 = vmatprep.mubr.bf16.mxu1 %v11645_v47  ;;  %v11640_v38 = vrot.slane %v6654_v15, 9  ;;  %v6663_v47 = vld [vmem:[#allocation2 + $0x9c] sm:$0x1]  ;;  %v15456_v15 = vld [vmem:[#allocation3 + $0x50] sm:$0xf] }
 0x2d9   :  { %12884 = vmatprep.subr.bf16.mxu1 %v13749_v8  ;;  %v6758_v53 = vrot.slane %v6663_v47, 5 }
 0x2da   :  { %v6743_v43 = vsel %vm14247_vm6, %v11640_v38, %v6742_v39  ;;  %12913 = vmatpush3.bf16.msra.mxu0 %v13755_v2  ;;  %v7804_v39 = vshrl.u32 %v15456_v15, 16 }
 0x2db   :  { %v11650_v31 = vcombine.low %v6739_v49, %v6743_v43  ;;  %v6759_v57 = vsel %vm14247_vm6, %v11644_v52, %v6758_v53  ;;  %12914 = vmatprep.subr.bf16.mxu0 %v13756_v56 }
 0x2dc   :  { %12885 = vmatpush3.bf16.msra.mxu1 %v13749_v8  ;;  %v6747_v8 = vsel %vm14247_vm6, %v11641_v7, %v6746_v63  ;;  %v11652_v58 = vcombine.low %v6755_v55, %v6759_v57  ;;  %v7807_v7 = vshll.u32 %v15456_v15, 16  ;;  %v7813_v63 = vshll.u32 %v15459_v37, 16 }
 0x2dd   :  { %v11651_v21 = vcombine.low %v6747_v8, %v6751_v50 }
 0x2de   :  { %12915 = vmatpush3.bf16.msra.mxu0 %v13756_v56 }
 0x2df   :  { %12887 = vmatmul.mubr.bf16.vlgmr.msra.gmra.mrb[16].mxu1 %v11646_v45  ;;  %12916 = vmatprep.subr.bf16.mxu0 %v13757_v62  ;;  %v7692_v45 = vshrl.u32 %v7659_v4, 16  ;;  %v7343_v4 = vld [vmem:[#allocation3 + $0x24] sm:$0x1] }
 0x2e0   :  { %12890 = vmatprep.mubr.bf16.mxu1 %v11647_v6 }
 0x2e1   :  { %v7694_v6 = vrot.slane %v7692_v45, 4 }
 0x2e2   :  { %12917 = vmatpush3.bf16.msra.mxu0 %v13757_v62 }
 0x2e3   :  { %12934 = vmatprep.subr.bf16.mxu0 %v15445_v3  ;;  %v7698_v33 = vor.u32 %v7697_v9, %v7694_v6 }
 0x2e5   :  { %v15463_v38 = vrot.slane %v7698_v33, 4 }
 0x2e7   :  { %12891 = vmatmul.mubr.bf16.gmra.mrb[20].mxu1 %v11648_v25 }
 0x2e8   :  { %12894 = vmatprep.mubr.bf16.mxu1 %v11649_v20 }
 0x2ef   :  { %12895 = vmatmul.mubr.bf16.gmra.mrb[24].mxu1 %v11650_v31 }
 0x2f0   :  { %12898 = vmatprep.mubr.bf16.mxu1 %v11651_v21  ;;  %v7325_v21 = vld [vmem:[#allocation3 + $0xc] sm:$0x1] }
 0x2f7   :  { %12899 = vmatmul.mubr.bf16.gmra.mrb[28].mxu1 %v11652_v58 }
 0x3b2   :  { %v12888_v11 = vpop.f32.mrb[16].mxu1 }
 0x3b3   :  { %v7027_v26 = vadd.f32 %v12888_v11, %v15451_v48  ;;  %v6891_v27 = vpop.f32.mrb[17].mxu1 }
 0x3b4   :  { %v7025_v13 = vadd.f32 %v15451_v48, %v6891_v27  ;;  %v12889_v32 = vpop.f32.mrb[18].mxu1  ;;  %v7331_v27 = vld [vmem:[#allocation3 + $0x14] sm:$0x1] }
 0x3b5   :  { %v7043_v36 = vmax.f32 %v7027_v26, 0.0  ;;  %v7028_v14 = vadd.f32 %v12889_v32, %v15451_v48  ;;  %v6894_v16 = vpop.f32.mrb[19].mxu1  ;;  %v7328_v26 = vld [vmem:[#allocation3 + $0x10] sm:$0xf] }
 0x3b6   :  { %v7041_v28 = vmax.f32 %v7025_v13, 0.0  ;;  %v7026_v44 = vadd.f32 %v15451_v48, %v6894_v16 }
 0x3b7   :  { %v12026_v25 = vpack.c.bf16 %v7043_v36, %v7043_v36  ;;  %v7044_v24 = vmax.f32 %v7028_v14, 0.0 }
 0x3b8   :  { %v12024_v5 = vpack.c.bf16 %v7041_v28, %v7041_v28  ;;  %v7042_v20 = vmax.f32 %v7026_v44, 0.0 }
 0x3b9   :  { %v7178_v40 = vshrl.u32 %v12026_v25, 16  ;;  %v12027_v41 = vpack.c.bf16 %v7044_v24, %v7044_v24  ;;  %v7181_v22 = vshll.u32 %v12026_v25, 16 }
 0x3ba   :  { %v7162_v42 = vshrl.u32 %v12024_v5, 16  ;;  %v7165_v43 = vshll.u32 %v12024_v5, 16  ;;  %v12025_v17 = vpack.c.bf16 %v7042_v20, %v7042_v20  ;;  %v12892_v8 = vpop.f32.mrb[20].mxu1 }
 0x3bb   :  { %v7180_v18 = vrot.slane %v7178_v40, 7  ;;  %v7186_v47 = vshrl.u32 %v12027_v41, 16  ;;  %v7189_v49 = vshll.u32 %v12027_v41, 16  ;;  %v7031_v31 = vadd.f32 %v12892_v8, %v15451_v48  ;;  %v6907_v50 = vpop.f32.mrb[21].mxu1 }
 0x3bc   :  { %v7164_v19 = vrot.slane %v7162_v42, 7  ;;  %v7170_v51 = vshrl.u32 %v12025_v17, 16  ;;  %v7173_v52 = vshll.u32 %v12025_v17, 16  ;;  %v7029_v53 = vadd.f32 %v15451_v48, %v6907_v50  ;;  %v12893_v55 = vpop.f32.mrb[22].mxu1  ;;  %v7358_v42 = vld [vmem:[#allocation3 + $0x38] sm:$0xf] }
 0x3bd   :  { %v7183_v57 = vor.u32 %v7181_v22, %v7180_v18  ;;  %v7184_v58 = vrot.slane %v7180_v18, 4  ;;  %v7188_v0 = vrot.slane %v7186_v47, 7  ;;  %v7047_v1 = vmax.f32 %v7031_v31, 0.0  ;;  %v6910_v2 = vpop.f32.mrb[23].mxu1 }
 0x3be   :  { %v7167_v56 = vor.u32 %v7165_v43, %v7164_v19  ;;  %v7168_v62 = vrot.slane %v7164_v19, 4  ;;  %v7172_v45 = vrot.slane %v7170_v51, 7  ;;  %v7045_v54 = vmax.f32 %v7029_v53, 0.0  ;;  %v7346_v51 = vld [vmem:[#allocation3 + $0x28] sm:$0xf] }
 0x3bf   :  { %v7335_v60 = vsel %vm15094_vm11, %v7183_v57, %v7334_v34  ;;  %v7338_v6 = vsel %vm15101_vm12, %v7184_v58, %v7337_v23  ;;  %v7191_v9 = vor.u32 %v7189_v49, %v7188_v0  ;;  %v7192_v11 = vrot.slane %v7188_v0, 4  ;;  %v7361_v49 = vld [vmem:[#allocation3 + $0x3c] sm:$0x1] }
 0x3c0   :  { %7336 = vst [vmem:[#allocation3 + $0x18] sm:$0xf] %v7335_v60  ;;  %7339 = vst [vmem:[#allocation3 + $0x1c] sm:$0x1] %v7338_v6  ;;  %v7323_v12 = vsel %vm15094_vm11, %v7167_v56, %v7322_v46  ;;  %v7326_v13 = vsel %vm15101_vm12, %v7168_v62, %v7325_v21  ;;  %v7175_v32 = vor.u32 %v7173_v52, %v7172_v45  ;;  %v7176_v33 = vrot.slane %v7172_v45, 4 }
 0x3c1   :  { %7324 = vst [vmem:[#allocation3 + $0x8] sm:$0xf] %v7323_v12  ;;  %7327 = vst [vmem:[#allocation3 + $0xc] sm:$0x1] %v7326_v13  ;;  %v7341_v36 = vsel %vm15094_vm11, %v7191_v9, %v7340_v61  ;;  %v7344_v14 = vsel %vm15101_vm12, %v7192_v11, %v7343_v4  ;;  %v12030_v16 = vpack.c.bf16 %v7047_v1, %v7047_v1  ;;  %v15490_v23 = vrot.slane %v7804_v39, 4 }
 0x3c2   :  { %v12028_v28 = vpack.c.bf16 %v7045_v54, %v7045_v54  ;;  %7342 = vst [vmem:[#allocation3 + $0x20] sm:$0xf] %v7341_v36  ;;  %7345 = vst [vmem:[#allocation3 + $0x24] sm:$0x1] %v7344_v14  ;;  %v7329_v44 = vsel %vm15094_vm11, %v7175_v32, %v7328_v26  ;;  %v7332_v25 = vsel %vm15101_vm12, %v7176_v33, %v7331_v27  ;;  %v12896_v20 = vpop.f32.mrb[24].mxu1 }
 0x3c3   :  { %v7032_v24 = vadd.f32 %v12893_v55, %v15451_v48  ;;  %v7030_v5 = vadd.f32 %v15451_v48, %v6910_v2  ;;  %7330 = vst [vmem:[#allocation3 + $0x10] sm:$0xf] %v7329_v44  ;;  %7333 = vst [vmem:[#allocation3 + $0x14] sm:$0x1] %v7332_v25  ;;  %v7210_v40 = vshrl.u32 %v12030_v16, 16  ;;  %v7213_v41 = vshll.u32 %v12030_v16, 16 }
 0x3c4   :  { %v7194_v22 = vshrl.u32 %v12028_v28, 16  ;;  %v6923_v34 = vpop.f32.mrb[25].mxu1  ;;  %v7035_v8 = vadd.f32 %v12896_v20, %v15451_v48  ;;  %v7197_v50 = vshll.u32 %v12028_v28, 16  ;;  %v7349_v52 = vld [vmem:[#allocation3 + $0x2c] sm:$0x1]  ;;  %v15513_v20 = vrot.slane %v7807_v7, 5 }
 0x3c5   :  { %v7048_v43 = vmax.f32 %v7032_v24, 0.0  ;;  %v7046_v17 = vmax.f32 %v7030_v5, 0.0  ;;  %v7033_v18 = vadd.f32 %v15451_v48, %v6923_v34  ;;  %v12897_v46 = vpop.f32.mrb[26].mxu1  ;;  %v7212_v47 = vrot.slane %v7210_v40, 7  ;;  %v7364_v9 = vld [vmem:[#allocation3 + $0x40] sm:$0xf] }
 0x3c6   :  { %v7196_v31 = vrot.slane %v7194_v22, 7  ;;  %v15495_v19 = vadd.f32 %v12897_v46, %v15451_v48  ;;  %v6926_v21 = vpop.f32.mrb[27].mxu1  ;;  %v7051_v55 = vmax.f32 %v7035_v8, 0.0  ;;  %v7367_v11 = vld [vmem:[#allocation3 + $0x44] sm:$0x1]  ;;  %v13761_v5 = vld [vmem:[%s16059_s5 + $0x48] sm:$0xff]  }
 0x3c7   :  { %v12031_v39 = vpack.c.bf16 %v7048_v43, %v7048_v43  ;;  %v12029_v53 = vpack.c.bf16 %v7046_v17, %v7046_v17  ;;  %v7049_v57 = vmax.f32 %v7033_v18, 0.0  ;;  %v7215_v58 = vor.u32 %v7213_v41, %v7212_v47  ;;  %v7352_v26 = vld [vmem:[#allocation3 + $0x30] sm:$0xf]  ;;  %v7355_v27 = vld [vmem:[#allocation3 + $0x34] sm:$0x1] }
 0x3c8   :  { %v7216_v0 = vrot.slane %v7212_v47, 4  ;;  %v7199_v61 = vor.u32 %v7197_v50, %v7196_v31  ;;  %v7200_v1 = vrot.slane %v7196_v31, 4  ;;  %v13758_v12 = vld [vmem:[#allocation3] ss:$8 sps:$4 sm:$0xff]   ;;  %v12034_v33 = vpack.c.bf16 %v7051_v55, %v7051_v55 }
 0x3c9   :  { %v7218_v2 = vshrl.u32 %v12031_v39, 16  ;;  %v7221_v56 = vshll.u32 %v12031_v39, 16  ;;  %v7202_v62 = vshrl.u32 %v12029_v53, 16  ;;  %v7205_v4 = vshll.u32 %v12029_v53, 16  ;;  %12918 = vmatprep.mubr.bf16.mxu0 %v13758_v12  ;;  %v7382_v31 = vld [vmem:[#allocation3 + $0x68] sm:$0xf] }
 0x3ca   :  { %v7359_v45 = vsel %vm15094_vm11, %v7215_v58, %v7358_v42  ;;  %v7362_v54 = vsel %vm15101_vm12, %v7216_v0, %v7361_v49  ;;  %v7347_v60 = vsel %vm15094_vm11, %v7199_v61, %v7346_v51  ;;  %v7350_v6 = vsel %vm15101_vm12, %v7200_v1, %v7349_v52  ;;  %v12900_v14 = vpop.f32.mrb[28].mxu1  ;;  %v13760_v24 = vld [vmem:[#allocation3 + $0x10] ss:$8 sps:$4 sm:$0xff]   ;;  %v7373_v53 = vld [vmem:[#allocation3 + $0x5c] sm:$0x1] }
 0x3cb   :  { %7360 = vst [vmem:[#allocation3 + $0x38] sm:$0xf] %v7359_v45  ;;  %7363 = vst [vmem:[#allocation3 + $0x3c] sm:$0x1] %v7362_v54  ;;  %v7220_v13 = vrot.slane %v7218_v2, 7  ;;  %v7204_v32 = vrot.slane %v7202_v62, 7  ;;  %v12032_v36 = vpack.c.bf16 %v7049_v57, %v7049_v57  ;;  %v7034_v28 = vadd.f32 %v15451_v48, %v6926_v21  ;;  %12919 = vmatmul.mubr.bf16.vlgmr.msra.gmra.mrb[16].mxu0 %v13760_v24 }
 0x3cc   :  { %7348 = vst [vmem:[#allocation3 + $0x28] sm:$0xf] %v7347_v60  ;;  %7351 = vst [vmem:[#allocation3 + $0x2c] sm:$0x1] %v7350_v6  ;;  %v7052_v16 = vmax.f32 %v15495_v19, 0.0  ;;  %v7039_v44 = vadd.f32 %v12900_v14, %v15451_v48  ;;  %v6939_v25 = vpop.f32.mrb[29].mxu1  ;;  %12935 = vmatpush3.bf16.msra.mxu0 %v15445_v3 }
 0x3cd   :  { %v7223_v40 = vor.u32 %v7221_v56, %v7220_v13  ;;  %v7224_v41 = vrot.slane %v7220_v13, 4  ;;  %v7207_v22 = vor.u32 %v7205_v4, %v7204_v32  ;;  %v7208_v34 = vrot.slane %v7204_v32, 4  ;;  %v12901_v42 = vpop.f32.mrb[30].mxu1  ;;  %v7385_v19 = vld [vmem:[#allocation3 + $0x6c] sm:$0x1]  ;;  %12936 = vmatprep.subr.bf16.mxu0 %v13761_v5  ;;  %v13763_v3 = vld [vmem:[%s16059_s5 + $0x50] sm:$0xff]  }
 0x3ce   :  { %v7242_v43 = vshrl.u32 %v12034_v33, 16  ;;  %v7245_v17 = vshll.u32 %v12034_v33, 16  ;;  %v7226_v8 = vshrl.u32 %v12032_v36, 16  ;;  %v7229_v18 = vshll.u32 %v12032_v36, 16  ;;  %v6942_v46 = vpop.f32.mrb[31].mxu1  ;;  %v13765_v12 = vld [vmem:[%s16059_s5 + $0x58] sm:$0xff]  }
 0x3cf   :  { %v7365_v47 = vsel %vm15094_vm11, %v7223_v40, %v7364_v9  ;;  %v7368_v49 = vsel %vm15101_vm12, %v7224_v41, %v7367_v11  ;;  %v7353_v15 = vsel %vm15094_vm11, %v7207_v22, %v7352_v26  ;;  %v7356_v7 = vsel %vm15101_vm12, %v7208_v34, %v7355_v27  ;;  %v7370_v39 = vld [vmem:[#allocation3 + $0x58] sm:$0xf]  ;;  %v7388_v26 = vld [vmem:[#allocation3 + $0x70] sm:$0xf]  ;;  %v7391_v27 = vld [vmem:[#allocation3 + $0x74] sm:$0x1] }
 0x3d0   :  { %7366 = vst [vmem:[#allocation3 + $0x40] sm:$0xf] %v7365_v47  ;;  %7369 = vst [vmem:[#allocation3 + $0x44] sm:$0x1] %v7368_v49  ;;  %v7244_v50 = vrot.slane %v7242_v43, 7  ;;  %v7228_v21 = vrot.slane %v7226_v8, 7  ;;  %v12035_v51 = vpack.c.bf16 %v7052_v16, %v7052_v16  ;;  %v7037_v57 = vadd.f32 %v15451_v48, %v6939_v25  ;;  %12937 = vmatpush3.bf16.msra.mxu0 %v13761_v5 }
 0x3d1   :  { %7354 = vst [vmem:[#allocation3 + $0x30] sm:$0xf] %v7353_v15  ;;  %7357 = vst [vmem:[#allocation3 + $0x34] sm:$0x1] %v7356_v7  ;;  %v7050_v52 = vmax.f32 %v7034_v28, 0.0  ;;  %v7055_v55 = vmax.f32 %v7039_v44, 0.0  ;;  %v7040_v58 = vadd.f32 %v12901_v42, %v15451_v48  ;;  %v7038_v0 = vadd.f32 %v15451_v48, %v6942_v46  ;;  %12938 = vmatprep.subr.bf16.mxu0 %v13763_v3 }
 0x3d2   :  { %v7247_v61 = vor.u32 %v7245_v17, %v7244_v50  ;;  %v7248_v1 = vrot.slane %v7244_v50, 4  ;;  %v7231_v2 = vor.u32 %v7229_v18, %v7228_v21  ;;  %v7232_v56 = vrot.slane %v7228_v21, 4  ;;  %v15541_v14 = vld [vmem:[#allocation3 + $0x8] sm:$0xf]  ;;  %v7376_v16 = vld [vmem:[#allocation3 + $0x60] sm:$0xf] }
 0x3d3   :  { %v13762_v62 = vld [vmem:[#allocation3 + $0x20] ss:$8 sps:$4 sm:$0xff]   ;;  %v7250_v4 = vshrl.u32 %v12035_v51, 16  ;;  %v7253_v45 = vshll.u32 %v12035_v51, 16  ;;  %v12033_v54 = vpack.c.bf16 %v7050_v52, %v7050_v52  ;;  %v12038_v60 = vpack.c.bf16 %v7055_v55, %v7055_v55  ;;  %v7379_v34 = vld [vmem:[#allocation3 + $0x64] sm:$0x1] }
 0x3d4   :  { %v7383_v6 = vsel %vm15094_vm11, %v7247_v61, %v7382_v31  ;;  %v7386_v48 = vsel %vm15101_vm12, %v7248_v1, %v7385_v19  ;;  %v7371_v9 = vsel %vm15094_vm11, %v7231_v2, %v7370_v39  ;;  %v7374_v11 = vsel %vm15101_vm12, %v7232_v56, %v7373_v53  ;;  %12922 = vmatprep.mubr.bf16.mxu0 %v13762_v62  ;;  %v13767_v18 = vld [vmem:[%s16059_s5 + $0x60] sm:$0xff]   ;;  %v7406_v31 = vld [vmem:[#allocation3 + $0x88] sm:$0xf]  ;;  %v7409_v50 = vld [vmem:[#allocation3 + $0x8c] sm:$0x1] }
 0x3d5   :  { %7384 = vst [vmem:[#allocation3 + $0x68] sm:$0xf] %v7383_v6  ;;  %7387 = vst [vmem:[#allocation3 + $0x6c] sm:$0x1] %v7386_v48  ;;  %v7252_v13 = vrot.slane %v7250_v4, 7  ;;  %v7234_v32 = vshrl.u32 %v12033_v54, 16  ;;  %12939 = vmatpush3.bf16.msra.mxu0 %v13763_v3 }
 0x3d6   :  { %7372 = vst [vmem:[#allocation3 + $0x58] sm:$0xf] %v7371_v9  ;;  %7375 = vst [vmem:[#allocation3 + $0x5c] sm:$0x1] %v7374_v11  ;;  %v7237_v33 = vshll.u32 %v12033_v54, 16  ;;  %v7274_v36 = vshrl.u32 %v12038_v60, 16  ;;  %12940 = vmatprep.subr.bf16.mxu0 %v13765_v12 }
 0x3d7   :  { %v7277_v28 = vshll.u32 %v12038_v60, 16  ;;  %v7053_v44 = vmax.f32 %v7037_v57, 0.0  ;;  %v7056_v25 = vmax.f32 %v7040_v58, 0.0  ;;  %v7054_v24 = vmax.f32 %v7038_v0, 0.0  ;;  %v7394_v57 = vld [vmem:[#allocation3 + $0x78] sm:$0xf] }
 0x3d8   :  { %v7255_v5 = vor.u32 %v7253_v45, %v7252_v13  ;;  %v7256_v40 = vrot.slane %v7252_v13, 4  ;;  %v7236_v41 = vrot.slane %v7234_v32, 7  ;;  %v7276_v22 = vrot.slane %v7274_v36, 7  ;;  %v13764_v8 = vld [vmem:[#allocation3 + $0x30] ss:$8 sps:$4 sm:$0xff]   ;;  %v13769_v3 = vld [vmem:[%s16059_s5 + $0x68] sm:$0xff]  }
 0x3d9   :  { %v12036_v42 = vpack.c.bf16 %v7053_v44, %v7053_v44  ;;  %v12039_v43 = vpack.c.bf16 %v7056_v25, %v7056_v25  ;;  %v12037_v17 = vpack.c.bf16 %v7054_v24, %v7054_v24  ;;  %v7706_v46 = vshrl.u32 %v15541_v14, 16  ;;  %12923 = vmatmul.mubr.bf16.gmra.mrb[20].mxu0 %v13764_v8  ;;  %v7397_v58 = vld [vmem:[#allocation3 + $0x7c] sm:$0x1]  ;;  %v7663_v61 = vld [vmem:[#allocation3 + $0x10] sm:$0xf] }
 0x3da   :  { %v7389_v47 = vsel %vm15094_vm11, %v7255_v5, %v7388_v26  ;;  %v7392_v49 = vsel %vm15101_vm12, %v7256_v40, %v7391_v27  ;;  %v7239_v15 = vor.u32 %v7237_v33, %v7236_v41  ;;  %v7240_v7 = vrot.slane %v7236_v41, 4  ;;  %12941 = vmatpush3.bf16.msra.mxu0 %v13765_v12  ;;  %v7412_v2 = vld [vmem:[#allocation3 + $0x90] sm:$0xf]  ;;  %v7415_v56 = vld [vmem:[#allocation3 + $0x94] sm:$0x1] }
 0x3db   :  { %7390 = vst [vmem:[#allocation3 + $0x70] sm:$0xf] %v7389_v47  ;;  %7393 = vst [vmem:[#allocation3 + $0x74] sm:$0x1] %v7392_v49  ;;  %v7279_v19 = vor.u32 %v7277_v28, %v7276_v22  ;;  %v7280_v21 = vrot.slane %v7276_v22, 4  ;;  %v7258_v51 = vshrl.u32 %v12036_v42, 16  ;;  %12942 = vmatprep.subr.bf16.mxu0 %v13767_v18 }
 0x3dc   :  { %v15553_v52 = vrot.slane %v7813_v63, 5  ;;  %v7377_v39 = vsel %vm15094_vm11, %v7239_v15, %v7376_v16  ;;  %v7380_v53 = vsel %vm15101_vm12, %v7240_v7, %v7379_v34  ;;  %v7261_v55 = vshll.u32 %v12036_v42, 16  ;;  %v7400_v60 = vld [vmem:[#allocation3 + $0x80] sm:$0xf]  ;;  %v7662_v12 = vld [vmem:[#allocation3 + $0xc] sm:$0x1] }
 0x3dd   :  { %v7282_v0 = vshrl.u32 %v12039_v43, 16  ;;  %7378 = vst [vmem:[#allocation3 + $0x60] sm:$0xf] %v7377_v39  ;;  %7381 = vst [vmem:[#allocation3 + $0x64] sm:$0x1] %v7380_v53  ;;  %v7407_v37 = vsel %vm15094_vm11, %v7279_v19, %v7406_v31  ;;  %v7410_v63 = vsel %vm15101_vm12, %v7280_v21, %v7409_v50  ;;  %v7260_v1 = vrot.slane %v7258_v51, 7 }
 0x3de   :  { %v7266_v62 = vshrl.u32 %v12037_v17, 16  ;;  %v13766_v4 = vld [vmem:[#allocation3 + $0x50] ss:$8 sps:$4 sm:$0xff]   ;;  %7408 = vst [vmem:[#allocation3 + $0x88] sm:$0xf] %v7407_v37  ;;  %v7285_v54 = vshll.u32 %v12039_v43, 16  ;;  %12943 = vmatpush3.bf16.msra.mxu0 %v13767_v18  ;;  %v7810_v39 = vor.u32 %v15513_v20, %v15490_v23 }
 0x3df   :  { %7411 = vst [vmem:[#allocation3 + $0x8c] sm:$0x1] %v7410_v63  ;;  %v7284_v45 = vrot.slane %v7282_v0, 7  ;;  %v7708_v6 = vrot.slane %v7706_v46, 4  ;;  %v7709_v48 = vshll.u32 %v15541_v14, 16  ;;  %v7263_v9 = vor.u32 %v7261_v55, %v7260_v1  ;;  %12926 = vmatprep.mubr.bf16.mxu0 %v13766_v4  ;;  %12944 = vmatprep.subr.bf16.mxu0 %v13769_v3  ;;  %v13771_v24 = vld [vmem:[%s16059_s5 + $0x70] sm:$0xff]  }
 0x3e0   :  { %v7264_v11 = vrot.slane %v7260_v1, 4  ;;  %v7268_v26 = vrot.slane %v7266_v62, 7  ;;  %v7269_v27 = vshll.u32 %v12037_v17, 16  ;;  %v7403_v33 = vld [vmem:[#allocation3 + $0x84] sm:$0x1]  ;;  %v7720_v16 = vshrl.u32 %v7663_v61, 16 }
 0x3e1   :  { %v7287_v13 = vor.u32 %v7285_v54, %v7284_v45  ;;  %v7288_v32 = vrot.slane %v7284_v45, 4  ;;  %v7711_v36 = vrot.slane %v7709_v48, 5  ;;  %v7395_v28 = vsel %vm15094_vm11, %v7263_v9, %v7394_v57  ;;  %v7665_v34 = vld [vmem:[#allocation3 + $0x18] sm:$0xf]  ;;  %v7664_v8 = vld [vmem:[#allocation3 + $0x14] sm:$0x1] }
 0x3e2   :  { %v7398_v44 = vsel %vm15101_vm12, %v7264_v11, %v7397_v58  ;;  %v7271_v25 = vor.u32 %v7269_v27, %v7268_v26  ;;  %v7272_v14 = vrot.slane %v7268_v26, 4  ;;  %7396 = vst [vmem:[#allocation3 + $0x78] sm:$0xf] %v7395_v28  ;;  %v7715_v22 = vshll.u32 %v7662_v12, 16  ;;  %v13773_v17 = vld [vmem:[%s16059_s5 + $0x78] sm:$0xff]   ;;  %12945 = vmatpush3.bf16.msra.mxu0 %v13769_v3  ;;  %v15590_v53 = vld [vmem:[%s16059_s5 + $0x80] sm:$0xff]  }
 0x3e3   :  { %7399 = vst [vmem:[#allocation3 + $0x7c] sm:$0x1] %v7398_v44  ;;  %v7413_v5 = vsel %vm15094_vm11, %v7287_v13, %v7412_v2  ;;  %v7416_v40 = vsel %vm15101_vm12, %v7288_v32, %v7415_v56  ;;  %v7712_v41 = vor.u32 %v7711_v36, %v7708_v6  ;;  %v7722_v18 = vrot.slane %v7720_v16, 4  ;;  %v7667_v47 = vld [vmem:[#allocation3 + $0x20] sm:$0xf]  ;;  %12946 = vmatprep.subr.bf16.mxu0 %v13771_v24 }
 0x3e4   :  { %7414 = vst [vmem:[#allocation3 + $0x90] sm:$0xf] %v7413_v5  ;;  %7417 = vst [vmem:[#allocation3 + $0x94] sm:$0x1] %v7416_v40  ;;  %v7401_v42 = vsel %vm15094_vm11, %v7271_v25, %v7400_v60  ;;  %v7404_v43 = vsel %vm15101_vm12, %v7272_v14, %v7403_v33  ;;  %v7723_v46 = vshll.u32 %v7663_v61, 16  ;;  %v7734_v31 = vshrl.u32 %v7665_v34, 16 }
 0x3e5   :  { %7402 = vst [vmem:[#allocation3 + $0x80] sm:$0xf] %v7401_v42  ;;  %7405 = vst [vmem:[#allocation3 + $0x84] sm:$0x1] %v7404_v43  ;;  %v13768_v49 = vld [vmem:[#allocation3 + $0x60] ss:$8 sps:$4 sm:$0xff]   ;;  %v7704_v61 = vsel %vm14060_vm3, %v15463_v38, %v15461_v35 }
 0x3e6   :  { %v7666_v15 = vld [vmem:[#allocation3 + $0x1c] sm:$0x1]  ;;  %v7713_v7 = vrot.slane %v7712_v41, 4  ;;  %v7725_v10 = vrot.slane %v7723_v46, 5  ;;  %v7737_v50 = vshll.u32 %v7665_v34, 16  ;;  %12927 = vmatmul.mubr.bf16.gmra.mrb[24].mxu0 %v13768_v49  ;;  %v7717_v29 = vrot.slane %v7715_v22, 5 }
 0x3e7   :  { %v7669_v19 = vld [vmem:[#allocation3 + $0x28] sm:$0xf]  ;;  %v7748_v21 = vshrl.u32 %v7667_v47, 16  ;;  %v7751_v51 = vshll.u32 %v7667_v47, 16  ;;  %v7729_v57 = vshll.u32 %v7664_v8, 16  ;;  %v7736_v58 = vrot.slane %v7734_v31, 4  ;;  %12947 = vmatpush3.bf16.msra.mxu0 %v13771_v24 }
 0x3e8   :  { %v7726_v55 = vor.u32 %v7725_v10, %v7722_v18  ;;  %v7739_v0 = vrot.slane %v7737_v50, 5  ;;  %v7668_v3 = vld [vmem:[#allocation3 + $0x24] sm:$0x1]  ;;  %v7670_v37 = vld [vmem:[#allocation3 + $0x2c] sm:$0x1]  ;;  %v7718_v2 = vsel %vm14060_vm3, %v7713_v7, %v7717_v29  ;;  %12948 = vmatprep.subr.bf16.mxu0 %v13773_v17  ;;  %v7743_v62 = vshll.u32 %v7666_v15, 16 }
 0x3e9   :  { %v7750_v63 = vrot.slane %v7748_v21, 4  ;;  %v7753_v1 = vrot.slane %v7751_v51, 5  ;;  %v7671_v23 = vld [vmem:[#allocation3 + $0x30] sm:$0xf]  ;;  %v7762_v4 = vshrl.u32 %v7669_v19, 16  ;;  %v7757_v54 = vshll.u32 %v7668_v3, 16 }
 0x3ea   :  { %v13770_v20 = vld [vmem:[#allocation3 + $0x70] ss:$8 sps:$4 sm:$0xff]   ;;  %v7740_v56 = vor.u32 %v7739_v0, %v7736_v58  ;;  %v7727_v45 = vrot.slane %v7726_v55, 4  ;;  %v7765_v60 = vshll.u32 %v7669_v19, 16  ;;  %v15598_v48 = vrot.slane %v7810_v39, 4  ;;  %v13775_v0 = vld [vmem:[%s16059_s5 + $0x88] sm:$0xff]  }
 0x3eb   :  { %v7673_v6 = vld [vmem:[#allocation3 + $0x38] sm:$0xf]  ;;  %12930 = vmatprep.mubr.bf16.mxu0 %v13770_v20  ;;  %v7731_v38 = vrot.slane %v7729_v57, 5  ;;  %v7754_v9 = vor.u32 %v7753_v1, %v7750_v63  ;;  %v7764_v11 = vrot.slane %v7762_v4, 4  ;;  %v11710_v26 = vcombine.low %v7704_v61, %v7718_v2  ;;  %12949 = vmatpush3.bf16.msra.mxu0 %v13773_v17  ;;  %v7679_v5 = vld [vmem:[#allocation3 + $0x60] sm:$0xf] }
 0x3ec   :  { %v13772_v35 = vld [vmem:[#allocation3 + $0x80] ss:$8 sps:$4 sm:$0xff]   ;;  %v7767_v27 = vrot.slane %v7765_v60, 5  ;;  %v7771_v12 = vshll.u32 %v7670_v37, 16  ;;  %v7776_v13 = vshrl.u32 %v7671_v23, 16  ;;  %12966 = vmatprep.subr.bf16.mxu0 %v15590_v53  ;;  %v7741_v32 = vrot.slane %v7740_v56, 4 }
 0x3ed   :  { %v7745_v33 = vrot.slane %v7743_v62, 5  ;;  %v7779_v36 = vshll.u32 %v7671_v23, 16  ;;  %v7790_v16 = vshrl.u32 %v7673_v6, 16  ;;  %v7677_v28 = vld [vmem:[#allocation3 + $0x58] sm:$0xf]  ;;  %v7732_v44 = vsel %vm14060_vm3, %v7727_v45, %v7731_v38 }
 0x3ee   :  { %12931 = vmatmul.mubr.bf16.gmra.mrb[28].mxu0 %v13772_v35  ;;  %v7759_v25 = vrot.slane %v7757_v54, 5  ;;  %v7768_v14 = vor.u32 %v7767_v27, %v7764_v11  ;;  %v7778_v24 = vrot.slane %v7776_v13, 4  ;;  %v7755_v40 = vrot.slane %v7754_v9, 4  ;;  %v7672_v41 = vld [vmem:[#allocation3 + $0x34] sm:$0x1] }
 0x3ef   :  { %12950 = vmatprep.mubr.bf16.mxu0 %v11710_v26  ;;  %v7781_v22 = vrot.slane %v7779_v36, 5  ;;  %v7792_v34 = vrot.slane %v7790_v16, 4  ;;  %v7793_v42 = vshll.u32 %v7673_v6, 16  ;;  %v7773_v17 = vrot.slane %v7771_v12, 5  ;;  %v7674_v8 = vld [vmem:[#allocation3 + $0x3c] sm:$0x1] }
 0x3f0   :  { %v7769_v43 = vrot.slane %v7768_v14, 4  ;;  %v7818_v18 = vshrl.u32 %v7677_v28, 16  ;;  %v7821_v46 = vshll.u32 %v7677_v28, 16  ;;  %v7746_v47 = vsel %vm14060_vm3, %v7741_v32, %v7745_v33  ;;  %v7678_v7 = vld [vmem:[#allocation3 + $0x5c] sm:$0x1]  ;;  %v13776_v9 = vld [vmem:[%s16059_s5 + $0x90] sm:$0xff]  }
 0x3f1   :  { %v7782_v49 = vor.u32 %v7781_v22, %v7778_v24  ;;  %v7795_v15 = vrot.slane %v7793_v42, 5  ;;  %v7832_v10 = vshrl.u32 %v7679_v5, 16  ;;  %v7785_v50 = vshll.u32 %v7672_v41, 16  ;;  %v7681_v21 = vld [vmem:[#allocation3 + $0x68] sm:$0xf]  ;;  %v13777_v22 = vld [vmem:[%s16059_s5 + $0x98] sm:$0xff]  }
 0x3f2   :  { %v7774_v31 = vsel %vm14060_vm3, %v7769_v43, %v7773_v17  ;;  %v7820_v29 = vrot.slane %v7818_v18, 4  ;;  %v7823_v19 = vrot.slane %v7821_v46, 5  ;;  %v11711_v51 = vcombine.low %v7732_v44, %v7746_v47  ;;  %v7683_v63 = vld [vmem:[#allocation3 + $0x70] sm:$0xf]  ;;  %v7680_v4 = vld [vmem:[#allocation3 + $0x64] sm:$0x1] }
 0x3f3   :  { %v7760_v39 = vsel %vm14060_vm3, %v7755_v40, %v7759_v25  ;;  %v7796_v55 = vor.u32 %v7795_v15, %v7792_v34  ;;  %v7799_v57 = vshll.u32 %v7674_v8, 16  ;;  %v7827_v61 = vshll.u32 %v7678_v7, 16  ;;  %v7685_v35 = vld [vmem:[#allocation3 + $0x78] sm:$0xf]  ;;  %v7687_v12 = vld [vmem:[#allocation3 + $0x80] sm:$0xf] }
 0x3f4   :  { %v11712_v58 = vcombine.low %v7760_v39, %v7774_v31  ;;  %v7824_v3 = vor.u32 %v7823_v19, %v7820_v29  ;;  %v7835_v37 = vshll.u32 %v7679_v5, 16  ;;  %v7783_v1 = vrot.slane %v7782_v49, 4  ;;  %v7686_v32 = vld [vmem:[#allocation3 + $0x7c] sm:$0x1]  ;;  %v7682_v28 = vld [vmem:[#allocation3 + $0x6c] sm:$0x1] }
 0x3f5   :  { %v7834_v23 = vrot.slane %v7832_v10, 4  ;;  %v7846_v20 = vshrl.u32 %v7681_v21, 16  ;;  %v7849_v2 = vshll.u32 %v7681_v21, 16  ;;  %v7787_v56 = vrot.slane %v7785_v50, 5  ;;  %v7684_v24 = vld [vmem:[#allocation3 + $0x74] sm:$0x1] }
 0x3f6   :  { %12951 = vmatmul.mubr.bf16.vlgmr.msra.gmra.mrb[16].mxu0 %v11711_v51  ;;  %v7825_v62 = vrot.slane %v7824_v3, 4  ;;  %v7837_v45 = vrot.slane %v7835_v37, 5  ;;  %v7797_v54 = vrot.slane %v7796_v55, 4  ;;  %v7860_v38 = vshrl.u32 %v7683_v63, 16  ;;  %v7689_v17 = vld [vmem:[#allocation3 + $0x88] sm:$0xf] }
 0x3f7   :  { %12967 = vmatpush3.bf16.msra.mxu0 %v15590_v53  ;;  %12954 = vmatprep.mubr.bf16.mxu0 %v11712_v58  ;;  %v7848_v60 = vrot.slane %v7846_v20, 4  ;;  %v7851_v6 = vrot.slane %v7849_v2, 5  ;;  %v7801_v11 = vrot.slane %v7799_v57, 5  ;;  %v7816_v26 = vsel %vm14060_vm3, %v15598_v48, %v15553_v52  ;;  %v13778_v49 = vld [vmem:[%s16059_s5 + $0xa0] sm:$0xff]   ;;  %v8159_v20 = vld [vmem:[#allocation3 + $0x8] sm:$0xe] }
 0x3f8   :  { %12968 = vmatprep.subr.bf16.mxu0 %v13775_v0  ;;  %v7829_v27 = vrot.slane %v7827_v61, 5  ;;  %v7788_v53 = vsel %vm14060_vm3, %v7783_v1, %v7787_v56  ;;  %v7838_v13 = vor.u32 %v7837_v45, %v7834_v23  ;;  %v7862_v33 = vrot.slane %v7860_v38, 4  ;;  %v7688_v10 = vld [vmem:[#allocation3 + $0x84] sm:$0x1]  ;;  %v7690_v61 = vld [vmem:[#allocation3 + $0x8c] sm:$0x1] }
 0x3f9   :  { %v7863_v36 = vshll.u32 %v7683_v63, 16  ;;  %v7841_v44 = vshll.u32 %v7680_v4, 16  ;;  %v7874_v25 = vshrl.u32 %v7685_v35, 16  ;;  %v7877_v14 = vshll.u32 %v7685_v35, 16  ;;  %v8157_v1 = vld [vmem:[#allocation3] sm:$0xe] }
 0x3fa   :  { %v7830_v16 = vsel %vm14060_vm3, %v7825_v62, %v7829_v27  ;;  %v7802_v52 = vsel %vm14060_vm3, %v7797_v54, %v7801_v11  ;;  %v7852_v48 = vor.u32 %v7851_v6, %v7848_v60  ;;  %v7888_v40 = vshrl.u32 %v7687_v12, 16  ;;  %v8158_v23 = vld [vmem:[#allocation3 + $0x4] sm:$0x1]  ;;  %v8160_v60 = vld [vmem:[#allocation3 + $0xc] sm:$0x1] }
 0x3fb   :  { %12969 = vmatpush3.bf16.msra.mxu0 %v13775_v0  ;;  %v7865_v5 = vrot.slane %v7863_v36, 5  ;;  %v11713_v41 = vcombine.low %v7788_v53, %v7802_v52  ;;  %v7876_v34 = vrot.slane %v7874_v25, 4  ;;  %v7879_v42 = vrot.slane %v7877_v14, 5  ;;  %v13779_v38 = vld [vmem:[%s16059_s5 + $0xa8] sm:$0xff]   ;;  %v13780_v36 = vld [vmem:[%s16059_s5 + $0xb0] sm:$0xff]  }
 0x3fc   :  { %12970 = vmatprep.subr.bf16.mxu0 %v13776_v9  ;;  %v7883_v43 = vshll.u32 %v7686_v32, 16  ;;  %v11714_v8 = vcombine.low %v7816_v26, %v7830_v16  ;;  %v7839_v18 = vrot.slane %v7838_v13, 4  ;;  %v7855_v46 = vshll.u32 %v7682_v28, 16  ;;  %v8161_v14 = vld [vmem:[#allocation3 + $0x10] sm:$0xe] }
 0x3fd   :  { %v7866_v47 = vor.u32 %v7865_v5, %v7862_v33  ;;  %v7869_v15 = vshll.u32 %v7684_v24, 16  ;;  %v7880_v7 = vor.u32 %v7879_v42, %v7876_v34  ;;  %v7890_v31 = vrot.slane %v7888_v40, 4  ;;  %v8162_v52 = vld [vmem:[#allocation3 + $0x14] sm:$0x1]  ;;  %v8168_v5 = vld [vmem:[#allocation3 + $0x2c] sm:$0x1] }
 0x3fe   :  { %12955 = vmatmul.mubr.bf16.gmra.mrb[20].mxu0 %v11713_v41  ;;  %v7891_v50 = vshll.u32 %v7687_v12, 16  ;;  %v7843_v29 = vrot.slane %v7841_v44, 5  ;;  %v7853_v19 = vrot.slane %v7852_v48, 4  ;;  %v7902_v21 = vshrl.u32 %v7689_v17, 16  ;;  %v8167_v48 = vld [vmem:[#allocation3 + $0x28] sm:$0xe] }
 0x3ff   :  { %12971 = vmatpush3.bf16.msra.mxu0 %v13776_v9  ;;  %12958 = vmatprep.mubr.bf16.mxu0 %v11714_v8  ;;  %v7905_v51 = vshll.u32 %v7689_v17, 16  ;;  %v7867_v39 = vrot.slane %v7866_v47, 4  ;;  %v7881_v55 = vrot.slane %v7880_v7, 4  ;;  %v7885_v57 = vrot.slane %v7883_v43, 5  ;;  %v13781_v41 = vld [vmem:[%s16059_s5 + $0xb8] sm:$0xff]   ;;  %v13782_v7 = vld [vmem:[%s16059_s5 + $0xc0] sm:$0xff]  }
 0x400   :  { %12972 = vmatprep.subr.bf16.mxu0 %v13777_v22  ;;  %v7893_v58 = vrot.slane %v7891_v50, 5  ;;  %v7844_v0 = vsel %vm14060_vm3, %v7839_v18, %v7843_v29  ;;  %v7857_v3 = vrot.slane %v7855_v46, 5  ;;  %v7904_v37 = vrot.slane %v7902_v21, 4  ;;  %v8164_v34 = vld [vmem:[#allocation3 + $0x1c] sm:$0x1] }
 0x401   :  { %v7907_v63 = vrot.slane %v7905_v51, 5  ;;  %v7871_v2 = vrot.slane %v7869_v15, 5  ;;  %v7886_v56 = vsel %vm14060_vm3, %v7881_v55, %v7885_v57  ;;  %v7897_v45 = vshll.u32 %v7688_v10, 16  ;;  %v8165_v8 = vld [vmem:[#allocation3 + $0x20] sm:$0xe] }
 0x402   :  { %v7894_v62 = vor.u32 %v7893_v58, %v7890_v31  ;;  %v7858_v4 = vsel %vm14060_vm3, %v7853_v19, %v7857_v3  ;;  %v7911_v26 = vshll.u32 %v7690_v61, 16  ;;  %v11726_v27 = vrot.slane %v8157_v1, 9  ;;  %v8166_v18 = vld [vmem:[#allocation3 + $0x24] sm:$0x1]  ;;  %v8169_v19 = vld [vmem:[#allocation3 + $0x30] sm:$0xe] }
 0x403   :  { %12973 = vmatpush3.bf16.msra.mxu0 %v13777_v22  ;;  %v7908_v54 = vor.u32 %v7907_v63, %v7904_v37  ;;  %v11715_v6 = vcombine.low %v7844_v0, %v7858_v4  ;;  %v7872_v35 = vsel %vm14060_vm3, %v7867_v39, %v7871_v2  ;;  %v8223_v12 = vrot.slane %v8158_v23, 5  ;;  %v8163_v22 = vld [vmem:[#allocation3 + $0x18] sm:$0xe]  ;;  %v8170_v21 = vld [vmem:[#allocation3 + $0x34] sm:$0x1]  ;;  %v13783_v61 = vld [vmem:[%s16059_s5 + $0xc8] sm:$0xff]  }
 0x404   :  { %12974 = vmatprep.subr.bf16.mxu0 %v13778_v49  ;;  %v11716_v9 = vcombine.low %v7872_v35, %v7886_v56  ;;  %v7895_v11 = vrot.slane %v7894_v62, 4  ;;  %v11727_v53 = vrot.slane %v8159_v20, 9  ;;  %v8227_v13 = vrot.slane %v8160_v60, 5  ;;  %v8173_v51 = vld [vmem:[#allocation3 + $0x50] sm:$0xe] }
 0x405   :  { %v7899_v32 = vrot.slane %v7897_v45, 5  ;;  %v7909_v33 = vrot.slane %v7908_v54, 4  ;;  %v7913_v28 = vrot.slane %v7911_v26, 5  ;;  %v8224_v44 = vsel %vm14247_vm6, %v11726_v27, %v8223_v12  ;;  %v8174_v55 = vld [vmem:[#allocation3 + $0x54] sm:$0x1] }
 0x406   :  { %12959 = vmatmul.mubr.bf16.gmra.mrb[24].mxu0 %v11715_v6  ;;  %v8228_v25 = vsel %vm14247_vm6, %v11727_v53, %v8227_v13  ;;  %v11728_v43 = vrot.slane %v8161_v14, 9  ;;  %v8231_v17 = vrot.slane %v8162_v52, 5  ;;  %v11731_v46 = vrot.slane %v8167_v48, 9  ;;  %v8175_v57 = vld [vmem:[#allocation3 + $0x58] sm:$0xe]  ;;  %v13784_v60 = vld [vmem:[%s16059_s5 + $0xd0] sm:$0xff]  }
 0x407   :  { %12975 = vmatpush3.bf16.msra.mxu0 %v13778_v49  ;;  %12962 = vmatprep.mubr.bf16.mxu0 %v11716_v9  ;;  %v7900_v16 = vsel %vm14060_vm3, %v7895_v11, %v7899_v32  ;;  %v7914_v24 = vsel %vm14060_vm3, %v7909_v33, %v7913_v28  ;;  %v11758_v42 = vcombine.low %v8224_v44, %v8228_v25  ;;  %v8243_v47 = vrot.slane %v8168_v5, 5  ;;  %v8176_v58 = vld [vmem:[#allocation3 + $0x5c] sm:$0x1]  ;;  %v8171_v37 = vld [vmem:[#allocation3 + $0x38] sm:$0xe]  ;;  %v13786_v5 = vld [vmem:[%s16059_s5 + $0xe0] sm:$0xff]  }
 0x408   :  { %12976 = vmatprep.subr.bf16.mxu0 %v13779_v38  ;;  %v11717_v40 = vcombine.low %v7900_v16, %v7914_v24  ;;  %v11729_v49 = vrot.slane %v8163_v22, 9  ;;  %v8235_v15 = vrot.slane %v8164_v34, 5  ;;  %v11730_v10 = vrot.slane %v8165_v8, 9  ;;  %v8172_v63 = vld [vmem:[#allocation3 + $0x3c] sm:$0x1] }
 0x409   :  { %v8239_v31 = vrot.slane %v8166_v18, 5  ;;  %v8232_v50 = vsel %vm14247_vm6, %v11728_v43, %v8231_v17  ;;  %v8244_v29 = vsel %vm14247_vm6, %v11731_v46, %v8243_v47  ;;  %v11732_v23 = vrot.slane %v8169_v19, 9  ;;  %v8177_v9 = vld [vmem:[#allocation3 + $0x60] sm:$0xe]  ;;  %v8178_v11 = vld [vmem:[#allocation3 + $0x64] sm:$0x1] }
 0x40a   :  { %v8236_v39 = vsel %vm14247_vm6, %v11729_v49, %v8235_v15  ;;  %v8247_v20 = vrot.slane %v8170_v21, 5  ;;  %v11734_v2 = vrot.slane %v8173_v51, 9  ;;  %v8255_v56 = vrot.slane %v8174_v55, 5  ;;  %v8183_v27 = vld [vmem:[#allocation3 + $0x78] sm:$0xe]  ;;  %v13787_v46 = vld [vmem:[%s16059_s5 + $0xe8] sm:$0xff]  }
 0x40b   :  { %12977 = vmatpush3.bf16.msra.mxu0 %v13779_v38  ;;  %v11759_v0 = vcombine.low %v8232_v50, %v8236_v39  ;;  %v8240_v3 = vsel %vm14247_vm6, %v11730_v10, %v8239_v31  ;;  %v11735_v62 = vrot.slane %v8175_v57, 9  ;;  %v8259_v4 = vrot.slane %v8176_v58, 5  ;;  %v8184_v12 = vld [vmem:[#allocation3 + $0x7c] sm:$0x1]  ;;  %v8179_v32 = vld [vmem:[#allocation3 + $0x68] sm:$0xe] }
 0x40c   :  { %12978 = vmatprep.subr.bf16.mxu0 %v13780_v36  ;;  %v11760_v1 = vcombine.low %v8240_v3, %v8244_v29  ;;  %v11733_v45 = vrot.slane %v8171_v37, 9  ;;  %v8251_v54 = vrot.slane %v8172_v63, 5  ;;  %v8248_v6 = vsel %vm14247_vm6, %v11732_v23, %v8247_v20  ;;  %v13785_v13 = vld [vmem:[%s16059_s5 + $0xd8] sm:$0xff]   ;;  %v8180_v33 = vld [vmem:[#allocation3 + $0x6c] sm:$0x1]  ;;  %v13788_v29 = vld [vmem:[%s16059_s5 + $0xf0] sm:$0xff]  }
 0x40d   :  { %v8256_v35 = vsel %vm14247_vm6, %v11734_v2, %v8255_v56  ;;  %v8260_v38 = vsel %vm14247_vm6, %v11735_v62, %v8259_v4  ;;  %v11736_v16 = vrot.slane %v8177_v9, 9  ;;  %v8263_v28 = vrot.slane %v8178_v11, 5  ;;  %v8181_v44 = vld [vmem:[#allocation3 + $0x70] sm:$0xe]  ;;  %v8182_v25 = vld [vmem:[#allocation3 + $0x74] sm:$0x1] }
 0x40e   :  { %12963 = vmatmul.mubr.bf16.gmra.mrb[28].mxu0 %v11717_v40  ;;  %v8252_v26 = vsel %vm14247_vm6, %v11733_v45, %v8251_v54  ;;  %v11739_v14 = vrot.slane %v8183_v27, 9  ;;  %v8275_v52 = vrot.slane %v8184_v12, 5  ;;  %v11737_v48 = vrot.slane %v8179_v32, 9  ;;  %v8186_v43 = vld [vmem:[#allocation3 + $0x84] sm:$0x1]  ;;  %v13790_v39 = vld [vmem:[%s16059_s5 + $0xf8] sm:$0xff]  }
 0x40f   :  { %12979 = vmatpush3.bf16.msra.mxu0 %v13780_v36  ;;  %12982 = vmatprep.mubr.bf16.mxu0 %v11758_v42  ;;  %v11761_v53 = vcombine.low %v8248_v6, %v8252_v26  ;;  %v11762_v36 = vcombine.low %v8256_v35, %v8260_v38  ;;  %v8267_v24 = vrot.slane %v8180_v33, 5  ;;  %v11738_v40 = vrot.slane %v8181_v44, 9  ;;  %v8185_v42 = vld [vmem:[#allocation3 + $0x80] sm:$0xe]  ;;  %v8187_v47 = vld [vmem:[#allocation3 + $0x88] sm:$0xe] }
 0x410   :  { %12980 = vmatprep.subr.bf16.mxu0 %v13781_v41  ;;  %v8264_v22 = vsel %vm14247_vm6, %v11736_v16, %v8263_v28  ;;  %v8276_v34 = vsel %vm14247_vm6, %v11739_v14, %v8275_v52  ;;  %v8188_v49 = vld [vmem:[#allocation3 + $0x8c] sm:$0x1]  ;;  %v8279_v10 = vrot.slane %v8186_v43, 5  ;;  %v11741_v31 = vrot.slane %v8187_v47, 9  ;;  %v13789_v55 = vld [vmem:[#allocation3 + $0x8] ss:$8 sps:$4 sm:$0xff]  }
 0x411   :  { %v8268_v17 = vsel %vm14247_vm6, %v11737_v48, %v8267_v24  ;;  %v8283_v50 = vrot.slane %v8188_v49, 5  ;;  %v13791_v57 = vld [vmem:[%s16059_s5 + $0x100] sm:$0xff]   ;;  %v8801_v58 = vld [vmem:[#allocation3 + $0x8] sm:$0xf]  ;;  %v8802_v23 = vld [vmem:[#allocation3 + $0xc] sm:$0x1] }
 0x412   :  { %v11763_v8 = vcombine.low %v8264_v22, %v8268_v17  ;;  %v13794_v3 = vld [vmem:[%s16059_s5 + $0x108] sm:$0xff]   ;;  %v8834_v37 = vshrl.u32 %v8801_v58, 16  ;;  %v8837_v63 = vshll.u32 %v8801_v58, 16  ;;  %v13795_v20 = vld [vmem:[%s16059_s5 + $0x110] sm:$0xff]   ;;  %v8807_v45 = vld [vmem:[#allocation3 + $0x20] sm:$0xf] }
 0x413   :  { %12981 = vmatpush3.bf16.msra.mxu0 %v13781_v41  ;;  %v8271_v41 = vrot.slane %v8182_v25, 5  ;;  %v8284_v21 = vsel %vm14247_vm6, %v11741_v31, %v8283_v50  ;;  %v13798_v54 = vld [vmem:[%s16059_s5 + $0x118] sm:$0xff]   ;;  %v8804_v9 = vld [vmem:[#allocation3 + $0x14] sm:$0x1]  ;;  %v8876_v26 = vshrl.u32 %v8807_v45, 16  ;;  %v8879_v27 = vshll.u32 %v8807_v45, 16 }
 0x414   :  { %12998 = vmatprep.subr.bf16.mxu0 %v13782_v7  ;;  %v8836_v2 = vrot.slane %v8834_v37, 4  ;;  %v8839_v56 = vrot.slane %v8837_v63, 5  ;;  %v8805_v6 = vld [vmem:[#allocation3 + $0x18] sm:$0xf]  ;;  %v8806_v11 = vld [vmem:[#allocation3 + $0x1c] sm:$0x1] }
 0x415   :  { %v8272_v18 = vsel %vm14247_vm6, %v11738_v40, %v8271_v41  ;;  %v13796_v35 = vld [vmem:[#allocation3 + $0x38] ss:$8 sps:$4 sm:$0xff]   ;;  %v8808_v32 = vld [vmem:[#allocation3 + $0x24] sm:$0x1]  ;;  %v8862_v33 = vshrl.u32 %v8805_v6, 16  ;;  %v8857_v28 = vshll.u32 %v8804_v9, 16 }
 0x416   :  { %12983 = vmatmul.mubr.bf16.vlgmr.msra.gmra.mrb[16].mxu0 %v11759_v0  ;;  %v11764_v15 = vcombine.low %v8272_v18, %v8276_v34  ;;  %v13792_v0 = vld [vmem:[#allocation3 + $0x18] ss:$8 sps:$4 sm:$0xff]   ;;  %v8840_v12 = vor.u32 %v8839_v56, %v8836_v2  ;;  %v8865_v44 = vshll.u32 %v8805_v6, 16  ;;  %v8809_v25 = vld [vmem:[#allocation3 + $0x28] sm:$0xf]  ;;  %v8878_v52 = vrot.slane %v8876_v26, 4 }
 0x417   :  { %12999 = vmatpush3.bf16.msra.mxu0 %v13782_v7  ;;  %12986 = vmatprep.mubr.bf16.mxu0 %v11760_v1  ;;  %v11740_v7 = vrot.slane %v8185_v42, 9  ;;  %v8803_v1 = vld [vmem:[#allocation3 + $0x10] sm:$0xf]  ;;  %v13797_v38 = vld [vmem:[#allocation3 + $0x58] ss:$8 sps:$4 sm:$0xff]   ;;  %v8881_v48 = vrot.slane %v8879_v27, 5 }
 0x418   :  { %13000 = vmatprep.subr.bf16.mxu0 %v13783_v61  ;;  %v8848_v62 = vshrl.u32 %v8803_v1, 16  ;;  %v8851_v4 = vshll.u32 %v8803_v1, 16  ;;  %v8811_v14 = vld [vmem:[#allocation3 + $0x30] sm:$0xf]  ;;  %v8841_v24 = vrot.slane %v8840_v12, 4  ;;  %v8864_v40 = vrot.slane %v8862_v33, 4 }
 0x419   :  { %v8280_v19 = vsel %vm14247_vm6, %v11740_v7, %v8279_v10  ;;  %v8871_v41 = vshll.u32 %v8806_v11, 16  ;;  %v13800_v22 = vld [vmem:[#allocation3 + $0x68] ss:$8 sps:$4 sm:$0xff]   ;;  %v8867_v42 = vrot.slane %v8865_v44, 5  ;;  %v8885_v43 = vshll.u32 %v8808_v32, 16  ;;  %v13805_v27 = vld [vmem:[%s16059_s5 + $0x138] sm:$0xff]  }
 0x41a   :  { %v11765_v51 = vcombine.low %v8280_v19, %v8284_v21  ;;  %v13802_v34 = vld [vmem:[%s16059_s5 + $0x128] sm:$0xff]   ;;  %v8904_v17 = vshrl.u32 %v8811_v14, 16  ;;  %v13801_v18 = vld [vmem:[#allocation3 + $0x78] ss:$8 sps:$4 sm:$0xff]   ;;  %v8893_v47 = vshll.u32 %v8809_v25, 16  ;;  %v8882_v49 = vor.u32 %v8881_v48, %v8878_v52 }
 0x41b   :  { %13001 = vmatpush3.bf16.msra.mxu0 %v13783_v61  ;;  %v13793_v61 = vld [vmem:[#allocation3 + $0x28] ss:$8 sps:$4 sm:$0xff]   ;;  %v8813_v7 = vld [vmem:[#allocation3 + $0x38] sm:$0xf]  ;;  %v8859_v31 = vrot.slane %v8857_v28, 5  ;;  %v8868_v50 = vor.u32 %v8867_v42, %v8864_v40  ;;  %v8873_v37 = vrot.slane %v8871_v41, 5 }
 0x41c   :  { %13002 = vmatprep.subr.bf16.mxu0 %v13784_v60  ;;  %v8906_v19 = vrot.slane %v8904_v17, 4  ;;  %v8921_v58 = vshll.u32 %v8813_v7, 16  ;;  %v8883_v63 = vrot.slane %v8882_v49, 4  ;;  %v8887_v1 = vrot.slane %v8885_v43, 5  ;;  %v13804_v26 = vld [vmem:[#allocation3 + $0x88] ss:$8 sps:$4 sm:$0xff]  }
 0x41d   :  { %v8869_v45 = vrot.slane %v8868_v50, 4  ;;  %v13806_v44 = vld [vmem:[%s16059_s5 + $0x140] sm:$0xff]  }
 0x41e   :  { %12987 = vmatmul.mubr.bf16.gmra.mrb[20].mxu0 %v11761_v53  ;;  %v8850_v53 = vrot.slane %v8848_v62, 4  ;;  %v8923_v11 = vrot.slane %v8921_v58, 5  ;;  %v8888_v12 = vsel %vm14060_vm3, %v8883_v63, %v8887_v1  ;;  %v8827_v42 = vld [vmem:[#allocation3 + $0x80] sm:$0xf]  ;;  %v13807_v58 = vld [vmem:[%s16059_s5 + $0x148] sm:$0xff]  }
 0x41f   :  { %13003 = vmatpush3.bf16.msra.mxu0 %v13784_v60  ;;  %12990 = vmatprep.mubr.bf16.mxu0 %v11762_v36  ;;  %v8843_v60 = vshll.u32 %v8802_v23, 16  ;;  %v13799_v36 = vld [vmem:[%s16059_s5 + $0x120] sm:$0xff]   ;;  %v8814_v23 = vld [vmem:[#allocation3 + $0x3c] sm:$0x1] }
 0x420   :  { %13004 = vmatprep.subr.bf16.mxu0 %v13785_v13  ;;  %v10447_v30 = vld [vmem:[#allocation3 + $0x24] sm:$0x1] }
 0x421   :  { %v15724_v16 = vrot.slane %v8843_v60, 5 }
 0x423   :  { %13005 = vmatpush3.bf16.msra.mxu0 %v13785_v13  ;;  %v8853_v13 = vrot.slane %v8851_v4, 5  ;;  %v8817_v4 = vld [vmem:[#allocation3 + $0x58] sm:$0xf] }
 0x424   :  { %13006 = vmatprep.subr.bf16.mxu0 %v13786_v5  ;;  %v8949_v32 = vshll.u32 %v8817_v4, 16 }
 0x426   :  { %12991 = vmatmul.mubr.bf16.gmra.mrb[24].mxu0 %v11763_v8  ;;  %v8907_v8 = vshll.u32 %v8811_v14, 16 }
 0x427   :  { %13007 = vmatpush3.bf16.msra.mxu0 %v13786_v5  ;;  %12994 = vmatprep.mubr.bf16.mxu0 %v11764_v15  ;;  %v8854_v5 = vor.u32 %v8853_v13, %v8850_v53  ;;  %v8810_v15 = vld [vmem:[#allocation3 + $0x2c] sm:$0x1]  ;;  %v8927_v53 = vshll.u32 %v8814_v23, 16  ;;  %v8946_v13 = vshrl.u32 %v8817_v4, 16 }
 0x428   :  { %13008 = vmatprep.subr.bf16.mxu0 %v13787_v46  ;;  %v8909_v21 = vrot.slane %v8907_v8, 5  ;;  %v8899_v2 = vshll.u32 %v8810_v15, 16  ;;  %v8822_v23 = vld [vmem:[#allocation3 + $0x6c] sm:$0x1] }
 0x429   :  { %v8855_v10 = vrot.slane %v8854_v5, 4  ;;  %v15747_v17 = vrot.slane %v8927_v53, 5  ;;  %v8948_v8 = vrot.slane %v8946_v13, 4  ;;  %v8829_v13 = vld [vmem:[#allocation3 + $0x88] sm:$0xf] }
 0x42a   :  { %v8901_v41 = vrot.slane %v8899_v2, 5 }
 0x42b   :  { %13009 = vmatpush3.bf16.msra.mxu0 %v13787_v46  ;;  %v8890_v46 = vshrl.u32 %v8809_v25, 16  ;;  %v8874_v25 = vsel %vm14060_vm3, %v8869_v45, %v8873_v37 }
 0x42c   :  { %13010 = vmatprep.subr.bf16.mxu0 %v13788_v29  ;;  %v11823_v5 = vcombine.low %v8874_v25, %v8888_v12 }
 0x42e   :  { %12995 = vmatmul.mubr.bf16.gmra.mrb[28].mxu0 %v11765_v51  ;;  %v8815_v51 = vld [vmem:[#allocation3 + $0x40] sm:$0xf] }
 0x42f   :  { %13011 = vmatpush3.bf16.msra.mxu0 %v13788_v29  ;;  %13014 = vmatprep.mubr.bf16.mxu0 %v13789_v55  ;;  %v8812_v29 = vld [vmem:[#allocation3 + $0x34] sm:$0x1]  ;;  %v8895_v55 = vrot.slane %v8893_v47, 5  ;;  %v8932_v56 = vshrl.u32 %v8815_v51, 16  ;;  %v8935_v62 = vshll.u32 %v8815_v51, 16 }
 0x430   :  { %13012 = vmatprep.subr.bf16.mxu0 %v13790_v39 }
 0x431   :  { %v8937_v28 = vrot.slane %v8935_v62, 5 }
 0x433   :  { %13013 = vmatpush3.bf16.msra.mxu0 %v13790_v39  ;;  %v8892_v39 = vrot.slane %v8890_v46, 4  ;;  %v8821_v46 = vld [vmem:[#allocation3 + $0x68] sm:$0xf] }
 0x434   :  { %13030 = vmatprep.subr.bf16.mxu0 %v13791_v57 }
 0x436   :  { %13015 = vmatmul.mubr.bf16.vlgmr.msra.gmra.mrb[16].mxu0 %v13792_v0  ;;  %v8819_v0 = vld [vmem:[#allocation3 + $0x60] sm:$0xf] }
 0x437   :  { %13031 = vmatpush3.bf16.msra.mxu0 %v13791_v57  ;;  %13018 = vmatprep.mubr.bf16.mxu0 %v13793_v61  ;;  %v8918_v57 = vshrl.u32 %v8813_v7, 16  ;;  %v8846_v61 = vsel %vm14060_vm3, %v8841_v24, %v15724_v16  ;;  %v8960_v60 = vshrl.u32 %v8819_v0, 16  ;;  %v8963_v6 = vshll.u32 %v8819_v0, 16  ;;  %v8823_v24 = vld [vmem:[#allocation3 + $0x70] sm:$0xf] }
 0x438   :  { %13032 = vmatprep.subr.bf16.mxu0 %v13794_v3  ;;  %v8934_v16 = vrot.slane %v8932_v56, 4  ;;  %v8988_v15 = vshrl.u32 %v8823_v24, 16  ;;  %v8991_v7 = vshll.u32 %v8823_v24, 16 }
 0x439   :  { %v8920_v9 = vrot.slane %v8918_v57, 4  ;;  %v8962_v52 = vrot.slane %v8960_v60, 4  ;;  %v8965_v48 = vrot.slane %v8963_v6, 5  ;;  %v8977_v57 = vshll.u32 %v8821_v46, 16  ;;  %v13808_v60 = vld [vmem:[%s16059_s5 + $0x150] sm:$0xff]  }
 0x43a   :  { %v8938_v47 = vor.u32 %v8937_v28, %v8934_v16  ;;  %v8993_v2 = vrot.slane %v8991_v7, 5 }
 0x43b   :  { %13033 = vmatpush3.bf16.msra.mxu0 %v13794_v3  ;;  %v13803_v3 = vld [vmem:[%s16059_s5 + $0x130] sm:$0xff]   ;;  %v8966_v50 = vor.u32 %v8965_v48, %v8962_v52 }
 0x43c   :  { %13034 = vmatprep.subr.bf16.mxu0 %v13795_v20  ;;  %v8939_v1 = vrot.slane %v8938_v47, 4 }
 0x43d   :  { %v8967_v62 = vrot.slane %v8966_v50, 4 }
 0x43e   :  { %13019 = vmatmul.mubr.bf16.gmra.mrb[20].mxu0 %v13796_v35  ;;  %v8896_v35 = vor.u32 %v8895_v55, %v8892_v39  ;;  %v8818_v39 = vld [vmem:[#allocation3 + $0x5c] sm:$0x1]  ;;  %v8974_v55 = vshrl.u32 %v8821_v46, 16 }
 0x43f   :  { %13035 = vmatpush3.bf16.msra.mxu0 %v13795_v20  ;;  %13022 = vmatprep.mubr.bf16.mxu0 %v13797_v38  ;;  %v8860_v20 = vsel %vm14060_vm3, %v8855_v10, %v8859_v31  ;;  %v8913_v38 = vshll.u32 %v8812_v29, 16  ;;  %v8825_v10 = vld [vmem:[#allocation3 + $0x78] sm:$0xf]  ;;  %v9016_v29 = vshrl.u32 %v8827_v42, 16  ;;  %v8955_v56 = vshll.u32 %v8818_v39, 16 }
 0x440   :  { %13036 = vmatprep.subr.bf16.mxu0 %v13798_v54  ;;  %v11822_v33 = vcombine.low %v8846_v61, %v8860_v20  ;;  %v8897_v40 = vrot.slane %v8896_v35, 4  ;;  %v9002_v61 = vshrl.u32 %v8825_v10, 16  ;;  %v9005_v37 = vshll.u32 %v8825_v10, 16 }
 0x441   :  { %v8915_v43 = vrot.slane %v8913_v38, 5  ;;  %v8990_v20 = vrot.slane %v8988_v15, 4  ;;  %v9018_v4 = vrot.slane %v9016_v29, 4  ;;  %v8824_v38 = vld [vmem:[#allocation3 + $0x74] sm:$0x1]  ;;  %v13810_v29 = vld [vmem:[%s16059_s5 + $0x160] sm:$0xff]  }
 0x442   :  { %v9004_v12 = vrot.slane %v9002_v61, 4  ;;  %v9007_v53 = vrot.slane %v9005_v37, 5  ;;  %v8997_v24 = vshll.u32 %v8824_v38, 16 }
 0x443   :  { %13037 = vmatpush3.bf16.msra.mxu0 %v13798_v54  ;;  %v8910_v54 = vor.u32 %v8909_v21, %v8906_v19  ;;  %v9019_v19 = vshll.u32 %v8827_v42, 16  ;;  %v8902_v21 = vsel %vm14060_vm3, %v8897_v40, %v8901_v41  ;;  %v9030_v40 = vshrl.u32 %v8829_v13, 16  ;;  %v13809_v42 = vld [vmem:[%s16059_s5 + $0x158] sm:$0xff]  }
 0x444   :  { %13038 = vmatprep.subr.bf16.mxu0 %v13799_v36  ;;  %v9033_v41 = vshll.u32 %v8829_v13, 16  ;;  %v8999_v10 = vrot.slane %v8997_v24, 5 }
 0x445   :  { %v8911_v14 = vrot.slane %v8910_v54, 4  ;;  %v9021_v45 = vrot.slane %v9019_v19, 5  ;;  %v8831_v54 = vld [vmem:[#allocation3 + $0x90] sm:$0xf] }
 0x446   :  { %13023 = vmatmul.mubr.bf16.gmra.mrb[24].mxu0 %v13800_v22  ;;  %v8924_v22 = vor.u32 %v8923_v11, %v8920_v9  ;;  %v8976_v9 = vrot.slane %v8974_v55, 4  ;;  %v8979_v11 = vrot.slane %v8977_v57, 5  ;;  %v9044_v16 = vshrl.u32 %v8831_v54, 16 }
 0x447   :  { %13039 = vmatpush3.bf16.msra.mxu0 %v13799_v36  ;;  %13026 = vmatprep.mubr.bf16.mxu0 %v13801_v18  ;;  %v8816_v36 = vld [vmem:[#allocation3 + $0x44] sm:$0x1]  ;;  %v8951_v18 = vrot.slane %v8949_v32, 5  ;;  %v8916_v31 = vsel %vm14060_vm3, %v8911_v14, %v8915_v43  ;;  %v9047_v28 = vshll.u32 %v8831_v54, 16  ;;  %v8983_v14 = vshll.u32 %v8822_v23, 16 }
 0x448   :  { %13040 = vmatprep.subr.bf16.mxu0 %v13802_v34  ;;  %v8941_v49 = vshll.u32 %v8816_v36, 16  ;;  %v8925_v51 = vrot.slane %v8924_v22, 4  ;;  %v11824_v63 = vcombine.low %v8902_v21, %v8916_v31  ;;  %v8828_v36 = vld [vmem:[#allocation3 + $0x84] sm:$0x1]  ;;  %v9022_v52 = vor.u32 %v9021_v45, %v9018_v4  ;;  %v9302_v23 = vld [vmem:[#allocation3 + $0x14] sm:$0x1] }
 0x449   :  { %v8952_v0 = vor.u32 %v8951_v18, %v8948_v8  ;;  %v8980_v48 = vor.u32 %v8979_v11, %v8976_v9  ;;  %v9008_v43 = vor.u32 %v9007_v53, %v9004_v12  ;;  %v9046_v46 = vrot.slane %v9044_v16, 4  ;;  %v9299_v54 = vld [vmem:[#allocation3 + $0x8] sm:$0xe]  ;;  %v13812_v11 = vld [vmem:[%s16059_s5 + $0x170] sm:$0xff]  }
 0x44a   :  { %v8930_v6 = vsel %vm14060_vm3, %v8925_v51, %v15747_v17  ;;  %v8943_v35 = vrot.slane %v8941_v49, 5  ;;  %v9025_v17 = vshll.u32 %v8828_v36, 16  ;;  %v9049_v47 = vrot.slane %v9047_v28, 5  ;;  %v8832_v51 = vld [vmem:[#allocation3 + $0x94] sm:$0x1] }
 0x44b   :  { %13041 = vmatpush3.bf16.msra.mxu0 %v13802_v34  ;;  %v8820_v34 = vld [vmem:[#allocation3 + $0x64] sm:$0x1]  ;;  %v9023_v15 = vrot.slane %v9022_v52, 4  ;;  %v8981_v7 = vrot.slane %v8980_v48, 4  ;;  %v9032_v31 = vrot.slane %v9030_v40, 4  ;;  %v9035_v50 = vrot.slane %v9033_v41, 5 }
 0x44c   :  { %13042 = vmatprep.subr.bf16.mxu0 %v13803_v3  ;;  %v8944_v32 = vsel %vm14060_vm3, %v8939_v1, %v8943_v35  ;;  %v9009_v19 = vrot.slane %v9008_v43, 4  ;;  %v9027_v21 = vrot.slane %v9025_v17, 5  ;;  %v8985_v39 = vrot.slane %v8983_v14, 5  ;;  %v9301_v1 = vld [vmem:[#allocation3 + $0x10] sm:$0xe]  ;;  %v13813_v14 = vld [vmem:[%s16059_s5 + $0x178] sm:$0xff]  }
 0x44d   :  { %v11825_v22 = vcombine.low %v8930_v6, %v8944_v32  ;;  %v9050_v57 = vor.u32 %v9049_v47, %v9046_v46  ;;  %v9036_v37 = vor.u32 %v9035_v50, %v9032_v31  ;;  %v11839_v6 = vrot.slane %v9301_v1, 9  ;;  %v9305_v32 = vld [vmem:[#allocation3 + $0x20] sm:$0xe]  ;;  %v9309_v16 = vld [vmem:[#allocation3 + $0x30] sm:$0xe] }
 0x44e   :  { %13027 = vmatmul.mubr.bf16.gmra.mrb[28].mxu0 %v13804_v26  ;;  %v8953_v26 = vrot.slane %v8952_v0, 4  ;;  %v9028_v0 = vsel %vm14060_vm3, %v9023_v15, %v9027_v21  ;;  %v8986_v61 = vsel %vm14060_vm3, %v8981_v7, %v8985_v39  ;;  %v9369_v35 = vrot.slane %v9302_v23, 5  ;;  %v9310_v28 = vld [vmem:[#allocation3 + $0x34] sm:$0x1]  ;;  %v9303_v52 = vld [vmem:[#allocation3 + $0x18] sm:$0xe] }
 0x44f   :  { %13043 = vmatpush3.bf16.msra.mxu0 %v13803_v3  ;;  %13046 = vmatprep.mubr.bf16.mxu0 %v11822_v33  ;;  %v8969_v3 = vshll.u32 %v8820_v34, 16  ;;  %v8994_v33 = vor.u32 %v8993_v2, %v8990_v20  ;;  %v9051_v45 = vrot.slane %v9050_v57, 4  ;;  %v9037_v38 = vrot.slane %v9036_v37, 4  ;;  %v9304_v48 = vld [vmem:[#allocation3 + $0x1c] sm:$0x1]  ;;  %v13846_v43 = vld [vmem:[%s16061_s7] sm:$0xff]  }
 0x450   :  { %13044 = vmatprep.subr.bf16.mxu0 %v13805_v27  ;;  %v9370_v13 = vsel %vm14247_vm6, %v11839_v6, %v9369_v35  ;;  %v9307_v41 = vld [vmem:[#allocation3 + $0x28] sm:$0xe]  ;;  %v11840_v17 = vrot.slane %v9303_v52, 9  ;;  %v13814_v46 = vld [vmem:[%s16059_s5 + $0x180] sm:$0xff]   ;;  %13190 = vmatprep.subr.bf16.mxu1 %v13846_v43  ;;  %v9312_v57 = vld [vmem:[#allocation3 + $0x3c] sm:$0x1] }
 0x451   :  { %v8995_v18 = vrot.slane %v8994_v33, 4  ;;  %v9306_v33 = vld [vmem:[#allocation3 + $0x24] sm:$0x1]  ;;  %v11842_v47 = vrot.slane %v9307_v41, 9  ;;  %13191 = vmatpush3.bf16.msra.mxu1 %v13846_v43  ;;  %v9316_v37 = vld [vmem:[#allocation3 + $0x5c] sm:$0x1] }
 0x452   :  { %v9377_v40 = vrot.slane %v9306_v33, 5  ;;  %v9314_v31 = vld [vmem:[#allocation3 + $0x44] sm:$0x1]  ;;  %v9321_v6 = vld [vmem:[#allocation3 + $0x70] sm:$0xe]  ;;  %v13851_v52 = vld [vmem:[%s16061_s7 + $0x28] sm:$0xff]  }
 0x453   :  { %13045 = vmatpush3.bf16.msra.mxu0 %v13805_v27  ;;  %v8971_v27 = vrot.slane %v8969_v3, 5  ;;  %v9000_v55 = vsel %vm14060_vm3, %v8995_v18, %v8999_v10  ;;  %v8830_v3 = vld [vmem:[#allocation3 + $0x8c] sm:$0x1]  ;;  %v9313_v10 = vld [vmem:[#allocation3 + $0x40] sm:$0xe] }
 0x454   :  { %13062 = vmatprep.subr.bf16.mxu0 %v13806_v44  ;;  %v11827_v20 = vcombine.low %v8986_v61, %v9000_v55  ;;  %v9039_v4 = vshll.u32 %v8830_v3, 16  ;;  %v13847_v18 = vld [vmem:[%s16061_s7 + $0x8] sm:$0xff]   ;;  %v9318_v21 = vld [vmem:[#allocation3 + $0x64] sm:$0x1]  ;;  %v9311_v55 = vld [vmem:[#allocation3 + $0x38] sm:$0xe] }
 0x455   :  { %v8972_v25 = vsel %vm14060_vm3, %v8967_v62, %v8971_v27  ;;  %13192 = vmatprep.subr.bf16.mxu1 %v13847_v18  ;;  %v11845_v3 = vrot.slane %v9313_v10, 9  ;;  %v9393_v61 = vrot.slane %v9314_v31, 5  ;;  %v9401_v23 = vrot.slane %v9318_v21, 5  ;;  %v9322_v35 = vld [vmem:[#allocation3 + $0x74] sm:$0x1] }
 0x456   :  { %13047 = vmatmul.mubr.bf16.vlgmr.msra.gmra.mrb[16].mxu0 %v11823_v5  ;;  %v8826_v5 = vld [vmem:[#allocation3 + $0x7c] sm:$0x1]  ;;  %v9041_v12 = vrot.slane %v9039_v4, 5  ;;  %13193 = vmatpush3.bf16.msra.mxu1 %v13847_v18  ;;  %v9330_v43 = vld [vmem:[#allocation3 + $0x94] sm:$0x1] }
 0x457   :  { %13063 = vmatpush3.bf16.msra.mxu0 %v13806_v44  ;;  %13050 = vmatprep.mubr.bf16.mxu0 %v11824_v63  ;;  %v8957_v44 = vrot.slane %v8955_v56, 5  ;;  %v9011_v49 = vshll.u32 %v8826_v5, 16  ;;  %v9053_v63 = vshll.u32 %v8832_v51, 16  ;;  %v13811_v56 = vld [vmem:[%s16059_s5 + $0x168] sm:$0xff]   ;;  %v11841_v5 = vrot.slane %v9305_v32, 9 }
 0x458   :  { %13064 = vmatprep.subr.bf16.mxu0 %v13807_v58  ;;  %v9042_v36 = vsel %vm14060_vm3, %v9037_v38, %v9041_v12  ;;  %v13850_v38 = vld [vmem:[%s16061_s7 + $0x20] sm:$0xff]   ;;  %v9320_v32 = vld [vmem:[#allocation3 + $0x6c] sm:$0x1]  ;;  %v9425_v10 = vrot.slane %v9330_v43, 5 }
 0x459   :  { %v8958_v34 = vsel %vm14060_vm3, %v8953_v26, %v8957_v44  ;;  %v9055_v9 = vrot.slane %v9053_v63, 5  ;;  %v11838_v26 = vrot.slane %v9299_v54, 9  ;;  %v9378_v15 = vsel %vm14247_vm6, %v11841_v5, %v9377_v40  ;;  %v13848_v63 = vld [vmem:[%s16061_s7 + $0x10] sm:$0xff]   ;;  %v13818_v5 = vld [vmem:[%s16059_s5 + $0x1a0] sm:$0xff]  }
 0x45a   :  { %v11826_v8 = vcombine.low %v8958_v34, %v8972_v25  ;;  %v11843_v34 = vrot.slane %v9309_v16, 9  ;;  %13194 = vmatprep.subr.bf16.mxu1 %v13848_v63  ;;  %v9394_v54 = vsel %vm14247_vm6, %v11845_v3, %v9393_v61  ;;  %v9409_v16 = vrot.slane %v9322_v35, 5  ;;  %v9944_v3 = vld [vmem:[#allocation3 + $0x10] sm:$0xf] }
 0x45b   :  { %13065 = vmatpush3.bf16.msra.mxu0 %v13807_v58  ;;  %v9013_v58 = vrot.slane %v9011_v49, 5  ;;  %v9056_v53 = vsel %vm14060_vm3, %v9051_v45, %v9055_v9  ;;  %v9397_v45 = vrot.slane %v9316_v37, 5  ;;  %13195 = vmatpush3.bf16.msra.mxu1 %v13848_v63  ;;  %v13825_v61 = vld [vmem:[#allocation3 + $0x30] ss:$8 sps:$4 sm:$0xff]   ;;  %v9977_v37 = vshrl.u32 %v9944_v3, 16 }
 0x45c   :  { %13066 = vmatprep.subr.bf16.mxu0 %v13808_v60  ;;  %v11829_v44 = vcombine.low %v9042_v36, %v9056_v53  ;;  %v13817_v53 = vld [vmem:[%s16059_s5 + $0x198] sm:$0xff]   ;;  %v11849_v36 = vrot.slane %v9321_v6, 9  ;;  %v9980_v63 = vshll.u32 %v9944_v3, 16  ;;  %v9945_v6 = vld [vmem:[#allocation3 + $0x14] sm:$0x1] }
 0x45d   :  { %v9014_v2 = vsel %vm14060_vm3, %v9009_v19, %v9013_v58  ;;  %v9317_v19 = vld [vmem:[#allocation3 + $0x60] sm:$0xe]  ;;  %v9315_v58 = vld [vmem:[#allocation3 + $0x58] sm:$0xe] }
 0x45e   :  { %13051 = vmatmul.mubr.bf16.gmra.mrb[20].mxu0 %v11825_v22  ;;  %v11828_v62 = vcombine.low %v9014_v2, %v9028_v0  ;;  %v9308_v22 = vld [vmem:[#allocation3 + $0x2c] sm:$0x1]  ;;  %v11847_v1 = vrot.slane %v9317_v19, 9  ;;  %v11844_v2 = vrot.slane %v9311_v55, 9  ;;  %v11846_v4 = vrot.slane %v9315_v58, 9 }
 0x45f   :  { %13067 = vmatpush3.bf16.msra.mxu0 %v13808_v60  ;;  %13054 = vmatprep.mubr.bf16.mxu0 %v11826_v8  ;;  %v9300_v60 = vld [vmem:[#allocation3 + $0xc] sm:$0x1]  ;;  %v9373_v8 = vrot.slane %v9304_v48, 5  ;;  %v9381_v49 = vrot.slane %v9308_v22, 5  ;;  %v9410_v22 = vsel %vm14247_vm6, %v11849_v36, %v9409_v16  ;;  %v13821_v55 = vld [vmem:[#allocation3 + $0x10] ss:$8 sps:$4 sm:$0xff]  }
 0x460   :  { %13068 = vmatprep.subr.bf16.mxu0 %v13809_v42  ;;  %v9365_v27 = vrot.slane %v9300_v60, 5  ;;  %v9402_v60 = vsel %vm14247_vm6, %v11847_v1, %v9401_v23  ;;  %v9398_v12 = vsel %vm14247_vm6, %v11846_v4, %v9397_v45  ;;  %v13824_v58 = vld [vmem:[#allocation3 + $0x20] ss:$8 sps:$4 sm:$0xff]   ;;  %v13827_v1 = vld [vmem:[%s16059_s5 + $0x1d0] sm:$0xff]   ;;  %v9946_v23 = vld [vmem:[#allocation3 + $0x18] sm:$0xf] }
 0x461   :  { %v9374_v50 = vsel %vm14247_vm6, %v11840_v17, %v9373_v8  ;;  %v9382_v39 = vsel %vm14247_vm6, %v11842_v47, %v9381_v49  ;;  %v11874_v33 = vcombine.low %v9398_v12, %v9402_v60  ;;  %v9327_v47 = vld [vmem:[#allocation3 + $0x88] sm:$0xe]  ;;  %v9328_v49 = vld [vmem:[#allocation3 + $0x8c] sm:$0x1]  ;;  %v9991_v4 = vshrl.u32 %v9946_v23, 16 }
 0x462   :  { %v9366_v25 = vsel %vm14247_vm6, %v11838_v26, %v9365_v27  ;;  %v11871_v51 = vcombine.low %v9374_v50, %v9378_v15  ;;  %v9326_v26 = vld [vmem:[#allocation3 + $0x84] sm:$0x1]  ;;  %v11852_v31 = vrot.slane %v9327_v47, 9  ;;  %v9421_v50 = vrot.slane %v9328_v49, 5  ;;  %v13828_v60 = vld [vmem:[#allocation3 + $0x40] ss:$8 sps:$4 sm:$0xff]  }
 0x463   :  { %13069 = vmatpush3.bf16.msra.mxu0 %v13809_v42  ;;  %v11870_v24 = vcombine.low %v9366_v25, %v9370_v13  ;;  %v9385_v42 = vrot.slane %v9310_v28, 5  ;;  %v9319_v13 = vld [vmem:[#allocation3 + $0x68] sm:$0xe]  ;;  %v9323_v28 = vld [vmem:[#allocation3 + $0x78] sm:$0xe]  ;;  %v9994_v45 = vshll.u32 %v9946_v23, 16 }
 0x464   :  { %13070 = vmatprep.subr.bf16.mxu0 %v13810_v29  ;;  %v11848_v48 = vrot.slane %v9319_v13, 9  ;;  %v11850_v40 = vrot.slane %v9323_v28, 9  ;;  %v9422_v21 = vsel %vm14247_vm6, %v11852_v31, %v9421_v50  ;;  %v13831_v13 = vld [vmem:[%s16059_s5 + $0x1e0] sm:$0xff]   ;;  %v9993_v36 = vrot.slane %v9991_v4, 4  ;;  %v13834_v47 = vld [vmem:[%s16059_s5 + $0x1e8] sm:$0xff]   ;;  %v13835_v23 = vld [vmem:[%s16059_s5 + $0x1f0] sm:$0xff]  }
 0x465   :  { %v9386_v7 = vsel %vm14247_vm6, %v11843_v34, %v9385_v42  ;;  %v9329_v42 = vld [vmem:[#allocation3 + $0x90] sm:$0xe]  ;;  %v9996_v16 = vrot.slane %v9994_v45, 5  ;;  %v9949_v28 = vld [vmem:[#allocation3 + $0x24] sm:$0x1] }
 0x466   :  { %13055 = vmatmul.mubr.bf16.gmra.mrb[24].mxu0 %v11827_v20  ;;  %v11872_v0 = vcombine.low %v9382_v39, %v9386_v7  ;;  %v13849_v20 = vld [vmem:[%s16061_s7 + $0x18] sm:$0xff]   ;;  %v11853_v7 = vrot.slane %v9329_v42, 9  ;;  %v9956_v42 = vld [vmem:[#allocation3 + $0x40] sm:$0xf]  ;;  %v9962_v4 = vld [vmem:[#allocation3 + $0x68] sm:$0xf] }
 0x467   :  { %13071 = vmatpush3.bf16.msra.mxu0 %v13810_v29  ;;  %13058 = vmatprep.mubr.bf16.mxu0 %v11828_v62  ;;  %v13815_v29 = vld [vmem:[%s16059_s5 + $0x188] sm:$0xff]   ;;  %v13816_v62 = vld [vmem:[%s16059_s5 + $0x190] sm:$0xff]   ;;  %v13822_v39 = vld [vmem:[%s16059_s5 + $0x1b8] sm:$0xff]  }
 0x468   :  { %13072 = vmatprep.subr.bf16.mxu0 %v13811_v56  ;;  %13196 = vmatprep.subr.bf16.mxu1 %v13849_v20  ;;  %v9426_v19 = vsel %vm14247_vm6, %v11853_v7, %v9425_v10  ;;  %v9960_v31 = vld [vmem:[#allocation3 + $0x60] sm:$0xf] }
 0x469   :  { %13197 = vmatpush3.bf16.msra.mxu1 %v13849_v20  ;;  %v9950_v20 = vld [vmem:[#allocation3 + $0x28] sm:$0xf] }
 0x46a   :  { %13198 = vmatprep.subr.bf16.mxu1 %v13850_v38  ;;  %v10019_v35 = vshrl.u32 %v9950_v20, 16  ;;  %v13833_v50 = vld [vmem:[#allocation3 + $0x80] ss:$8 sps:$4 sm:$0xff]  }
 0x46b   :  { %13073 = vmatpush3.bf16.msra.mxu0 %v13811_v56  ;;  %v9389_v56 = vrot.slane %v9312_v57, 5  ;;  %v13823_v57 = vld [vmem:[%s16059_s5 + $0x1c0] sm:$0xff]  }
 0x46c   :  { %13074 = vmatprep.subr.bf16.mxu0 %v13812_v11 }
 0x46d   :  { %v9390_v9 = vsel %vm14247_vm6, %v11844_v2, %v9389_v56  ;;  %13199 = vmatpush3.bf16.msra.mxu1 %v13850_v38  ;;  %v13830_v2 = vld [vmem:[%s16059_s5 + $0x1d8] sm:$0xff]   ;;  %v9979_v56 = vrot.slane %v9977_v37, 4  ;;  %v10022_v38 = vshll.u32 %v9950_v20, 16 }
 0x46e   :  { %13059 = vmatmul.mubr.bf16.gmra.mrb[28].mxu0 %v11829_v44  ;;  %v11873_v27 = vcombine.low %v9390_v9, %v9394_v54  ;;  %v9324_v44 = vld [vmem:[#allocation3 + $0x7c] sm:$0x1]  ;;  %13200 = vmatprep.subr.bf16.mxu1 %v13851_v52  ;;  %v9948_v54 = vld [vmem:[#allocation3 + $0x20] sm:$0xf] }
 0x46f   :  { %13075 = vmatpush3.bf16.msra.mxu0 %v13812_v11  ;;  %13078 = vmatprep.mubr.bf16.mxu0 %v11870_v24  ;;  %v9325_v11 = vld [vmem:[#allocation3 + $0x80] sm:$0xe]  ;;  %v9405_v24 = vrot.slane %v9320_v32, 5  ;;  %v9413_v41 = vrot.slane %v9324_v44, 5  ;;  %v10008_v12 = vshll.u32 %v9948_v54, 16 }
 0x470   :  { %13076 = vmatprep.subr.bf16.mxu0 %v13813_v14  ;;  %v11851_v25 = vrot.slane %v9325_v11, 9  ;;  %v13829_v9 = vld [vmem:[#allocation3 + $0x60] ss:$8 sps:$4 sm:$0xff]   ;;  %v9952_v11 = vld [vmem:[#allocation3 + $0x30] sm:$0xf] }
 0x471   :  { %v9406_v17 = vsel %vm14247_vm6, %v11848_v48, %v9405_v24  ;;  %v9414_v18 = vsel %vm14247_vm6, %v11850_v40, %v9413_v41  ;;  %13201 = vmatpush3.bf16.msra.mxu1 %v13851_v52  ;;  %v9951_v44 = vld [vmem:[#allocation3 + $0x2c] sm:$0x1]  ;;  %v10033_v52 = vshrl.u32 %v9952_v11, 16  ;;  %v10036_v48 = vshll.u32 %v9952_v11, 16  ;;  %v13832_v40 = vld [vmem:[#allocation3 + $0x70] ss:$8 sps:$4 sm:$0xff]  }
 0x472   :  { %v11875_v8 = vcombine.low %v9406_v17, %v9410_v22  ;;  %v9997_v17 = vor.u32 %v9996_v16, %v9993_v36  ;;  %v9955_v37 = vld [vmem:[#allocation3 + $0x3c] sm:$0x1]  ;;  %v9959_v11 = vld [vmem:[#allocation3 + $0x4c] sm:$0x1] }
 0x473   :  { %13077 = vmatpush3.bf16.msra.mxu0 %v13813_v14  ;;  %v9417_v14 = vrot.slane %v9326_v26, 5  ;;  %v9947_v26 = vld [vmem:[#allocation3 + $0x1c] sm:$0x1]  ;;  %v10035_v7 = vrot.slane %v10033_v52, 4  ;;  %v10038_v10 = vrot.slane %v10036_v48, 5 }
 0x474   :  { %13094 = vmatprep.subr.bf16.mxu0 %v13814_v46  ;;  %v10000_v41 = vshll.u32 %v9947_v26, 16  ;;  %v9998_v3 = vrot.slane %v9997_v17, 4  ;;  %v13837_v16 = vld [vmem:[%s16059_s5 + $0x1f8] sm:$0xff]   ;;  %v9963_v17 = vld [vmem:[#allocation3 + $0x6c] sm:$0x1] }
 0x475   :  { %v9418_v34 = vsel %vm14247_vm6, %v11851_v25, %v9417_v14  ;;  %v10021_v25 = vrot.slane %v10019_v35, 4  ;;  %v10024_v14 = vrot.slane %v10022_v38, 5 }
 0x476   :  { %13079 = vmatmul.mubr.bf16.vlgmr.msra.gmra.mrb[16].mxu0 %v11871_v51  ;;  %v11876_v15 = vcombine.low %v9414_v18, %v9418_v34  ;;  %v11877_v51 = vcombine.low %v9422_v21, %v9426_v19  ;;  %v10010_v34 = vrot.slane %v10008_v12, 5  ;;  %v10028_v18 = vshll.u32 %v9951_v44, 16 }
 0x477   :  { %13095 = vmatpush3.bf16.msra.mxu0 %v13814_v46  ;;  %13082 = vmatprep.mubr.bf16.mxu0 %v11872_v0  ;;  %v13819_v46 = vld [vmem:[%s16059_s5 + $0x1a8] sm:$0xff]   ;;  %v10061_v21 = vshrl.u32 %v9956_v42, 16 }
 0x478   :  { %13096 = vmatprep.subr.bf16.mxu0 %v13815_v29  ;;  %v13826_v0 = vld [vmem:[%s16059_s5 + $0x1c8] sm:$0xff]  }
 0x47b   :  { %13097 = vmatpush3.bf16.msra.mxu0 %v13815_v29  ;;  %v13820_v29 = vld [vmem:[%s16059_s5 + $0x1b0] sm:$0xff]  }
 0x47c   :  { %13098 = vmatprep.subr.bf16.mxu0 %v13816_v62 }
 0x47e   :  { %13083 = vmatmul.mubr.bf16.gmra.mrb[20].mxu0 %v11873_v27  ;;  %v10005_v27 = vshrl.u32 %v9948_v54, 16 }
 0x47f   :  { %13099 = vmatpush3.bf16.msra.mxu0 %v13816_v62  ;;  %13086 = vmatprep.mubr.bf16.mxu0 %v11874_v33  ;;  %v9982_v62 = vrot.slane %v9980_v63, 5  ;;  %v9986_v33 = vshll.u32 %v9945_v6, 16  ;;  %v10089_v63 = vshrl.u32 %v9960_v31, 16  ;;  %v10063_v6 = vrot.slane %v10061_v21, 4 }
 0x480   :  { %13100 = vmatprep.subr.bf16.mxu0 %v13817_v53  ;;  %v10007_v22 = vrot.slane %v10005_v27, 4 }
 0x481   :  { %v9983_v32 = vor.u32 %v9982_v62, %v9979_v56  ;;  %v9988_v43 = vrot.slane %v9986_v33, 5  ;;  %v10030_v56 = vrot.slane %v10028_v18, 5  ;;  %v10039_v62 = vor.u32 %v10038_v10, %v10035_v7  ;;  %v13836_v33 = vld [vmem:[#allocation3 + $0x90] ss:$8 sps:$4 sm:$0xff]  }
 0x482   :  { %v10091_v12 = vrot.slane %v10089_v63, 4  ;;  %v9964_v10 = vld [vmem:[#allocation3 + $0x70] sm:$0xf] }
 0x483   :  { %13101 = vmatpush3.bf16.msra.mxu0 %v13817_v53  ;;  %v9954_v53 = vld [vmem:[#allocation3 + $0x38] sm:$0xf]  ;;  %v9984_v49 = vrot.slane %v9983_v32, 4  ;;  %v10106_v32 = vshll.u32 %v9962_v4, 16  ;;  %v10040_v44 = vrot.slane %v10039_v62, 4  ;;  %v10120_v63 = vshll.u32 %v9964_v10, 16 }
 0x484   :  { %13102 = vmatprep.subr.bf16.mxu0 %v13818_v5  ;;  %v10047_v24 = vshrl.u32 %v9954_v53, 16 }
 0x485   :  { %v9989_v20 = vsel %vm14060_vm3, %v9984_v49, %v9988_v43  ;;  %v13838_v49 = vld [vmem:[%s16059_s5 + $0x200] sm:$0xff]  }
 0x486   :  { %13087 = vmatmul.mubr.bf16.gmra.mrb[24].mxu0 %v11875_v8  ;;  %v10014_v8 = vshll.u32 %v9949_v28, 16 }
 0x487   :  { %13103 = vmatpush3.bf16.msra.mxu0 %v13818_v5  ;;  %13090 = vmatprep.mubr.bf16.mxu0 %v11876_v15  ;;  %v10050_v5 = vshll.u32 %v9954_v53, 16  ;;  %v10025_v15 = vor.u32 %v10024_v14, %v10021_v25 }
 0x488   :  { %13104 = vmatprep.subr.bf16.mxu0 %v13819_v46 }
 0x489   :  { %v10052_v19 = vrot.slane %v10050_v5, 5  ;;  %v9966_v5 = vld [vmem:[#allocation3 + $0x78] sm:$0xf] }
 0x48b   :  { %13105 = vmatpush3.bf16.msra.mxu0 %v13819_v46  ;;  %v9958_v46 = vld [vmem:[#allocation3 + $0x48] sm:$0xf] }
 0x48c   :  { %13106 = vmatprep.subr.bf16.mxu0 %v13820_v29 }
 0x48e   :  { %13091 = vmatmul.mubr.bf16.gmra.mrb[28].mxu0 %v11877_v51  ;;  %v10064_v51 = vshll.u32 %v9956_v42, 16  ;;  %v9961_v42 = vld [vmem:[#allocation3 + $0x64] sm:$0x1] }
 0x48f   :  { %13107 = vmatpush3.bf16.msra.mxu0 %v13820_v29  ;;  %13110 = vmatprep.mubr.bf16.mxu0 %v13821_v55  ;;  %v10049_v29 = vrot.slane %v10047_v24, 4  ;;  %v10011_v55 = vor.u32 %v10010_v34, %v10007_v22  ;;  %v10084_v24 = vshll.u32 %v9959_v11, 16 }
 0x490   :  { %13108 = vmatprep.subr.bf16.mxu0 %v13822_v39  ;;  %v10066_v35 = vrot.slane %v10064_v51, 5  ;;  %v10098_v51 = vshll.u32 %v9961_v42, 16 }
 0x491   :  { %v10053_v54 = vor.u32 %v10052_v19, %v10049_v29  ;;  %v10012_v38 = vrot.slane %v10011_v55, 4  ;;  %v10086_v21 = vrot.slane %v10084_v24, 5 }
 0x492   :  { %v10067_v48 = vor.u32 %v10066_v35, %v10063_v6  ;;  %v9972_v35 = vld [vmem:[#allocation3 + $0x90] sm:$0xf] }
 0x493   :  { %13109 = vmatpush3.bf16.msra.mxu0 %v13822_v39  ;;  %v10002_v39 = vrot.slane %v10000_v41, 5  ;;  %v10054_v52 = vrot.slane %v10053_v54, 4 }
 0x494   :  { %13126 = vmatprep.subr.bf16.mxu0 %v13823_v57  ;;  %v10068_v19 = vrot.slane %v10067_v48, 4 }
 0x495   :  { %v10003_v36 = vsel %vm14060_vm3, %v9998_v3, %v10002_v39  ;;  %v9970_v39 = vld [vmem:[#allocation3 + $0x88] sm:$0xf] }
 0x496   :  { %13111 = vmatmul.mubr.bf16.vlgmr.msra.gmra.mrb[16].mxu0 %v13824_v58  ;;  %v10075_v58 = vshrl.u32 %v9958_v46, 16  ;;  %v11934_v14 = vcombine.low %v9989_v20, %v10003_v36 }
 0x497   :  { %13127 = vmatpush3.bf16.msra.mxu0 %v13823_v57  ;;  %13114 = vmatprep.mubr.bf16.mxu0 %v13825_v61  ;;  %v9953_v57 = vld [vmem:[#allocation3 + $0x34] sm:$0x1]  ;;  %v10016_v61 = vrot.slane %v10014_v8, 5 }
 0x498   :  { %13128 = vmatprep.subr.bf16.mxu0 %v13826_v0  ;;  %v10042_v45 = vshll.u32 %v9953_v57, 16  ;;  %v10077_v26 = vrot.slane %v10075_v58, 4  ;;  %v10112_v57 = vshll.u32 %v9963_v17, 16 }
 0x49a   :  { %v10044_v41 = vrot.slane %v10042_v45, 5  ;;  %v10114_v11 = vrot.slane %v10112_v57, 5 }
 0x49b   :  { %13129 = vmatpush3.bf16.msra.mxu0 %v13826_v0  ;;  %v10078_v0 = vshll.u32 %v9958_v46, 16  ;;  %v10108_v46 = vrot.slane %v10106_v32, 5  ;;  %v9967_v32 = vld [vmem:[#allocation3 + $0x7c] sm:$0x1] }
 0x49c   :  { %13130 = vmatprep.subr.bf16.mxu0 %v13827_v1 }
 0x49d   :  { %v10080_v27 = vrot.slane %v10078_v0, 5 }
 0x49e   :  { %13115 = vmatmul.mubr.bf16.gmra.mrb[20].mxu0 %v13828_v60  ;;  %v9957_v60 = vld [vmem:[#allocation3 + $0x44] sm:$0x1] }
 0x49f   :  { %13131 = vmatpush3.bf16.msra.mxu0 %v13827_v1  ;;  %13118 = vmatprep.mubr.bf16.mxu0 %v13829_v9  ;;  %v10092_v1 = vshll.u32 %v9960_v31, 16  ;;  %v10056_v9 = vshll.u32 %v9955_v37, 16  ;;  %v10070_v25 = vshll.u32 %v9957_v60, 16  ;;  %v10081_v34 = vor.u32 %v10080_v27, %v10077_v26  ;;  %v9965_v26 = vld [vmem:[#allocation3 + $0x74] sm:$0x1] }
 0x4a0   :  { %13132 = vmatprep.subr.bf16.mxu0 %v13830_v2  ;;  %v10131_v31 = vshrl.u32 %v9966_v5, 16  ;;  %v10117_v37 = vshrl.u32 %v9964_v10, 16  ;;  %v10126_v48 = vshll.u32 %v9965_v26, 16  ;;  %v13844_v26 = vld [vmem:[%s16059_s5 + $0x230] sm:$0xff]  }
 0x4a1   :  { %v10094_v53 = vrot.slane %v10092_v1, 5  ;;  %v10058_v22 = vrot.slane %v10056_v9, 5  ;;  %v10072_v7 = vrot.slane %v10070_v25, 5  ;;  %v10082_v55 = vrot.slane %v10081_v34, 4  ;;  %v13839_v1 = vld [vmem:[%s16059_s5 + $0x208] sm:$0xff]  }
 0x4a2   :  { %v10119_v27 = vrot.slane %v10117_v37, 4  ;;  %v10176_v25 = vshll.u32 %v9972_v35, 16  ;;  %v9971_v34 = vld [vmem:[#allocation3 + $0x8c] sm:$0x1] }
 0x4a3   :  { %13133 = vmatpush3.bf16.msra.mxu0 %v13830_v2  ;;  %v10026_v2 = vrot.slane %v10025_v15, 4  ;;  %v10095_v8 = vor.u32 %v10094_v53, %v10091_v12  ;;  %v10045_v15 = vsel %vm14060_vm3, %v10040_v44, %v10044_v41  ;;  %v10059_v29 = vsel %vm14060_vm3, %v10054_v52, %v10058_v22  ;;  %v13840_v53 = vld [vmem:[%s16059_s5 + $0x210] sm:$0xff]  }
 0x4a4   :  { %13134 = vmatprep.subr.bf16.mxu0 %v13831_v13  ;;  %v11936_v62 = vcombine.low %v10045_v15, %v10059_v29  ;;  %v10073_v45 = vsel %vm14060_vm3, %v10068_v19, %v10072_v7  ;;  %v10087_v54 = vsel %vm14060_vm3, %v10082_v55, %v10086_v21  ;;  %v10122_v12 = vrot.slane %v10120_v63, 5  ;;  %v13842_v19 = vld [vmem:[%s16059_s5 + $0x220] sm:$0xff]   ;;  %v9973_v55 = vld [vmem:[#allocation3 + $0x94] sm:$0x1] }
 0x4a5   :  { %v10031_v28 = vsel %vm14060_vm3, %v10026_v2, %v10030_v56  ;;  %v10096_v3 = vrot.slane %v10095_v8, 4  ;;  %v10159_v2 = vshrl.u32 %v9970_v39, 16  ;;  %v10162_v56 = vshll.u32 %v9970_v39, 16 }
 0x4a6   :  { %13119 = vmatmul.mubr.bf16.gmra.mrb[24].mxu0 %v13832_v40  ;;  %v10017_v40 = vsel %vm14060_vm3, %v10012_v38, %v10016_v61  ;;  %v9974_v38 = vld [vmem:[#allocation3 + $0x98] sm:$0xf]  ;;  %v10173_v44 = vshrl.u32 %v9972_v35, 16  ;;  %v10123_v41 = vor.u32 %v10122_v12, %v10119_v27  ;;  %v10140_v22 = vshll.u32 %v9967_v32, 16  ;;  %v10445_v35 = vld [vmem:[#allocation3 + $0x1c] sm:$0x1] }
 0x4a7   :  { %13135 = vmatpush3.bf16.msra.mxu0 %v13831_v13  ;;  %13122 = vmatprep.mubr.bf16.mxu0 %v13833_v50  ;;  %v10103_v13 = vshrl.u32 %v9962_v4, 16  ;;  %v11935_v43 = vcombine.low %v10017_v40, %v10031_v28  ;;  %v10134_v50 = vshll.u32 %v9966_v5, 16  ;;  %v10100_v4 = vrot.slane %v10098_v51, 5  ;;  %v9969_v28 = vld [vmem:[#allocation3 + $0x84] sm:$0x1] }
 0x4a8   :  { %13136 = vmatprep.subr.bf16.mxu0 %v13834_v47  ;;  %v10161_v36 = vrot.slane %v10159_v2, 4  ;;  %v10190_v52 = vshll.u32 %v9974_v38, 16  ;;  %v11937_v5 = vcombine.low %v10073_v45, %v10087_v54  ;;  %v10154_v8 = vshll.u32 %v9969_v28, 16  ;;  %v10451_v28 = vld [vmem:[#allocation3 + $0x34] sm:$0x1] }
 0x4a9   :  { %v10105_v18 = vrot.slane %v10103_v13, 4  ;;  %v10136_v20 = vrot.slane %v10134_v50, 5  ;;  %v10101_v13 = vsel %vm14060_vm3, %v10096_v3, %v10100_v4  ;;  %v10168_v10 = vshll.u32 %v9971_v34, 16  ;;  %v10444_v4 = vld [vmem:[#allocation3 + $0x18] sm:$0xe] }
 0x4aa   :  { %v10192_v15 = vrot.slane %v10190_v52, 5  ;;  %v10124_v50 = vrot.slane %v10123_v41, 4  ;;  %v10142_v29 = vrot.slane %v10140_v22, 5  ;;  %v10128_v21 = vrot.slane %v10126_v48, 5  ;;  %v10446_v52 = vld [vmem:[#allocation3 + $0x20] sm:$0xe] }
 0x4ab   :  { %13137 = vmatpush3.bf16.msra.mxu0 %v13834_v47  ;;  %v9968_v47 = vld [vmem:[#allocation3 + $0x80] sm:$0xf]  ;;  %v10109_v61 = vor.u32 %v10108_v46, %v10105_v18  ;;  %v10175_v46 = vrot.slane %v10173_v44, 4  ;;  %v10156_v51 = vrot.slane %v10154_v8, 5  ;;  %v10170_v37 = vrot.slane %v10168_v10, 5 }
 0x4ac   :  { %13138 = vmatprep.subr.bf16.mxu0 %v13835_v23  ;;  %v10145_v58 = vshrl.u32 %v9968_v47, 16  ;;  %v10148_v0 = vshll.u32 %v9968_v47, 16  ;;  %v10178_v47 = vrot.slane %v10176_v25, 5  ;;  %v10129_v63 = vsel %vm14060_vm3, %v10124_v50, %v10128_v21  ;;  %v10453_v41 = vld [vmem:[#allocation3 + $0x3c] sm:$0x1] }
 0x4ad   :  { %v10110_v9 = vrot.slane %v10109_v61, 4  ;;  %v11951_v27 = vrot.slane %v10444_v4, 9  ;;  %v10512_v12 = vrot.slane %v10445_v35, 5  ;;  %v10524_v34 = vrot.slane %v10451_v28, 5  ;;  %v10459_v50 = vld [vmem:[#allocation3 + $0x64] sm:$0x1] }
 0x4ae   :  { %13123 = vmatmul.mubr.bf16.gmra.mrb[28].mxu0 %v13836_v33  ;;  %v10147_v60 = vrot.slane %v10145_v58, 4  ;;  %v10150_v6 = vrot.slane %v10148_v0, 5  ;;  %v10179_v58 = vor.u32 %v10178_v47, %v10175_v46  ;;  %v10528_v8 = vrot.slane %v10453_v41, 5  ;;  %v10454_v46 = vld [vmem:[#allocation3 + $0x40] sm:$0xe] }
 0x4af   :  { %13139 = vmatpush3.bf16.msra.mxu0 %v13835_v23  ;;  %13142 = vmatprep.mubr.bf16.mxu0 %v11934_v14  ;;  %v10133_v23 = vrot.slane %v10131_v31, 4  ;;  %v10187_v14 = vshrl.u32 %v9974_v38, 16  ;;  %v10115_v40 = vsel %vm14060_vm3, %v10110_v9, %v10114_v11  ;;  %v9975_v31 = vld [vmem:[#allocation3 + $0x9c] sm:$0x1]  ;;  %v10513_v25 = vsel %vm14247_vm6, %v11951_v27, %v10512_v12  ;;  %v10467_v4 = vld [vmem:[#allocation3 + $0x84] sm:$0x1] }
 0x4b0   :  { %13140 = vmatprep.subr.bf16.mxu0 %v13837_v16  ;;  %v10151_v24 = vor.u32 %v10150_v6, %v10147_v60  ;;  %v11938_v42 = vcombine.low %v10101_v13, %v10115_v40  ;;  %v10196_v3 = vshll.u32 %v9975_v31, 16  ;;  %v10180_v54 = vrot.slane %v10179_v58, 4  ;;  %v10452_v40 = vld [vmem:[#allocation3 + $0x38] sm:$0xe]  ;;  %v10458_v31 = vld [vmem:[#allocation3 + $0x60] sm:$0xe] }
 0x4b1   :  { %v10137_v33 = vor.u32 %v10136_v20, %v10133_v23  ;;  %v10442_v23 = vld [vmem:[#allocation3 + $0x10] sm:$0xe]  ;;  %v10443_v20 = vld [vmem:[#allocation3 + $0x14] sm:$0x1]  ;;  %v11956_v21 = vrot.slane %v10454_v46, 9  ;;  %v10556_v12 = vrot.slane %v10467_v4, 5 }
 0x4b2   :  { %v10152_v7 = vrot.slane %v10151_v24, 4  ;;  %v10198_v6 = vrot.slane %v10196_v3, 5  ;;  %v11950_v38 = vrot.slane %v10442_v23, 9  ;;  %v10508_v9 = vrot.slane %v10443_v20, 5 }
 0x4b3   :  { %13141 = vmatpush3.bf16.msra.mxu0 %v13837_v16  ;;  %v10164_v16 = vrot.slane %v10162_v56, 5  ;;  %v10138_v17 = vrot.slane %v10137_v33, 4  ;;  %v10448_v33 = vld [vmem:[#allocation3 + $0x28] sm:$0xe]  ;;  %v11958_v3 = vrot.slane %v10458_v31, 9 }
 0x4b4   :  { %13158 = vmatprep.subr.bf16.mxu0 %v13838_v49  ;;  %v10157_v61 = vsel %vm14060_vm3, %v10152_v7, %v10156_v51  ;;  %v10509_v32 = vsel %vm14247_vm6, %v11950_v38, %v10508_v9  ;;  %v11953_v24 = vrot.slane %v10448_v33, 9  ;;  %v10457_v7 = vld [vmem:[#allocation3 + $0x4c] sm:$0x1]  ;;  %v10460_v51 = vld [vmem:[#allocation3 + $0x68] sm:$0xe] }
 0x4b5   :  { %v10165_v18 = vor.u32 %v10164_v16, %v10161_v36  ;;  %v10143_v57 = vsel %vm14060_vm3, %v10138_v17, %v10142_v29  ;;  %v10449_v36 = vld [vmem:[#allocation3 + $0x2c] sm:$0x1]  ;;  %v10450_v16 = vld [vmem:[#allocation3 + $0x30] sm:$0xe]  ;;  %v11982_v48 = vcombine.low %v10509_v32, %v10513_v25  ;;  %v11955_v17 = vrot.slane %v10452_v40, 9 }
 0x4b6   :  { %13143 = vmatmul.mubr.bf16.vlgmr.msra.gmra.mrb[16].mxu0 %v11935_v43  ;;  %v13841_v43 = vld [vmem:[%s16059_s5 + $0x218] sm:$0xff]   ;;  %v11939_v2 = vcombine.low %v10129_v63, %v10143_v57  ;;  %v11954_v22 = vrot.slane %v10450_v16, 9  ;;  %v10536_v58 = vrot.slane %v10457_v7, 5  ;;  %v10470_v16 = vld [vmem:[#allocation3 + $0x90] sm:$0xe] }
 0x4b7   :  { %13159 = vmatpush3.bf16.msra.mxu0 %v13838_v49  ;;  %13146 = vmatprep.mubr.bf16.mxu0 %v11936_v62  ;;  %v10189_v49 = vrot.slane %v10187_v14, 4  ;;  %v10166_v39 = vrot.slane %v10165_v18, 4  ;;  %v13843_v62 = vld [vmem:[%s16059_s5 + $0x228] sm:$0xff]   ;;  %v13845_v14 = vld [vmem:[%s16059_s5 + $0x238] sm:$0xff]  }
 0x4b8   :  { %13160 = vmatprep.subr.bf16.mxu0 %v13839_v1  ;;  %v10525_v47 = vsel %vm14247_vm6, %v11954_v22, %v10524_v34  ;;  %v10472_v25 = vld [vmem:[#allocation3 + $0x98] sm:$0xe] }
 0x4b9   :  { %v10193_v0 = vor.u32 %v10192_v15, %v10189_v49  ;;  %v10171_v56 = vsel %vm14060_vm3, %v10166_v39, %v10170_v37  ;;  %v10455_v49 = vld [vmem:[#allocation3 + $0x44] sm:$0x1]  ;;  %v10456_v15 = vld [vmem:[#allocation3 + $0x48] sm:$0xe]  ;;  %v11959_v37 = vrot.slane %v10460_v51, 9  ;;  %v11965_v41 = vrot.slane %v10472_v25, 9 }
 0x4ba   :  { %v11940_v45 = vcombine.low %v10157_v61, %v10171_v56  ;;  %v11957_v57 = vrot.slane %v10456_v15, 9  ;;  %v10540_v61 = vrot.slane %v10459_v50, 5  ;;  %v10465_v56 = vld [vmem:[#allocation3 + $0x7c] sm:$0x1] }
 0x4bb   :  { %13161 = vmatpush3.bf16.msra.mxu0 %v13839_v1  ;;  %v10182_v1 = vshll.u32 %v9973_v55, 16  ;;  %v10194_v60 = vrot.slane %v10193_v0, 4  ;;  %v10532_v55 = vrot.slane %v10455_v49, 5  ;;  %v10461_v0 = vld [vmem:[#allocation3 + $0x6c] sm:$0x1]  ;;  %v10552_v9 = vrot.slane %v10465_v56, 5 }
 0x4bc   :  { %13162 = vmatprep.subr.bf16.mxu0 %v13840_v53  ;;  %v10544_v63 = vrot.slane %v10461_v0, 5  ;;  %v10537_v23 = vsel %vm14247_vm6, %v11957_v57, %v10536_v58  ;;  %v10541_v20 = vsel %vm14247_vm6, %v11958_v3, %v10540_v61 }
 0x4bd   :  { %v10184_v11 = vrot.slane %v10182_v1, 5  ;;  %v10199_v13 = vsel %vm14060_vm3, %v10194_v60, %v10198_v6  ;;  %v10533_v1 = vsel %vm14247_vm6, %v11956_v21, %v10532_v55  ;;  %v10462_v60 = vld [vmem:[#allocation3 + $0x70] sm:$0xe]  ;;  %v10463_v6 = vld [vmem:[#allocation3 + $0x74] sm:$0x1] }
 0x4be   :  { %13147 = vmatmul.mubr.bf16.gmra.mrb[20].mxu0 %v11937_v5  ;;  %v10520_v5 = vrot.slane %v10449_v36, 5 }
 0x4bf   :  { %13163 = vmatpush3.bf16.msra.mxu0 %v13840_v53  ;;  %13150 = vmatprep.mubr.bf16.mxu0 %v11938_v42  ;;  %v10185_v53 = vsel %vm14060_vm3, %v10180_v54, %v10184_v11  ;;  %v11952_v42 = vrot.slane %v10446_v52, 9  ;;  %v10545_v54 = vsel %vm14247_vm6, %v11959_v37, %v10544_v63  ;;  %v10468_v11 = vld [vmem:[#allocation3 + $0x88] sm:$0xe] }
 0x4c0   :  { %13164 = vmatprep.subr.bf16.mxu0 %v13841_v43  ;;  %v11941_v44 = vcombine.low %v10185_v53, %v10199_v13  ;;  %v10521_v18 = vsel %vm14247_vm6, %v11953_v24, %v10520_v5  ;;  %v11986_v35 = vcombine.low %v10541_v20, %v10545_v54  ;;  %v11960_v53 = vrot.slane %v10462_v60, 9 }
 0x4c1   :  { %v10548_v13 = vrot.slane %v10463_v6, 5  ;;  %v11963_v32 = vrot.slane %v10468_v11, 9  ;;  %v11964_v24 = vrot.slane %v10470_v16, 9 }
 0x4c3   :  { %13165 = vmatpush3.bf16.msra.mxu0 %v13841_v43  ;;  %v10516_v43 = vrot.slane %v10447_v30, 5  ;;  %v10549_v52 = vsel %vm14247_vm6, %v11960_v53, %v10548_v13 }
 0x4c4   :  { %13166 = vmatprep.subr.bf16.mxu0 %v13842_v19 }
 0x4c5   :  { %v10517_v10 = vsel %vm14247_vm6, %v11952_v42, %v10516_v43 }
 0x4c6   :  { %13151 = vmatmul.mubr.bf16.gmra.mrb[24].mxu0 %v11939_v2  ;;  %v11983_v29 = vcombine.low %v10517_v10, %v10521_v18  ;;  %v10464_v2 = vld [vmem:[#allocation3 + $0x78] sm:$0xe]  ;;  %v11998_v18 = vld [vmem:[%s16060_s6] ss:$0 sm:$0xff] }
 0x4c7   :  { %13167 = vmatpush3.bf16.msra.mxu0 %v13842_v19  ;;  %13154 = vmatprep.mubr.bf16.mxu0 %v11940_v45  ;;  %v10529_v19 = vsel %vm14247_vm6, %v11955_v17, %v10528_v8  ;;  %v11985_v45 = vcombine.low %v10533_v1, %v10537_v23  ;;  %v11961_v38 = vrot.slane %v10464_v2, 9  ;;  %v13852_v17 = vld [vmem:[%s16061_s7 + $0x30] sm:$0xff]   ;;  %v13853_v8 = vld [vmem:[%s16061_s7 + $0x38] sm:$0xff]  }
 0x4c8   :  { %13168 = vmatprep.subr.bf16.mxu0 %v13843_v62  ;;  %v11984_v39 = vcombine.low %v10525_v47, %v10529_v19  ;;  %13202 = vmatprep.subr.bf16.mxu1 %v13852_v17 }
 0x4c9   :  { %v10553_v36 = vsel %vm14247_vm6, %v11961_v38, %v10552_v9  ;;  %13203 = vmatpush3.bf16.msra.mxu1 %v13852_v17 }
 0x4ca   :  { %v11987_v30 = vcombine.low %v10549_v52, %v10553_v36  ;;  %13204 = vmatprep.subr.bf16.mxu1 %v13853_v8 }
 0x4cb   :  { %13169 = vmatpush3.bf16.msra.mxu0 %v13843_v62  ;;  %v10466_v62 = vld [vmem:[#allocation3 + $0x80] sm:$0xe] }
 0x4cc   :  { %13170 = vmatprep.subr.bf16.mxu0 %v13844_v26  ;;  %v11962_v27 = vrot.slane %v10466_v62, 9 }
 0x4cd   :  { %13205 = vmatpush3.bf16.msra.mxu1 %v13853_v8 }
 0x4ce   :  { %13155 = vmatmul.mubr.bf16.gmra.mrb[28].mxu0 %v11941_v44  ;;  %v10557_v28 = vsel %vm14247_vm6, %v11962_v27, %v10556_v12  ;;  %v10471_v44 = vld [vmem:[#allocation3 + $0x94] sm:$0x1] }
 0x4cf   :  { %13171 = vmatpush3.bf16.msra.mxu0 %v13844_v26  ;;  %13174 = vmatprep.mubr.bf16.mxu0 %v11982_v48  ;;  %v10469_v26 = vld [vmem:[#allocation3 + $0x8c] sm:$0x1]  ;;  %v10564_v40 = vrot.slane %v10471_v44, 5 }
 0x4d0   :  { %13172 = vmatprep.subr.bf16.mxu0 %v13845_v14  ;;  %v10560_v33 = vrot.slane %v10469_v26, 5 }
 0x4d1   :  { %v10565_v34 = vsel %vm14247_vm6, %v11964_v24, %v10564_v40 }
 0x4d2   :  { %v10561_v48 = vsel %vm14247_vm6, %v11963_v32, %v10560_v33 }
 0x4d3   :  { %13173 = vmatpush3.bf16.msra.mxu0 %v13845_v14  ;;  %v10473_v14 = vld [vmem:[#allocation3 + $0x9c] sm:$0x1]  ;;  %v11988_v5 = vcombine.low %v10557_v28, %v10561_v48 }
 0x4d4   :  { %v10568_v22 = vrot.slane %v10473_v14, 5 }
 0x4d6   :  { %13175 = vmatmul.mubr.bf16.vlgmr.msra.gmra.mrb[16].mxu0 %v11983_v29  ;;  %v10569_v42 = vsel %vm14247_vm6, %v11965_v41, %v10568_v22  ;;  %v11999_v41 = vld [vmem:[#allocation9] ss:$0 sm:$0xff] }
 0x4d7   :  { %13178 = vmatprep.mubr.bf16.mxu0 %v11984_v39  ;;  %v11989_v43 = vcombine.low %v10565_v34, %v10569_v42 }
 0x4de   :  { %13179 = vmatmul.mubr.bf16.gmra.mrb[20].mxu0 %v11985_v45 }
 0x4df   :  { %13182 = vmatprep.mubr.bf16.mxu0 %v11986_v35 }
 0x4e6   :  { %13183 = vmatmul.mubr.bf16.gmra.mrb[24].mxu0 %v11987_v30 }
 0x4e7   :  { %13186 = vmatprep.mubr.bf16.mxu0 %v11988_v5 }
 0x4ee   :  { %13187 = vmatmul.mubr.bf16.gmra.mrb[28].mxu0 %v11989_v43 }
 0x5a9   :  { %v13176_v59 = vpop.f32.mrb[16].mxu0 }
 0x5aa   :  { %v10837_v46 = vadd.f32 %v13176_v59, %v11998_v18  ;;  %v10701_v47 = vpop.f32.mrb[17].mxu0 }
 0x5ab   :  { %v10835_v49 = vadd.f32 %v11998_v18, %v10701_v47  ;;  %v13177_v15 = vpop.f32.mrb[18].mxu0 }
 0x5ac   :  { %v10838_v7 = vadd.f32 %v13177_v15, %v11998_v18  ;;  %v10704_v10 = vpop.f32.mrb[19].mxu0  ;;  %v10853_v50 = vmax.f32 %v10837_v46, 0.0 }
 0x5ad   :  { %v10836_v31 = vadd.f32 %v11998_v18, %v10704_v10  ;;  %v10851_v19 = vmax.f32 %v10835_v49, 0.0 }
 0x5ae   :  { %v10854_v29 = vmax.f32 %v10838_v7, 0.0 }
 0x5af   :  { %v10852_v21 = vmax.f32 %v10836_v31, 0.0 }
 0x5b0   :  { %v10868_v51 = vpack.c.bf16 %v10854_v29, %v10853_v50 }
 0x5b1   :  { %v10867_v39 = vpack.c.bf16 %v10852_v21, %v10851_v19  ;;  %v13180_v55 = vpop.f32.mrb[20].mxu0 }
 0x5b2   :  { %v10841_v57 = vadd.f32 %v13180_v55, %v11998_v18  ;;  %v10717_v58 = vpop.f32.mrb[21].mxu0 }
 0x5b3   :  { %v10839_v0 = vadd.f32 %v11998_v18, %v10717_v58  ;;  %v13181_v3 = vpop.f32.mrb[22].mxu0  ;;  %13206 = vmatprep.mubr.bf16.mxu1 %v10867_v39 }
 0x5b4   :  { %v10842_v61 = vadd.f32 %v13181_v3, %v11998_v18  ;;  %v10720_v37 = vpop.f32.mrb[23].mxu0  ;;  %13207 = vmatmul.mubr.bf16.vlgmr.msra.gmra.mrb[32].mxu1 %v10868_v51  ;;  %v10857_v1 = vmax.f32 %v10841_v57, 0.0 }
 0x5b5   :  { %v10840_v63 = vadd.f32 %v11998_v18, %v10720_v37  ;;  %v10855_v20 = vmax.f32 %v10839_v0, 0.0 }
 0x5b6   :  { %v10858_v23 = vmax.f32 %v10842_v61, 0.0 }
 0x5b7   :  { %v10856_v2 = vmax.f32 %v10840_v63, 0.0 }
 0x5b8   :  { %v10870_v56 = vpack.c.bf16 %v10858_v23, %v10857_v1 }
 0x5b9   :  { %v10869_v62 = vpack.c.bf16 %v10856_v2, %v10855_v20  ;;  %v13184_v4 = vpop.f32.mrb[24].mxu0 }
 0x5ba   :  { %v10845_v45 = vadd.f32 %v13184_v4, %v11998_v18  ;;  %v10733_v54 = vpop.f32.mrb[25].mxu0 }
 0x5bb   :  { %v10843_v60 = vadd.f32 %v11998_v18, %v10733_v54  ;;  %v13185_v6 = vpop.f32.mrb[26].mxu0  ;;  %13210 = vmatprep.mubr.bf16.mxu1 %v10869_v62 }
 0x5bc   :  { %v10846_v35 = vadd.f32 %v13185_v6, %v11998_v18  ;;  %v10736_v38 = vpop.f32.mrb[27].mxu0  ;;  %13211 = vmatmul.mubr.bf16.gmra.mrb[36].mxu1 %v10870_v56  ;;  %v10861_v11 = vmax.f32 %v10845_v45, 0.0 }
 0x5bd   :  { %v10844_v9 = vadd.f32 %v11998_v18, %v10736_v38  ;;  %v10859_v27 = vmax.f32 %v10843_v60, 0.0 }
 0x5be   :  { %v10862_v26 = vmax.f32 %v10846_v35, 0.0 }
 0x5bf   :  { %v10860_v12 = vmax.f32 %v10844_v9, 0.0 }
 0x5c0   :  { %v10872_v53 = vpack.c.bf16 %v10862_v26, %v10861_v11 }
 0x5c1   :  { %v10871_v13 = vpack.c.bf16 %v10860_v12, %v10859_v27  ;;  %v13188_v32 = vpop.f32.mrb[28].mxu0 }
 0x5c2   :  { %v10849_v33 = vadd.f32 %v13188_v32, %v11998_v18  ;;  %v10749_v36 = vpop.f32.mrb[29].mxu0 }
 0x5c3   :  { %v10847_v16 = vadd.f32 %v11998_v18, %v10749_v36  ;;  %v13189_v28 = vpop.f32.mrb[30].mxu0  ;;  %13214 = vmatprep.mubr.bf16.mxu1 %v10871_v13 }
 0x5c4   :  { %v10850_v44 = vadd.f32 %v13189_v28, %v11998_v18  ;;  %v10752_v25 = vpop.f32.mrb[31].mxu0  ;;  %13215 = vmatmul.mubr.bf16.gmra.mrb[40].mxu1 %v10872_v53  ;;  %v10865_v52 = vmax.f32 %v10849_v33, 0.0 }
 0x5c5   :  { %v10848_v14 = vadd.f32 %v11998_v18, %v10752_v25  ;;  %v10863_v48 = vmax.f32 %v10847_v16, 0.0 }
 0x5c6   :  { %v10866_v30 = vmax.f32 %v10850_v44, 0.0 }
 0x5c7   :  { %v10864_v24 = vmax.f32 %v10848_v14, 0.0 }
 0x5c8   :  { %v10874_v5 = vpack.c.bf16 %v10866_v30, %v10865_v52 }
 0x5c9   :  { %v10873_v40 = vpack.c.bf16 %v10864_v24, %v10863_v48 }
 0x5cb   :  { %13218 = vmatprep.mubr.bf16.mxu1 %v10873_v40 }
 0x5cc   :  { %13219 = vmatmul.mubr.bf16.gmra.mrb[44].mxu1 %v10874_v5 }
 0x687   :  { %v13208_v22 = vpop.f32.mrb[32].mxu1 }
 0x688   :  { %v10989_v34 = vadd.f32 %v13208_v22, %v11999_v41  ;;  %v10980_v42 = vpop.f32.mrb[33].mxu1 }
 0x689   :  { %v10981_v43 = vadd.f32 %v11999_v41, %v10980_v42  ;;  %v13209_v17 = vpop.f32.mrb[34].mxu1 }
 0x68a   :  { %v11045_v8 = vmax.f32 %v10989_v34, 0.0  ;;  %v10992_v59 = vadd.f32 %v13209_v17, %v11999_v41  ;;  %v10983_v46 = vpop.f32.mrb[35].mxu1 }
 0x68b   :  { %v11043_v47 = vmax.f32 %v10981_v43, 0.0  ;;  %v10984_v18 = vadd.f32 %v11999_v41, %v10983_v46 }
 0x68c   :  { %11062 = vst.msk [vmem:[%s16063_s9 + $0x10] sm:$0xff] %vm11059_vm13, %v11045_v8  ;;  %v11046_v49 = vmax.f32 %v10992_v59, 0.0 }
 0x68d   :  { %11060 = vst.msk [vmem:[%s16063_s9] sm:$0xff] %vm11059_vm13, %v11043_v47  ;;  %v11044_v15 = vmax.f32 %v10984_v18, 0.0 }
 0x68e   :  { %11063 = vst.msk [vmem:[%s16063_s9 + $0x18] sm:$0xff] %vm11059_vm13, %v11046_v49 }
 0x68f   :  { %11061 = vst.msk [vmem:[%s16063_s9 + $0x8] sm:$0xff] %vm11059_vm13, %v11044_v15  ;;  %v13212_v7 = vpop.f32.mrb[36].mxu1 }
 0x690   :  { %v11005_v10 = vadd.f32 %v13212_v7, %v11999_v41  ;;  %v10996_v31 = vpop.f32.mrb[37].mxu1 }
 0x691   :  { %v10997_v50 = vadd.f32 %v11999_v41, %v10996_v31  ;;  %v13213_v29 = vpop.f32.mrb[38].mxu1 }
 0x692   :  { %v11049_v19 = vmax.f32 %v11005_v10, 0.0  ;;  %v11008_v21 = vadd.f32 %v13213_v29, %v11999_v41  ;;  %v10999_v51 = vpop.f32.mrb[39].mxu1 }
 0x693   :  { %v11047_v39 = vmax.f32 %v10997_v50, 0.0  ;;  %v11000_v55 = vadd.f32 %v11999_v41, %v10999_v51 }
 0x694   :  { %11066 = vst.msk [vmem:[%s16063_s9 + $0x30] sm:$0xff] %vm11059_vm13, %v11049_v19  ;;  %v11050_v57 = vmax.f32 %v11008_v21, 0.0 }
 0x695   :  { %11064 = vst.msk [vmem:[%s16063_s9 + $0x20] sm:$0xff] %vm11059_vm13, %v11047_v39  ;;  %v11048_v58 = vmax.f32 %v11000_v55, 0.0 }
 0x696   :  { %11067 = vst.msk [vmem:[%s16063_s9 + $0x38] sm:$0xff] %vm11059_vm13, %v11050_v57 }
 0x697   :  { %11065 = vst.msk [vmem:[%s16063_s9 + $0x28] sm:$0xff] %vm11059_vm13, %v11048_v58  ;;  %v13216_v0 = vpop.f32.mrb[40].mxu1 }
 0x698   :  { %v11021_v3 = vadd.f32 %v13216_v0, %v11999_v41  ;;  %v11012_v61 = vpop.f32.mrb[41].mxu1 }
 0x699   :  { %v11013_v37 = vadd.f32 %v11999_v41, %v11012_v61  ;;  %v13217_v63 = vpop.f32.mrb[42].mxu1 }
 0x69a   :  { %v11053_v1 = vmax.f32 %v11021_v3, 0.0  ;;  %v11024_v23 = vadd.f32 %v13217_v63, %v11999_v41  ;;  %v11015_v20 = vpop.f32.mrb[43].mxu1 }
 0x69b   :  { %v11051_v2 = vmax.f32 %v11013_v37, 0.0  ;;  %v11016_v56 = vadd.f32 %v11999_v41, %v11015_v20 }
 0x69c   :  { %11070 = vst.msk [vmem:[%s16063_s9 + $0x50] sm:$0xff] %vm11059_vm13, %v11053_v1  ;;  %v11054_v62 = vmax.f32 %v11024_v23, 0.0 }
 0x69d   :  { %11068 = vst.msk [vmem:[%s16063_s9 + $0x40] sm:$0xff] %vm11059_vm13, %v11051_v2  ;;  %v11052_v4 = vmax.f32 %v11016_v56, 0.0 }
 0x69e   :  { %11071 = vst.msk [vmem:[%s16063_s9 + $0x58] sm:$0xff] %vm11059_vm13, %v11054_v62 }
 0x69f   :  { %11069 = vst.msk [vmem:[%s16063_s9 + $0x48] sm:$0xff] %vm11059_vm13, %v11052_v4  ;;  %v13220_v45 = vpop.f32.mrb[44].mxu1 }
 0x6a0   :  { %v11037_v54 = vadd.f32 %v13220_v45, %v11999_v41  ;;  %v11028_v60 = vpop.f32.mrb[45].mxu1 }
 0x6a1   :  { %v11029_v6 = vadd.f32 %v11999_v41, %v11028_v60  ;;  %v13221_v35 = vpop.f32.mrb[46].mxu1 }
 0x6a2   :  { %v11057_v38 = vmax.f32 %v11037_v54, 0.0  ;;  %v11040_v9 = vadd.f32 %v13221_v35, %v11999_v41  ;;  %v11031_v11 = vpop.f32.mrb[47].mxu1 }
 0x6a3   :  { %v11055_v26 = vmax.f32 %v11029_v6, 0.0  ;;  %v11032_v27 = vadd.f32 %v11999_v41, %v11031_v11 }
 0x6a4   :  { %11074 = vst.msk [vmem:[%s16063_s9 + $0x70] sm:$0xff] %vm11059_vm13, %v11057_v38  ;;  %v11058_v12 = vmax.f32 %v11040_v9, 0.0 }
 0x6a5   :  { %11072 = vst.msk [vmem:[%s16063_s9 + $0x60] sm:$0xff] %vm11059_vm13, %v11055_v26  ;;  %v11056_v53 = vmax.f32 %v11032_v27, 0.0 }
 0x6a6   :  { %11075 = vst.msk [vmem:[%s16063_s9 + $0x78] sm:$0xff] %vm11059_vm13, %v11058_v12 }
 0x6a7   :  { %11073 = vst.msk [vmem:[%s16063_s9 + $0x68] sm:$0xff] %vm11059_vm13, %v11056_v53 }
 0x6a8   :  { %11080 = vsyncpa [#allocation6], 1 }
 0x6a9   :  { %11081 = vsyncpa [#allocation8], 1 }

</bundles_post_ra>
